<compile_context>
chip_gen: v6e
topology: v6e:2x2x1
jax: 0.10.0
libtpu: 0.0.40
codegen_flags: <defaults>
</compile_context>

<pallas_src>
import jax
import jax.numpy as jnp
from jax import lax
from jax.experimental import pallas as pl
from jax.experimental.pallas import tpu as pltpu


# -----------------------------------------------------------------------------
# Pallas kernel: whole sequence per invocation.
# -----------------------------------------------------------------------------
def _lstm_seq_kernel(
    x_ref,      # (T, B, 1)   inputs, time-major
    len_ref,    # (1, B)      int32 sequence lengths
    wih0_ref,   # (1, 4*Hp)   layer-0 input weights (gate-block padded)
    whh0_ref,   # (Hp, 4*Hp)  layer-0 recurrent weights
    b0_ref,     # (1, 4*Hp)   layer-0 combined bias (b_ih + b_hh)
    w1_ref,     # (2*Hp,4*Hp) layer-1 fused [w_ih; w_hh]
    b1_ref,     # (1, 4*Hp)   layer-1 combined bias
    wfc_ref,    # (1, Hp)     fc weight (row vector)
    bfc_ref,    # (1, 1)      fc bias
    out_ref,    # (T, B)      masked predictions, time-major
    h1_all,     # scratch: (T, B, Hp) layer-1 hidden states
):
    T = x_ref.shape[0]
    B = x_ref.shape[1]
    Hp = h1_all.shape[2]

    # Small constants hoisted out of the loop (a couple of vregs each).
    wih0 = wih0_ref[...]     # (1, 4Hp)
    b0 = b0_ref[...]         # (1, 4Hp)
    b1 = b1_ref[...]         # (1, 4Hp)

    def step(t, carry):
        h0, c0, h1, c1 = carry                       # each (B, Hp), in vregs

        # ---- LSTM layer 0 (input_size == 1 -> input proj is a broadcast) ----
        x_t = x_ref[t]                               # (B, 1)
        gates0 = (
            x_t * wih0
            + jnp.dot(h0, whh0_ref[...], preferred_element_type=jnp.float32)
            + b0
        )                                            # (B, 4Hp); gates i,f,g,o
        i0 = jax.nn.sigmoid(gates0[:, 0 * Hp:1 * Hp])
        f0 = jax.nn.sigmoid(gates0[:, 1 * Hp:2 * Hp])
        g0 = jnp.tanh(gates0[:, 2 * Hp:3 * Hp])
        o0 = jax.nn.sigmoid(gates0[:, 3 * Hp:4 * Hp])
        c0n = f0 * c0 + i0 * g0
        h0n = o0 * jnp.tanh(c0n)

        # ---- LSTM layer 1 (fused input+recurrent matmul, K = 2*Hp) ----
        hcat = jnp.concatenate([h0n, h1], axis=1)    # (B, 2Hp)
        gates1 = (
            jnp.dot(hcat, w1_ref[...], preferred_element_type=jnp.float32) + b1
        )
        i1 = jax.nn.sigmoid(gates1[:, 0 * Hp:1 * Hp])
        f1 = jax.nn.sigmoid(gates1[:, 1 * Hp:2 * Hp])
        g1 = jnp.tanh(gates1[:, 2 * Hp:3 * Hp])
        o1 = jax.nn.sigmoid(gates1[:, 3 * Hp:4 * Hp])
        c1n = f1 * c1 + i1 * g1
        h1n = o1 * jnp.tanh(c1n)

        h1_all[t] = h1n                              # lane-dense (B, Hp) store
        return (h0n, c0n, h1n, c1n)

    z = jnp.zeros((B, Hp), jnp.float32)
    lax.fori_loop(0, T, step, (z, z, z, z), unroll=True)

    # ---- Batched FC head (VPU mul + lane reduce) + packed-sequence mask ----
    h1_seq = h1_all[...]                             # (T, B, Hp)
    w = wfc_ref[...]                                 # (1, Hp)
    pred = jnp.sum(h1_seq * w[None, :, :], axis=-1) + bfc_ref[...]   # (T, B)
    t_idx = lax.broadcasted_iota(jnp.int32, (T, B), 0)
    valid = t_idx < len_ref[...]                     # (T, B)
    out_ref[...] = jnp.where(valid, pred, 0.0).astype(out_ref.dtype)


# -----------------------------------------------------------------------------
# Wrapper
# -----------------------------------------------------------------------------
@jax.jit
def lstm_forecaster_forward(x, lengths, kp):
    """x: (B, T) f32; lengths: (B,) int32 sorted descending, lengths[0]==T."""
    B, T = x.shape
    Hp = kp["wfc"].shape[1]

    x_tb1 = jnp.transpose(x, (1, 0))[:, :, None]     # (T, B, 1) time-major
    len_1b = lengths.astype(jnp.int32)[None, :]      # (1, B)

    const2 = lambda i: (0, 0)
    const3 = lambda i: (0, 0, 0)

    out_tb = pl.pallas_call(
        _lstm_seq_kernel,
        out_shape=jax.ShapeDtypeStruct((T, B), jnp.float32),
        grid_spec=pltpu.PrefetchScalarGridSpec(
            num_scalar_prefetch=0,
            grid=(1,),
            in_specs=[
                pl.BlockSpec((T, B, 1), const3),         # x
                pl.BlockSpec((1, B), const2),            # lengths
                pl.BlockSpec((1, 4 * Hp), const2),       # w_ih l0
                pl.BlockSpec((Hp, 4 * Hp), const2),      # w_hh l0
                pl.BlockSpec((1, 4 * Hp), const2),       # bias l0
                pl.BlockSpec((2 * Hp, 4 * Hp), const2),  # fused l1 weight
                pl.BlockSpec((1, 4 * Hp), const2),       # bias l1
                pl.BlockSpec((1, Hp), const2),           # fc weight
                pl.BlockSpec((1, 1), const2),            # fc bias
            ],
            out_specs=pl.BlockSpec((T, B), const2),
            scratch_shapes=[pltpu.VMEM((T, B, Hp), jnp.float32)],
        ),
        compiler_params=pltpu.CompilerParams(
            dimension_semantics=("arbitrary",),
        ),
    )(
        x_tb1, len_1b,
        kp["wih0"], kp["whh0"], kp["b0"],
        kp["w1"], kp["b1"],
        kp["wfc"], kp["bfc"],
    )
    return jnp.transpose(out_tb, (1, 0))             # (B, T)


# -----------------------------------------------------------------------------
# Parameter packing: PyTorch-layout params -> padded/fused kernel layout.
# -----------------------------------------------------------------------------
def _pad_gate_cols(w_t, H, Hp):
    """(in_dim, 4H) -> (in_dim, 4Hp): each of the 4 gate blocks zero-padded."""
    blocks = [
        jnp.pad(w_t[:, g * H:(g + 1) * H], ((0, 0), (0, Hp - H)))
        for g in range(4)
    ]
    return jnp.concatenate(blocks, axis=1)


def _pad_rows(w, rows_p):
    return jnp.pad(w, ((0, rows_p - w.shape[0]), (0, 0)))


def pack_params(p, H, Hp):
    wih0 = _pad_gate_cols(p["weight_ih_l0"].T, H, Hp)                    # (1, 4Hp)
    whh0 = _pad_rows(_pad_gate_cols(p["weight_hh_l0"].T, H, Hp), Hp)     # (Hp, 4Hp)
    b0 = _pad_gate_cols((p["bias_ih_l0"] + p["bias_hh_l0"])[None, :], H, Hp)
    wih1 = _pad_rows(_pad_gate_cols(p["weight_ih_l1"].T, H, Hp), Hp)
    whh1 = _pad_rows(_pad_gate_cols(p["weight_hh_l1"].T, H, Hp), Hp)
    w1 = jnp.concatenate([wih1, whh1], axis=0)                           # (2Hp, 4Hp)
    b1 = _pad_gate_cols((p["bias_ih_l1"] + p["bias_hh_l1"])[None, :], H, Hp)
    wfc = jnp.pad(p["fc_weight"], ((0, 0), (0, Hp - H)))                 # (1, Hp)
    bfc = p["fc_bias"].reshape(1, 1)
    return dict(wih0=wih0, whh0=whh0, b0=b0, w1=w1, b1=b1, wfc=wfc, bfc=bfc)


# -----------------------------------------------------------------------------
# Deterministic init in PyTorch layout (nn.LSTM / nn.Linear shapes).
# -----------------------------------------------------------------------------
def init_params(key, input_size=1, hidden_size=64):
    H = hidden_size
    ks = jax.random.split(key, 10)
    s = 1.0 / float(H) ** 0.5
    u = lambda k, shape: jax.random.uniform(k, shape, jnp.float32, -s, s)
    return dict(
        weight_ih_l0=u(ks[0], (4 * H, input_size)),
        weight_hh_l0=u(ks[1], (4 * H, H)),
        bias_ih_l0=u(ks[2], (4 * H,)),
        bias_hh_l0=u(ks[3], (4 * H,)),
        weight_ih_l1=u(ks[4], (4 * H, H)),
        weight_hh_l1=u(ks[5], (4 * H, H)),
        bias_ih_l1=u(ks[6], (4 * H,)),
        bias_hh_l1=u(ks[7], (4 * H,)),
        fc_weight=u(ks[8], (1, H)),
        fc_bias=u(ks[9], (1,)),
    )


# -----------------------------------------------------------------------------
# Pure-JAX reference (PyTorch packed-LSTM + fc + squeeze semantics), unpadded.
# -----------------------------------------------------------------------------
def reference_forward(x, lengths, p):
    B, T = x.shape
    H = p["weight_hh_l0"].shape[1]
    wih0 = p["weight_ih_l0"].T
    whh0 = p["weight_hh_l0"].T
    b0 = (p["bias_ih_l0"] + p["bias_hh_l0"])[None, :]
    wih1 = p["weight_ih_l1"].T
    whh1 = p["weight_hh_l1"].T
    b1 = (p["bias_ih_l1"] + p["bias_hh_l1"])[None, :]
    h0 = jnp.zeros((B, H)); c0 = jnp.zeros((B, H))
    h1 = jnp.zeros((B, H)); c1 = jnp.zeros((B, H))
    outs = []
    for t in range(T):
        x_t = x[:, t:t + 1]
        g0 = x_t * wih0 + h0 @ whh0 + b0
        i0 = jax.nn.sigmoid(g0[:, :H]);        f0 = jax.nn.sigmoid(g0[:, H:2 * H])
        gg0 = jnp.tanh(g0[:, 2 * H:3 * H]);    o0 = jax.nn.sigmoid(g0[:, 3 * H:])
        c0 = f0 * c0 + i0 * gg0; h0 = o0 * jnp.tanh(c0)
        g1 = h0 @ wih1 + h1 @ whh1 + b1
        i1 = jax.nn.sigmoid(g1[:, :H]);        f1 = jax.nn.sigmoid(g1[:, H:2 * H])
        gg1 = jnp.tanh(g1[:, 2 * H:3 * H]);    o1 = jax.nn.sigmoid(g1[:, 3 * H:])
        c1 = f1 * c1 + i1 * gg1; h1 = o1 * jnp.tanh(c1)
        pred = h1 @ p["fc_weight"].T + p["fc_bias"][None, :]     # (B, 1)
        outs.append(jnp.where(t < lengths[:, None], pred, 0.0))
    return jnp.concatenate(outs, axis=1)                         # (B, T)


if __name__ == "__main__":
    key = jax.random.PRNGKey(0)
    k_x, k_p = jax.random.split(key)

    B, T, H, Hp = 4, 8, 64, 128
    params = init_params(k_p, input_size=1, hidden_size=H)
    kparams = pack_params(params, H, Hp)

    x = jax.random.normal(k_x, (B, T), jnp.float32)
    # enforce_sorted=True: lengths descending; lengths[0] == T so the padded
    # output length matches the input length.
    lengths = jnp.array([8, 6, 5, 3], jnp.int32)

    out = lstm_forecaster_forward(x, lengths, kparams)
    out = jax.block_until_ready(out)

    ref = reference_forward(x, lengths, params)
    assert out.shape == (B, T)
    assert jnp.allclose(out, ref, atol=1e-5, rtol=1e-5), "mismatch vs reference"

    print("KERNEL_OK")
</pallas_src>

<mosaic_0001>
module attributes {stable_mosaic.version = 11 : i64} {
  func.func @_lstm_seq_kernel(%arg0: i32, %arg1: memref<8x4x1xf32, #tpu.memory_space<vmem>>, %arg2: memref<1x4xi32, #tpu.memory_space<vmem>>, %arg3: memref<1x512xf32, #tpu.memory_space<vmem>>, %arg4: memref<128x512xf32, #tpu.memory_space<vmem>>, %arg5: memref<1x512xf32, #tpu.memory_space<vmem>>, %arg6: memref<256x512xf32, #tpu.memory_space<vmem>>, %arg7: memref<1x512xf32, #tpu.memory_space<vmem>>, %arg8: memref<1x128xf32, #tpu.memory_space<vmem>>, %arg9: memref<1x1xf32, #tpu.memory_space<vmem>>, %arg10: memref<8x4xf32, #tpu.memory_space<vmem>>, %arg11: memref<8x4x128xf32, #tpu.memory_space<vmem>>) attributes {dimension_semantics = [#tpu.dimension_semantics<arbitrary>], iteration_bounds = array<i64: 1>, scalar_prefetch = 0 : i64, scratch_operands = 1 : i64, tpu.core_type = #tpu.core_type<tc>, window_params = [{pipeline_mode = #tpu.pipeline_mode<synchronous>, transform_indices = @transform_0, window_bounds = array<i64: 8, 4, 1>}, {pipeline_mode = #tpu.pipeline_mode<synchronous>, transform_indices = @transform_1, window_bounds = array<i64: 1, 4>}, {pipeline_mode = #tpu.pipeline_mode<synchronous>, transform_indices = @transform_2, window_bounds = array<i64: 1, 512>}, {pipeline_mode = #tpu.pipeline_mode<synchronous>, transform_indices = @transform_3, window_bounds = array<i64: 128, 512>}, {pipeline_mode = #tpu.pipeline_mode<synchronous>, transform_indices = @transform_4, window_bounds = array<i64: 1, 512>}, {pipeline_mode = #tpu.pipeline_mode<synchronous>, transform_indices = @transform_5, window_bounds = array<i64: 256, 512>}, {pipeline_mode = #tpu.pipeline_mode<synchronous>, transform_indices = @transform_6, window_bounds = array<i64: 1, 512>}, {pipeline_mode = #tpu.pipeline_mode<synchronous>, transform_indices = @transform_7, window_bounds = array<i64: 1, 128>}, {pipeline_mode = #tpu.pipeline_mode<synchronous>, transform_indices = @transform_8, window_bounds = array<i64: 1, 1>}, {pipeline_mode = #tpu.pipeline_mode<synchronous>, transform_indices = @transform_9, window_bounds = array<i64: 8, 4>}]} {
    %c0 = arith.constant 0 : index
    %c0_0 = arith.constant 0 : index
    %0 = vector.load %arg3[%c0, %c0_0] : memref<1x512xf32, #tpu.memory_space<vmem>>, vector<1x512xf32>
    %c0_1 = arith.constant 0 : index
    %c0_2 = arith.constant 0 : index
    %1 = vector.load %arg5[%c0_1, %c0_2] : memref<1x512xf32, #tpu.memory_space<vmem>>, vector<1x512xf32>
    %c0_3 = arith.constant 0 : index
    %c0_4 = arith.constant 0 : index
    %2 = vector.load %arg7[%c0_3, %c0_4] : memref<1x512xf32, #tpu.memory_space<vmem>>, vector<1x512xf32>
    %cst = arith.constant 0.000000e+00 : f32
    %3 = vector.broadcast %cst : f32 to vector<4x128xf32>
    %c0_i32 = arith.constant 0 : i32
    %4 = arith.index_cast %c0_i32 : i32 to index
    %c0_5 = arith.constant 0 : index
    %c0_6 = arith.constant 0 : index
    %5 = vector.load %arg1[%4, %c0_5, %c0_6] : memref<8x4x1xf32, #tpu.memory_space<vmem>>, vector<1x4x1xf32>
    %6 = vector.shape_cast %5 : vector<1x4x1xf32> to vector<4x1xf32>
    %7 = vector.broadcast %6 : vector<4x1xf32> to vector<4x512xf32>
    %8 = vector.broadcast %0 : vector<1x512xf32> to vector<4x512xf32>
    %9 = arith.mulf %7, %8 : vector<4x512xf32>
    %c0_7 = arith.constant 0 : index
    %c0_8 = arith.constant 0 : index
    %10 = vector.load %arg4[%c0_7, %c0_8] : memref<128x512xf32, #tpu.memory_space<vmem>>, vector<128x512xf32>
    %cst_9 = arith.constant dense<0.000000e+00> : vector<4x512xf32>
    %11 = tpu.matmul %3, %10, %cst_9 {dimension_numbers = #tpu.dot_dimension_numbers<[1], [0], [0], [1], [0, 0, 1, 1], [], []>} : vector<4x128xf32>, vector<128x512xf32>, vector<4x512xf32> -> vector<4x512xf32>
    %12 = arith.addf %9, %11 : vector<4x512xf32>
    %13 = vector.broadcast %1 : vector<1x512xf32> to vector<4x512xf32>
    %14 = arith.addf %12, %13 : vector<4x512xf32>
    %15 = vector.extract_strided_slice %14 {offsets = [0, 0], sizes = [4, 128], strides = [1, 1]} : vector<4x512xf32> to vector<4x128xf32>
    %16 = arith.negf %15 : vector<4x128xf32>
    %17 = math.exp %16 : vector<4x128xf32>
    %cst_10 = arith.constant 1.000000e+00 : f32
    %18 = vector.broadcast %cst_10 : f32 to vector<4x128xf32>
    %19 = arith.addf %18, %17 : vector<4x128xf32>
    %20 = arith.divf %18, %19 : vector<4x128xf32>
    %21 = vector.extract_strided_slice %14 {offsets = [0, 128], sizes = [4, 128], strides = [1, 1]} : vector<4x512xf32> to vector<4x128xf32>
    %22 = arith.negf %21 : vector<4x128xf32>
    %23 = math.exp %22 : vector<4x128xf32>
    %cst_11 = arith.constant 1.000000e+00 : f32
    %24 = vector.broadcast %cst_11 : f32 to vector<4x128xf32>
    %25 = arith.addf %24, %23 : vector<4x128xf32>
    %26 = arith.divf %24, %25 : vector<4x128xf32>
    %27 = vector.extract_strided_slice %14 {offsets = [0, 256], sizes = [4, 128], strides = [1, 1]} : vector<4x512xf32> to vector<4x128xf32>
    %28 = math.tanh %27 : vector<4x128xf32>
    %29 = vector.extract_strided_slice %14 {offsets = [0, 384], sizes = [4, 128], strides = [1, 1]} : vector<4x512xf32> to vector<4x128xf32>
    %30 = arith.negf %29 : vector<4x128xf32>
    %31 = math.exp %30 : vector<4x128xf32>
    %cst_12 = arith.constant 1.000000e+00 : f32
    %32 = vector.broadcast %cst_12 : f32 to vector<4x128xf32>
    %33 = arith.addf %32, %31 : vector<4x128xf32>
    %34 = arith.divf %32, %33 : vector<4x128xf32>
    %35 = arith.mulf %26, %3 : vector<4x128xf32>
    %36 = arith.mulf %20, %28 : vector<4x128xf32>
    %37 = arith.addf %35, %36 : vector<4x128xf32>
    %38 = math.tanh %37 : vector<4x128xf32>
    %39 = arith.mulf %34, %38 : vector<4x128xf32>
    %40 = tpu.concatenate %39, %3 in 1 : vector<4x128xf32>, vector<4x128xf32> -> vector<4x256xf32>
    %c0_13 = arith.constant 0 : index
    %c0_14 = arith.constant 0 : index
    %41 = vector.load %arg6[%c0_13, %c0_14] : memref<256x512xf32, #tpu.memory_space<vmem>>, vector<256x512xf32>
    %cst_15 = arith.constant dense<0.000000e+00> : vector<4x512xf32>
    %42 = tpu.matmul %40, %41, %cst_15 {dimension_numbers = #tpu.dot_dimension_numbers<[1], [0], [0], [1], [0, 0, 1, 1], [], []>} : vector<4x256xf32>, vector<256x512xf32>, vector<4x512xf32> -> vector<4x512xf32>
    %43 = vector.broadcast %2 : vector<1x512xf32> to vector<4x512xf32>
    %44 = arith.addf %42, %43 : vector<4x512xf32>
    %45 = vector.extract_strided_slice %44 {offsets = [0, 0], sizes = [4, 128], strides = [1, 1]} : vector<4x512xf32> to vector<4x128xf32>
    %46 = arith.negf %45 : vector<4x128xf32>
    %47 = math.exp %46 : vector<4x128xf32>
    %cst_16 = arith.constant 1.000000e+00 : f32
    %48 = vector.broadcast %cst_16 : f32 to vector<4x128xf32>
    %49 = arith.addf %48, %47 : vector<4x128xf32>
    %50 = arith.divf %48, %49 : vector<4x128xf32>
    %51 = vector.extract_strided_slice %44 {offsets = [0, 128], sizes = [4, 128], strides = [1, 1]} : vector<4x512xf32> to vector<4x128xf32>
    %52 = arith.negf %51 : vector<4x128xf32>
    %53 = math.exp %52 : vector<4x128xf32>
    %cst_17 = arith.constant 1.000000e+00 : f32
    %54 = vector.broadcast %cst_17 : f32 to vector<4x128xf32>
    %55 = arith.addf %54, %53 : vector<4x128xf32>
    %56 = arith.divf %54, %55 : vector<4x128xf32>
    %57 = vector.extract_strided_slice %44 {offsets = [0, 256], sizes = [4, 128], strides = [1, 1]} : vector<4x512xf32> to vector<4x128xf32>
    %58 = math.tanh %57 : vector<4x128xf32>
    %59 = vector.extract_strided_slice %44 {offsets = [0, 384], sizes = [4, 128], strides = [1, 1]} : vector<4x512xf32> to vector<4x128xf32>
    %60 = arith.negf %59 : vector<4x128xf32>
    %61 = math.exp %60 : vector<4x128xf32>
    %cst_18 = arith.constant 1.000000e+00 : f32
    %62 = vector.broadcast %cst_18 : f32 to vector<4x128xf32>
    %63 = arith.addf %62, %61 : vector<4x128xf32>
    %64 = arith.divf %62, %63 : vector<4x128xf32>
    %65 = arith.mulf %56, %3 : vector<4x128xf32>
    %66 = arith.mulf %50, %58 : vector<4x128xf32>
    %67 = arith.addf %65, %66 : vector<4x128xf32>
    %68 = math.tanh %67 : vector<4x128xf32>
    %69 = arith.mulf %64, %68 : vector<4x128xf32>
    %70 = arith.index_cast %c0_i32 : i32 to index
    %c0_19 = arith.constant 0 : index
    %c0_20 = arith.constant 0 : index
    %71 = vector.load %arg11[%70, %c0_19, %c0_20] : memref<8x4x128xf32, #tpu.memory_space<vmem>>, vector<1x4x128xf32>
    %72 = vector.shape_cast %71 : vector<1x4x128xf32> to vector<4x128xf32>
    %73 = vector.shape_cast %69 : vector<4x128xf32> to vector<1x4x128xf32>
    tpu.vector_store %arg11[%70, %c0_19, %c0_20], %73 {strides = array<i32>} : memref<8x4x128xf32, #tpu.memory_space<vmem>>, vector<1x4x128xf32>,
    %c1_i32 = arith.constant 1 : i32
    %74 = arith.index_cast %c1_i32 : i32 to index
    %c0_21 = arith.constant 0 : index
    %c0_22 = arith.constant 0 : index
    %75 = vector.load %arg1[%74, %c0_21, %c0_22] : memref<8x4x1xf32, #tpu.memory_space<vmem>>, vector<1x4x1xf32>
    %76 = vector.shape_cast %75 : vector<1x4x1xf32> to vector<4x1xf32>
    %77 = vector.broadcast %76 : vector<4x1xf32> to vector<4x512xf32>
    %78 = vector.broadcast %0 : vector<1x512xf32> to vector<4x512xf32>
    %79 = arith.mulf %77, %78 : vector<4x512xf32>
    %c0_23 = arith.constant 0 : index
    %c0_24 = arith.constant 0 : index
    %80 = vector.load %arg4[%c0_23, %c0_24] : memref<128x512xf32, #tpu.memory_space<vmem>>, vector<128x512xf32>
    %cst_25 = arith.constant dense<0.000000e+00> : vector<4x512xf32>
    %81 = tpu.matmul %39, %80, %cst_25 {dimension_numbers = #tpu.dot_dimension_numbers<[1], [0], [0], [1], [0, 0, 1, 1], [], []>} : vector<4x128xf32>, vector<128x512xf32>, vector<4x512xf32> -> vector<4x512xf32>
    %82 = arith.addf %79, %81 : vector<4x512xf32>
    %83 = vector.broadcast %1 : vector<1x512xf32> to vector<4x512xf32>
    %84 = arith.addf %82, %83 : vector<4x512xf32>
    %85 = vector.extract_strided_slice %84 {offsets = [0, 0], sizes = [4, 128], strides = [1, 1]} : vector<4x512xf32> to vector<4x128xf32>
    %86 = arith.negf %85 : vector<4x128xf32>
    %87 = math.exp %86 : vector<4x128xf32>
    %cst_26 = arith.constant 1.000000e+00 : f32
    %88 = vector.broadcast %cst_26 : f32 to vector<4x128xf32>
    %89 = arith.addf %88, %87 : vector<4x128xf32>
    %90 = arith.divf %88, %89 : vector<4x128xf32>
    %91 = vector.extract_strided_slice %84 {offsets = [0, 128], sizes = [4, 128], strides = [1, 1]} : vector<4x512xf32> to vector<4x128xf32>
    %92 = arith.negf %91 : vector<4x128xf32>
    %93 = math.exp %92 : vector<4x128xf32>
    %cst_27 = arith.constant 1.000000e+00 : f32
    %94 = vector.broadcast %cst_27 : f32 to vector<4x128xf32>
    %95 = arith.addf %94, %93 : vector<4x128xf32>
    %96 = arith.divf %94, %95 : vector<4x128xf32>
    %97 = vector.extract_strided_slice %84 {offsets = [0, 256], sizes = [4, 128], strides = [1, 1]} : vector<4x512xf32> to vector<4x128xf32>
    %98 = math.tanh %97 : vector<4x128xf32>
    %99 = vector.extract_strided_slice %84 {offsets = [0, 384], sizes = [4, 128], strides = [1, 1]} : vector<4x512xf32> to vector<4x128xf32>
    %100 = arith.negf %99 : vector<4x128xf32>
    %101 = math.exp %100 : vector<4x128xf32>
    %cst_28 = arith.constant 1.000000e+00 : f32
    %102 = vector.broadcast %cst_28 : f32 to vector<4x128xf32>
    %103 = arith.addf %102, %101 : vector<4x128xf32>
    %104 = arith.divf %102, %103 : vector<4x128xf32>
    %105 = arith.mulf %96, %37 : vector<4x128xf32>
    %106 = arith.mulf %90, %98 : vector<4x128xf32>
    %107 = arith.addf %105, %106 : vector<4x128xf32>
    %108 = math.tanh %107 : vector<4x128xf32>
    %109 = arith.mulf %104, %108 : vector<4x128xf32>
    %110 = tpu.concatenate %109, %69 in 1 : vector<4x128xf32>, vector<4x128xf32> -> vector<4x256xf32>
    %c0_29 = arith.constant 0 : index
    %c0_30 = arith.constant 0 : index
    %111 = vector.load %arg6[%c0_29, %c0_30] : memref<256x512xf32, #tpu.memory_space<vmem>>, vector<256x512xf32>
    %cst_31 = arith.constant dense<0.000000e+00> : vector<4x512xf32>
    %112 = tpu.matmul %110, %111, %cst_31 {dimension_numbers = #tpu.dot_dimension_numbers<[1], [0], [0], [1], [0, 0, 1, 1], [], []>} : vector<4x256xf32>, vector<256x512xf32>, vector<4x512xf32> -> vector<4x512xf32>
    %113 = vector.broadcast %2 : vector<1x512xf32> to vector<4x512xf32>
    %114 = arith.addf %112, %113 : vector<4x512xf32>
    %115 = vector.extract_strided_slice %114 {offsets = [0, 0], sizes = [4, 128], strides = [1, 1]} : vector<4x512xf32> to vector<4x128xf32>
    %116 = arith.negf %115 : vector<4x128xf32>
    %117 = math.exp %116 : vector<4x128xf32>
    %cst_32 = arith.constant 1.000000e+00 : f32
    %118 = vector.broadcast %cst_32 : f32 to vector<4x128xf32>
    %119 = arith.addf %118, %117 : vector<4x128xf32>
    %120 = arith.divf %118, %119 : vector<4x128xf32>
    %121 = vector.extract_strided_slice %114 {offsets = [0, 128], sizes = [4, 128], strides = [1, 1]} : vector<4x512xf32> to vector<4x128xf32>
    %122 = arith.negf %121 : vector<4x128xf32>
    %123 = math.exp %122 : vector<4x128xf32>
    %cst_33 = arith.constant 1.000000e+00 : f32
    %124 = vector.broadcast %cst_33 : f32 to vector<4x128xf32>
    %125 = arith.addf %124, %123 : vector<4x128xf32>
    %126 = arith.divf %124, %125 : vector<4x128xf32>
    %127 = vector.extract_strided_slice %114 {offsets = [0, 256], sizes = [4, 128], strides = [1, 1]} : vector<4x512xf32> to vector<4x128xf32>
    %128 = math.tanh %127 : vector<4x128xf32>
    %129 = vector.extract_strided_slice %114 {offsets = [0, 384], sizes = [4, 128], strides = [1, 1]} : vector<4x512xf32> to vector<4x128xf32>
    %130 = arith.negf %129 : vector<4x128xf32>
    %131 = math.exp %130 : vector<4x128xf32>
    %cst_34 = arith.constant 1.000000e+00 : f32
    %132 = vector.broadcast %cst_34 : f32 to vector<4x128xf32>
    %133 = arith.addf %132, %131 : vector<4x128xf32>
    %134 = arith.divf %132, %133 : vector<4x128xf32>
    %135 = arith.mulf %126, %67 : vector<4x128xf32>
    %136 = arith.mulf %120, %128 : vector<4x128xf32>
    %137 = arith.addf %135, %136 : vector<4x128xf32>
    %138 = math.tanh %137 : vector<4x128xf32>
    %139 = arith.mulf %134, %138 : vector<4x128xf32>
    %140 = arith.index_cast %c1_i32 : i32 to index
    %c0_35 = arith.constant 0 : index
    %c0_36 = arith.constant 0 : index
    %141 = vector.load %arg11[%140, %c0_35, %c0_36] : memref<8x4x128xf32, #tpu.memory_space<vmem>>, vector<1x4x128xf32>
    %142 = vector.shape_cast %141 : vector<1x4x128xf32> to vector<4x128xf32>
    %143 = vector.shape_cast %139 : vector<4x128xf32> to vector<1x4x128xf32>
    tpu.vector_store %arg11[%140, %c0_35, %c0_36], %143 {strides = array<i32>} : memref<8x4x128xf32, #tpu.memory_space<vmem>>, vector<1x4x128xf32>,
    %c2_i32 = arith.constant 2 : i32
    %144 = arith.index_cast %c2_i32 : i32 to index
    %c0_37 = arith.constant 0 : index
    %c0_38 = arith.constant 0 : index
    %145 = vector.load %arg1[%144, %c0_37, %c0_38] : memref<8x4x1xf32, #tpu.memory_space<vmem>>, vector<1x4x1xf32>
    %146 = vector.shape_cast %145 : vector<1x4x1xf32> to vector<4x1xf32>
    %147 = vector.broadcast %146 : vector<4x1xf32> to vector<4x512xf32>
    %148 = vector.broadcast %0 : vector<1x512xf32> to vector<4x512xf32>
    %149 = arith.mulf %147, %148 : vector<4x512xf32>
    %c0_39 = arith.constant 0 : index
    %c0_40 = arith.constant 0 : index
    %150 = vector.load %arg4[%c0_39, %c0_40] : memref<128x512xf32, #tpu.memory_space<vmem>>, vector<128x512xf32>
    %cst_41 = arith.constant dense<0.000000e+00> : vector<4x512xf32>
    %151 = tpu.matmul %109, %150, %cst_41 {dimension_numbers = #tpu.dot_dimension_numbers<[1], [0], [0], [1], [0, 0, 1, 1], [], []>} : vector<4x128xf32>, vector<128x512xf32>, vector<4x512xf32> -> vector<4x512xf32>
    %152 = arith.addf %149, %151 : vector<4x512xf32>
    %153 = vector.broadcast %1 : vector<1x512xf32> to vector<4x512xf32>
    %154 = arith.addf %152, %153 : vector<4x512xf32>
    %155 = vector.extract_strided_slice %154 {offsets = [0, 0], sizes = [4, 128], strides = [1, 1]} : vector<4x512xf32> to vector<4x128xf32>
    %156 = arith.negf %155 : vector<4x128xf32>
    %157 = math.exp %156 : vector<4x128xf32>
    %cst_42 = arith.constant 1.000000e+00 : f32
    %158 = vector.broadcast %cst_42 : f32 to vector<4x128xf32>
    %159 = arith.addf %158, %157 : vector<4x128xf32>
    %160 = arith.divf %158, %159 : vector<4x128xf32>
    %161 = vector.extract_strided_slice %154 {offsets = [0, 128], sizes = [4, 128], strides = [1, 1]} : vector<4x512xf32> to vector<4x128xf32>
    %162 = arith.negf %161 : vector<4x128xf32>
    %163 = math.exp %162 : vector<4x128xf32>
    %cst_43 = arith.constant 1.000000e+00 : f32
    %164 = vector.broadcast %cst_43 : f32 to vector<4x128xf32>
    %165 = arith.addf %164, %163 : vector<4x128xf32>
    %166 = arith.divf %164, %165 : vector<4x128xf32>
    %167 = vector.extract_strided_slice %154 {offsets = [0, 256], sizes = [4, 128], strides = [1, 1]} : vector<4x512xf32> to vector<4x128xf32>
    %168 = math.tanh %167 : vector<4x128xf32>
    %169 = vector.extract_strided_slice %154 {offsets = [0, 384], sizes = [4, 128], strides = [1, 1]} : vector<4x512xf32> to vector<4x128xf32>
    %170 = arith.negf %169 : vector<4x128xf32>
    %171 = math.exp %170 : vector<4x128xf32>
    %cst_44 = arith.constant 1.000000e+00 : f32
    %172 = vector.broadcast %cst_44 : f32 to vector<4x128xf32>
    %173 = arith.addf %172, %171 : vector<4x128xf32>
    %174 = arith.divf %172, %173 : vector<4x128xf32>
    %175 = arith.mulf %166, %107 : vector<4x128xf32>
    %176 = arith.mulf %160, %168 : vector<4x128xf32>
    %177 = arith.addf %175, %176 : vector<4x128xf32>
    %178 = math.tanh %177 : vector<4x128xf32>
    %179 = arith.mulf %174, %178 : vector<4x128xf32>
    %180 = tpu.concatenate %179, %139 in 1 : vector<4x128xf32>, vector<4x128xf32> -> vector<4x256xf32>
    %c0_45 = arith.constant 0 : index
    %c0_46 = arith.constant 0 : index
    %181 = vector.load %arg6[%c0_45, %c0_46] : memref<256x512xf32, #tpu.memory_space<vmem>>, vector<256x512xf32>
    %cst_47 = arith.constant dense<0.000000e+00> : vector<4x512xf32>
    %182 = tpu.matmul %180, %181, %cst_47 {dimension_numbers = #tpu.dot_dimension_numbers<[1], [0], [0], [1], [0, 0, 1, 1], [], []>} : vector<4x256xf32>, vector<256x512xf32>, vector<4x512xf32> -> vector<4x512xf32>
    %183 = vector.broadcast %2 : vector<1x512xf32> to vector<4x512xf32>
    %184 = arith.addf %182, %183 : vector<4x512xf32>
    %185 = vector.extract_strided_slice %184 {offsets = [0, 0], sizes = [4, 128], strides = [1, 1]} : vector<4x512xf32> to vector<4x128xf32>
    %186 = arith.negf %185 : vector<4x128xf32>
    %187 = math.exp %186 : vector<4x128xf32>
    %cst_48 = arith.constant 1.000000e+00 : f32
    %188 = vector.broadcast %cst_48 : f32 to vector<4x128xf32>
    %189 = arith.addf %188, %187 : vector<4x128xf32>
    %190 = arith.divf %188, %189 : vector<4x128xf32>
    %191 = vector.extract_strided_slice %184 {offsets = [0, 128], sizes = [4, 128], strides = [1, 1]} : vector<4x512xf32> to vector<4x128xf32>
    %192 = arith.negf %191 : vector<4x128xf32>
    %193 = math.exp %192 : vector<4x128xf32>
    %cst_49 = arith.constant 1.000000e+00 : f32
    %194 = vector.broadcast %cst_49 : f32 to vector<4x128xf32>
    %195 = arith.addf %194, %193 : vector<4x128xf32>
    %196 = arith.divf %194, %195 : vector<4x128xf32>
    %197 = vector.extract_strided_slice %184 {offsets = [0, 256], sizes = [4, 128], strides = [1, 1]} : vector<4x512xf32> to vector<4x128xf32>
    %198 = math.tanh %197 : vector<4x128xf32>
    %199 = vector.extract_strided_slice %184 {offsets = [0, 384], sizes = [4, 128], strides = [1, 1]} : vector<4x512xf32> to vector<4x128xf32>
    %200 = arith.negf %199 : vector<4x128xf32>
    %201 = math.exp %200 : vector<4x128xf32>
    %cst_50 = arith.constant 1.000000e+00 : f32
    %202 = vector.broadcast %cst_50 : f32 to vector<4x128xf32>
    %203 = arith.addf %202, %201 : vector<4x128xf32>
    %204 = arith.divf %202, %203 : vector<4x128xf32>
    %205 = arith.mulf %196, %137 : vector<4x128xf32>
    %206 = arith.mulf %190, %198 : vector<4x128xf32>
    %207 = arith.addf %205, %206 : vector<4x128xf32>
    %208 = math.tanh %207 : vector<4x128xf32>
    %209 = arith.mulf %204, %208 : vector<4x128xf32>
    %210 = arith.index_cast %c2_i32 : i32 to index
    %c0_51 = arith.constant 0 : index
    %c0_52 = arith.constant 0 : index
    %211 = vector.load %arg11[%210, %c0_51, %c0_52] : memref<8x4x128xf32, #tpu.memory_space<vmem>>, vector<1x4x128xf32>
    %212 = vector.shape_cast %211 : vector<1x4x128xf32> to vector<4x128xf32>
    %213 = vector.shape_cast %209 : vector<4x128xf32> to vector<1x4x128xf32>
    tpu.vector_store %arg11[%210, %c0_51, %c0_52], %213 {strides = array<i32>} : memref<8x4x128xf32, #tpu.memory_space<vmem>>, vector<1x4x128xf32>,
    %c3_i32 = arith.constant 3 : i32
    %214 = arith.index_cast %c3_i32 : i32 to index
    %c0_53 = arith.constant 0 : index
    %c0_54 = arith.constant 0 : index
    %215 = vector.load %arg1[%214, %c0_53, %c0_54] : memref<8x4x1xf32, #tpu.memory_space<vmem>>, vector<1x4x1xf32>
    %216 = vector.shape_cast %215 : vector<1x4x1xf32> to vector<4x1xf32>
    %217 = vector.broadcast %216 : vector<4x1xf32> to vector<4x512xf32>
    %218 = vector.broadcast %0 : vector<1x512xf32> to vector<4x512xf32>
    %219 = arith.mulf %217, %218 : vector<4x512xf32>
    %c0_55 = arith.constant 0 : index
    %c0_56 = arith.constant 0 : index
    %220 = vector.load %arg4[%c0_55, %c0_56] : memref<128x512xf32, #tpu.memory_space<vmem>>, vector<128x512xf32>
    %cst_57 = arith.constant dense<0.000000e+00> : vector<4x512xf32>
    %221 = tpu.matmul %179, %220, %cst_57 {dimension_numbers = #tpu.dot_dimension_numbers<[1], [0], [0], [1], [0, 0, 1, 1], [], []>} : vector<4x128xf32>, vector<128x512xf32>, vector<4x512xf32> -> vector<4x512xf32>
    %222 = arith.addf %219, %221 : vector<4x512xf32>
    %223 = vector.broadcast %1 : vector<1x512xf32> to vector<4x512xf32>
    %224 = arith.addf %222, %223 : vector<4x512xf32>
    %225 = vector.extract_strided_slice %224 {offsets = [0, 0], sizes = [4, 128], strides = [1, 1]} : vector<4x512xf32> to vector<4x128xf32>
    %226 = arith.negf %225 : vector<4x128xf32>
    %227 = math.exp %226 : vector<4x128xf32>
    %cst_58 = arith.constant 1.000000e+00 : f32
    %228 = vector.broadcast %cst_58 : f32 to vector<4x128xf32>
    %229 = arith.addf %228, %227 : vector<4x128xf32>
    %230 = arith.divf %228, %229 : vector<4x128xf32>
    %231 = vector.extract_strided_slice %224 {offsets = [0, 128], sizes = [4, 128], strides = [1, 1]} : vector<4x512xf32> to vector<4x128xf32>
    %232 = arith.negf %231 : vector<4x128xf32>
    %233 = math.exp %232 : vector<4x128xf32>
    %cst_59 = arith.constant 1.000000e+00 : f32
    %234 = vector.broadcast %cst_59 : f32 to vector<4x128xf32>
    %235 = arith.addf %234, %233 : vector<4x128xf32>
    %236 = arith.divf %234, %235 : vector<4x128xf32>
    %237 = vector.extract_strided_slice %224 {offsets = [0, 256], sizes = [4, 128], strides = [1, 1]} : vector<4x512xf32> to vector<4x128xf32>
    %238 = math.tanh %237 : vector<4x128xf32>
    %239 = vector.extract_strided_slice %224 {offsets = [0, 384], sizes = [4, 128], strides = [1, 1]} : vector<4x512xf32> to vector<4x128xf32>
    %240 = arith.negf %239 : vector<4x128xf32>
    %241 = math.exp %240 : vector<4x128xf32>
    %cst_60 = arith.constant 1.000000e+00 : f32
    %242 = vector.broadcast %cst_60 : f32 to vector<4x128xf32>
    %243 = arith.addf %242, %241 : vector<4x128xf32>
    %244 = arith.divf %242, %243 : vector<4x128xf32>
    %245 = arith.mulf %236, %177 : vector<4x128xf32>
    %246 = arith.mulf %230, %238 : vector<4x128xf32>
    %247 = arith.addf %245, %246 : vector<4x128xf32>
    %248 = math.tanh %247 : vector<4x128xf32>
    %249 = arith.mulf %244, %248 : vector<4x128xf32>
    %250 = tpu.concatenate %249, %209 in 1 : vector<4x128xf32>, vector<4x128xf32> -> vector<4x256xf32>
    %c0_61 = arith.constant 0 : index
    %c0_62 = arith.constant 0 : index
    %251 = vector.load %arg6[%c0_61, %c0_62] : memref<256x512xf32, #tpu.memory_space<vmem>>, vector<256x512xf32>
    %cst_63 = arith.constant dense<0.000000e+00> : vector<4x512xf32>
    %252 = tpu.matmul %250, %251, %cst_63 {dimension_numbers = #tpu.dot_dimension_numbers<[1], [0], [0], [1], [0, 0, 1, 1], [], []>} : vector<4x256xf32>, vector<256x512xf32>, vector<4x512xf32> -> vector<4x512xf32>
    %253 = vector.broadcast %2 : vector<1x512xf32> to vector<4x512xf32>
    %254 = arith.addf %252, %253 : vector<4x512xf32>
    %255 = vector.extract_strided_slice %254 {offsets = [0, 0], sizes = [4, 128], strides = [1, 1]} : vector<4x512xf32> to vector<4x128xf32>
    %256 = arith.negf %255 : vector<4x128xf32>
    %257 = math.exp %256 : vector<4x128xf32>
    %cst_64 = arith.constant 1.000000e+00 : f32
    %258 = vector.broadcast %cst_64 : f32 to vector<4x128xf32>
    %259 = arith.addf %258, %257 : vector<4x128xf32>
    %260 = arith.divf %258, %259 : vector<4x128xf32>
    %261 = vector.extract_strided_slice %254 {offsets = [0, 128], sizes = [4, 128], strides = [1, 1]} : vector<4x512xf32> to vector<4x128xf32>
    %262 = arith.negf %261 : vector<4x128xf32>
    %263 = math.exp %262 : vector<4x128xf32>
    %cst_65 = arith.constant 1.000000e+00 : f32
    %264 = vector.broadcast %cst_65 : f32 to vector<4x128xf32>
    %265 = arith.addf %264, %263 : vector<4x128xf32>
    %266 = arith.divf %264, %265 : vector<4x128xf32>
    %267 = vector.extract_strided_slice %254 {offsets = [0, 256], sizes = [4, 128], strides = [1, 1]} : vector<4x512xf32> to vector<4x128xf32>
    %268 = math.tanh %267 : vector<4x128xf32>
    %269 = vector.extract_strided_slice %254 {offsets = [0, 384], sizes = [4, 128], strides = [1, 1]} : vector<4x512xf32> to vector<4x128xf32>
    %270 = arith.negf %269 : vector<4x128xf32>
    %271 = math.exp %270 : vector<4x128xf32>
    %cst_66 = arith.constant 1.000000e+00 : f32
    %272 = vector.broadcast %cst_66 : f32 to vector<4x128xf32>
    %273 = arith.addf %272, %271 : vector<4x128xf32>
    %274 = arith.divf %272, %273 : vector<4x128xf32>
    %275 = arith.mulf %266, %207 : vector<4x128xf32>
    %276 = arith.mulf %260, %268 : vector<4x128xf32>
    %277 = arith.addf %275, %276 : vector<4x128xf32>
    %278 = math.tanh %277 : vector<4x128xf32>
    %279 = arith.mulf %274, %278 : vector<4x128xf32>
    %280 = arith.index_cast %c3_i32 : i32 to index
    %c0_67 = arith.constant 0 : index
    %c0_68 = arith.constant 0 : index
    %281 = vector.load %arg11[%280, %c0_67, %c0_68] : memref<8x4x128xf32, #tpu.memory_space<vmem>>, vector<1x4x128xf32>
    %282 = vector.shape_cast %281 : vector<1x4x128xf32> to vector<4x128xf32>
    %283 = vector.shape_cast %279 : vector<4x128xf32> to vector<1x4x128xf32>
    tpu.vector_store %arg11[%280, %c0_67, %c0_68], %283 {strides = array<i32>} : memref<8x4x128xf32, #tpu.memory_space<vmem>>, vector<1x4x128xf32>,
    %c4_i32 = arith.constant 4 : i32
    %284 = arith.index_cast %c4_i32 : i32 to index
    %c0_69 = arith.constant 0 : index
    %c0_70 = arith.constant 0 : index
    %285 = vector.load %arg1[%284, %c0_69, %c0_70] : memref<8x4x1xf32, #tpu.memory_space<vmem>>, vector<1x4x1xf32>
    %286 = vector.shape_cast %285 : vector<1x4x1xf32> to vector<4x1xf32>
    %287 = vector.broadcast %286 : vector<4x1xf32> to vector<4x512xf32>
    %288 = vector.broadcast %0 : vector<1x512xf32> to vector<4x512xf32>
    %289 = arith.mulf %287, %288 : vector<4x512xf32>
    %c0_71 = arith.constant 0 : index
    %c0_72 = arith.constant 0 : index
    %290 = vector.load %arg4[%c0_71, %c0_72] : memref<128x512xf32, #tpu.memory_space<vmem>>, vector<128x512xf32>
    %cst_73 = arith.constant dense<0.000000e+00> : vector<4x512xf32>
    %291 = tpu.matmul %249, %290, %cst_73 {dimension_numbers = #tpu.dot_dimension_numbers<[1], [0], [0], [1], [0, 0, 1, 1], [], []>} : vector<4x128xf32>, vector<128x512xf32>, vector<4x512xf32> -> vector<4x512xf32>
    %292 = arith.addf %289, %291 : vector<4x512xf32>
    %293 = vector.broadcast %1 : vector<1x512xf32> to vector<4x512xf32>
    %294 = arith.addf %292, %293 : vector<4x512xf32>
    %295 = vector.extract_strided_slice %294 {offsets = [0, 0], sizes = [4, 128], strides = [1, 1]} : vector<4x512xf32> to vector<4x128xf32>
    %296 = arith.negf %295 : vector<4x128xf32>
    %297 = math.exp %296 : vector<4x128xf32>
    %cst_74 = arith.constant 1.000000e+00 : f32
    %298 = vector.broadcast %cst_74 : f32 to vector<4x128xf32>
    %299 = arith.addf %298, %297 : vector<4x128xf32>
    %300 = arith.divf %298, %299 : vector<4x128xf32>
    %301 = vector.extract_strided_slice %294 {offsets = [0, 128], sizes = [4, 128], strides = [1, 1]} : vector<4x512xf32> to vector<4x128xf32>
    %302 = arith.negf %301 : vector<4x128xf32>
    %303 = math.exp %302 : vector<4x128xf32>
    %cst_75 = arith.constant 1.000000e+00 : f32
    %304 = vector.broadcast %cst_75 : f32 to vector<4x128xf32>
    %305 = arith.addf %304, %303 : vector<4x128xf32>
    %306 = arith.divf %304, %305 : vector<4x128xf32>
    %307 = vector.extract_strided_slice %294 {offsets = [0, 256], sizes = [4, 128], strides = [1, 1]} : vector<4x512xf32> to vector<4x128xf32>
    %308 = math.tanh %307 : vector<4x128xf32>
    %309 = vector.extract_strided_slice %294 {offsets = [0, 384], sizes = [4, 128], strides = [1, 1]} : vector<4x512xf32> to vector<4x128xf32>
    %310 = arith.negf %309 : vector<4x128xf32>
    %311 = math.exp %310 : vector<4x128xf32>
    %cst_76 = arith.constant 1.000000e+00 : f32
    %312 = vector.broadcast %cst_76 : f32 to vector<4x128xf32>
    %313 = arith.addf %312, %311 : vector<4x128xf32>
    %314 = arith.divf %312, %313 : vector<4x128xf32>
    %315 = arith.mulf %306, %247 : vector<4x128xf32>
    %316 = arith.mulf %300, %308 : vector<4x128xf32>
    %317 = arith.addf %315, %316 : vector<4x128xf32>
    %318 = math.tanh %317 : vector<4x128xf32>
    %319 = arith.mulf %314, %318 : vector<4x128xf32>
    %320 = tpu.concatenate %319, %279 in 1 : vector<4x128xf32>, vector<4x128xf32> -> vector<4x256xf32>
    %c0_77 = arith.constant 0 : index
    %c0_78 = arith.constant 0 : index
    %321 = vector.load %arg6[%c0_77, %c0_78] : memref<256x512xf32, #tpu.memory_space<vmem>>, vector<256x512xf32>
    %cst_79 = arith.constant dense<0.000000e+00> : vector<4x512xf32>
    %322 = tpu.matmul %320, %321, %cst_79 {dimension_numbers = #tpu.dot_dimension_numbers<[1], [0], [0], [1], [0, 0, 1, 1], [], []>} : vector<4x256xf32>, vector<256x512xf32>, vector<4x512xf32> -> vector<4x512xf32>
    %323 = vector.broadcast %2 : vector<1x512xf32> to vector<4x512xf32>
    %324 = arith.addf %322, %323 : vector<4x512xf32>
    %325 = vector.extract_strided_slice %324 {offsets = [0, 0], sizes = [4, 128], strides = [1, 1]} : vector<4x512xf32> to vector<4x128xf32>
    %326 = arith.negf %325 : vector<4x128xf32>
    %327 = math.exp %326 : vector<4x128xf32>
    %cst_80 = arith.constant 1.000000e+00 : f32
    %328 = vector.broadcast %cst_80 : f32 to vector<4x128xf32>
    %329 = arith.addf %328, %327 : vector<4x128xf32>
    %330 = arith.divf %328, %329 : vector<4x128xf32>
    %331 = vector.extract_strided_slice %324 {offsets = [0, 128], sizes = [4, 128], strides = [1, 1]} : vector<4x512xf32> to vector<4x128xf32>
    %332 = arith.negf %331 : vector<4x128xf32>
    %333 = math.exp %332 : vector<4x128xf32>
    %cst_81 = arith.constant 1.000000e+00 : f32
    %334 = vector.broadcast %cst_81 : f32 to vector<4x128xf32>
    %335 = arith.addf %334, %333 : vector<4x128xf32>
    %336 = arith.divf %334, %335 : vector<4x128xf32>
    %337 = vector.extract_strided_slice %324 {offsets = [0, 256], sizes = [4, 128], strides = [1, 1]} : vector<4x512xf32> to vector<4x128xf32>
    %338 = math.tanh %337 : vector<4x128xf32>
    %339 = vector.extract_strided_slice %324 {offsets = [0, 384], sizes = [4, 128], strides = [1, 1]} : vector<4x512xf32> to vector<4x128xf32>
    %340 = arith.negf %339 : vector<4x128xf32>
    %341 = math.exp %340 : vector<4x128xf32>
    %cst_82 = arith.constant 1.000000e+00 : f32
    %342 = vector.broadcast %cst_82 : f32 to vector<4x128xf32>
    %343 = arith.addf %342, %341 : vector<4x128xf32>
    %344 = arith.divf %342, %343 : vector<4x128xf32>
    %345 = arith.mulf %336, %277 : vector<4x128xf32>
    %346 = arith.mulf %330, %338 : vector<4x128xf32>
    %347 = arith.addf %345, %346 : vector<4x128xf32>
    %348 = math.tanh %347 : vector<4x128xf32>
    %349 = arith.mulf %344, %348 : vector<4x128xf32>
    %350 = arith.index_cast %c4_i32 : i32 to index
    %c0_83 = arith.constant 0 : index
    %c0_84 = arith.constant 0 : index
    %351 = vector.load %arg11[%350, %c0_83, %c0_84] : memref<8x4x128xf32, #tpu.memory_space<vmem>>, vector<1x4x128xf32>
    %352 = vector.shape_cast %351 : vector<1x4x128xf32> to vector<4x128xf32>
    %353 = vector.shape_cast %349 : vector<4x128xf32> to vector<1x4x128xf32>
    tpu.vector_store %arg11[%350, %c0_83, %c0_84], %353 {strides = array<i32>} : memref<8x4x128xf32, #tpu.memory_space<vmem>>, vector<1x4x128xf32>,
    %c5_i32 = arith.constant 5 : i32
    %354 = arith.index_cast %c5_i32 : i32 to index
    %c0_85 = arith.constant 0 : index
    %c0_86 = arith.constant 0 : index
    %355 = vector.load %arg1[%354, %c0_85, %c0_86] : memref<8x4x1xf32, #tpu.memory_space<vmem>>, vector<1x4x1xf32>
    %356 = vector.shape_cast %355 : vector<1x4x1xf32> to vector<4x1xf32>
    %357 = vector.broadcast %356 : vector<4x1xf32> to vector<4x512xf32>
    %358 = vector.broadcast %0 : vector<1x512xf32> to vector<4x512xf32>
    %359 = arith.mulf %357, %358 : vector<4x512xf32>
    %c0_87 = arith.constant 0 : index
    %c0_88 = arith.constant 0 : index
    %360 = vector.load %arg4[%c0_87, %c0_88] : memref<128x512xf32, #tpu.memory_space<vmem>>, vector<128x512xf32>
    %cst_89 = arith.constant dense<0.000000e+00> : vector<4x512xf32>
    %361 = tpu.matmul %319, %360, %cst_89 {dimension_numbers = #tpu.dot_dimension_numbers<[1], [0], [0], [1], [0, 0, 1, 1], [], []>} : vector<4x128xf32>, vector<128x512xf32>, vector<4x512xf32> -> vector<4x512xf32>
    %362 = arith.addf %359, %361 : vector<4x512xf32>
    %363 = vector.broadcast %1 : vector<1x512xf32> to vector<4x512xf32>
    %364 = arith.addf %362, %363 : vector<4x512xf32>
    %365 = vector.extract_strided_slice %364 {offsets = [0, 0], sizes = [4, 128], strides = [1, 1]} : vector<4x512xf32> to vector<4x128xf32>
    %366 = arith.negf %365 : vector<4x128xf32>
    %367 = math.exp %366 : vector<4x128xf32>
    %cst_90 = arith.constant 1.000000e+00 : f32
    %368 = vector.broadcast %cst_90 : f32 to vector<4x128xf32>
    %369 = arith.addf %368, %367 : vector<4x128xf32>
    %370 = arith.divf %368, %369 : vector<4x128xf32>
    %371 = vector.extract_strided_slice %364 {offsets = [0, 128], sizes = [4, 128], strides = [1, 1]} : vector<4x512xf32> to vector<4x128xf32>
    %372 = arith.negf %371 : vector<4x128xf32>
    %373 = math.exp %372 : vector<4x128xf32>
    %cst_91 = arith.constant 1.000000e+00 : f32
    %374 = vector.broadcast %cst_91 : f32 to vector<4x128xf32>
    %375 = arith.addf %374, %373 : vector<4x128xf32>
    %376 = arith.divf %374, %375 : vector<4x128xf32>
    %377 = vector.extract_strided_slice %364 {offsets = [0, 256], sizes = [4, 128], strides = [1, 1]} : vector<4x512xf32> to vector<4x128xf32>
    %378 = math.tanh %377 : vector<4x128xf32>
    %379 = vector.extract_strided_slice %364 {offsets = [0, 384], sizes = [4, 128], strides = [1, 1]} : vector<4x512xf32> to vector<4x128xf32>
    %380 = arith.negf %379 : vector<4x128xf32>
    %381 = math.exp %380 : vector<4x128xf32>
    %cst_92 = arith.constant 1.000000e+00 : f32
    %382 = vector.broadcast %cst_92 : f32 to vector<4x128xf32>
    %383 = arith.addf %382, %381 : vector<4x128xf32>
    %384 = arith.divf %382, %383 : vector<4x128xf32>
    %385 = arith.mulf %376, %317 : vector<4x128xf32>
    %386 = arith.mulf %370, %378 : vector<4x128xf32>
    %387 = arith.addf %385, %386 : vector<4x128xf32>
    %388 = math.tanh %387 : vector<4x128xf32>
    %389 = arith.mulf %384, %388 : vector<4x128xf32>
    %390 = tpu.concatenate %389, %349 in 1 : vector<4x128xf32>, vector<4x128xf32> -> vector<4x256xf32>
    %c0_93 = arith.constant 0 : index
    %c0_94 = arith.constant 0 : index
    %391 = vector.load %arg6[%c0_93, %c0_94] : memref<256x512xf32, #tpu.memory_space<vmem>>, vector<256x512xf32>
    %cst_95 = arith.constant dense<0.000000e+00> : vector<4x512xf32>
    %392 = tpu.matmul %390, %391, %cst_95 {dimension_numbers = #tpu.dot_dimension_numbers<[1], [0], [0], [1], [0, 0, 1, 1], [], []>} : vector<4x256xf32>, vector<256x512xf32>, vector<4x512xf32> -> vector<4x512xf32>
    %393 = vector.broadcast %2 : vector<1x512xf32> to vector<4x512xf32>
    %394 = arith.addf %392, %393 : vector<4x512xf32>
    %395 = vector.extract_strided_slice %394 {offsets = [0, 0], sizes = [4, 128], strides = [1, 1]} : vector<4x512xf32> to vector<4x128xf32>
    %396 = arith.negf %395 : vector<4x128xf32>
    %397 = math.exp %396 : vector<4x128xf32>
    %cst_96 = arith.constant 1.000000e+00 : f32
    %398 = vector.broadcast %cst_96 : f32 to vector<4x128xf32>
    %399 = arith.addf %398, %397 : vector<4x128xf32>
    %400 = arith.divf %398, %399 : vector<4x128xf32>
    %401 = vector.extract_strided_slice %394 {offsets = [0, 128], sizes = [4, 128], strides = [1, 1]} : vector<4x512xf32> to vector<4x128xf32>
    %402 = arith.negf %401 : vector<4x128xf32>
    %403 = math.exp %402 : vector<4x128xf32>
    %cst_97 = arith.constant 1.000000e+00 : f32
    %404 = vector.broadcast %cst_97 : f32 to vector<4x128xf32>
    %405 = arith.addf %404, %403 : vector<4x128xf32>
    %406 = arith.divf %404, %405 : vector<4x128xf32>
    %407 = vector.extract_strided_slice %394 {offsets = [0, 256], sizes = [4, 128], strides = [1, 1]} : vector<4x512xf32> to vector<4x128xf32>
    %408 = math.tanh %407 : vector<4x128xf32>
    %409 = vector.extract_strided_slice %394 {offsets = [0, 384], sizes = [4, 128], strides = [1, 1]} : vector<4x512xf32> to vector<4x128xf32>
    %410 = arith.negf %409 : vector<4x128xf32>
    %411 = math.exp %410 : vector<4x128xf32>
    %cst_98 = arith.constant 1.000000e+00 : f32
    %412 = vector.broadcast %cst_98 : f32 to vector<4x128xf32>
    %413 = arith.addf %412, %411 : vector<4x128xf32>
    %414 = arith.divf %412, %413 : vector<4x128xf32>
    %415 = arith.mulf %406, %347 : vector<4x128xf32>
    %416 = arith.mulf %400, %408 : vector<4x128xf32>
    %417 = arith.addf %415, %416 : vector<4x128xf32>
    %418 = math.tanh %417 : vector<4x128xf32>
    %419 = arith.mulf %414, %418 : vector<4x128xf32>
    %420 = arith.index_cast %c5_i32 : i32 to index
    %c0_99 = arith.constant 0 : index
    %c0_100 = arith.constant 0 : index
    %421 = vector.load %arg11[%420, %c0_99, %c0_100] : memref<8x4x128xf32, #tpu.memory_space<vmem>>, vector<1x4x128xf32>
    %422 = vector.shape_cast %421 : vector<1x4x128xf32> to vector<4x128xf32>
    %423 = vector.shape_cast %419 : vector<4x128xf32> to vector<1x4x128xf32>
    tpu.vector_store %arg11[%420, %c0_99, %c0_100], %423 {strides = array<i32>} : memref<8x4x128xf32, #tpu.memory_space<vmem>>, vector<1x4x128xf32>,
    %c6_i32 = arith.constant 6 : i32
    %424 = arith.index_cast %c6_i32 : i32 to index
    %c0_101 = arith.constant 0 : index
    %c0_102 = arith.constant 0 : index
    %425 = vector.load %arg1[%424, %c0_101, %c0_102] : memref<8x4x1xf32, #tpu.memory_space<vmem>>, vector<1x4x1xf32>
    %426 = vector.shape_cast %425 : vector<1x4x1xf32> to vector<4x1xf32>
    %427 = vector.broadcast %426 : vector<4x1xf32> to vector<4x512xf32>
    %428 = vector.broadcast %0 : vector<1x512xf32> to vector<4x512xf32>
    %429 = arith.mulf %427, %428 : vector<4x512xf32>
    %c0_103 = arith.constant 0 : index
    %c0_104 = arith.constant 0 : index
    %430 = vector.load %arg4[%c0_103, %c0_104] : memref<128x512xf32, #tpu.memory_space<vmem>>, vector<128x512xf32>
    %cst_105 = arith.constant dense<0.000000e+00> : vector<4x512xf32>
    %431 = tpu.matmul %389, %430, %cst_105 {dimension_numbers = #tpu.dot_dimension_numbers<[1], [0], [0], [1], [0, 0, 1, 1], [], []>} : vector<4x128xf32>, vector<128x512xf32>, vector<4x512xf32> -> vector<4x512xf32>
    %432 = arith.addf %429, %431 : vector<4x512xf32>
    %433 = vector.broadcast %1 : vector<1x512xf32> to vector<4x512xf32>
    %434 = arith.addf %432, %433 : vector<4x512xf32>
    %435 = vector.extract_strided_slice %434 {offsets = [0, 0], sizes = [4, 128], strides = [1, 1]} : vector<4x512xf32> to vector<4x128xf32>
    %436 = arith.negf %435 : vector<4x128xf32>
    %437 = math.exp %436 : vector<4x128xf32>
    %cst_106 = arith.constant 1.000000e+00 : f32
    %438 = vector.broadcast %cst_106 : f32 to vector<4x128xf32>
    %439 = arith.addf %438, %437 : vector<4x128xf32>
    %440 = arith.divf %438, %439 : vector<4x128xf32>
    %441 = vector.extract_strided_slice %434 {offsets = [0, 128], sizes = [4, 128], strides = [1, 1]} : vector<4x512xf32> to vector<4x128xf32>
    %442 = arith.negf %441 : vector<4x128xf32>
    %443 = math.exp %442 : vector<4x128xf32>
    %cst_107 = arith.constant 1.000000e+00 : f32
    %444 = vector.broadcast %cst_107 : f32 to vector<4x128xf32>
    %445 = arith.addf %444, %443 : vector<4x128xf32>
    %446 = arith.divf %444, %445 : vector<4x128xf32>
    %447 = vector.extract_strided_slice %434 {offsets = [0, 256], sizes = [4, 128], strides = [1, 1]} : vector<4x512xf32> to vector<4x128xf32>
    %448 = math.tanh %447 : vector<4x128xf32>
    %449 = vector.extract_strided_slice %434 {offsets = [0, 384], sizes = [4, 128], strides = [1, 1]} : vector<4x512xf32> to vector<4x128xf32>
    %450 = arith.negf %449 : vector<4x128xf32>
    %451 = math.exp %450 : vector<4x128xf32>
    %cst_108 = arith.constant 1.000000e+00 : f32
    %452 = vector.broadcast %cst_108 : f32 to vector<4x128xf32>
    %453 = arith.addf %452, %451 : vector<4x128xf32>
    %454 = arith.divf %452, %453 : vector<4x128xf32>
    %455 = arith.mulf %446, %387 : vector<4x128xf32>
    %456 = arith.mulf %440, %448 : vector<4x128xf32>
    %457 = arith.addf %455, %456 : vector<4x128xf32>
    %458 = math.tanh %457 : vector<4x128xf32>
    %459 = arith.mulf %454, %458 : vector<4x128xf32>
    %460 = tpu.concatenate %459, %419 in 1 : vector<4x128xf32>, vector<4x128xf32> -> vector<4x256xf32>
    %c0_109 = arith.constant 0 : index
    %c0_110 = arith.constant 0 : index
    %461 = vector.load %arg6[%c0_109, %c0_110] : memref<256x512xf32, #tpu.memory_space<vmem>>, vector<256x512xf32>
    %cst_111 = arith.constant dense<0.000000e+00> : vector<4x512xf32>
    %462 = tpu.matmul %460, %461, %cst_111 {dimension_numbers = #tpu.dot_dimension_numbers<[1], [0], [0], [1], [0, 0, 1, 1], [], []>} : vector<4x256xf32>, vector<256x512xf32>, vector<4x512xf32> -> vector<4x512xf32>
    %463 = vector.broadcast %2 : vector<1x512xf32> to vector<4x512xf32>
    %464 = arith.addf %462, %463 : vector<4x512xf32>
    %465 = vector.extract_strided_slice %464 {offsets = [0, 0], sizes = [4, 128], strides = [1, 1]} : vector<4x512xf32> to vector<4x128xf32>
    %466 = arith.negf %465 : vector<4x128xf32>
    %467 = math.exp %466 : vector<4x128xf32>
    %cst_112 = arith.constant 1.000000e+00 : f32
    %468 = vector.broadcast %cst_112 : f32 to vector<4x128xf32>
    %469 = arith.addf %468, %467 : vector<4x128xf32>
    %470 = arith.divf %468, %469 : vector<4x128xf32>
    %471 = vector.extract_strided_slice %464 {offsets = [0, 128], sizes = [4, 128], strides = [1, 1]} : vector<4x512xf32> to vector<4x128xf32>
    %472 = arith.negf %471 : vector<4x128xf32>
    %473 = math.exp %472 : vector<4x128xf32>
    %cst_113 = arith.constant 1.000000e+00 : f32
    %474 = vector.broadcast %cst_113 : f32 to vector<4x128xf32>
    %475 = arith.addf %474, %473 : vector<4x128xf32>
    %476 = arith.divf %474, %475 : vector<4x128xf32>
    %477 = vector.extract_strided_slice %464 {offsets = [0, 256], sizes = [4, 128], strides = [1, 1]} : vector<4x512xf32> to vector<4x128xf32>
    %478 = math.tanh %477 : vector<4x128xf32>
    %479 = vector.extract_strided_slice %464 {offsets = [0, 384], sizes = [4, 128], strides = [1, 1]} : vector<4x512xf32> to vector<4x128xf32>
    %480 = arith.negf %479 : vector<4x128xf32>
    %481 = math.exp %480 : vector<4x128xf32>
    %cst_114 = arith.constant 1.000000e+00 : f32
    %482 = vector.broadcast %cst_114 : f32 to vector<4x128xf32>
    %483 = arith.addf %482, %481 : vector<4x128xf32>
    %484 = arith.divf %482, %483 : vector<4x128xf32>
    %485 = arith.mulf %476, %417 : vector<4x128xf32>
    %486 = arith.mulf %470, %478 : vector<4x128xf32>
    %487 = arith.addf %485, %486 : vector<4x128xf32>
    %488 = math.tanh %487 : vector<4x128xf32>
    %489 = arith.mulf %484, %488 : vector<4x128xf32>
    %490 = arith.index_cast %c6_i32 : i32 to index
    %c0_115 = arith.constant 0 : index
    %c0_116 = arith.constant 0 : index
    %491 = vector.load %arg11[%490, %c0_115, %c0_116] : memref<8x4x128xf32, #tpu.memory_space<vmem>>, vector<1x4x128xf32>
    %492 = vector.shape_cast %491 : vector<1x4x128xf32> to vector<4x128xf32>
    %493 = vector.shape_cast %489 : vector<4x128xf32> to vector<1x4x128xf32>
    tpu.vector_store %arg11[%490, %c0_115, %c0_116], %493 {strides = array<i32>} : memref<8x4x128xf32, #tpu.memory_space<vmem>>, vector<1x4x128xf32>,
    %c7_i32 = arith.constant 7 : i32
    %494 = arith.index_cast %c7_i32 : i32 to index
    %c0_117 = arith.constant 0 : index
    %c0_118 = arith.constant 0 : index
    %495 = vector.load %arg1[%494, %c0_117, %c0_118] : memref<8x4x1xf32, #tpu.memory_space<vmem>>, vector<1x4x1xf32>
    %496 = vector.shape_cast %495 : vector<1x4x1xf32> to vector<4x1xf32>
    %497 = vector.broadcast %496 : vector<4x1xf32> to vector<4x512xf32>
    %498 = vector.broadcast %0 : vector<1x512xf32> to vector<4x512xf32>
    %499 = arith.mulf %497, %498 : vector<4x512xf32>
    %c0_119 = arith.constant 0 : index
    %c0_120 = arith.constant 0 : index
    %500 = vector.load %arg4[%c0_119, %c0_120] : memref<128x512xf32, #tpu.memory_space<vmem>>, vector<128x512xf32>
    %cst_121 = arith.constant dense<0.000000e+00> : vector<4x512xf32>
    %501 = tpu.matmul %459, %500, %cst_121 {dimension_numbers = #tpu.dot_dimension_numbers<[1], [0], [0], [1], [0, 0, 1, 1], [], []>} : vector<4x128xf32>, vector<128x512xf32>, vector<4x512xf32> -> vector<4x512xf32>
    %502 = arith.addf %499, %501 : vector<4x512xf32>
    %503 = vector.broadcast %1 : vector<1x512xf32> to vector<4x512xf32>
    %504 = arith.addf %502, %503 : vector<4x512xf32>
    %505 = vector.extract_strided_slice %504 {offsets = [0, 0], sizes = [4, 128], strides = [1, 1]} : vector<4x512xf32> to vector<4x128xf32>
    %506 = arith.negf %505 : vector<4x128xf32>
    %507 = math.exp %506 : vector<4x128xf32>
    %cst_122 = arith.constant 1.000000e+00 : f32
    %508 = vector.broadcast %cst_122 : f32 to vector<4x128xf32>
    %509 = arith.addf %508, %507 : vector<4x128xf32>
    %510 = arith.divf %508, %509 : vector<4x128xf32>
    %511 = vector.extract_strided_slice %504 {offsets = [0, 128], sizes = [4, 128], strides = [1, 1]} : vector<4x512xf32> to vector<4x128xf32>
    %512 = arith.negf %511 : vector<4x128xf32>
    %513 = math.exp %512 : vector<4x128xf32>
    %cst_123 = arith.constant 1.000000e+00 : f32
    %514 = vector.broadcast %cst_123 : f32 to vector<4x128xf32>
    %515 = arith.addf %514, %513 : vector<4x128xf32>
    %516 = arith.divf %514, %515 : vector<4x128xf32>
    %517 = vector.extract_strided_slice %504 {offsets = [0, 256], sizes = [4, 128], strides = [1, 1]} : vector<4x512xf32> to vector<4x128xf32>
    %518 = math.tanh %517 : vector<4x128xf32>
    %519 = vector.extract_strided_slice %504 {offsets = [0, 384], sizes = [4, 128], strides = [1, 1]} : vector<4x512xf32> to vector<4x128xf32>
    %520 = arith.negf %519 : vector<4x128xf32>
    %521 = math.exp %520 : vector<4x128xf32>
    %cst_124 = arith.constant 1.000000e+00 : f32
    %522 = vector.broadcast %cst_124 : f32 to vector<4x128xf32>
    %523 = arith.addf %522, %521 : vector<4x128xf32>
    %524 = arith.divf %522, %523 : vector<4x128xf32>
    %525 = arith.mulf %516, %457 : vector<4x128xf32>
    %526 = arith.mulf %510, %518 : vector<4x128xf32>
    %527 = arith.addf %525, %526 : vector<4x128xf32>
    %528 = math.tanh %527 : vector<4x128xf32>
    %529 = arith.mulf %524, %528 : vector<4x128xf32>
    %530 = tpu.concatenate %529, %489 in 1 : vector<4x128xf32>, vector<4x128xf32> -> vector<4x256xf32>
    %c0_125 = arith.constant 0 : index
    %c0_126 = arith.constant 0 : index
    %531 = vector.load %arg6[%c0_125, %c0_126] : memref<256x512xf32, #tpu.memory_space<vmem>>, vector<256x512xf32>
    %cst_127 = arith.constant dense<0.000000e+00> : vector<4x512xf32>
    %532 = tpu.matmul %530, %531, %cst_127 {dimension_numbers = #tpu.dot_dimension_numbers<[1], [0], [0], [1], [0, 0, 1, 1], [], []>} : vector<4x256xf32>, vector<256x512xf32>, vector<4x512xf32> -> vector<4x512xf32>
    %533 = vector.broadcast %2 : vector<1x512xf32> to vector<4x512xf32>
    %534 = arith.addf %532, %533 : vector<4x512xf32>
    %535 = vector.extract_strided_slice %534 {offsets = [0, 0], sizes = [4, 128], strides = [1, 1]} : vector<4x512xf32> to vector<4x128xf32>
    %536 = arith.negf %535 : vector<4x128xf32>
    %537 = math.exp %536 : vector<4x128xf32>
    %cst_128 = arith.constant 1.000000e+00 : f32
    %538 = vector.broadcast %cst_128 : f32 to vector<4x128xf32>
    %539 = arith.addf %538, %537 : vector<4x128xf32>
    %540 = arith.divf %538, %539 : vector<4x128xf32>
    %541 = vector.extract_strided_slice %534 {offsets = [0, 128], sizes = [4, 128], strides = [1, 1]} : vector<4x512xf32> to vector<4x128xf32>
    %542 = arith.negf %541 : vector<4x128xf32>
    %543 = math.exp %542 : vector<4x128xf32>
    %cst_129 = arith.constant 1.000000e+00 : f32
    %544 = vector.broadcast %cst_129 : f32 to vector<4x128xf32>
    %545 = arith.addf %544, %543 : vector<4x128xf32>
    %546 = arith.divf %544, %545 : vector<4x128xf32>
    %547 = vector.extract_strided_slice %534 {offsets = [0, 256], sizes = [4, 128], strides = [1, 1]} : vector<4x512xf32> to vector<4x128xf32>
    %548 = math.tanh %547 : vector<4x128xf32>
    %549 = vector.extract_strided_slice %534 {offsets = [0, 384], sizes = [4, 128], strides = [1, 1]} : vector<4x512xf32> to vector<4x128xf32>
    %550 = arith.negf %549 : vector<4x128xf32>
    %551 = math.exp %550 : vector<4x128xf32>
    %cst_130 = arith.constant 1.000000e+00 : f32
    %552 = vector.broadcast %cst_130 : f32 to vector<4x128xf32>
    %553 = arith.addf %552, %551 : vector<4x128xf32>
    %554 = arith.divf %552, %553 : vector<4x128xf32>
    %555 = arith.mulf %546, %487 : vector<4x128xf32>
    %556 = arith.mulf %540, %548 : vector<4x128xf32>
    %557 = arith.addf %555, %556 : vector<4x128xf32>
    %558 = math.tanh %557 : vector<4x128xf32>
    %559 = arith.mulf %554, %558 : vector<4x128xf32>
    %560 = arith.index_cast %c7_i32 : i32 to index
    %c0_131 = arith.constant 0 : index
    %c0_132 = arith.constant 0 : index
    %561 = vector.load %arg11[%560, %c0_131, %c0_132] : memref<8x4x128xf32, #tpu.memory_space<vmem>>, vector<1x4x128xf32>
    %562 = vector.shape_cast %561 : vector<1x4x128xf32> to vector<4x128xf32>
    %563 = vector.shape_cast %559 : vector<4x128xf32> to vector<1x4x128xf32>
    tpu.vector_store %arg11[%560, %c0_131, %c0_132], %563 {strides = array<i32>} : memref<8x4x128xf32, #tpu.memory_space<vmem>>, vector<1x4x128xf32>,
    %c8_i32 = arith.constant 8 : i32
    %c0_133 = arith.constant 0 : index
    %c0_134 = arith.constant 0 : index
    %c0_135 = arith.constant 0 : index
    %564 = vector.load %arg11[%c0_133, %c0_134, %c0_135] : memref<8x4x128xf32, #tpu.memory_space<vmem>>, vector<8x4x128xf32>
    %c0_136 = arith.constant 0 : index
    %c0_137 = arith.constant 0 : index
    %565 = vector.load %arg8[%c0_136, %c0_137] : memref<1x128xf32, #tpu.memory_space<vmem>>, vector<1x128xf32>
    %566 = vector.shape_cast %565 : vector<1x128xf32> to vector<1x1x128xf32>
    %567 = vector.broadcast %566 : vector<1x1x128xf32> to vector<8x4x128xf32>
    %568 = arith.mulf %564, %567 : vector<8x4x128xf32>
    %cst_138 = arith.constant dense<0.000000e+00> : vector<8x4xf32>
    %569 = vector.multi_reduction <add>, %568, %cst_138 [2] : vector<8x4x128xf32> to vector<8x4xf32>
    %c0_139 = arith.constant 0 : index
    %c0_140 = arith.constant 0 : index
    %570 = vector.load %arg9[%c0_139, %c0_140] : memref<1x1xf32, #tpu.memory_space<vmem>>, vector<1x1xf32>
    %571 = vector.broadcast %570 : vector<1x1xf32> to vector<8x4xf32>
    %572 = arith.addf %569, %571 : vector<8x4xf32>
    %573 = tpu.iota {dimensions = array<i32: 0>} : vector<8x4xi32>
    %c0_141 = arith.constant 0 : index
    %c0_142 = arith.constant 0 : index
    %574 = vector.load %arg2[%c0_141, %c0_142] : memref<1x4xi32, #tpu.memory_space<vmem>>, vector<1x4xi32>
    %575 = vector.broadcast %574 : vector<1x4xi32> to vector<8x4xi32>
    %576 = arith.cmpi slt, %573, %575 : vector<8x4xi32>
    %cst_143 = arith.constant 0.000000e+00 : f32
    %577 = vector.broadcast %cst_143 : f32 to vector<8x4xf32>
    %578 = arith.select %576, %572, %577 : vector<8x4xi1>, vector<8x4xf32>
    %c0_144 = arith.constant 0 : index
    %c0_145 = arith.constant 0 : index
    %579 = vector.load %arg10[%c0_144, %c0_145] : memref<8x4xf32, #tpu.memory_space<vmem>>, vector<8x4xf32>
    tpu.vector_store %arg10[%c0_144, %c0_145], %578 {strides = array<i32>} : memref<8x4xf32, #tpu.memory_space<vmem>>, vector<8x4xf32>,
    return
  }
  func.func @transform_0(%arg0: i32) -> (i32, i32, i32) {
    %c0_i32 = arith.constant 0 : i32
    %c0_i32_0 = arith.constant 0 : i32
    %c0_i32_1 = arith.constant 0 : i32
    %c0_i32_2 = arith.constant 0 : i32
    return %c0_i32, %c0_i32_0, %c0_i32_1 : i32, i32, i32
  }
  func.func @transform_1(%arg0: i32) -> (i32, i32) {
    %c0_i32 = arith.constant 0 : i32
    %c0_i32_0 = arith.constant 0 : i32
    %c0_i32_1 = arith.constant 0 : i32
    return %c0_i32, %c0_i32_0 : i32, i32
  }
  func.func @transform_2(%arg0: i32) -> (i32, i32) {
    %c0_i32 = arith.constant 0 : i32
    %c0_i32_0 = arith.constant 0 : i32
    %c0_i32_1 = arith.constant 0 : i32
    return %c0_i32, %c0_i32_0 : i32, i32
  }
  func.func @transform_3(%arg0: i32) -> (i32, i32) {
    %c0_i32 = arith.constant 0 : i32
    %c0_i32_0 = arith.constant 0 : i32
    %c0_i32_1 = arith.constant 0 : i32
    return %c0_i32, %c0_i32_0 : i32, i32
  }
  func.func @transform_4(%arg0: i32) -> (i32, i32) {
    %c0_i32 = arith.constant 0 : i32
    %c0_i32_0 = arith.constant 0 : i32
    %c0_i32_1 = arith.constant 0 : i32
    return %c0_i32, %c0_i32_0 : i32, i32
  }
  func.func @transform_5(%arg0: i32) -> (i32, i32) {
    %c0_i32 = arith.constant 0 : i32
    %c0_i32_0 = arith.constant 0 : i32
    %c0_i32_1 = arith.constant 0 : i32
    return %c0_i32, %c0_i32_0 : i32, i32
  }
  func.func @transform_6(%arg0: i32) -> (i32, i32) {
    %c0_i32 = arith.constant 0 : i32
    %c0_i32_0 = arith.constant 0 : i32
    %c0_i32_1 = arith.constant 0 : i32
    return %c0_i32, %c0_i32_0 : i32, i32
  }
  func.func @transform_7(%arg0: i32) -> (i32, i32) {
    %c0_i32 = arith.constant 0 : i32
    %c0_i32_0 = arith.constant 0 : i32
    %c0_i32_1 = arith.constant 0 : i32
    return %c0_i32, %c0_i32_0 : i32, i32
  }
  func.func @transform_8(%arg0: i32) -> (i32, i32) {
    %c0_i32 = arith.constant 0 : i32
    %c0_i32_0 = arith.constant 0 : i32
    %c0_i32_1 = arith.constant 0 : i32
    return %c0_i32, %c0_i32_0 : i32, i32
  }
  func.func @transform_9(%arg0: i32) -> (i32, i32) {
    %c0_i32 = arith.constant 0 : i32
    %c0_i32_0 = arith.constant 0 : i32
    %c0_i32_1 = arith.constant 0 : i32
    return %c0_i32, %c0_i32_0 : i32, i32
  }
}

</mosaic_0001>

<bundles_post_ra>
// kernel: lstm_forecaster_forward.1
= control target key start
LH: loop header
LB: loop body
LE: loop exit
PB: predicated region body
PF: predicated region fallthrough
CT: control target
= control target key end

     0   :  { %s8471_s0 = inlined_call_operand.vmem [shape: f32[8,4,1], index: 0, kind: input, shape index: {}]   ;;  %s8472_s1 = inlined_call_operand.vmem [shape: s32[1,4], index: 1, kind: input, shape index: {}]   ;;  %s8473_s2 = inlined_call_operand.vmem [shape: f32[1,512], index: 2, kind: input, shape index: {}]   ;;  %s8474_s3 = inlined_call_operand.hbm [shape: f32[128,512], index: 3, kind: input, shape index: {}]   ;;  %s8475_s4 = inlined_call_operand.vmem [shape: f32[1,512], index: 4, kind: input, shape index: {}]   ;;  %s8476_s5 = inlined_call_operand.hbm [shape: f32[256,512], index: 5, kind: input, shape index: {}]   ;;  %s8477_s6 = inlined_call_operand.vmem [shape: f32[1,512], index: 6, kind: input, shape index: {}]   ;;  %s8478_s7 = inlined_call_operand.vmem [shape: f32[1,128], index: 7, kind: input, shape index: {}]   ;;  %s8479_s8 = inlined_call_operand.<no memory space> [shape: f32[1,1], index: 8, kind: input, shape index: {}]   ;;  %s8480_s9 = inlined_call_operand.vmem [shape: f32[8,4], index: 9, kind: output, shape index: {}]  }
   0x1   :  { %v14_v0 = vstv %s8479_s8 }
   0x2   :  { %15 = vst [vmem:[#allocation3] sm:$0x1] %v14_v0 }
   0x3   :  { %16 = vsyncpa [#allocation5], 0 }
   0x4   :  { %17 = vsyncpa [#allocation7], 0  ;;  %s4995_s11 = smov [#allocation4]  }
   0x5   :  { %s29_s12 = sshll.u32 %s4995_s11, 4  ;;  %s30_s12 = int_to_ptr.vmem [resolvable:$true] %s29_s12 }
   0x6   :  { %s4959_s13 = scalar_lea.vmem %s30_s12, 8192  ;;  %p4964_p1 = scmp.lt.s32.totalorder %s30_s12, %s30_s12 }
   0x7   :  { %p4960_p0 = scmp.ne.s32.totalorder %s30_s12, %s4959_s13  ;;  %p4965_p2 = scmp.lt.s32.totalorder %s4959_s13, %s4959_s13 }
   0x9   :  { %p4966_p3 = por %p4965_p2, %p4964_p1 }
   0xb   :  { %p4967_p4 = pnand %p4966_p3, %p4960_p0 }
   0xd   :  { %4970 = shalt.err (!%p4967_p4)
}
   0xe   :  { %s4996_s14 = smov 512   ;;  %s4997_s15 = smov 32  }
   0xf   :  { %35 = dma.hbm_to_vmem [thread:$0]  %s8474_s3, 8192, %s30_s12, [#allocation5], %s4996_s14, %s4996_s14, %s4997_s15  }
  0x10   :  { %s4998_s8 = smov [#allocation6]  }
  0x11   :  { %s43_s18 = sshll.u32 %s4998_s8, 4  ;;  %s44_s18 = int_to_ptr.vmem [resolvable:$true] %s43_s18 }
  0x12   :  { %s4979_s19 = scalar_lea.vmem %s44_s18, 16384  ;;  %p4984_p6 = scmp.lt.s32.totalorder %s44_s18, %s44_s18 }
  0x13   :  { %p4980_p5 = scmp.ne.s32.totalorder %s44_s18, %s4979_s19  ;;  %p4985_p7 = scmp.lt.s32.totalorder %s4979_s19, %s4979_s19 }
  0x15   :  { %p4986_p8 = por %p4985_p7, %p4984_p6 }
  0x17   :  { %p4987_p9 = pnand %p4986_p8, %p4980_p5 }
  0x19   :  { %4990 = shalt.err (!%p4987_p9)
}
  0x1a   :  { %49 = dma.hbm_to_vmem [thread:$0]  %s8476_s5, 16384, %s44_s18, [#allocation7], %s4996_s14, %s4996_s14, %s4997_s15  }
  0x1b   :  { %4991 = dma.done.wait [#allocation5], 8192  }
  0x1c   :  { %4992 = vsyncadd [#allocation5], 4294959104 }
  0x1d   :  { %4993 = dma.done.wait [#allocation7], 16384  }
  0x1e   :  { %4994 = vsyncadd [#allocation7], 4294950912  ;;  %v8481_v1 = vmov 0.0   ;;  %v5000_v2 = vmov 0   ;;  %v5062_v3 = vld [vmem:[#allocation4 + $0x1e8] sm:$0xff]  ;;  %v5064_v4 = vld [vmem:[#allocation4 + $0x1f8] sm:$0xff] }
  0x1f   :  { %224 = vmatprep.mubr.f32.mxu0 %v8481_v1  ;;  %295 = vmatprep.mubr.f32.mxu1 %v8481_v1  ;;  %v5066_v5 = vld [vmem:[#allocation4 + $0x1e0] sm:$0xff]  ;;  %v5070_v6 = vld [vmem:[#allocation4 + $0x1f0] sm:$0xff]  ;;  %v5072_v7 = vld [vmem:[#allocation4 + $0x1c8] sm:$0xff]  ;;  %vm4509_vm0 = vcmask 1043456   ;;  %vm4602_vm1 = vcmask 1041409   ;;  %vm4604_vm2 = vcmask 1042434  }
  0x20   :  { %4690 = vset.pattern.permute.xlu0 %v5000_v2  ;;  %4691 = vset.pattern.permute.xlu1 %v5000_v2  ;;  %v5074_v8 = vld [vmem:[#allocation4 + $0x1d8] sm:$0xff]  ;;  %v5078_v9 = vld [vmem:[#allocation4 + $0x1c0] sm:$0xff]  ;;  %v5080_v10 = vld [vmem:[#allocation4 + $0x1d0] sm:$0xff]  ;;  %vm4606_vm3 = vcmask 1043459   ;;  %vm4608_vm4 = vcmask 1044484   ;;  %vm4610_vm5 = vcmask 1045509  }
  0x21   :  { %160 = vmatprep.subr.mxu0 %v5062_v3  ;;  %231 = vmatprep.subr.mxu1 %v5064_v4  ;;  %v5082_v11 = vld [vmem:[#allocation4 + $0x1a8] sm:$0xff]  ;;  %v5086_v12 = vld [vmem:[#allocation4 + $0x1b8] sm:$0xff]  ;;  %v5088_v13 = vld [vmem:[#allocation4 + $0x1a0] sm:$0xff]  ;;  %vm4612_vm6 = vcmask 1046534   ;;  %vm4614_vm7 = vcmask 1047559   ;;  %vm4618_vm9 = vcmask 31744  }
  0x22   :  { %161 = vmatpush1.msra.mxu0 %v5066_v5  ;;  %232 = vmatpush1.msra.mxu1 %v5070_v6  ;;  %v5090_v14 = vld [vmem:[#allocation4 + $0x1b0] sm:$0xff]  ;;  %v5094_v15 = vld [vmem:[#allocation4 + $0x188] sm:$0xff]  ;;  %v5096_v16 = vld [vmem:[#allocation4 + $0x198] sm:$0xff] }
  0x23   :  { %162 = vmatprep.subr.mxu0 %v5072_v7  ;;  %233 = vmatprep.subr.mxu1 %v5074_v8  ;;  %v5100_v17 = vld [vmem:[#allocation4 + $0x180] sm:$0xff]  ;;  %v5102_v18 = vld [vmem:[#allocation4 + $0x190] sm:$0xff]  ;;  %v5106_v19 = vld [vmem:[#allocation4 + $0x168] sm:$0xff] }
  0x24   :  { %163 = vmatpush1.msra.mxu0 %v5078_v9  ;;  %234 = vmatpush1.msra.mxu1 %v5080_v10  ;;  %v5108_v20 = vld [vmem:[#allocation4 + $0x178] sm:$0xff]  ;;  %v5112_v21 = vld [vmem:[#allocation4 + $0x160] sm:$0xff]  ;;  %v5114_v22 = vld [vmem:[#allocation4 + $0x170] sm:$0xff] }
  0x25   :  { %164 = vmatprep.subr.mxu0 %v5082_v11  ;;  %235 = vmatprep.subr.mxu1 %v5086_v12  ;;  %v5118_v23 = vld [vmem:[#allocation4 + $0x148] sm:$0xff]  ;;  %v5120_v24 = vld [vmem:[#allocation4 + $0x158] sm:$0xff]  ;;  %v5124_v25 = vld [vmem:[#allocation4 + $0x140] sm:$0xff] }
  0x26   :  { %165 = vmatpush1.msra.mxu0 %v5088_v13  ;;  %236 = vmatpush1.msra.mxu1 %v5090_v14  ;;  %v5126_v26 = vld [vmem:[#allocation4 + $0x150] sm:$0xff]  ;;  %v5130_v27 = vld [vmem:[#allocation4 + $0x128] sm:$0xff]  ;;  %v5132_v28 = vld [vmem:[#allocation4 + $0x138] sm:$0xff] }
  0x27   :  { %166 = vmatprep.subr.mxu0 %v5094_v15  ;;  %237 = vmatprep.subr.mxu1 %v5096_v16  ;;  %v5136_v29 = vld [vmem:[#allocation4 + $0x120] sm:$0xff]  ;;  %v5138_v30 = vld [vmem:[#allocation4 + $0x130] sm:$0xff]  ;;  %v5142_v31 = vld [vmem:[#allocation4 + $0x108] sm:$0xff] }
  0x28   :  { %167 = vmatpush1.msra.mxu0 %v5100_v17  ;;  %238 = vmatpush1.msra.mxu1 %v5102_v18  ;;  %v5144_v32 = vld [vmem:[#allocation4 + $0x118] sm:$0xff]  ;;  %v5148_v33 = vld [vmem:[#allocation4 + $0x100] sm:$0xff]  ;;  %v5150_v34 = vld [vmem:[#allocation4 + $0x110] sm:$0xff] }
  0x29   :  { %168 = vmatprep.subr.mxu0 %v5106_v19  ;;  %239 = vmatprep.subr.mxu1 %v5108_v20  ;;  %v5154_v35 = vld [vmem:[#allocation4 + $0xe8] sm:$0xff]  ;;  %v5156_v36 = vld [vmem:[#allocation4 + $0xf8] sm:$0xff]  ;;  %v5160_v37 = vld [vmem:[#allocation4 + $0xe0] sm:$0xff] }
  0x2a   :  { %169 = vmatpush1.msra.mxu0 %v5112_v21  ;;  %240 = vmatpush1.msra.mxu1 %v5114_v22  ;;  %v5162_v38 = vld [vmem:[#allocation4 + $0xf0] sm:$0xff]  ;;  %v5166_v39 = vld [vmem:[#allocation4 + $0xc8] sm:$0xff]  ;;  %v5168_v40 = vld [vmem:[#allocation4 + $0xd8] sm:$0xff] }
  0x2b   :  { %170 = vmatprep.subr.mxu0 %v5118_v23  ;;  %241 = vmatprep.subr.mxu1 %v5120_v24  ;;  %v5172_v41 = vld [vmem:[#allocation4 + $0xc0] sm:$0xff]  ;;  %v5174_v42 = vld [vmem:[#allocation4 + $0xd0] sm:$0xff]  ;;  %v5178_v43 = vld [vmem:[#allocation4 + $0xa8] sm:$0xff] }
  0x2c   :  { %171 = vmatpush1.msra.mxu0 %v5124_v25  ;;  %242 = vmatpush1.msra.mxu1 %v5126_v26  ;;  %v5180_v44 = vld [vmem:[#allocation4 + $0xb8] sm:$0xff]  ;;  %v5184_v45 = vld [vmem:[#allocation4 + $0xa0] sm:$0xff]  ;;  %v5186_v46 = vld [vmem:[#allocation4 + $0xb0] sm:$0xff] }
  0x2d   :  { %172 = vmatprep.subr.mxu0 %v5130_v27  ;;  %243 = vmatprep.subr.mxu1 %v5132_v28  ;;  %v5190_v47 = vld [vmem:[#allocation4 + $0x88] sm:$0xff]  ;;  %v5192_v48 = vld [vmem:[#allocation4 + $0x98] sm:$0xff]  ;;  %v5196_v49 = vld [vmem:[#allocation4 + $0x80] sm:$0xff] }
  0x2e   :  { %173 = vmatpush1.msra.mxu0 %v5136_v29  ;;  %244 = vmatpush1.msra.mxu1 %v5138_v30  ;;  %9133 = vst [vmem:[#allocation10_spill] sm:$0xff] %v5190_v47  ;;  %9134 = vst [vmem:[#allocation11_spill] sm:$0xff] %v5192_v48  ;;  %v5198_v50 = vld [vmem:[#allocation4 + $0x90] sm:$0xff]  ;;  %v5202_v51 = vld [vmem:[#allocation4 + $0x68] sm:$0xff] }
  0x2f   :  { %174 = vmatprep.subr.mxu0 %v5142_v31  ;;  %245 = vmatprep.subr.mxu1 %v5144_v32  ;;  %9135 = vst [vmem:[#allocation12_spill] sm:$0xff] %v5196_v49  ;;  %9136 = vst [vmem:[#allocation13_spill] sm:$0xff] %v5198_v50  ;;  %v5204_v52 = vld [vmem:[#allocation4 + $0x78] sm:$0xff]  ;;  %v5208_v53 = vld [vmem:[#allocation4 + $0x60] sm:$0xff] }
  0x30   :  { %175 = vmatpush1.msra.mxu0 %v5148_v33  ;;  %246 = vmatpush1.msra.mxu1 %v5150_v34  ;;  %9137 = vst [vmem:[#allocation14_spill] sm:$0xff] %v5202_v51  ;;  %9138 = vst [vmem:[#allocation15_spill] sm:$0xff] %v5204_v52  ;;  %v5210_v54 = vld [vmem:[#allocation4 + $0x70] sm:$0xff]  ;;  %v5214_v55 = vld [vmem:[#allocation4 + $0x48] sm:$0xff] }
  0x31   :  { %176 = vmatprep.subr.mxu0 %v5154_v35  ;;  %247 = vmatprep.subr.mxu1 %v5156_v36  ;;  %9139 = vst [vmem:[#allocation16_spill] sm:$0xff] %v5208_v53  ;;  %9140 = vst [vmem:[#allocation17_spill] sm:$0xff] %v5210_v54  ;;  %v5216_v56 = vld [vmem:[#allocation4 + $0x58] sm:$0xff]  ;;  %v5220_v57 = vld [vmem:[#allocation4 + $0x40] sm:$0xff] }
  0x32   :  { %177 = vmatpush1.msra.mxu0 %v5160_v37  ;;  %248 = vmatpush1.msra.mxu1 %v5162_v38  ;;  %9141 = vst [vmem:[#allocation18_spill] sm:$0xff] %v5214_v55  ;;  %9142 = vst [vmem:[#allocation19_spill] sm:$0xff] %v5216_v56  ;;  %v5222_v58 = vld [vmem:[#allocation4 + $0x50] sm:$0xff]  ;;  %v5226_v59 = vld [vmem:[#allocation4 + $0x28] sm:$0xff] }
  0x33   :  { %178 = vmatprep.subr.mxu0 %v5166_v39  ;;  %249 = vmatprep.subr.mxu1 %v5168_v40  ;;  %9143 = vst [vmem:[#allocation20_spill] sm:$0xff] %v5220_v57  ;;  %9144 = vst [vmem:[#allocation21_spill] sm:$0xff] %v5222_v58  ;;  %v5228_v60 = vld [vmem:[#allocation4 + $0x38] sm:$0xff]  ;;  %v5232_v61 = vld [vmem:[#allocation4 + $0x20] sm:$0xff] }
  0x34   :  { %179 = vmatpush1.msra.mxu0 %v5172_v41  ;;  %250 = vmatpush1.msra.mxu1 %v5174_v42  ;;  %9145 = vst [vmem:[#allocation22_spill] sm:$0xff] %v5226_v59  ;;  %9146 = vst [vmem:[#allocation23_spill] sm:$0xff] %v5228_v60  ;;  %v5234_v62 = vld [vmem:[#allocation4 + $0x30] sm:$0xff]  ;;  %v5238_v63 = vld [vmem:[#allocation4 + $0x8] sm:$0xff] }
  0x35   :  { %180 = vmatprep.subr.mxu0 %v5178_v43  ;;  %251 = vmatprep.subr.mxu1 %v5180_v44  ;;  %9147 = vst [vmem:[#allocation24_spill] sm:$0xff] %v5232_v61  ;;  %9148 = vst [vmem:[#allocation25_spill] sm:$0xff] %v5234_v62  ;;  %v5240_v0 = vld [vmem:[#allocation4 + $0x18] sm:$0xff]  ;;  %v5244_v2 = vld [vmem:[#allocation4] sm:$0xff] }
  0x36   :  { %181 = vmatpush1.msra.mxu0 %v5184_v45  ;;  %252 = vmatpush1.msra.mxu1 %v5186_v46  ;;  %9149 = vst [vmem:[#allocation26_spill] sm:$0xff] %v5238_v63  ;;  %9150 = vst [vmem:[#allocation27_spill] sm:$0xff] %v5240_v0  ;;  %v5246_v1 = vld [vmem:[#allocation4 + $0x10] sm:$0xff] }
  0x37   :  { %182 = vmatprep.subr.mxu0 %v5190_v47  ;;  %253 = vmatprep.subr.mxu1 %v5192_v48  ;;  %9151 = vst [vmem:[#allocation28_spill] sm:$0xff] %v5244_v2  ;;  %9152 = vst [vmem:[#allocation29_spill] sm:$0xff] %v5246_v1 }
  0x38   :  { %183 = vmatpush1.msra.mxu0 %v5196_v49  ;;  %254 = vmatpush1.msra.mxu1 %v5198_v50 }
  0x39   :  { %184 = vmatprep.subr.mxu0 %v5202_v51  ;;  %255 = vmatprep.subr.mxu1 %v5204_v52 }
  0x3a   :  { %185 = vmatpush1.msra.mxu0 %v5208_v53  ;;  %256 = vmatpush1.msra.mxu1 %v5210_v54 }
  0x3b   :  { %186 = vmatprep.subr.mxu0 %v5214_v55  ;;  %257 = vmatprep.subr.mxu1 %v5216_v56  ;;  %v5608_v56 = vld [vmem:[#allocation6 + $0x260] sm:$0xff] }
  0x3c   :  { %187 = vmatpush1.msra.mxu0 %v5220_v57  ;;  %258 = vmatpush1.msra.mxu1 %v5222_v58  ;;  %v65_v58 = vld [vmem:[%s8471_s0] sm:$0xf]  ;;  %v5284_v57 = vld [vmem:[#allocation6 + $0x1a8] sm:$0xff]  ;;  %9268 = vst [vmem:[#allocation144_spill] sm:$0xff] %v5608_v56 }
  0x3d   :  { %188 = vmatprep.subr.mxu0 %v5226_v59  ;;  %259 = vmatprep.subr.mxu1 %v5228_v60  ;;  %v9153_v60 = vmov 0.0   ;;  %v5259_v59 = vld [vmem:[#allocation6 + $0x1e8] sm:$0xff]  ;;  %9162 = vst [vmem:[#allocation38_spill] sm:$0xff] %v5284_v57 }
  0x3e   :  { %189 = vmatpush1.msra.mxu0 %v5232_v61  ;;  %260 = vmatpush1.msra.mxu1 %v5234_v62  ;;  %9154 = vst [vmem:[#allocation30_spill] sm:$0xff] %v5259_v59  ;;  %v5261_v61 = vld [vmem:[#allocation6 + $0x1f8] sm:$0xff]  ;;  %v5263_v62 = vld [vmem:[#allocation6 + $0x1e0] sm:$0xff] }
  0x3f   :  { %190 = vmatprep.subr.mxu0 %v5238_v63  ;;  %261 = vmatprep.subr.mxu1 %v5240_v0  ;;  %9155 = vst [vmem:[#allocation31_spill] sm:$0xff] %v5261_v61  ;;  %9156 = vst [vmem:[#allocation32_spill] sm:$0xff] %v5263_v62  ;;  %v5266_v0 = vld [vmem:[#allocation6 + $0x1f0] sm:$0xff]  ;;  %v5268_v63 = vld [vmem:[#allocation6 + $0x1c8] sm:$0xff] }
  0x40   :  { %191 = vmatpush1.msra.mxu0 %v5244_v2  ;;  %262 = vmatpush1.msra.mxu1 %v5246_v1  ;;  %9157 = vst [vmem:[#allocation33_spill] sm:$0xff] %v5266_v0  ;;  %9158 = vst [vmem:[#allocation34_spill] sm:$0xff] %v5268_v63  ;;  %v5270_v2 = vld [vmem:[#allocation6 + $0x1d8] sm:$0xff]  ;;  %v4632_v1 = vld [vmem:[%s8471_s0 + $0x4] sm:$0xf] }
  0x41   :  { %225 = vmatmul.mubr.f32.vlgmr.msra.gmra.mxu0 %v9153_v60  ;;  %296 = vmatmul.mubr.f32.vlgmr.msra.gmra.mxu1 %v9153_v60  ;;  %9159 = vst [vmem:[#allocation35_spill] sm:$0xff] %v5270_v2 }
  0x42   :  { %68 = vperm.xlu0 %4690, %v65_v58   ;;  %504 = vmatprep.subr.mxu0 %v5259_v59  ;;  %v5280_v58 = vld [vmem:[#allocation6 + $0x1c0] sm:$0xff]  ;;  %v5282_v59 = vld [vmem:[#allocation6 + $0x1d0] sm:$0xff] }
  0x43   :  { %575 = vmatprep.subr.mxu1 %v5261_v61  ;;  %505 = vmatpush1.msra.mxu0 %v5263_v62  ;;  %9160 = vst [vmem:[#allocation36_spill] sm:$0xff] %v5280_v58  ;;  %9161 = vst [vmem:[#allocation37_spill] sm:$0xff] %v5282_v59  ;;  %v5288_v61 = vld [vmem:[#allocation6 + $0x1b8] sm:$0xff]  ;;  %v5290_v62 = vld [vmem:[#allocation6 + $0x1a0] sm:$0xff] }
  0x44   :  { %576 = vmatpush1.msra.mxu1 %v5266_v0  ;;  %506 = vmatprep.subr.mxu0 %v5268_v63  ;;  %9163 = vst [vmem:[#allocation39_spill] sm:$0xff] %v5288_v61  ;;  %9164 = vst [vmem:[#allocation40_spill] sm:$0xff] %v5290_v62  ;;  %v5292_v0 = vld [vmem:[#allocation6 + $0x1b0] sm:$0xff]  ;;  %v5308_v63 = vld [vmem:[#allocation6 + $0x198] sm:$0xff] }
  0x45   :  { %577 = vmatprep.subr.mxu1 %v5270_v2  ;;  %568 = vmatprep.mubr.f32.mxu0 %v9153_v60  ;;  %9165 = vst [vmem:[#allocation41_spill] sm:$0xff] %v5292_v0  ;;  %v4653_v2 = vld [vmem:[%s8471_s0 + $0x10] sm:$0xf]  ;;  %9167 = vst [vmem:[#allocation43_spill] sm:$0xff] %v5308_v63 }
  0x46   :  { %675 = vperm.xlu0 %4690, %v4632_v1   ;;  %507 = vmatpush1.msra.mxu0 %v5280_v58  ;;  %v4667_v1 = vld [vmem:[%s8471_s0 + $0x18] sm:$0xf]  ;;  %v5306_v58 = vld [vmem:[#allocation6 + $0x188] sm:$0xff] }
  0x47   :  { %578 = vmatpush1.msra.mxu1 %v5282_v59  ;;  %508 = vmatprep.subr.mxu0 %v5284_v57  ;;  %9166 = vst [vmem:[#allocation42_spill] sm:$0xff] %v5306_v58  ;;  %v5576_v57 = vld [vmem:[#allocation6 + $0x2d0] sm:$0xff]  ;;  %v5584_v59 = vld [vmem:[#allocation6 + $0x2a0] sm:$0xff] }
  0x48   :  { %579 = vmatprep.subr.mxu1 %v5288_v61  ;;  %509 = vmatpush1.msra.mxu0 %v5290_v62  ;;  %v5312_v61 = vld [vmem:[#allocation6 + $0x180] sm:$0xff]  ;;  %v5314_v62 = vld [vmem:[#allocation6 + $0x190] sm:$0xff]  ;;  %9257 = vst [vmem:[#allocation133_spill] sm:$0xff] %v5576_v57  ;;  %9260 = vst [vmem:[#allocation136_spill] sm:$0xff] %v5584_v59 }
  0x49   :  { %580 = vmatpush1.msra.mxu1 %v5292_v0  ;;  %639 = vmatprep.mubr.f32.mxu1 %v9153_v60  ;;  %9168 = vst [vmem:[#allocation44_spill] sm:$0xff] %v5312_v61  ;;  %9169 = vst [vmem:[#allocation45_spill] sm:$0xff] %v5314_v62  ;;  %v5320_v0 = vld [vmem:[#allocation6 + $0x178] sm:$0xff] }
  0x4a   :  { %2310 = vperm.xlu0 %4690, %v4653_v2   ;;  %510 = vmatprep.subr.mxu0 %v5306_v58  ;;  %v5318_v2 = vld [vmem:[#allocation6 + $0x168] sm:$0xff]  ;;  %9171 = vst [vmem:[#allocation47_spill] sm:$0xff] %v5320_v0  ;;  %v5326_v58 = vld [vmem:[#allocation6 + $0x170] sm:$0xff]  ;;  %v5592_v60 = vld [vmem:[#allocation6 + $0x298] sm:$0xff] }
  0x4b   :  { %581 = vmatprep.subr.mxu1 %v5308_v63  ;;  %511 = vmatpush1.msra.mxu0 %v5312_v61  ;;  %9170 = vst [vmem:[#allocation46_spill] sm:$0xff] %v5318_v2  ;;  %9173 = vst [vmem:[#allocation49_spill] sm:$0xff] %v5326_v58  ;;  %v5330_v63 = vld [vmem:[#allocation6 + $0x148] sm:$0xff]  ;;  %v5332_v61 = vld [vmem:[#allocation6 + $0x158] sm:$0xff] }
  0x4c   :  { %582 = vmatpush1.msra.mxu1 %v5314_v62  ;;  %512 = vmatprep.subr.mxu0 %v5318_v2  ;;  %9174 = vst [vmem:[#allocation50_spill] sm:$0xff] %v5330_v63  ;;  %9175 = vst [vmem:[#allocation51_spill] sm:$0xff] %v5332_v61  ;;  %v5336_v62 = vld [vmem:[#allocation6 + $0x140] sm:$0xff]  ;;  %v5338_v2 = vld [vmem:[#allocation6 + $0x150] sm:$0xff] }
  0x4d   :  { %583 = vmatprep.subr.mxu1 %v5320_v0  ;;  %9176 = vst [vmem:[#allocation52_spill] sm:$0xff] %v5336_v62  ;;  %9177 = vst [vmem:[#allocation53_spill] sm:$0xff] %v5338_v2  ;;  %v5342_v0 = vld [vmem:[#allocation6 + $0x128] sm:$0xff] }
  0x4e   :  { %3400 = vperm.xlu0 %4690, %v4667_v1   ;;  %v5324_v1 = vld [vmem:[#allocation6 + $0x160] sm:$0xff]  ;;  %584 = vmatpush1.msra.mxu1 %v5326_v58  ;;  %9178 = vst [vmem:[#allocation54_spill] sm:$0xff] %v5342_v0  ;;  %9263 = vst [vmem:[#allocation139_spill] sm:$0xff] %v5592_v60 }
  0x4f   :  { %9172 = vst [vmem:[#allocation48_spill] sm:$0xff] %v5324_v1  ;;  %513 = vmatpush1.msra.mxu0 %v5324_v1  ;;  %585 = vmatprep.subr.mxu1 %v5332_v61  ;;  %v5344_v1 = vld [vmem:[#allocation6 + $0x138] sm:$0xff]  ;;  %v5348_v58 = vld [vmem:[#allocation6 + $0x120] sm:$0xff]  ;;  %v5354_v61 = vld [vmem:[#allocation6 + $0x108] sm:$0xff] }
  0x50   :  { %514 = vmatprep.subr.mxu0 %v5330_v63  ;;  %586 = vmatpush1.msra.mxu1 %v5338_v2  ;;  %9179 = vst [vmem:[#allocation55_spill] sm:$0xff] %v5344_v1  ;;  %9180 = vst [vmem:[#allocation56_spill] sm:$0xff] %v5348_v58  ;;  %v5350_v63 = vld [vmem:[#allocation6 + $0x130] sm:$0xff]  ;;  %v5360_v2 = vld [vmem:[#allocation6 + $0x100] sm:$0xff] }
  0x51   :  { %515 = vmatpush1.msra.mxu0 %v5336_v62  ;;  %587 = vmatprep.subr.mxu1 %v5344_v1  ;;  %9181 = vst [vmem:[#allocation57_spill] sm:$0xff] %v5350_v63  ;;  %9182 = vst [vmem:[#allocation58_spill] sm:$0xff] %v5354_v61  ;;  %v5356_v62 = vld [vmem:[#allocation6 + $0x118] sm:$0xff]  ;;  %v5366_v1 = vld [vmem:[#allocation6 + $0xe8] sm:$0xff] }
  0x52   :  { %516 = vmatprep.subr.mxu0 %v5342_v0  ;;  %588 = vmatpush1.msra.mxu1 %v5350_v63  ;;  %9183 = vst [vmem:[#allocation59_spill] sm:$0xff] %v5356_v62  ;;  %9184 = vst [vmem:[#allocation60_spill] sm:$0xff] %v5360_v2  ;;  %v5362_v0 = vld [vmem:[#allocation6 + $0x110] sm:$0xff]  ;;  %v5372_v63 = vld [vmem:[#allocation6 + $0xe0] sm:$0xff] }
  0x53   :  { %517 = vmatpush1.msra.mxu0 %v5348_v58  ;;  %589 = vmatprep.subr.mxu1 %v5356_v62  ;;  %9185 = vst [vmem:[#allocation61_spill] sm:$0xff] %v5362_v0  ;;  %9186 = vst [vmem:[#allocation62_spill] sm:$0xff] %v5366_v1  ;;  %v5368_v58 = vld [vmem:[#allocation6 + $0xf8] sm:$0xff]  ;;  %v5378_v62 = vld [vmem:[#allocation6 + $0xc8] sm:$0xff] }
  0x54   :  { %518 = vmatprep.subr.mxu0 %v5354_v61  ;;  %590 = vmatpush1.msra.mxu1 %v5362_v0  ;;  %9187 = vst [vmem:[#allocation63_spill] sm:$0xff] %v5368_v58  ;;  %9188 = vst [vmem:[#allocation64_spill] sm:$0xff] %v5372_v63  ;;  %v5374_v61 = vld [vmem:[#allocation6 + $0xf0] sm:$0xff]  ;;  %v5384_v0 = vld [vmem:[#allocation6 + $0xc0] sm:$0xff] }
  0x55   :  { %519 = vmatpush1.msra.mxu0 %v5360_v2  ;;  %591 = vmatprep.subr.mxu1 %v5368_v58  ;;  %9189 = vst [vmem:[#allocation65_spill] sm:$0xff] %v5374_v61  ;;  %9190 = vst [vmem:[#allocation66_spill] sm:$0xff] %v5378_v62  ;;  %v5380_v2 = vld [vmem:[#allocation6 + $0xd8] sm:$0xff]  ;;  %v5390_v58 = vld [vmem:[#allocation6 + $0xa8] sm:$0xff] }
  0x56   :  { %520 = vmatprep.subr.mxu0 %v5366_v1  ;;  %592 = vmatpush1.msra.mxu1 %v5374_v61  ;;  %9191 = vst [vmem:[#allocation67_spill] sm:$0xff] %v5380_v2  ;;  %9192 = vst [vmem:[#allocation68_spill] sm:$0xff] %v5384_v0  ;;  %v5386_v1 = vld [vmem:[#allocation6 + $0xd0] sm:$0xff]  ;;  %v5396_v61 = vld [vmem:[#allocation6 + $0xa0] sm:$0xff] }
  0x57   :  { %521 = vmatpush1.msra.mxu0 %v5372_v63  ;;  %593 = vmatprep.subr.mxu1 %v5380_v2  ;;  %9193 = vst [vmem:[#allocation69_spill] sm:$0xff] %v5386_v1  ;;  %9194 = vst [vmem:[#allocation70_spill] sm:$0xff] %v5390_v58  ;;  %v5392_v63 = vld [vmem:[#allocation6 + $0xb8] sm:$0xff]  ;;  %v5402_v2 = vld [vmem:[#allocation6 + $0x88] sm:$0xff] }
  0x58   :  { %522 = vmatprep.subr.mxu0 %v5378_v62  ;;  %594 = vmatpush1.msra.mxu1 %v5386_v1  ;;  %9195 = vst [vmem:[#allocation71_spill] sm:$0xff] %v5392_v63  ;;  %9196 = vst [vmem:[#allocation72_spill] sm:$0xff] %v5396_v61  ;;  %v5398_v62 = vld [vmem:[#allocation6 + $0xb0] sm:$0xff]  ;;  %v5408_v1 = vld [vmem:[#allocation6 + $0x80] sm:$0xff] }
  0x59   :  { %523 = vmatpush1.msra.mxu0 %v5384_v0  ;;  %595 = vmatprep.subr.mxu1 %v5392_v63  ;;  %9197 = vst [vmem:[#allocation73_spill] sm:$0xff] %v5398_v62  ;;  %9198 = vst [vmem:[#allocation74_spill] sm:$0xff] %v5402_v2  ;;  %v5404_v0 = vld [vmem:[#allocation6 + $0x98] sm:$0xff]  ;;  %v5414_v63 = vld [vmem:[#allocation6 + $0x68] sm:$0xff] }
  0x5a   :  { %524 = vmatprep.subr.mxu0 %v5390_v58  ;;  %596 = vmatpush1.msra.mxu1 %v5398_v62  ;;  %9199 = vst [vmem:[#allocation75_spill] sm:$0xff] %v5404_v0  ;;  %9200 = vst [vmem:[#allocation76_spill] sm:$0xff] %v5408_v1  ;;  %v5410_v58 = vld [vmem:[#allocation6 + $0x90] sm:$0xff]  ;;  %v5420_v62 = vld [vmem:[#allocation6 + $0x60] sm:$0xff] }
  0x5b   :  { %525 = vmatpush1.msra.mxu0 %v5396_v61  ;;  %597 = vmatprep.subr.mxu1 %v5404_v0  ;;  %9201 = vst [vmem:[#allocation77_spill] sm:$0xff] %v5410_v58  ;;  %9202 = vst [vmem:[#allocation78_spill] sm:$0xff] %v5414_v63  ;;  %v5416_v61 = vld [vmem:[#allocation6 + $0x78] sm:$0xff]  ;;  %v5426_v0 = vld [vmem:[#allocation6 + $0x48] sm:$0xff] }
  0x5c   :  { %526 = vmatprep.subr.mxu0 %v5402_v2  ;;  %598 = vmatpush1.msra.mxu1 %v5410_v58  ;;  %9203 = vst [vmem:[#allocation79_spill] sm:$0xff] %v5416_v61  ;;  %9204 = vst [vmem:[#allocation80_spill] sm:$0xff] %v5420_v62  ;;  %v5422_v2 = vld [vmem:[#allocation6 + $0x70] sm:$0xff]  ;;  %v5432_v58 = vld [vmem:[#allocation6 + $0x40] sm:$0xff] }
  0x5d   :  { %527 = vmatpush1.msra.mxu0 %v5408_v1  ;;  %599 = vmatprep.subr.mxu1 %v5416_v61  ;;  %9205 = vst [vmem:[#allocation81_spill] sm:$0xff] %v5422_v2  ;;  %9206 = vst [vmem:[#allocation82_spill] sm:$0xff] %v5426_v0  ;;  %v5428_v1 = vld [vmem:[#allocation6 + $0x58] sm:$0xff]  ;;  %v5438_v61 = vld [vmem:[#allocation6 + $0x28] sm:$0xff] }
  0x5e   :  { %528 = vmatprep.subr.mxu0 %v5414_v63  ;;  %600 = vmatpush1.msra.mxu1 %v5422_v2  ;;  %9207 = vst [vmem:[#allocation83_spill] sm:$0xff] %v5428_v1  ;;  %9208 = vst [vmem:[#allocation84_spill] sm:$0xff] %v5432_v58  ;;  %v5434_v63 = vld [vmem:[#allocation6 + $0x50] sm:$0xff]  ;;  %v5444_v2 = vld [vmem:[#allocation6 + $0x20] sm:$0xff] }
  0x5f   :  { %529 = vmatpush1.msra.mxu0 %v5420_v62  ;;  %601 = vmatprep.subr.mxu1 %v5428_v1  ;;  %9209 = vst [vmem:[#allocation85_spill] sm:$0xff] %v5434_v63  ;;  %9210 = vst [vmem:[#allocation86_spill] sm:$0xff] %v5438_v61  ;;  %v5440_v62 = vld [vmem:[#allocation6 + $0x38] sm:$0xff]  ;;  %v5450_v1 = vld [vmem:[#allocation6 + $0x8] sm:$0xff] }
  0x60   :  { %530 = vmatprep.subr.mxu0 %v5426_v0  ;;  %602 = vmatpush1.msra.mxu1 %v5434_v63  ;;  %9211 = vst [vmem:[#allocation87_spill] sm:$0xff] %v5440_v62  ;;  %9212 = vst [vmem:[#allocation88_spill] sm:$0xff] %v5444_v2  ;;  %v5446_v0 = vld [vmem:[#allocation6 + $0x30] sm:$0xff]  ;;  %v5456_v63 = vld [vmem:[#allocation6] sm:$0xff] }
  0x61   :  { %531 = vmatpush1.msra.mxu0 %v5432_v58  ;;  %603 = vmatprep.subr.mxu1 %v5440_v62  ;;  %9213 = vst [vmem:[#allocation89_spill] sm:$0xff] %v5446_v0  ;;  %9214 = vst [vmem:[#allocation90_spill] sm:$0xff] %v5450_v1  ;;  %v5452_v58 = vld [vmem:[#allocation6 + $0x18] sm:$0xff]  ;;  %v5462_v62 = vld [vmem:[#allocation6 + $0x3e8] sm:$0xff] }
  0x62   :  { %532 = vmatprep.subr.mxu0 %v5438_v61  ;;  %604 = vmatpush1.msra.mxu1 %v5446_v0  ;;  %9215 = vst [vmem:[#allocation91_spill] sm:$0xff] %v5452_v58  ;;  %9216 = vst [vmem:[#allocation92_spill] sm:$0xff] %v5456_v63  ;;  %v5458_v61 = vld [vmem:[#allocation6 + $0x10] sm:$0xff]  ;;  %v5468_v0 = vld [vmem:[#allocation6 + $0x3e0] sm:$0xff] }
  0x63   :  { %533 = vmatpush1.msra.mxu0 %v5444_v2  ;;  %605 = vmatprep.subr.mxu1 %v5452_v58  ;;  %9217 = vst [vmem:[#allocation93_spill] sm:$0xff] %v5458_v61  ;;  %9218 = vst [vmem:[#allocation94_spill] sm:$0xff] %v5462_v62  ;;  %v5464_v2 = vld [vmem:[#allocation6 + $0x3f8] sm:$0xff]  ;;  %v5474_v58 = vld [vmem:[#allocation6 + $0x3c8] sm:$0xff] }
  0x64   :  { %534 = vmatprep.subr.mxu0 %v5450_v1  ;;  %606 = vmatpush1.msra.mxu1 %v5458_v61  ;;  %9219 = vst [vmem:[#allocation95_spill] sm:$0xff] %v5464_v2  ;;  %9220 = vst [vmem:[#allocation96_spill] sm:$0xff] %v5468_v0  ;;  %v5470_v1 = vld [vmem:[#allocation6 + $0x3f0] sm:$0xff]  ;;  %v5480_v61 = vld [vmem:[#allocation6 + $0x3c0] sm:$0xff] }
  0x65   :  { %535 = vmatpush1.msra.mxu0 %v5456_v63  ;;  %607 = vmatprep.subr.mxu1 %v5464_v2  ;;  %9221 = vst [vmem:[#allocation97_spill] sm:$0xff] %v5470_v1  ;;  %9222 = vst [vmem:[#allocation98_spill] sm:$0xff] %v5474_v58  ;;  %v5476_v63 = vld [vmem:[#allocation6 + $0x3d8] sm:$0xff]  ;;  %v5486_v2 = vld [vmem:[#allocation6 + $0x3a8] sm:$0xff] }
  0x66   :  { %536 = vmatprep.subr.mxu0 %v5462_v62  ;;  %608 = vmatpush2.msra.mxu1 %v5470_v1  ;;  %9223 = vst [vmem:[#allocation99_spill] sm:$0xff] %v5476_v63  ;;  %9224 = vst [vmem:[#allocation100_spill] sm:$0xff] %v5480_v61  ;;  %v5482_v62 = vld [vmem:[#allocation6 + $0x3d0] sm:$0xff]  ;;  %v5492_v1 = vld [vmem:[#allocation6 + $0x3a0] sm:$0xff] }
  0x67   :  { %537 = vmatpush2.msra.mxu0 %v5468_v0  ;;  %609 = vmatprep.subr.mxu1 %v5476_v63  ;;  %9225 = vst [vmem:[#allocation101_spill] sm:$0xff] %v5482_v62  ;;  %9226 = vst [vmem:[#allocation102_spill] sm:$0xff] %v5486_v2  ;;  %v5488_v0 = vld [vmem:[#allocation6 + $0x3b8] sm:$0xff]  ;;  %v5498_v63 = vld [vmem:[#allocation6 + $0x388] sm:$0xff] }
  0x68   :  { %538 = vmatprep.subr.mxu0 %v5474_v58  ;;  %610 = vmatpush2.msra.mxu1 %v5482_v62  ;;  %9227 = vst [vmem:[#allocation103_spill] sm:$0xff] %v5488_v0  ;;  %9228 = vst [vmem:[#allocation104_spill] sm:$0xff] %v5492_v1  ;;  %v5494_v58 = vld [vmem:[#allocation6 + $0x3b0] sm:$0xff]  ;;  %v5504_v62 = vld [vmem:[#allocation6 + $0x380] sm:$0xff] }
  0x69   :  { %539 = vmatpush2.msra.mxu0 %v5480_v61  ;;  %611 = vmatprep.subr.mxu1 %v5488_v0  ;;  %9229 = vst [vmem:[#allocation105_spill] sm:$0xff] %v5494_v58  ;;  %9230 = vst [vmem:[#allocation106_spill] sm:$0xff] %v5498_v63  ;;  %v5500_v61 = vld [vmem:[#allocation6 + $0x398] sm:$0xff]  ;;  %v5510_v0 = vld [vmem:[#allocation6 + $0x368] sm:$0xff] }
  0x6a   :  { %540 = vmatprep.subr.mxu0 %v5486_v2  ;;  %612 = vmatpush2.msra.mxu1 %v5494_v58  ;;  %9231 = vst [vmem:[#allocation107_spill] sm:$0xff] %v5500_v61  ;;  %9232 = vst [vmem:[#allocation108_spill] sm:$0xff] %v5504_v62  ;;  %v5506_v2 = vld [vmem:[#allocation6 + $0x390] sm:$0xff]  ;;  %v5516_v58 = vld [vmem:[#allocation6 + $0x360] sm:$0xff] }
  0x6b   :  { %541 = vmatpush2.msra.mxu0 %v5492_v1  ;;  %613 = vmatprep.subr.mxu1 %v5500_v61  ;;  %9233 = vst [vmem:[#allocation109_spill] sm:$0xff] %v5506_v2  ;;  %9234 = vst [vmem:[#allocation110_spill] sm:$0xff] %v5510_v0  ;;  %v5512_v1 = vld [vmem:[#allocation6 + $0x378] sm:$0xff]  ;;  %v5522_v61 = vld [vmem:[#allocation6 + $0x348] sm:$0xff] }
  0x6c   :  { %542 = vmatprep.subr.mxu0 %v5498_v63  ;;  %614 = vmatpush2.msra.mxu1 %v5506_v2  ;;  %9235 = vst [vmem:[#allocation111_spill] sm:$0xff] %v5512_v1  ;;  %9236 = vst [vmem:[#allocation112_spill] sm:$0xff] %v5516_v58  ;;  %v5518_v63 = vld [vmem:[#allocation6 + $0x370] sm:$0xff]  ;;  %v5528_v2 = vld [vmem:[#allocation6 + $0x340] sm:$0xff] }
  0x6d   :  { %543 = vmatpush2.msra.mxu0 %v5504_v62  ;;  %615 = vmatprep.subr.mxu1 %v5512_v1  ;;  %9237 = vst [vmem:[#allocation113_spill] sm:$0xff] %v5518_v63  ;;  %9238 = vst [vmem:[#allocation114_spill] sm:$0xff] %v5522_v61  ;;  %v5524_v62 = vld [vmem:[#allocation6 + $0x358] sm:$0xff]  ;;  %v5534_v1 = vld [vmem:[#allocation6 + $0x328] sm:$0xff] }
  0x6e   :  { %544 = vmatprep.subr.mxu0 %v5510_v0  ;;  %616 = vmatpush2.msra.mxu1 %v5518_v63  ;;  %9239 = vst [vmem:[#allocation115_spill] sm:$0xff] %v5524_v62  ;;  %9240 = vst [vmem:[#allocation116_spill] sm:$0xff] %v5528_v2  ;;  %v5530_v0 = vld [vmem:[#allocation6 + $0x350] sm:$0xff]  ;;  %v5540_v63 = vld [vmem:[#allocation6 + $0x320] sm:$0xff] }
  0x6f   :  { %545 = vmatpush2.msra.mxu0 %v5516_v58  ;;  %617 = vmatprep.subr.mxu1 %v5524_v62  ;;  %9241 = vst [vmem:[#allocation117_spill] sm:$0xff] %v5530_v0  ;;  %9242 = vst [vmem:[#allocation118_spill] sm:$0xff] %v5534_v1  ;;  %v5536_v58 = vld [vmem:[#allocation6 + $0x338] sm:$0xff]  ;;  %v5546_v62 = vld [vmem:[#allocation6 + $0x308] sm:$0xff] }
  0x70   :  { %546 = vmatprep.subr.mxu0 %v5522_v61  ;;  %618 = vmatpush2.msra.mxu1 %v5530_v0  ;;  %9243 = vst [vmem:[#allocation119_spill] sm:$0xff] %v5536_v58  ;;  %9244 = vst [vmem:[#allocation120_spill] sm:$0xff] %v5540_v63  ;;  %v5542_v61 = vld [vmem:[#allocation6 + $0x330] sm:$0xff]  ;;  %v5552_v0 = vld [vmem:[#allocation6 + $0x300] sm:$0xff] }
  0x71   :  { %547 = vmatpush2.msra.mxu0 %v5528_v2  ;;  %619 = vmatprep.subr.mxu1 %v5536_v58  ;;  %9245 = vst [vmem:[#allocation121_spill] sm:$0xff] %v5542_v61  ;;  %9246 = vst [vmem:[#allocation122_spill] sm:$0xff] %v5546_v62  ;;  %v5548_v2 = vld [vmem:[#allocation6 + $0x318] sm:$0xff]  ;;  %v5558_v58 = vld [vmem:[#allocation6 + $0x2e8] sm:$0xff] }
  0x72   :  { %548 = vmatprep.subr.mxu0 %v5534_v1  ;;  %620 = vmatpush2.msra.mxu1 %v5542_v61  ;;  %9247 = vst [vmem:[#allocation123_spill] sm:$0xff] %v5548_v2  ;;  %9248 = vst [vmem:[#allocation124_spill] sm:$0xff] %v5552_v0  ;;  %v5554_v1 = vld [vmem:[#allocation6 + $0x310] sm:$0xff]  ;;  %v5564_v61 = vld [vmem:[#allocation6 + $0x2e0] sm:$0xff] }
  0x73   :  { %549 = vmatpush2.msra.mxu0 %v5540_v63  ;;  %621 = vmatprep.subr.mxu1 %v5548_v2  ;;  %9249 = vst [vmem:[#allocation125_spill] sm:$0xff] %v5554_v1  ;;  %9250 = vst [vmem:[#allocation126_spill] sm:$0xff] %v5558_v58  ;;  %v5560_v63 = vld [vmem:[#allocation6 + $0x2f8] sm:$0xff]  ;;  %v5568_v2 = vld [vmem:[#allocation6 + $0x2c8] sm:$0xff] }
  0x74   :  { %550 = vmatprep.subr.mxu0 %v5546_v62  ;;  %622 = vmatpush2.msra.mxu1 %v5554_v1  ;;  %9251 = vst [vmem:[#allocation127_spill] sm:$0xff] %v5560_v63  ;;  %9252 = vst [vmem:[#allocation128_spill] sm:$0xff] %v5564_v61  ;;  %v5566_v62 = vld [vmem:[#allocation6 + $0x2f0] sm:$0xff]  ;;  %v5574_v1 = vld [vmem:[#allocation6 + $0x2c0] sm:$0xff] }
  0x75   :  { %551 = vmatpush2.msra.mxu0 %v5552_v0  ;;  %623 = vmatprep.subr.mxu1 %v5560_v63  ;;  %9253 = vst [vmem:[#allocation129_spill] sm:$0xff] %v5566_v62  ;;  %9254 = vst [vmem:[#allocation130_spill] sm:$0xff] %v5568_v2  ;;  %v5572_v0 = vld [vmem:[#allocation6 + $0x2d8] sm:$0xff]  ;;  %v5580_v63 = vld [vmem:[#allocation6 + $0x2a8] sm:$0xff] }
  0x76   :  { %552 = vmatprep.subr.mxu0 %v5558_v58  ;;  %624 = vmatpush2.msra.mxu1 %v5566_v62  ;;  %9255 = vst [vmem:[#allocation131_spill] sm:$0xff] %v5572_v0  ;;  %9256 = vst [vmem:[#allocation132_spill] sm:$0xff] %v5574_v1  ;;  %v5582_v58 = vld [vmem:[#allocation6 + $0x2b8] sm:$0xff]  ;;  %v5588_v62 = vld [vmem:[#allocation6 + $0x2b0] sm:$0xff] }
  0x77   :  { %553 = vmatpush2.msra.mxu0 %v5564_v61  ;;  %625 = vmatprep.subr.mxu1 %v5572_v0  ;;  %9258 = vst [vmem:[#allocation134_spill] sm:$0xff] %v5580_v63  ;;  %9259 = vst [vmem:[#allocation135_spill] sm:$0xff] %v5582_v58  ;;  %v5590_v61 = vld [vmem:[#allocation6 + $0x288] sm:$0xff]  ;;  %v5596_v0 = vld [vmem:[#allocation6 + $0x280] sm:$0xff] }
  0x78   :  { %554 = vmatprep.subr.mxu0 %v5568_v2  ;;  %626 = vmatpush2.msra.mxu1 %v5576_v57  ;;  %9261 = vst [vmem:[#allocation137_spill] sm:$0xff] %v5588_v62  ;;  %9262 = vst [vmem:[#allocation138_spill] sm:$0xff] %v5590_v61  ;;  %v5598_v2 = vld [vmem:[#allocation6 + $0x290] sm:$0xff]  ;;  %v5604_v57 = vld [vmem:[#allocation6 + $0x278] sm:$0xff] }
  0x79   :  { %555 = vmatpush2.msra.mxu0 %v5574_v1  ;;  %627 = vmatprep.subr.mxu1 %v5582_v58  ;;  %9264 = vst [vmem:[#allocation140_spill] sm:$0xff] %v5596_v0  ;;  %9265 = vst [vmem:[#allocation141_spill] sm:$0xff] %v5598_v2  ;;  %v5602_v1 = vld [vmem:[#allocation6 + $0x268] sm:$0xff] }
  0x7a   :  { %556 = vmatprep.subr.mxu0 %v5580_v63  ;;  %628 = vmatpush2.msra.mxu1 %v5588_v62  ;;  %9266 = vst [vmem:[#allocation142_spill] sm:$0xff] %v5602_v1  ;;  %9267 = vst [vmem:[#allocation143_spill] sm:$0xff] %v5604_v57  ;;  %v5610_v63 = vld [vmem:[#allocation6 + $0x270] sm:$0xff]  ;;  %v5614_v58 = vld [vmem:[#allocation6 + $0x248] sm:$0xff] }
  0x7b   :  { %557 = vmatpush2.msra.mxu0 %v5584_v59  ;;  %629 = vmatprep.subr.mxu1 %v5592_v60  ;;  %9269 = vst [vmem:[#allocation145_spill] sm:$0xff] %v5610_v63  ;;  %9270 = vst [vmem:[#allocation146_spill] sm:$0xff] %v5614_v58  ;;  %v5616_v59 = vld [vmem:[#allocation6 + $0x258] sm:$0xff]  ;;  %v5620_v62 = vld [vmem:[#allocation6 + $0x240] sm:$0xff] }
  0x7c   :  { %558 = vmatprep.subr.mxu0 %v5590_v61  ;;  %630 = vmatpush2.msra.mxu1 %v5598_v2  ;;  %9271 = vst [vmem:[#allocation147_spill] sm:$0xff] %v5616_v59  ;;  %9272 = vst [vmem:[#allocation148_spill] sm:$0xff] %v5620_v62  ;;  %v5622_v61 = vld [vmem:[#allocation6 + $0x250] sm:$0xff]  ;;  %v5626_v60 = vld [vmem:[#allocation6 + $0x228] sm:$0xff] }
  0x7d   :  { %559 = vmatpush2.msra.mxu0 %v5596_v0  ;;  %631 = vmatprep.subr.mxu1 %v5604_v57  ;;  %9273 = vst [vmem:[#allocation149_spill] sm:$0xff] %v5622_v61  ;;  %9274 = vst [vmem:[#allocation150_spill] sm:$0xff] %v5626_v60  ;;  %v5628_v0 = vld [vmem:[#allocation6 + $0x238] sm:$0xff]  ;;  %v5632_v2 = vld [vmem:[#allocation6 + $0x220] sm:$0xff] }
  0x7e   :  { %560 = vmatprep.subr.mxu0 %v5602_v1  ;;  %632 = vmatpush2.msra.mxu1 %v5610_v63  ;;  %9275 = vst [vmem:[#allocation151_spill] sm:$0xff] %v5628_v0  ;;  %9276 = vst [vmem:[#allocation152_spill] sm:$0xff] %v5632_v2  ;;  %v5634_v1 = vld [vmem:[#allocation6 + $0x230] sm:$0xff]  ;;  %v5638_v57 = vld [vmem:[#allocation6 + $0x208] sm:$0xff] }
  0x7f   :  { %561 = vmatpush2.msra.mxu0 %v5608_v56  ;;  %633 = vmatprep.subr.mxu1 %v5616_v59  ;;  %9277 = vst [vmem:[#allocation153_spill] sm:$0xff] %v5634_v1  ;;  %9278 = vst [vmem:[#allocation154_spill] sm:$0xff] %v5638_v57  ;;  %v5640_v56 = vld [vmem:[#allocation6 + $0x218] sm:$0xff]  ;;  %v5644_v63 = vld [vmem:[#allocation6 + $0x200] sm:$0xff] }
  0x80   :  { %562 = vmatprep.subr.mxu0 %v5614_v58  ;;  %634 = vmatpush2.msra.mxu1 %v5622_v61  ;;  %9279 = vst [vmem:[#allocation155_spill] sm:$0xff] %v5640_v56  ;;  %9280 = vst [vmem:[#allocation156_spill] sm:$0xff] %v5644_v63  ;;  %v5646_v58 = vld [vmem:[#allocation6 + $0x210] sm:$0xff] }
  0x81   :  { %563 = vmatpush2.msra.mxu0 %v5620_v62  ;;  %635 = vmatprep.subr.mxu1 %v5628_v0  ;;  %9281 = vst [vmem:[#allocation157_spill] sm:$0xff] %v5646_v58  ;;  %v8618_v0 = vlaneseq }
  0x82   :  { %564 = vmatprep.subr.mxu0 %v5626_v60  ;;  %636 = vmatpush2.msra.mxu1 %v5634_v1 }
  0x83   :  { %565 = vmatpush2.msra.mxu0 %v5632_v2  ;;  %637 = vmatprep.subr.mxu1 %v5640_v56  ;;  %v5657_v60 = vshrl.u32 %v8618_v0, 7  ;;  %v63_v0 = vld [vmem:[%s8475_s4] sm:$0xf] }
  0x84   :  { %566 = vmatprep.subr.mxu0 %v5638_v57  ;;  %638 = vmatpush2.msra.mxu1 %v5646_v58  ;;  %v62_v57 = vld [vmem:[%s8473_s2] sm:$0xf] }
  0x85   :  { %567 = vmatpush2.msra.mxu0 %v5644_v63  ;;  %817 = vmatprep.subr.mxu1 %v5064_v4  ;;  %9282 = vst [vmem:[#allocation158_spill] sm:$0xff] %v5657_v60  ;;  %v5660_v2 = vsub.s32 0, %v5657_v60  ;;  %v5666_v56 = vsub.s32 1, %v5657_v60  ;;  %v5679_v1 = vsub.s32 3, %v5657_v60  ;;  %v5693_v49 = vsub.s32 2, %v5657_v60 }
  0x86   :  { %746 = vmatprep.subr.mxu0 %v5062_v3 }
  0x87   :  { %9283 = vst [vmem:[#allocation159_spill] sm:$0xff] %v5660_v2  ;;  %9284 = vst [vmem:[#allocation160_spill] sm:$0xff] %v5666_v56  ;;  %v5669_v58 = vrot.slane %v62_v57, %v5660_v2  ;;  %v5672_v3 = vrot.slane %v62_v57, %v5666_v56  ;;  %v5682_v61 = vrot.slane %v63_v0, %v5660_v2 }
  0x88   :  { %v5686_v54 = vrot.slane %v63_v0, %v5666_v56  ;;  %v5689_v52 = vrot.slane %v62_v57, %v5679_v1  ;;  %v5698_v56 = vrot.slane %v62_v57, %v5693_v49 }
  0x89   :  { %9285 = vst [vmem:[#allocation161_spill] sm:$0xff] %v5669_v58  ;;  %9286 = vst [vmem:[#allocation162_spill] sm:$0xff] %v5672_v3 }
  0x8a   :  { %9287 = vst [vmem:[#allocation163_spill] sm:$0xff] %v5689_v52  ;;  %9288 = vst [vmem:[#allocation164_spill] sm:$0xff] %v5698_v56 }
  0xbd   :  { %v69_v4 = vpop.permute.xlu0 %68 }
  0xbe   :  { %v92_v63 = vmul.f32 %v5669_v58, %v69_v4  ;;  %v93_v62 = vmul.f32 %v5672_v3, %v69_v4  ;;  %v95_v3 = vmul.f32 %v5689_v52, %v69_v4 }
 0x101   :  { %v226_v59 = vpop.f32.mrf.mxu0  ;;  %v297_v58 = vpop.f32.mrf.mxu1 }
 0x102   :  { %v302_v55 = vadd.f32 %v226_v59, %v92_v63 }
 0x103   :  { %v228_v53 = vpop.f32.mrf.mxu0  ;;  %v299_v63 = vpop.f32.mrf.mxu1 }
 0x104   :  { %v327_v51 = vadd.f32 %v5682_v61, %v302_v55  ;;  %v303_v50 = vadd.f32 %v228_v53, %v93_v62  ;;  %v305_v47 = vadd.f32 %v299_v63, %v95_v3  ;;  %v5701_v55 = vrot.slane %v63_v0, %v5679_v1 }
 0x105   :  { %v94_v53 = vmul.f32 %v5698_v56, %v69_v4 }
 0x106   :  { %v4626_v2 = vmul.f32 -1.442695, %v327_v51  ;;  %v328_v48 = vadd.f32 %v5686_v54, %v303_v50  ;;  %v330_v62 = vadd.f32 %v5701_v55, %v305_v47  ;;  %v5706_v50 = vrot.slane %v63_v0, %v5693_v49 }
 0x107   :  { %v304_v51 = vadd.f32 %v297_v58, %v94_v53 }
 0x108   :  { %4692 = vpow2.f32 %v4626_v2  ;;  %v4627_v59 = vmul.f32 -1.442695, %v328_v48  ;;  %v4628_v60 = vmul.f32 -1.442695, %v330_v62 }
 0x109   :  { %v329_v48 = vadd.f32 %v5706_v50, %v304_v51 }
 0x10a   :  { %4694 = vpow2.f32 %v4627_v59 }
 0x10b   :  { %4696 = vpow2.f32 %v4628_v60  ;;  %v9333_v60 = vld [vmem:[#allocation53_spill] sm:$0xff] }
 0x115   :  { %v4693_v2 = vpop.eup %4692 }
 0x116   :  { %v334_v52 = vadd.f32 1.0, %v4693_v2 }
 0x117   :  { %v4695_v57 = vpop.eup %4694 }
 0x118   :  { %4698 = vrcp.f32 %v334_v52  ;;  %v340_v3 = vadd.f32 1.0, %v4695_v57  ;;  %v4697_v59 = vpop.eup %4696  ;;  %v9331_v52 = vld [vmem:[#allocation51_spill] sm:$0xff] }
 0x119   :  { %4700 = vtanh.f32 %v329_v48  ;;  %v347_v47 = vadd.f32 1.0, %v4697_v59  ;;  %v9334_v48 = vld [vmem:[#allocation54_spill] sm:$0xff]  ;;  %v9335_v57 = vld [vmem:[#allocation55_spill] sm:$0xff]  ;;  %v9337_v59 = vld [vmem:[#allocation57_spill] sm:$0xff] }
 0x11a   :  { %4702 = vrcp.f32 %v340_v3  ;;  %v9336_v3 = vld [vmem:[#allocation56_spill] sm:$0xff] }
 0x11b   :  { %4704 = vrcp.f32 %v347_v47  ;;  %v9340_v47 = vld [vmem:[#allocation60_spill] sm:$0xff] }
 0x125   :  { %v4699_v63 = vpop.eup %4698 }
 0x126   :  { %v4701_v4 = vpop.eup %4700 }
 0x127   :  { %v4703_v56 = vpop.eup %4702  ;;  %v351_v53 = vmul.f32 %v4701_v4, %v4699_v63  ;;  %v9338_v63 = vld [vmem:[#allocation58_spill] sm:$0xff]  ;;  %v9339_v4 = vld [vmem:[#allocation59_spill] sm:$0xff] }
 0x128   :  { %v350_v58 = vmul.f32 0.0, %v4703_v56  ;;  %v4705_v62 = vpop.eup %4704  ;;  %v9332_v56 = vld [vmem:[#allocation52_spill] sm:$0xff] }
 0x12a   :  { %v5709_v0 = vadd.f32 %v351_v53, %v350_v58  ;;  %v9341_v58 = vld [vmem:[#allocation61_spill] sm:$0xff]  ;;  %v9342_v53 = vld [vmem:[#allocation62_spill] sm:$0xff] }
 0x12c   :  { %4706 = vtanh.f32 %v5709_v0 }
 0x139   :  { %v4707_v51 = vpop.eup %4706 }
 0x13a   :  { %v5712_v2 = vmul.f32 %v4707_v51, %v4705_v62  ;;  %v9343_v62 = vld [vmem:[#allocation63_spill] sm:$0xff]  ;;  %v9344_v51 = vld [vmem:[#allocation64_spill] sm:$0xff] }
 0x13c   :  { %569 = vmatmul.mubr.f32.vlgmr.msra.gmra.mxu0 %v5712_v2  ;;  %640 = vmatmul.mubr.f32.vlgmr.msra.gmra.mxu1 %v5712_v2 }
 0x13d   :  { %747 = vmatpush1.msra.mxu0 %v5066_v5  ;;  %818 = vmatpush1.msra.mxu1 %v5070_v6  ;;  %v9289_v5 = vld [vmem:[#allocation10_spill] sm:$0xff]  ;;  %v9290_v6 = vld [vmem:[#allocation11_spill] sm:$0xff] }
 0x13e   :  { %748 = vmatprep.subr.mxu0 %v5072_v7  ;;  %819 = vmatprep.subr.mxu1 %v5074_v8  ;;  %v9291_v7 = vld [vmem:[#allocation12_spill] sm:$0xff]  ;;  %v9292_v8 = vld [vmem:[#allocation13_spill] sm:$0xff] }
 0x13f   :  { %749 = vmatpush1.msra.mxu0 %v5078_v9  ;;  %820 = vmatpush1.msra.mxu1 %v5080_v10  ;;  %v9293_v9 = vld [vmem:[#allocation14_spill] sm:$0xff]  ;;  %v9294_v10 = vld [vmem:[#allocation15_spill] sm:$0xff] }
 0x140   :  { %750 = vmatprep.subr.mxu0 %v5082_v11  ;;  %821 = vmatprep.subr.mxu1 %v5086_v12  ;;  %v9295_v11 = vld [vmem:[#allocation16_spill] sm:$0xff]  ;;  %v9296_v12 = vld [vmem:[#allocation17_spill] sm:$0xff] }
 0x141   :  { %751 = vmatpush1.msra.mxu0 %v5088_v13  ;;  %822 = vmatpush1.msra.mxu1 %v5090_v14  ;;  %v9297_v13 = vld [vmem:[#allocation18_spill] sm:$0xff]  ;;  %v9298_v14 = vld [vmem:[#allocation19_spill] sm:$0xff] }
 0x142   :  { %752 = vmatprep.subr.mxu0 %v5094_v15  ;;  %823 = vmatprep.subr.mxu1 %v5096_v16  ;;  %v9299_v15 = vld [vmem:[#allocation20_spill] sm:$0xff]  ;;  %v9300_v16 = vld [vmem:[#allocation21_spill] sm:$0xff] }
 0x143   :  { %753 = vmatpush1.msra.mxu0 %v5100_v17  ;;  %824 = vmatpush1.msra.mxu1 %v5102_v18  ;;  %v9301_v17 = vld [vmem:[#allocation22_spill] sm:$0xff]  ;;  %v9302_v18 = vld [vmem:[#allocation23_spill] sm:$0xff] }
 0x144   :  { %754 = vmatprep.subr.mxu0 %v5106_v19  ;;  %825 = vmatprep.subr.mxu1 %v5108_v20  ;;  %v9303_v19 = vld [vmem:[#allocation24_spill] sm:$0xff]  ;;  %v9304_v20 = vld [vmem:[#allocation25_spill] sm:$0xff] }
 0x145   :  { %755 = vmatpush1.msra.mxu0 %v5112_v21  ;;  %826 = vmatpush1.msra.mxu1 %v5114_v22  ;;  %v9305_v21 = vld [vmem:[#allocation26_spill] sm:$0xff]  ;;  %v9306_v22 = vld [vmem:[#allocation27_spill] sm:$0xff] }
 0x146   :  { %756 = vmatprep.subr.mxu0 %v5118_v23  ;;  %827 = vmatprep.subr.mxu1 %v5120_v24  ;;  %v9307_v23 = vld [vmem:[#allocation28_spill] sm:$0xff]  ;;  %v9308_v24 = vmov 0.0  }
 0x147   :  { %757 = vmatpush1.msra.mxu0 %v5124_v25  ;;  %828 = vmatpush1.msra.mxu1 %v5126_v26  ;;  %v9309_v25 = vld [vmem:[#allocation29_spill] sm:$0xff]  ;;  %v9310_v26 = vld [vmem:[#allocation30_spill] sm:$0xff] }
 0x148   :  { %758 = vmatprep.subr.mxu0 %v5130_v27  ;;  %829 = vmatprep.subr.mxu1 %v5132_v28  ;;  %v9311_v27 = vld [vmem:[#allocation31_spill] sm:$0xff]  ;;  %v9312_v28 = vld [vmem:[#allocation32_spill] sm:$0xff] }
 0x149   :  { %759 = vmatpush1.msra.mxu0 %v5136_v29  ;;  %830 = vmatpush1.msra.mxu1 %v5138_v30  ;;  %v9313_v29 = vld [vmem:[#allocation33_spill] sm:$0xff]  ;;  %v9314_v30 = vld [vmem:[#allocation34_spill] sm:$0xff] }
 0x14a   :  { %760 = vmatprep.subr.mxu0 %v5142_v31  ;;  %831 = vmatprep.subr.mxu1 %v5144_v32  ;;  %v9315_v31 = vld [vmem:[#allocation35_spill] sm:$0xff]  ;;  %v9316_v32 = vld [vmem:[#allocation36_spill] sm:$0xff] }
 0x14b   :  { %761 = vmatpush1.msra.mxu0 %v5148_v33  ;;  %832 = vmatpush1.msra.mxu1 %v5150_v34  ;;  %v9317_v33 = vld [vmem:[#allocation37_spill] sm:$0xff]  ;;  %v9318_v34 = vld [vmem:[#allocation38_spill] sm:$0xff] }
 0x14c   :  { %762 = vmatprep.subr.mxu0 %v5154_v35  ;;  %833 = vmatprep.subr.mxu1 %v5156_v36  ;;  %v9319_v35 = vld [vmem:[#allocation39_spill] sm:$0xff]  ;;  %v9320_v36 = vld [vmem:[#allocation40_spill] sm:$0xff] }
 0x14d   :  { %763 = vmatpush1.msra.mxu0 %v5160_v37  ;;  %834 = vmatpush1.msra.mxu1 %v5162_v38  ;;  %v9321_v37 = vld [vmem:[#allocation41_spill] sm:$0xff]  ;;  %v9322_v38 = vld [vmem:[#allocation42_spill] sm:$0xff] }
 0x14e   :  { %764 = vmatprep.subr.mxu0 %v5166_v39  ;;  %835 = vmatprep.subr.mxu1 %v5168_v40  ;;  %v9323_v39 = vld [vmem:[#allocation43_spill] sm:$0xff]  ;;  %v9324_v40 = vld [vmem:[#allocation44_spill] sm:$0xff] }
 0x14f   :  { %765 = vmatpush1.msra.mxu0 %v5172_v41  ;;  %836 = vmatpush1.msra.mxu1 %v5174_v42  ;;  %v9325_v41 = vld [vmem:[#allocation45_spill] sm:$0xff]  ;;  %v9326_v42 = vld [vmem:[#allocation46_spill] sm:$0xff] }
 0x150   :  { %766 = vmatprep.subr.mxu0 %v5178_v43  ;;  %837 = vmatprep.subr.mxu1 %v5180_v44  ;;  %v9327_v43 = vld [vmem:[#allocation47_spill] sm:$0xff]  ;;  %v9328_v44 = vld [vmem:[#allocation48_spill] sm:$0xff] }
 0x151   :  { %767 = vmatpush1.msra.mxu0 %v5184_v45  ;;  %838 = vmatpush1.msra.mxu1 %v5186_v46  ;;  %v9329_v45 = vld [vmem:[#allocation49_spill] sm:$0xff]  ;;  %v9330_v46 = vld [vmem:[#allocation50_spill] sm:$0xff] }
 0x152   :  { %768 = vmatprep.subr.mxu0 %v9289_v5  ;;  %839 = vmatprep.subr.mxu1 %v9290_v6  ;;  %v9346_v5 = vld [vmem:[#allocation66_spill] sm:$0xff]  ;;  %v9347_v6 = vld [vmem:[#allocation67_spill] sm:$0xff] }
 0x153   :  { %769 = vmatpush1.msra.mxu0 %v9291_v7  ;;  %840 = vmatpush1.msra.mxu1 %v9292_v8  ;;  %v9348_v7 = vld [vmem:[#allocation68_spill] sm:$0xff]  ;;  %v9349_v8 = vld [vmem:[#allocation69_spill] sm:$0xff] }
 0x154   :  { %770 = vmatprep.subr.mxu0 %v9293_v9  ;;  %841 = vmatprep.subr.mxu1 %v9294_v10  ;;  %v9350_v9 = vld [vmem:[#allocation70_spill] sm:$0xff]  ;;  %v9351_v10 = vld [vmem:[#allocation71_spill] sm:$0xff] }
 0x155   :  { %771 = vmatpush1.msra.mxu0 %v9295_v11  ;;  %842 = vmatpush1.msra.mxu1 %v9296_v12  ;;  %v9352_v11 = vld [vmem:[#allocation72_spill] sm:$0xff]  ;;  %v9353_v12 = vld [vmem:[#allocation73_spill] sm:$0xff] }
 0x156   :  { %772 = vmatprep.subr.mxu0 %v9297_v13  ;;  %843 = vmatprep.subr.mxu1 %v9298_v14  ;;  %v9354_v13 = vld [vmem:[#allocation74_spill] sm:$0xff]  ;;  %v9355_v14 = vld [vmem:[#allocation75_spill] sm:$0xff] }
 0x157   :  { %773 = vmatpush1.msra.mxu0 %v9299_v15  ;;  %844 = vmatpush1.msra.mxu1 %v9300_v16  ;;  %v9356_v15 = vld [vmem:[#allocation76_spill] sm:$0xff]  ;;  %v9357_v16 = vld [vmem:[#allocation77_spill] sm:$0xff] }
 0x158   :  { %774 = vmatprep.subr.mxu0 %v9301_v17  ;;  %845 = vmatprep.subr.mxu1 %v9302_v18  ;;  %v9358_v17 = vld [vmem:[#allocation78_spill] sm:$0xff]  ;;  %v9359_v18 = vld [vmem:[#allocation79_spill] sm:$0xff] }
 0x159   :  { %775 = vmatpush1.msra.mxu0 %v9303_v19  ;;  %846 = vmatpush1.msra.mxu1 %v9304_v20  ;;  %v9360_v19 = vld [vmem:[#allocation80_spill] sm:$0xff]  ;;  %v9361_v20 = vld [vmem:[#allocation81_spill] sm:$0xff] }
 0x15a   :  { %776 = vmatprep.subr.mxu0 %v9305_v21  ;;  %847 = vmatprep.subr.mxu1 %v9306_v22  ;;  %v9362_v21 = vld [vmem:[#allocation82_spill] sm:$0xff]  ;;  %v9363_v22 = vld [vmem:[#allocation83_spill] sm:$0xff] }
 0x15b   :  { %777 = vmatpush1.msra.mxu0 %v9307_v23  ;;  %810 = vmatprep.mubr.f32.mxu0 %v9308_v24  ;;  %v9364_v23 = vld [vmem:[#allocation84_spill] sm:$0xff] }
 0x15c   :  { %848 = vmatpush1.msra.mxu1 %v9309_v25  ;;  %881 = vmatprep.mubr.f32.mxu1 %v9308_v24  ;;  %v9365_v25 = vld [vmem:[#allocation85_spill] sm:$0xff] }
 0x15d   :  { %811 = vmatmul.mubr.f32.vlgmr.msra.gmra.mxu0 %v5712_v2  ;;  %882 = vmatmul.mubr.f32.vlgmr.msra.gmra.mxu1 %v5712_v2  ;;  %v9345_v2 = vld [vmem:[#allocation65_spill] sm:$0xff] }
 0x15e   :  { %1048 = vmatprep.subr.mxu0 %v9310_v26  ;;  %1119 = vmatprep.subr.mxu1 %v9311_v27  ;;  %v9366_v26 = vld [vmem:[#allocation86_spill] sm:$0xff]  ;;  %v9367_v27 = vld [vmem:[#allocation87_spill] sm:$0xff] }
 0x15f   :  { %1049 = vmatpush1.msra.mxu0 %v9312_v28  ;;  %1120 = vmatpush1.msra.mxu1 %v9313_v29  ;;  %v9368_v28 = vld [vmem:[#allocation88_spill] sm:$0xff]  ;;  %v9369_v29 = vld [vmem:[#allocation89_spill] sm:$0xff] }
 0x160   :  { %1050 = vmatprep.subr.mxu0 %v9314_v30  ;;  %1121 = vmatprep.subr.mxu1 %v9315_v31  ;;  %v9370_v30 = vld [vmem:[#allocation90_spill] sm:$0xff]  ;;  %v9371_v31 = vld [vmem:[#allocation91_spill] sm:$0xff] }
 0x161   :  { %1051 = vmatpush1.msra.mxu0 %v9316_v32  ;;  %1122 = vmatpush1.msra.mxu1 %v9317_v33  ;;  %v9372_v32 = vld [vmem:[#allocation92_spill] sm:$0xff]  ;;  %v9373_v33 = vld [vmem:[#allocation93_spill] sm:$0xff] }
 0x162   :  { %1052 = vmatprep.subr.mxu0 %v9318_v34  ;;  %1123 = vmatprep.subr.mxu1 %v9319_v35  ;;  %v9374_v34 = vld [vmem:[#allocation94_spill] sm:$0xff]  ;;  %v9375_v35 = vld [vmem:[#allocation95_spill] sm:$0xff] }
 0x163   :  { %1053 = vmatpush1.msra.mxu0 %v9320_v36  ;;  %1124 = vmatpush1.msra.mxu1 %v9321_v37  ;;  %v9376_v36 = vld [vmem:[#allocation96_spill] sm:$0xff]  ;;  %v9377_v37 = vld [vmem:[#allocation97_spill] sm:$0xff] }
 0x164   :  { %1054 = vmatprep.subr.mxu0 %v9322_v38  ;;  %1125 = vmatprep.subr.mxu1 %v9323_v39  ;;  %v9378_v38 = vld [vmem:[#allocation98_spill] sm:$0xff]  ;;  %v9379_v39 = vld [vmem:[#allocation99_spill] sm:$0xff] }
 0x165   :  { %1055 = vmatpush1.msra.mxu0 %v9324_v40  ;;  %1126 = vmatpush1.msra.mxu1 %v9325_v41  ;;  %v9380_v40 = vld [vmem:[#allocation100_spill] sm:$0xff]  ;;  %v9381_v41 = vld [vmem:[#allocation101_spill] sm:$0xff] }
 0x166   :  { %1056 = vmatprep.subr.mxu0 %v9326_v42  ;;  %1127 = vmatprep.subr.mxu1 %v9327_v43  ;;  %v9382_v42 = vld [vmem:[#allocation102_spill] sm:$0xff]  ;;  %v9383_v43 = vld [vmem:[#allocation103_spill] sm:$0xff] }
 0x167   :  { %1057 = vmatpush1.msra.mxu0 %v9328_v44  ;;  %1128 = vmatpush1.msra.mxu1 %v9329_v45  ;;  %v9384_v44 = vld [vmem:[#allocation104_spill] sm:$0xff]  ;;  %v9385_v45 = vld [vmem:[#allocation105_spill] sm:$0xff] }
 0x168   :  { %1058 = vmatprep.subr.mxu0 %v9330_v46  ;;  %1129 = vmatprep.subr.mxu1 %v9331_v52  ;;  %v9386_v46 = vld [vmem:[#allocation106_spill] sm:$0xff]  ;;  %v9387_v52 = vld [vmem:[#allocation107_spill] sm:$0xff] }
 0x169   :  { %1059 = vmatpush1.msra.mxu0 %v9332_v56  ;;  %1130 = vmatpush1.msra.mxu1 %v9333_v60  ;;  %v9388_v56 = vld [vmem:[#allocation108_spill] sm:$0xff]  ;;  %v9389_v60 = vld [vmem:[#allocation109_spill] sm:$0xff] }
 0x16a   :  { %1060 = vmatprep.subr.mxu0 %v9334_v48  ;;  %1131 = vmatprep.subr.mxu1 %v9335_v57  ;;  %v9390_v48 = vld [vmem:[#allocation110_spill] sm:$0xff]  ;;  %v9391_v57 = vld [vmem:[#allocation111_spill] sm:$0xff] }
 0x16b   :  { %1061 = vmatpush1.msra.mxu0 %v9336_v3  ;;  %1132 = vmatpush1.msra.mxu1 %v9337_v59  ;;  %v9392_v3 = vld [vmem:[#allocation112_spill] sm:$0xff]  ;;  %v9393_v59 = vld [vmem:[#allocation113_spill] sm:$0xff] }
 0x16c   :  { %1062 = vmatprep.subr.mxu0 %v9338_v63  ;;  %1133 = vmatprep.subr.mxu1 %v9339_v4  ;;  %v9394_v63 = vld [vmem:[#allocation114_spill] sm:$0xff]  ;;  %v9395_v4 = vld [vmem:[#allocation115_spill] sm:$0xff] }
 0x16d   :  { %1063 = vmatpush1.msra.mxu0 %v9340_v47  ;;  %1134 = vmatpush1.msra.mxu1 %v9341_v58  ;;  %v9396_v47 = vld [vmem:[#allocation116_spill] sm:$0xff]  ;;  %v9397_v58 = vld [vmem:[#allocation117_spill] sm:$0xff] }
 0x16e   :  { %1064 = vmatprep.subr.mxu0 %v9342_v53  ;;  %1135 = vmatprep.subr.mxu1 %v9343_v62  ;;  %v9398_v53 = vld [vmem:[#allocation118_spill] sm:$0xff]  ;;  %v9399_v62 = vld [vmem:[#allocation119_spill] sm:$0xff] }
 0x16f   :  { %1065 = vmatpush1.msra.mxu0 %v9344_v51  ;;  %1136 = vmatpush1.msra.mxu1 %v9345_v2  ;;  %v9400_v51 = vld [vmem:[#allocation120_spill] sm:$0xff]  ;;  %v9401_v2 = vld [vmem:[#allocation121_spill] sm:$0xff] }
 0x170   :  { %1066 = vmatprep.subr.mxu0 %v9346_v5  ;;  %1137 = vmatprep.subr.mxu1 %v9347_v6  ;;  %v9402_v5 = vld [vmem:[#allocation122_spill] sm:$0xff]  ;;  %v9403_v6 = vld [vmem:[#allocation123_spill] sm:$0xff] }
 0x171   :  { %1067 = vmatpush1.msra.mxu0 %v9348_v7  ;;  %1138 = vmatpush1.msra.mxu1 %v9349_v8  ;;  %v9404_v7 = vld [vmem:[#allocation124_spill] sm:$0xff]  ;;  %v9405_v8 = vld [vmem:[#allocation125_spill] sm:$0xff] }
 0x172   :  { %1068 = vmatprep.subr.mxu0 %v9350_v9  ;;  %1139 = vmatprep.subr.mxu1 %v9351_v10  ;;  %v9406_v9 = vld [vmem:[#allocation126_spill] sm:$0xff]  ;;  %v9407_v10 = vld [vmem:[#allocation127_spill] sm:$0xff] }
 0x173   :  { %1069 = vmatpush1.msra.mxu0 %v9352_v11  ;;  %1140 = vmatpush1.msra.mxu1 %v9353_v12  ;;  %v9408_v11 = vld [vmem:[#allocation128_spill] sm:$0xff]  ;;  %v9409_v12 = vld [vmem:[#allocation129_spill] sm:$0xff] }
 0x174   :  { %1070 = vmatprep.subr.mxu0 %v9354_v13  ;;  %1141 = vmatprep.subr.mxu1 %v9355_v14  ;;  %v9410_v13 = vld [vmem:[#allocation130_spill] sm:$0xff]  ;;  %v9411_v14 = vld [vmem:[#allocation131_spill] sm:$0xff] }
 0x175   :  { %1071 = vmatpush1.msra.mxu0 %v9356_v15  ;;  %1142 = vmatpush1.msra.mxu1 %v9357_v16  ;;  %v9412_v15 = vld [vmem:[#allocation132_spill] sm:$0xff]  ;;  %v9413_v16 = vld [vmem:[#allocation133_spill] sm:$0xff] }
 0x176   :  { %1072 = vmatprep.subr.mxu0 %v9358_v17  ;;  %1143 = vmatprep.subr.mxu1 %v9359_v18  ;;  %v9414_v17 = vld [vmem:[#allocation134_spill] sm:$0xff]  ;;  %v9415_v18 = vld [vmem:[#allocation135_spill] sm:$0xff] }
 0x177   :  { %1073 = vmatpush1.msra.mxu0 %v9360_v19  ;;  %1144 = vmatpush1.msra.mxu1 %v9361_v20  ;;  %v9416_v19 = vld [vmem:[#allocation136_spill] sm:$0xff]  ;;  %v9417_v20 = vld [vmem:[#allocation137_spill] sm:$0xff] }
 0x178   :  { %1074 = vmatprep.subr.mxu0 %v9362_v21  ;;  %1145 = vmatprep.subr.mxu1 %v9363_v22  ;;  %v9418_v21 = vld [vmem:[#allocation138_spill] sm:$0xff]  ;;  %v9419_v22 = vld [vmem:[#allocation139_spill] sm:$0xff] }
 0x179   :  { %1075 = vmatpush1.msra.mxu0 %v9364_v23  ;;  %1146 = vmatpush1.msra.mxu1 %v9365_v25  ;;  %v9420_v23 = vld [vmem:[#allocation140_spill] sm:$0xff]  ;;  %v9421_v25 = vld [vmem:[#allocation141_spill] sm:$0xff] }
 0x17a   :  { %1076 = vmatprep.subr.mxu0 %v9366_v26  ;;  %1147 = vmatprep.subr.mxu1 %v9367_v27  ;;  %v9422_v26 = vld [vmem:[#allocation142_spill] sm:$0xff]  ;;  %v9423_v27 = vld [vmem:[#allocation143_spill] sm:$0xff] }
 0x17b   :  { %1077 = vmatpush1.msra.mxu0 %v9368_v28  ;;  %1148 = vmatpush1.msra.mxu1 %v9369_v29  ;;  %v9424_v28 = vld [vmem:[#allocation144_spill] sm:$0xff]  ;;  %v9425_v29 = vld [vmem:[#allocation145_spill] sm:$0xff] }
 0x17c   :  { %1078 = vmatprep.subr.mxu0 %v9370_v30  ;;  %1149 = vmatprep.subr.mxu1 %v9371_v31  ;;  %v9426_v30 = vld [vmem:[#allocation146_spill] sm:$0xff]  ;;  %v9427_v31 = vld [vmem:[#allocation147_spill] sm:$0xff] }
 0x17d   :  { %1079 = vmatpush1.msra.mxu0 %v9372_v32  ;;  %1150 = vmatpush1.msra.mxu1 %v9373_v33  ;;  %v9428_v32 = vld [vmem:[#allocation148_spill] sm:$0xff]  ;;  %v9429_v33 = vld [vmem:[#allocation149_spill] sm:$0xff] }
 0x17e   :  { %1080 = vmatprep.subr.mxu0 %v9374_v34  ;;  %1151 = vmatprep.subr.mxu1 %v9375_v35  ;;  %v9430_v34 = vld [vmem:[#allocation150_spill] sm:$0xff]  ;;  %v9431_v35 = vld [vmem:[#allocation151_spill] sm:$0xff] }
 0x17f   :  { %1081 = vmatpush2.msra.mxu0 %v9376_v36  ;;  %1152 = vmatpush2.msra.mxu1 %v9377_v37  ;;  %v9432_v36 = vld [vmem:[#allocation152_spill] sm:$0xff]  ;;  %v9433_v37 = vld [vmem:[#allocation153_spill] sm:$0xff] }
 0x180   :  { %1082 = vmatprep.subr.mxu0 %v9378_v38  ;;  %1153 = vmatprep.subr.mxu1 %v9379_v39  ;;  %v9434_v38 = vld [vmem:[#allocation154_spill] sm:$0xff]  ;;  %v9435_v39 = vld [vmem:[#allocation155_spill] sm:$0xff] }
 0x181   :  { %1083 = vmatpush2.msra.mxu0 %v9380_v40  ;;  %1154 = vmatpush2.msra.mxu1 %v9381_v41  ;;  %v9436_v40 = vld [vmem:[#allocation156_spill] sm:$0xff]  ;;  %v9437_v41 = vld [vmem:[#allocation157_spill] sm:$0xff] }
 0x182   :  { %1084 = vmatprep.subr.mxu0 %v9382_v42  ;;  %1155 = vmatprep.subr.mxu1 %v9383_v43  ;;  %v5910_v42 = vld [vmem:[#allocation4 + $0x1e8] sm:$0xff]  ;;  %v5912_v43 = vld [vmem:[#allocation4 + $0x1f8] sm:$0xff] }
 0x183   :  { %1085 = vmatpush2.msra.mxu0 %v9384_v44  ;;  %1156 = vmatpush2.msra.mxu1 %v9385_v45  ;;  %v64_v44 = vld [vmem:[%s8477_s6] sm:$0xf]  ;;  %v9438_v45 = vld [vmem:[#allocation159_spill] sm:$0xff] }
 0x184   :  { %1086 = vmatprep.subr.mxu0 %v9386_v46  ;;  %1157 = vmatprep.subr.mxu1 %v9387_v52  ;;  %v5920_v46 = vrot.slane %v64_v44, %v9438_v45  ;;  %v4639_v52 = vld [vmem:[%s8471_s0 + $0x8] sm:$0xf] }
 0x185   :  { %1087 = vmatpush2.msra.mxu0 %v9388_v56  ;;  %1158 = vmatpush2.msra.mxu1 %v9389_v60  ;;  %v9440_v56 = vld [vmem:[#allocation160_spill] sm:$0xff] }
 0x186   :  { %1088 = vmatprep.subr.mxu0 %v9390_v48  ;;  %1159 = vmatprep.subr.mxu1 %v9391_v57  ;;  %9439 = vst [vmem:[#allocation10_spill] sm:$0xff] %v5920_v46  ;;  %v5926_v60 = vrot.slane %v64_v44, %v9440_v56  ;;  %v4646_v48 = vld [vmem:[%s8471_s0 + $0xc] sm:$0xf] }
 0x187   :  { %1089 = vmatpush2.msra.mxu0 %v9392_v3  ;;  %1160 = vmatpush2.msra.mxu1 %v9393_v59 }
 0x188   :  { %1090 = vmatprep.subr.mxu0 %v9394_v63  ;;  %1161 = vmatprep.subr.mxu1 %v9395_v4  ;;  %9441 = vst [vmem:[#allocation11_spill] sm:$0xff] %v5926_v60 }
 0x189   :  { %1091 = vmatpush2.msra.mxu0 %v9396_v47  ;;  %1162 = vmatpush2.msra.mxu1 %v9397_v58  ;;  %v4660_v47 = vld [vmem:[%s8471_s0 + $0x14] sm:$0xf] }
 0x18a   :  { %1092 = vmatprep.subr.mxu0 %v9398_v53  ;;  %1163 = vmatprep.subr.mxu1 %v9399_v62  ;;  %v5937_v62 = vrot.slane %v64_v44, %v5679_v1 }
 0x18b   :  { %1093 = vmatpush2.msra.mxu0 %v9400_v51  ;;  %1164 = vmatpush2.msra.mxu1 %v9401_v2  ;;  %v4674_v51 = vld [vmem:[%s8471_s0 + $0x1c] sm:$0xf] }
 0x18c   :  { %1094 = vmatprep.subr.mxu0 %v9402_v5  ;;  %1165 = vmatprep.subr.mxu1 %v9403_v6  ;;  %9442 = vst [vmem:[#allocation12_spill] sm:$0xff] %v5937_v62  ;;  %v5944_v6 = vrot.slane %v64_v44, %v5693_v49  ;;  %v9445_v49 = vld [vmem:[#allocation162_spill] sm:$0xff] }
 0x18d   :  { %1095 = vmatpush2.msra.mxu0 %v9404_v7  ;;  %1166 = vmatpush2.msra.mxu1 %v9405_v8 }
 0x18e   :  { %1096 = vmatprep.subr.mxu0 %v9406_v9  ;;  %1167 = vmatprep.subr.mxu1 %v9407_v10  ;;  %9443 = vst [vmem:[#allocation13_spill] sm:$0xff] %v5944_v6 }
 0x18f   :  { %1097 = vmatpush2.msra.mxu0 %v9408_v11  ;;  %1168 = vmatpush2.msra.mxu1 %v9409_v12  ;;  %v676_v12 = vpop.permute.xlu0 %675 }
 0x190   :  { %1098 = vmatprep.subr.mxu0 %v9410_v13  ;;  %1169 = vmatprep.subr.mxu1 %v9411_v14  ;;  %v9444_v14 = vld [vmem:[#allocation161_spill] sm:$0xff] }
 0x191   :  { %1099 = vmatpush2.msra.mxu0 %v9412_v15  ;;  %1170 = vmatpush2.msra.mxu1 %v9413_v16  ;;  %v678_v15 = vmul.f32 %v676_v12, %v9444_v14 }
 0x192   :  { %1100 = vmatprep.subr.mxu0 %v9414_v17  ;;  %1171 = vmatprep.subr.mxu1 %v9415_v18 }
 0x193   :  { %1101 = vmatpush2.msra.mxu0 %v9416_v19  ;;  %1172 = vmatpush2.msra.mxu1 %v9417_v20  ;;  %v679_v19 = vmul.f32 %v676_v12, %v9445_v49 }
 0x194   :  { %1102 = vmatprep.subr.mxu0 %v9418_v21  ;;  %1173 = vmatprep.subr.mxu1 %v9419_v22 }
 0x195   :  { %1103 = vmatpush2.msra.mxu0 %v9420_v23  ;;  %1174 = vmatpush2.msra.mxu1 %v9421_v25 }
 0x196   :  { %1104 = vmatprep.subr.mxu0 %v9422_v26  ;;  %1175 = vmatprep.subr.mxu1 %v9423_v27 }
 0x197   :  { %1105 = vmatpush2.msra.mxu0 %v9424_v28  ;;  %1176 = vmatpush2.msra.mxu1 %v9425_v29 }
 0x198   :  { %1106 = vmatprep.subr.mxu0 %v9426_v30  ;;  %1177 = vmatprep.subr.mxu1 %v9427_v31 }
 0x199   :  { %1107 = vmatpush2.msra.mxu0 %v9428_v32  ;;  %1178 = vmatpush2.msra.mxu1 %v9429_v33 }
 0x19a   :  { %1108 = vmatprep.subr.mxu0 %v9430_v34  ;;  %1179 = vmatprep.subr.mxu1 %v9431_v35  ;;  %v9446_v35 = vld [vmem:[#allocation163_spill] sm:$0xff] }
 0x19b   :  { %1109 = vmatpush2.msra.mxu0 %v9432_v36  ;;  %1180 = vmatpush2.msra.mxu1 %v9433_v37  ;;  %v681_v36 = vmul.f32 %v676_v12, %v9446_v35 }
 0x19c   :  { %1110 = vmatprep.subr.mxu0 %v9434_v38  ;;  %1181 = vmatprep.subr.mxu1 %v9435_v39  ;;  %v9447_v38 = vld [vmem:[#allocation164_spill] sm:$0xff] }
 0x19d   :  { %1111 = vmatpush2.msra.mxu0 %v9436_v40  ;;  %1182 = vmatpush2.msra.mxu1 %v9437_v41  ;;  %v680_v39 = vmul.f32 %v676_v12, %v9447_v38 }
 0x19e   :  { %1291 = vmatprep.subr.mxu0 %v5910_v42  ;;  %1362 = vmatprep.subr.mxu1 %v5912_v43 }
 0x19f   :  { %1220 = vperm.xlu1 %4691, %v4639_v52  }
 0x1a3   :  { %1765 = vperm.xlu1 %4691, %v4646_v48  }
 0x1a7   :  { %2855 = vperm.xlu1 %4691, %v4660_v47  }
 0x1ab   :  { %3945 = vperm.xlu1 %4691, %v4674_v51  }
 0x1fc   :  { %v570_v57 = vpop.f32.mrf.mxu0  ;;  %v641_v58 = vpop.f32.mrf.mxu1 }
 0x1fd   :  { %v571_v3 = vadd.f32 %v570_v57, %v5920_v46  ;;  %v642_v9 = vadd.f32 %v641_v58, %v5944_v6 }
 0x1fe   :  { %v572_v59 = vpop.f32.mrf.mxu0  ;;  %v643_v2 = vpop.f32.mrf.mxu1 }
 0x1ff   :  { %v4629_v63 = vmul.f32 -1.442695, %v571_v3  ;;  %v573_v4 = vadd.f32 %v572_v59, %v5926_v60  ;;  %v644_v5 = vadd.f32 %v643_v2, %v5937_v62 }
 0x201   :  { %4708 = vpow2.f32 %v4629_v63  ;;  %v4630_v53 = vmul.f32 -1.442695, %v573_v4  ;;  %v4631_v7 = vmul.f32 -1.442695, %v644_v5  ;;  %v5961_v4 = vld [vmem:[%s8478_s7] ss:$0 sm:$0xff] }
 0x203   :  { %4710 = vpow2.f32 %v4630_v53 }
 0x204   :  { %4712 = vpow2.f32 %v4631_v7 }
 0x20e   :  { %v4709_v8 = vpop.eup %4708 }
 0x20f   :  { %v649_v10 = vadd.f32 1.0, %v4709_v8 }
 0x210   :  { %v4711_v11 = vpop.eup %4710 }
 0x211   :  { %4714 = vrcp.f32 %v649_v10  ;;  %v655_v1 = vadd.f32 1.0, %v4711_v11  ;;  %v4713_v13 = vpop.eup %4712 }
 0x212   :  { %4716 = vtanh.f32 %v642_v9  ;;  %v662_v21 = vadd.f32 1.0, %v4713_v13 }
 0x213   :  { %4718 = vrcp.f32 %v655_v1 }
 0x214   :  { %4720 = vrcp.f32 %v662_v21  ;;  %v5989_v21 = vld [vmem:[#allocation4 + $0x1b8] sm:$0xff] }
 0x21d   :  { %v812_v16 = vpop.f32.mrf.mxu0  ;;  %v883_v26 = vpop.f32.mrf.mxu1 }
 0x21e   :  { %v4715_v17 = vpop.eup %4714  ;;  %v888_v18 = vadd.f32 %v812_v16, %v678_v15  ;;  %v890_v41 = vadd.f32 %v883_v26, %v680_v39  ;;  %v5971_v15 = vld [vmem:[#allocation4 + $0x1e0] sm:$0xff]  ;;  %v5973_v16 = vld [vmem:[#allocation4 + $0x1f0] sm:$0xff]  ;;  %v6001_v26 = vld [vmem:[#allocation4 + $0x198] sm:$0xff] }
 0x21f   :  { %v4717_v20 = vpop.eup %4716  ;;  %v814_v22 = vpop.f32.mrf.mxu0  ;;  %v6031_v39 = vld [vmem:[#allocation4 + $0x150] sm:$0xff] }
 0x220   :  { %v4719_v23 = vpop.eup %4718  ;;  %v892_v25 = vadd.f32 %v888_v18, %v5682_v61  ;;  %v889_v27 = vadd.f32 %v814_v22, %v679_v19  ;;  %v666_v29 = vmul.f32 %v4717_v20, %v4715_v17  ;;  %v885_v34 = vpop.f32.mrf.mxu1  ;;  %v894_v56 = vadd.f32 %v890_v41, %v5706_v50  ;;  %v5975_v17 = vld [vmem:[#allocation4 + $0x1c8] sm:$0xff]  ;;  %v5977_v18 = vld [vmem:[#allocation4 + $0x1d8] sm:$0xff]  ;;  %v5983_v19 = vld [vmem:[#allocation4 + $0x1d0] sm:$0xff] }
 0x221   :  { %v665_v28 = vmul.f32 0.0, %v4719_v23  ;;  %v891_v37 = vadd.f32 %v885_v34, %v681_v36  ;;  %v4721_v45 = vpop.eup %4720  ;;  %v5987_v20 = vld [vmem:[#allocation4 + $0x1a8] sm:$0xff]  ;;  %v5993_v22 = vld [vmem:[#allocation4 + $0x1a0] sm:$0xff]  ;;  %v5995_v23 = vld [vmem:[#allocation4 + $0x1b0] sm:$0xff] }
 0x222   :  { %v4633_v30 = vmul.f32 -1.442695, %v892_v25  ;;  %v893_v31 = vadd.f32 %v889_v27, %v5686_v54  ;;  %v5999_v25 = vld [vmem:[#allocation4 + $0x188] sm:$0xff]  ;;  %v6005_v27 = vld [vmem:[#allocation4 + $0x180] sm:$0xff]  ;;  %v6025_v36 = vld [vmem:[#allocation4 + $0x158] sm:$0xff] }
 0x223   :  { %v5951_v32 = vadd.f32 %v666_v29, %v665_v28  ;;  %v895_v40 = vadd.f32 %v891_v37, %v5701_v55  ;;  %v6007_v28 = vld [vmem:[#allocation4 + $0x190] sm:$0xff]  ;;  %v6011_v29 = vld [vmem:[#allocation4 + $0x168] sm:$0xff]  ;;  %v6029_v37 = vld [vmem:[#allocation4 + $0x140] sm:$0xff] }
 0x224   :  { %4722 = vpow2.f32 %v4633_v30  ;;  %v4634_v33 = vmul.f32 -1.442695, %v893_v31  ;;  %v6013_v30 = vld [vmem:[#allocation4 + $0x178] sm:$0xff]  ;;  %v6017_v31 = vld [vmem:[#allocation4 + $0x160] sm:$0xff]  ;;  %v6023_v34 = vld [vmem:[#allocation4 + $0x148] sm:$0xff] }
 0x225   :  { %4724 = vtanh.f32 %v5951_v32  ;;  %v4635_v44 = vmul.f32 -1.442695, %v895_v40  ;;  %v6035_v40 = vld [vmem:[#allocation4 + $0x128] sm:$0xff]  ;;  %v6037_v41 = vld [vmem:[#allocation4 + $0x138] sm:$0xff] }
 0x226   :  { %4726 = vpow2.f32 %v4634_v33  ;;  %v6019_v33 = vld [vmem:[#allocation4 + $0x170] sm:$0xff] }
 0x227   :  { %4728 = vpow2.f32 %v4635_v44  ;;  %v6041_v44 = vld [vmem:[#allocation4 + $0x120] sm:$0xff] }
 0x231   :  { %v4723_v52 = vpop.eup %4722 }
 0x232   :  { %v4725_v48 = vpop.eup %4724  ;;  %v899_v57 = vadd.f32 1.0, %v4723_v52  ;;  %v6047_v52 = vld [vmem:[#allocation4 + $0x108] sm:$0xff] }
 0x233   :  { %v4727_v3 = vpop.eup %4726  ;;  %v669_v59 = vmul.f32 %v4725_v48, %v4721_v45  ;;  %v6043_v45 = vld [vmem:[#allocation4 + $0x130] sm:$0xff]  ;;  %v6053_v48 = vld [vmem:[#allocation4 + $0x100] sm:$0xff] }
 0x234   :  { %4730 = vrcp.f32 %v899_v57  ;;  %v905_v63 = vadd.f32 1.0, %v4727_v3  ;;  %v4729_v51 = vpop.eup %4728  ;;  %v6055_v57 = vld [vmem:[#allocation4 + $0x110] sm:$0xff]  ;;  %v6059_v3 = vld [vmem:[#allocation4 + $0xe8] sm:$0xff] }
 0x235   :  { %4732 = vtanh.f32 %v894_v56  ;;  %670 = vst [vmem:[#allocation2] sm:$0xf] %v669_v59  ;;  %1112 = vmatprep.mubr.f32.mxu0 %v669_v59  ;;  %1183 = vmatprep.mubr.f32.mxu1 %v669_v59  ;;  %v912_v8 = vadd.f32 1.0, %v4729_v51  ;;  %v6049_v56 = vld [vmem:[#allocation4 + $0x118] sm:$0xff]  ;;  %v6077_v51 = vld [vmem:[#allocation4 + $0xc0] sm:$0xff] }
 0x236   :  { %4734 = vrcp.f32 %v905_v63  ;;  %v6061_v59 = vld [vmem:[#allocation4 + $0xf8] sm:$0xff]  ;;  %v6065_v63 = vld [vmem:[#allocation4 + $0xe0] sm:$0xff]  ;;  %9450 = vst [vmem:[#allocation16_spill] sm:$0xff] %v6077_v51 }
 0x237   :  { %4736 = vrcp.f32 %v912_v8  ;;  %v6089_v8 = vld [vmem:[#allocation4 + $0xa0] sm:$0xff] }
 0x238   :  { %9454 = vst [vmem:[#allocation20_spill] sm:$0xff] %v6089_v8 }
 0x23c   :  { %v4486_v47 = vld [vmem:[#allocation2] sm:$0xf] }
 0x23d   :  { %v4501_v58 = vmul.f32 %v5961_v4, %v4486_v47  ;;  %v6067_v47 = vld [vmem:[#allocation4 + $0xf0] sm:$0xff] }
 0x23f   :  { %v4510_v53 = vsel %vm4509_vm0, %v4501_v58, 0.0  ;;  %v6071_v58 = vld [vmem:[#allocation4 + $0xc8] sm:$0xff] }
 0x240   :  { %4511 = vadd.xlane.f32.xlu0 %v4510_v53  ;;  %9448 = vst [vmem:[#allocation14_spill] sm:$0xff] %v6071_v58  ;;  %v6073_v53 = vld [vmem:[#allocation4 + $0xd8] sm:$0xff] }
 0x241   :  { %v4731_v2 = vpop.eup %4730  ;;  %9449 = vst [vmem:[#allocation15_spill] sm:$0xff] %v6073_v53 }
 0x242   :  { %v4733_v5 = vpop.eup %4732 }
 0x243   :  { %v4735_v7 = vpop.eup %4734  ;;  %v916_v9 = vmul.f32 %v4733_v5, %v4731_v2  ;;  %v6079_v2 = vld [vmem:[#allocation4 + $0xd0] sm:$0xff]  ;;  %v6083_v5 = vld [vmem:[#allocation4 + $0xa8] sm:$0xff] }
 0x244   :  { %v915_v10 = vmul.f32 %v4735_v7, %v5709_v0  ;;  %v4737_v1 = vpop.eup %4736  ;;  %v5981_v0 = vld [vmem:[#allocation4 + $0x1c0] sm:$0xff]  ;;  %9451 = vst [vmem:[#allocation17_spill] sm:$0xff] %v6079_v2  ;;  %9452 = vst [vmem:[#allocation18_spill] sm:$0xff] %v6083_v5  ;;  %v6085_v7 = vld [vmem:[#allocation4 + $0xb8] sm:$0xff] }
 0x245   :  { %9453 = vst [vmem:[#allocation19_spill] sm:$0xff] %v6085_v7 }
 0x246   :  { %v5966_v11 = vadd.f32 %v916_v9, %v915_v10  ;;  %v6091_v9 = vld [vmem:[#allocation4 + $0xb0] sm:$0xff]  ;;  %v6095_v10 = vld [vmem:[#allocation4 + $0x88] sm:$0xff] }
 0x247   :  { %9455 = vst [vmem:[#allocation21_spill] sm:$0xff] %v6091_v9  ;;  %9456 = vst [vmem:[#allocation22_spill] sm:$0xff] %v6095_v10 }
 0x248   :  { %4738 = vtanh.f32 %v5966_v11 }
 0x255   :  { %v4739_v12 = vpop.eup %4738 }
 0x256   :  { %v5969_v13 = vmul.f32 %v4739_v12, %v4737_v1  ;;  %v6097_v1 = vld [vmem:[#allocation4 + $0x98] sm:$0xff]  ;;  %v6101_v12 = vld [vmem:[#allocation4 + $0x80] sm:$0xff] }
 0x257   :  { %9457 = vst [vmem:[#allocation23_spill] sm:$0xff] %v6097_v1  ;;  %9458 = vst [vmem:[#allocation24_spill] sm:$0xff] %v6101_v12 }
 0x258   :  { %1113 = vmatmul.mubr.f32.vlgmr.msra.gmra.mxu0 %v5969_v13  ;;  %1184 = vmatmul.mubr.f32.vlgmr.msra.gmra.mxu1 %v5969_v13 }
 0x259   :  { %1292 = vmatpush1.msra.mxu0 %v5971_v15  ;;  %1363 = vmatpush1.msra.mxu1 %v5973_v16 }
 0x25a   :  { %1293 = vmatprep.subr.mxu0 %v5975_v17  ;;  %1364 = vmatprep.subr.mxu1 %v5977_v18 }
 0x25b   :  { %1294 = vmatpush1.msra.mxu0 %v5981_v0  ;;  %1365 = vmatpush1.msra.mxu1 %v5983_v19 }
 0x25c   :  { %1295 = vmatprep.subr.mxu0 %v5987_v20  ;;  %1366 = vmatprep.subr.mxu1 %v5989_v21 }
 0x25d   :  { %1296 = vmatpush1.msra.mxu0 %v5993_v22  ;;  %1367 = vmatpush1.msra.mxu1 %v5995_v23 }
 0x25e   :  { %1297 = vmatprep.subr.mxu0 %v5999_v25  ;;  %1368 = vmatprep.subr.mxu1 %v6001_v26 }
 0x25f   :  { %1298 = vmatpush1.msra.mxu0 %v6005_v27  ;;  %1369 = vmatpush1.msra.mxu1 %v6007_v28 }
 0x260   :  { %1299 = vmatprep.subr.mxu0 %v6011_v29  ;;  %1370 = vmatprep.subr.mxu1 %v6013_v30 }
 0x261   :  { %1300 = vmatpush1.msra.mxu0 %v6017_v31  ;;  %1371 = vmatpush1.msra.mxu1 %v6019_v33 }
 0x262   :  { %1301 = vmatprep.subr.mxu0 %v6023_v34  ;;  %1372 = vmatprep.subr.mxu1 %v6025_v36 }
 0x263   :  { %1302 = vmatpush1.msra.mxu0 %v6029_v37  ;;  %1373 = vmatpush1.msra.mxu1 %v6031_v39 }
 0x264   :  { %1303 = vmatprep.subr.mxu0 %v6035_v40  ;;  %1374 = vmatprep.subr.mxu1 %v6037_v41 }
 0x265   :  { %1304 = vmatpush1.msra.mxu0 %v6041_v44  ;;  %1375 = vmatpush1.msra.mxu1 %v6043_v45 }
 0x266   :  { %1305 = vmatprep.subr.mxu0 %v6047_v52  ;;  %1376 = vmatprep.subr.mxu1 %v6049_v56 }
 0x267   :  { %1306 = vmatpush1.msra.mxu0 %v6053_v48  ;;  %1377 = vmatpush1.msra.mxu1 %v6055_v57 }
 0x268   :  { %1307 = vmatprep.subr.mxu0 %v6059_v3  ;;  %1378 = vmatprep.subr.mxu1 %v6061_v59 }
 0x269   :  { %1308 = vmatpush1.msra.mxu0 %v6065_v63  ;;  %1379 = vmatpush1.msra.mxu1 %v6067_v47 }
 0x26a   :  { %1309 = vmatprep.subr.mxu0 %v6071_v58  ;;  %1380 = vmatprep.subr.mxu1 %v6073_v53  ;;  %v6103_v58 = vld [vmem:[#allocation4 + $0x90] sm:$0xff]  ;;  %v6107_v53 = vld [vmem:[#allocation4 + $0x68] sm:$0xff] }
 0x26b   :  { %1310 = vmatpush1.msra.mxu0 %v6077_v51  ;;  %1381 = vmatpush1.msra.mxu1 %v6079_v2  ;;  %9459 = vst [vmem:[#allocation25_spill] sm:$0xff] %v6103_v58  ;;  %9460 = vst [vmem:[#allocation26_spill] sm:$0xff] %v6107_v53  ;;  %v6109_v51 = vld [vmem:[#allocation4 + $0x78] sm:$0xff]  ;;  %v6113_v2 = vld [vmem:[#allocation4 + $0x60] sm:$0xff] }
 0x26c   :  { %1311 = vmatprep.subr.mxu0 %v6083_v5  ;;  %1382 = vmatprep.subr.mxu1 %v6085_v7  ;;  %9461 = vst [vmem:[#allocation27_spill] sm:$0xff] %v6109_v51  ;;  %9462 = vst [vmem:[#allocation28_spill] sm:$0xff] %v6113_v2  ;;  %v6115_v5 = vld [vmem:[#allocation4 + $0x70] sm:$0xff]  ;;  %v6119_v7 = vld [vmem:[#allocation4 + $0x48] sm:$0xff] }
 0x26d   :  { %1312 = vmatpush1.msra.mxu0 %v6089_v8  ;;  %1383 = vmatpush1.msra.mxu1 %v6091_v9  ;;  %9463 = vst [vmem:[#allocation29_spill] sm:$0xff] %v6115_v5  ;;  %v6121_v8 = vld [vmem:[#allocation4 + $0x58] sm:$0xff]  ;;  %v6125_v9 = vld [vmem:[#allocation4 + $0x40] sm:$0xff] }
 0x26e   :  { %1313 = vmatprep.subr.mxu0 %v6095_v10  ;;  %1384 = vmatprep.subr.mxu1 %v6097_v1  ;;  %9464 = vst [vmem:[#allocation30_spill] sm:$0xff] %v6121_v8  ;;  %9465 = vst [vmem:[#allocation31_spill] sm:$0xff] %v6125_v9  ;;  %v6127_v10 = vld [vmem:[#allocation4 + $0x50] sm:$0xff]  ;;  %v6131_v1 = vld [vmem:[#allocation4 + $0x28] sm:$0xff] }
 0x26f   :  { %1314 = vmatpush1.msra.mxu0 %v6101_v12  ;;  %1385 = vmatpush1.msra.mxu1 %v6103_v58  ;;  %9466 = vst [vmem:[#allocation32_spill] sm:$0xff] %v6127_v10  ;;  %9467 = vst [vmem:[#allocation33_spill] sm:$0xff] %v6131_v1  ;;  %v6133_v12 = vld [vmem:[#allocation4 + $0x38] sm:$0xff]  ;;  %v6137_v58 = vld [vmem:[#allocation4 + $0x20] sm:$0xff] }
 0x270   :  { %1315 = vmatprep.subr.mxu0 %v6107_v53  ;;  %1386 = vmatprep.subr.mxu1 %v6109_v51  ;;  %9468 = vst [vmem:[#allocation34_spill] sm:$0xff] %v6133_v12  ;;  %9469 = vst [vmem:[#allocation35_spill] sm:$0xff] %v6137_v58  ;;  %v6139_v53 = vld [vmem:[#allocation4 + $0x30] sm:$0xff]  ;;  %v6143_v51 = vld [vmem:[#allocation4 + $0x8] sm:$0xff] }
 0x271   :  { %1316 = vmatpush1.msra.mxu0 %v6113_v2  ;;  %1387 = vmatpush1.msra.mxu1 %v6115_v5  ;;  %9470 = vst [vmem:[#allocation36_spill] sm:$0xff] %v6139_v53  ;;  %9471 = vst [vmem:[#allocation37_spill] sm:$0xff] %v6143_v51  ;;  %v6145_v2 = vld [vmem:[#allocation4 + $0x18] sm:$0xff]  ;;  %v6149_v5 = vld [vmem:[#allocation4] sm:$0xff] }
 0x272   :  { %1317 = vmatprep.subr.mxu0 %v6119_v7  ;;  %1388 = vmatprep.subr.mxu1 %v6121_v8  ;;  %9472 = vst [vmem:[#allocation38_spill] sm:$0xff] %v6145_v2  ;;  %9473 = vst [vmem:[#allocation39_spill] sm:$0xff] %v6149_v5  ;;  %v6153_v8 = vld [vmem:[#allocation4 + $0x10] sm:$0xff] }
 0x273   :  { %1318 = vmatpush1.msra.mxu0 %v6125_v9  ;;  %1389 = vmatpush1.msra.mxu1 %v6127_v10  ;;  %9474 = vst [vmem:[#allocation40_spill] sm:$0xff] %v6153_v8  ;;  %v6477_v10 = vld [vmem:[#allocation6 + $0x2a0] sm:$0xff] }
 0x274   :  { %1319 = vmatprep.subr.mxu0 %v6131_v1  ;;  %1390 = vmatprep.subr.mxu1 %v6133_v12  ;;  %v6453_v12 = vld [vmem:[#allocation6 + $0x2e0] sm:$0xff]  ;;  %v6461_v1 = vld [vmem:[#allocation6 + $0x2d8] sm:$0xff]  ;;  %9581 = vst [vmem:[#allocation147_spill] sm:$0xff] %v6477_v10 }
 0x275   :  { %1320 = vmatpush1.msra.mxu0 %v6137_v58  ;;  %1391 = vmatpush1.msra.mxu1 %v6139_v53  ;;  %v6163_v58 = vld [vmem:[#allocation6 + $0x1e8] sm:$0xff]  ;;  %v6165_v53 = vld [vmem:[#allocation6 + $0x1f8] sm:$0xff]  ;;  %9573 = vst [vmem:[#allocation139_spill] sm:$0xff] %v6453_v12  ;;  %9576 = vst [vmem:[#allocation142_spill] sm:$0xff] %v6461_v1 }
 0x276   :  { %1321 = vmatprep.subr.mxu0 %v6143_v51  ;;  %1392 = vmatprep.subr.mxu1 %v6145_v2  ;;  %9475 = vst [vmem:[#allocation41_spill] sm:$0xff] %v6163_v58  ;;  %9476 = vst [vmem:[#allocation42_spill] sm:$0xff] %v6165_v53  ;;  %v6169_v2 = vld [vmem:[#allocation6 + $0x1e0] sm:$0xff]  ;;  %v6445_v51 = vld [vmem:[#allocation6 + $0x310] sm:$0xff] }
 0x277   :  { %1322 = vmatpush1.msra.mxu0 %v6149_v5  ;;  %1355 = vmatprep.mubr.f32.mxu0 %v9308_v24  ;;  %9477 = vst [vmem:[#allocation43_spill] sm:$0xff] %v6169_v2  ;;  %v6171_v5 = vld [vmem:[#allocation6 + $0x1f0] sm:$0xff]  ;;  %9570 = vst [vmem:[#allocation136_spill] sm:$0xff] %v6445_v51 }
 0x278   :  { %1393 = vmatpush1.msra.mxu1 %v6153_v8  ;;  %1426 = vmatprep.mubr.f32.mxu1 %v9308_v24  ;;  %9478 = vst [vmem:[#allocation44_spill] sm:$0xff] %v6171_v5  ;;  %v6175_v8 = vld [vmem:[#allocation6 + $0x1c8] sm:$0xff]  ;;  %v6177_v24 = vld [vmem:[#allocation6 + $0x1d8] sm:$0xff] }
 0x279   :  { %1356 = vmatmul.mubr.f32.vlgmr.msra.gmra.mxu0 %v5969_v13  ;;  %1427 = vmatmul.mubr.f32.vlgmr.msra.gmra.mxu1 %v5969_v13  ;;  %9479 = vst [vmem:[#allocation45_spill] sm:$0xff] %v6175_v8  ;;  %9480 = vst [vmem:[#allocation46_spill] sm:$0xff] %v6177_v24  ;;  %v6181_v13 = vld [vmem:[#allocation6 + $0x1c0] sm:$0xff] }
 0x27a   :  { %1593 = vmatprep.subr.mxu0 %v6163_v58  ;;  %1664 = vmatprep.subr.mxu1 %v6165_v53  ;;  %9481 = vst [vmem:[#allocation47_spill] sm:$0xff] %v6181_v13  ;;  %v6183_v58 = vld [vmem:[#allocation6 + $0x1d0] sm:$0xff]  ;;  %v6187_v53 = vld [vmem:[#allocation6 + $0x1a8] sm:$0xff] }
 0x27b   :  { %1594 = vmatpush1.msra.mxu0 %v6169_v2  ;;  %1665 = vmatpush1.msra.mxu1 %v6171_v5  ;;  %9482 = vst [vmem:[#allocation48_spill] sm:$0xff] %v6183_v58  ;;  %9483 = vst [vmem:[#allocation49_spill] sm:$0xff] %v6187_v53  ;;  %v6189_v2 = vld [vmem:[#allocation6 + $0x1b8] sm:$0xff]  ;;  %v6193_v5 = vld [vmem:[#allocation6 + $0x1a0] sm:$0xff] }
 0x27c   :  { %1595 = vmatprep.subr.mxu0 %v6175_v8  ;;  %1666 = vmatprep.subr.mxu1 %v6177_v24  ;;  %9484 = vst [vmem:[#allocation50_spill] sm:$0xff] %v6189_v2  ;;  %9485 = vst [vmem:[#allocation51_spill] sm:$0xff] %v6193_v5  ;;  %v6195_v8 = vld [vmem:[#allocation6 + $0x1b0] sm:$0xff]  ;;  %v6199_v24 = vld [vmem:[#allocation6 + $0x188] sm:$0xff] }
 0x27d   :  { %1596 = vmatpush1.msra.mxu0 %v6181_v13  ;;  %1667 = vmatpush1.msra.mxu1 %v6183_v58  ;;  %9486 = vst [vmem:[#allocation52_spill] sm:$0xff] %v6195_v8  ;;  %9487 = vst [vmem:[#allocation53_spill] sm:$0xff] %v6199_v24  ;;  %v6201_v13 = vld [vmem:[#allocation6 + $0x198] sm:$0xff]  ;;  %v6205_v58 = vld [vmem:[#allocation6 + $0x180] sm:$0xff] }
 0x27e   :  { %1597 = vmatprep.subr.mxu0 %v6187_v53  ;;  %1668 = vmatprep.subr.mxu1 %v6189_v2  ;;  %9488 = vst [vmem:[#allocation54_spill] sm:$0xff] %v6201_v13  ;;  %9489 = vst [vmem:[#allocation55_spill] sm:$0xff] %v6205_v58  ;;  %v6207_v53 = vld [vmem:[#allocation6 + $0x190] sm:$0xff]  ;;  %v6211_v2 = vld [vmem:[#allocation6 + $0x168] sm:$0xff] }
 0x27f   :  { %1598 = vmatpush1.msra.mxu0 %v6193_v5  ;;  %1669 = vmatpush1.msra.mxu1 %v6195_v8  ;;  %9490 = vst [vmem:[#allocation56_spill] sm:$0xff] %v6207_v53  ;;  %9491 = vst [vmem:[#allocation57_spill] sm:$0xff] %v6211_v2  ;;  %v6213_v5 = vld [vmem:[#allocation6 + $0x178] sm:$0xff]  ;;  %v6217_v8 = vld [vmem:[#allocation6 + $0x160] sm:$0xff] }
 0x280   :  { %1599 = vmatprep.subr.mxu0 %v6199_v24  ;;  %1670 = vmatprep.subr.mxu1 %v6201_v13  ;;  %9492 = vst [vmem:[#allocation58_spill] sm:$0xff] %v6213_v5  ;;  %9493 = vst [vmem:[#allocation59_spill] sm:$0xff] %v6217_v8  ;;  %v6219_v24 = vld [vmem:[#allocation6 + $0x170] sm:$0xff]  ;;  %v6223_v13 = vld [vmem:[#allocation6 + $0x148] sm:$0xff] }
 0x281   :  { %1600 = vmatpush1.msra.mxu0 %v6205_v58  ;;  %1671 = vmatpush1.msra.mxu1 %v6207_v53  ;;  %9494 = vst [vmem:[#allocation60_spill] sm:$0xff] %v6219_v24  ;;  %9495 = vst [vmem:[#allocation61_spill] sm:$0xff] %v6223_v13  ;;  %v6225_v58 = vld [vmem:[#allocation6 + $0x158] sm:$0xff]  ;;  %v6229_v53 = vld [vmem:[#allocation6 + $0x140] sm:$0xff] }
 0x282   :  { %1601 = vmatprep.subr.mxu0 %v6211_v2  ;;  %1672 = vmatprep.subr.mxu1 %v6213_v5  ;;  %9496 = vst [vmem:[#allocation62_spill] sm:$0xff] %v6225_v58  ;;  %9497 = vst [vmem:[#allocation63_spill] sm:$0xff] %v6229_v53  ;;  %v6231_v2 = vld [vmem:[#allocation6 + $0x150] sm:$0xff]  ;;  %v6235_v5 = vld [vmem:[#allocation6 + $0x128] sm:$0xff] }
 0x283   :  { %1602 = vmatpush1.msra.mxu0 %v6217_v8  ;;  %1673 = vmatpush1.msra.mxu1 %v6219_v24  ;;  %9498 = vst [vmem:[#allocation64_spill] sm:$0xff] %v6231_v2  ;;  %9499 = vst [vmem:[#allocation65_spill] sm:$0xff] %v6235_v5  ;;  %v6237_v8 = vld [vmem:[#allocation6 + $0x138] sm:$0xff]  ;;  %v6241_v24 = vld [vmem:[#allocation6 + $0x120] sm:$0xff] }
 0x284   :  { %1603 = vmatprep.subr.mxu0 %v6223_v13  ;;  %1674 = vmatprep.subr.mxu1 %v6225_v58  ;;  %9500 = vst [vmem:[#allocation66_spill] sm:$0xff] %v6237_v8  ;;  %9501 = vst [vmem:[#allocation67_spill] sm:$0xff] %v6241_v24  ;;  %v6243_v13 = vld [vmem:[#allocation6 + $0x130] sm:$0xff]  ;;  %v6247_v58 = vld [vmem:[#allocation6 + $0x108] sm:$0xff] }
 0x285   :  { %1604 = vmatpush1.msra.mxu0 %v6229_v53  ;;  %1675 = vmatpush1.msra.mxu1 %v6231_v2  ;;  %9502 = vst [vmem:[#allocation68_spill] sm:$0xff] %v6243_v13  ;;  %9503 = vst [vmem:[#allocation69_spill] sm:$0xff] %v6247_v58  ;;  %v6249_v53 = vld [vmem:[#allocation6 + $0x118] sm:$0xff]  ;;  %v6253_v2 = vld [vmem:[#allocation6 + $0x100] sm:$0xff] }
 0x286   :  { %1605 = vmatprep.subr.mxu0 %v6235_v5  ;;  %1676 = vmatprep.subr.mxu1 %v6237_v8  ;;  %9504 = vst [vmem:[#allocation70_spill] sm:$0xff] %v6249_v53  ;;  %9505 = vst [vmem:[#allocation71_spill] sm:$0xff] %v6253_v2  ;;  %v6255_v5 = vld [vmem:[#allocation6 + $0x110] sm:$0xff]  ;;  %v6259_v8 = vld [vmem:[#allocation6 + $0xe8] sm:$0xff] }
 0x287   :  { %1606 = vmatpush1.msra.mxu0 %v6241_v24  ;;  %1677 = vmatpush1.msra.mxu1 %v6243_v13  ;;  %9506 = vst [vmem:[#allocation72_spill] sm:$0xff] %v6255_v5  ;;  %9507 = vst [vmem:[#allocation73_spill] sm:$0xff] %v6259_v8  ;;  %v6261_v24 = vld [vmem:[#allocation6 + $0xf8] sm:$0xff]  ;;  %v6265_v13 = vld [vmem:[#allocation6 + $0xe0] sm:$0xff] }
 0x288   :  { %1607 = vmatprep.subr.mxu0 %v6247_v58  ;;  %1678 = vmatprep.subr.mxu1 %v6249_v53  ;;  %9508 = vst [vmem:[#allocation74_spill] sm:$0xff] %v6261_v24  ;;  %9509 = vst [vmem:[#allocation75_spill] sm:$0xff] %v6265_v13  ;;  %v6267_v58 = vld [vmem:[#allocation6 + $0xf0] sm:$0xff]  ;;  %v6271_v53 = vld [vmem:[#allocation6 + $0xc8] sm:$0xff] }
 0x289   :  { %1608 = vmatpush1.msra.mxu0 %v6253_v2  ;;  %1679 = vmatpush1.msra.mxu1 %v6255_v5  ;;  %9510 = vst [vmem:[#allocation76_spill] sm:$0xff] %v6267_v58  ;;  %9511 = vst [vmem:[#allocation77_spill] sm:$0xff] %v6271_v53  ;;  %v6273_v2 = vld [vmem:[#allocation6 + $0xd8] sm:$0xff]  ;;  %v6277_v5 = vld [vmem:[#allocation6 + $0xc0] sm:$0xff] }
 0x28a   :  { %1609 = vmatprep.subr.mxu0 %v6259_v8  ;;  %1680 = vmatprep.subr.mxu1 %v6261_v24  ;;  %9512 = vst [vmem:[#allocation78_spill] sm:$0xff] %v6273_v2  ;;  %9513 = vst [vmem:[#allocation79_spill] sm:$0xff] %v6277_v5  ;;  %v6279_v8 = vld [vmem:[#allocation6 + $0xd0] sm:$0xff]  ;;  %v6283_v24 = vld [vmem:[#allocation6 + $0xa8] sm:$0xff] }
 0x28b   :  { %1610 = vmatpush1.msra.mxu0 %v6265_v13  ;;  %1681 = vmatpush1.msra.mxu1 %v6267_v58  ;;  %9514 = vst [vmem:[#allocation80_spill] sm:$0xff] %v6279_v8  ;;  %9515 = vst [vmem:[#allocation81_spill] sm:$0xff] %v6283_v24  ;;  %v6285_v13 = vld [vmem:[#allocation6 + $0xb8] sm:$0xff]  ;;  %v6289_v58 = vld [vmem:[#allocation6 + $0xa0] sm:$0xff] }
 0x28c   :  { %1611 = vmatprep.subr.mxu0 %v6271_v53  ;;  %1682 = vmatprep.subr.mxu1 %v6273_v2  ;;  %9516 = vst [vmem:[#allocation82_spill] sm:$0xff] %v6285_v13  ;;  %9517 = vst [vmem:[#allocation83_spill] sm:$0xff] %v6289_v58  ;;  %v6291_v53 = vld [vmem:[#allocation6 + $0xb0] sm:$0xff]  ;;  %v6295_v2 = vld [vmem:[#allocation6 + $0x88] sm:$0xff] }
 0x28d   :  { %1612 = vmatpush1.msra.mxu0 %v6277_v5  ;;  %1683 = vmatpush1.msra.mxu1 %v6279_v8  ;;  %9518 = vst [vmem:[#allocation84_spill] sm:$0xff] %v6291_v53  ;;  %9519 = vst [vmem:[#allocation85_spill] sm:$0xff] %v6295_v2  ;;  %v6297_v5 = vld [vmem:[#allocation6 + $0x98] sm:$0xff]  ;;  %v6301_v8 = vld [vmem:[#allocation6 + $0x80] sm:$0xff] }
 0x28e   :  { %1613 = vmatprep.subr.mxu0 %v6283_v24  ;;  %1684 = vmatprep.subr.mxu1 %v6285_v13  ;;  %9520 = vst [vmem:[#allocation86_spill] sm:$0xff] %v6297_v5  ;;  %9521 = vst [vmem:[#allocation87_spill] sm:$0xff] %v6301_v8  ;;  %v6303_v24 = vld [vmem:[#allocation6 + $0x90] sm:$0xff]  ;;  %v6307_v13 = vld [vmem:[#allocation6 + $0x68] sm:$0xff] }
 0x28f   :  { %1614 = vmatpush1.msra.mxu0 %v6289_v58  ;;  %1685 = vmatpush1.msra.mxu1 %v6291_v53  ;;  %9522 = vst [vmem:[#allocation88_spill] sm:$0xff] %v6303_v24  ;;  %9523 = vst [vmem:[#allocation89_spill] sm:$0xff] %v6307_v13  ;;  %v6309_v58 = vld [vmem:[#allocation6 + $0x78] sm:$0xff]  ;;  %v6313_v53 = vld [vmem:[#allocation6 + $0x60] sm:$0xff] }
 0x290   :  { %1615 = vmatprep.subr.mxu0 %v6295_v2  ;;  %1686 = vmatprep.subr.mxu1 %v6297_v5  ;;  %9524 = vst [vmem:[#allocation90_spill] sm:$0xff] %v6309_v58  ;;  %9525 = vst [vmem:[#allocation91_spill] sm:$0xff] %v6313_v53  ;;  %v6315_v2 = vld [vmem:[#allocation6 + $0x70] sm:$0xff]  ;;  %v6319_v5 = vld [vmem:[#allocation6 + $0x48] sm:$0xff] }
 0x291   :  { %1616 = vmatpush1.msra.mxu0 %v6301_v8  ;;  %1687 = vmatpush1.msra.mxu1 %v6303_v24  ;;  %9526 = vst [vmem:[#allocation92_spill] sm:$0xff] %v6315_v2  ;;  %9527 = vst [vmem:[#allocation93_spill] sm:$0xff] %v6319_v5  ;;  %v6321_v8 = vld [vmem:[#allocation6 + $0x58] sm:$0xff]  ;;  %v6325_v24 = vld [vmem:[#allocation6 + $0x40] sm:$0xff] }
 0x292   :  { %1617 = vmatprep.subr.mxu0 %v6307_v13  ;;  %1688 = vmatprep.subr.mxu1 %v6309_v58  ;;  %9528 = vst [vmem:[#allocation94_spill] sm:$0xff] %v6321_v8  ;;  %9529 = vst [vmem:[#allocation95_spill] sm:$0xff] %v6325_v24  ;;  %v6327_v13 = vld [vmem:[#allocation6 + $0x50] sm:$0xff]  ;;  %v6331_v58 = vld [vmem:[#allocation6 + $0x28] sm:$0xff] }
 0x293   :  { %1618 = vmatpush1.msra.mxu0 %v6313_v53  ;;  %1689 = vmatpush1.msra.mxu1 %v6315_v2  ;;  %9530 = vst [vmem:[#allocation96_spill] sm:$0xff] %v6327_v13  ;;  %9531 = vst [vmem:[#allocation97_spill] sm:$0xff] %v6331_v58  ;;  %v6333_v53 = vld [vmem:[#allocation6 + $0x38] sm:$0xff]  ;;  %v6337_v2 = vld [vmem:[#allocation6 + $0x20] sm:$0xff] }
 0x294   :  { %1619 = vmatprep.subr.mxu0 %v6319_v5  ;;  %1690 = vmatprep.subr.mxu1 %v6321_v8  ;;  %9532 = vst [vmem:[#allocation98_spill] sm:$0xff] %v6333_v53  ;;  %9533 = vst [vmem:[#allocation99_spill] sm:$0xff] %v6337_v2  ;;  %v6339_v5 = vld [vmem:[#allocation6 + $0x30] sm:$0xff]  ;;  %v6343_v8 = vld [vmem:[#allocation6 + $0x8] sm:$0xff] }
 0x295   :  { %1620 = vmatpush1.msra.mxu0 %v6325_v24  ;;  %1691 = vmatpush1.msra.mxu1 %v6327_v13  ;;  %9534 = vst [vmem:[#allocation100_spill] sm:$0xff] %v6339_v5  ;;  %9535 = vst [vmem:[#allocation101_spill] sm:$0xff] %v6343_v8  ;;  %v6345_v24 = vld [vmem:[#allocation6 + $0x18] sm:$0xff]  ;;  %v6349_v13 = vld [vmem:[#allocation6] sm:$0xff] }
 0x296   :  { %1621 = vmatprep.subr.mxu0 %v6331_v58  ;;  %1692 = vmatprep.subr.mxu1 %v6333_v53  ;;  %9536 = vst [vmem:[#allocation102_spill] sm:$0xff] %v6345_v24  ;;  %9537 = vst [vmem:[#allocation103_spill] sm:$0xff] %v6349_v13  ;;  %v6351_v58 = vld [vmem:[#allocation6 + $0x10] sm:$0xff]  ;;  %v6355_v53 = vld [vmem:[#allocation6 + $0x3e8] sm:$0xff] }
 0x297   :  { %1622 = vmatpush1.msra.mxu0 %v6337_v2  ;;  %1693 = vmatpush1.msra.mxu1 %v6339_v5  ;;  %9538 = vst [vmem:[#allocation104_spill] sm:$0xff] %v6351_v58  ;;  %9539 = vst [vmem:[#allocation105_spill] sm:$0xff] %v6355_v53  ;;  %v6357_v2 = vld [vmem:[#allocation6 + $0x3f8] sm:$0xff]  ;;  %v6361_v5 = vld [vmem:[#allocation6 + $0x3e0] sm:$0xff] }
 0x298   :  { %1623 = vmatprep.subr.mxu0 %v6343_v8  ;;  %1694 = vmatprep.subr.mxu1 %v6345_v24  ;;  %9540 = vst [vmem:[#allocation106_spill] sm:$0xff] %v6357_v2  ;;  %9541 = vst [vmem:[#allocation107_spill] sm:$0xff] %v6361_v5  ;;  %v6363_v8 = vld [vmem:[#allocation6 + $0x3f0] sm:$0xff]  ;;  %v6367_v24 = vld [vmem:[#allocation6 + $0x3c8] sm:$0xff] }
 0x299   :  { %1624 = vmatpush1.msra.mxu0 %v6349_v13  ;;  %1695 = vmatpush1.msra.mxu1 %v6351_v58  ;;  %9542 = vst [vmem:[#allocation108_spill] sm:$0xff] %v6363_v8  ;;  %9543 = vst [vmem:[#allocation109_spill] sm:$0xff] %v6367_v24  ;;  %v6369_v13 = vld [vmem:[#allocation6 + $0x3d8] sm:$0xff]  ;;  %v6373_v58 = vld [vmem:[#allocation6 + $0x3c0] sm:$0xff] }
 0x29a   :  { %1625 = vmatprep.subr.mxu0 %v6355_v53  ;;  %1696 = vmatprep.subr.mxu1 %v6357_v2  ;;  %9544 = vst [vmem:[#allocation110_spill] sm:$0xff] %v6369_v13  ;;  %9545 = vst [vmem:[#allocation111_spill] sm:$0xff] %v6373_v58  ;;  %v6375_v53 = vld [vmem:[#allocation6 + $0x3d0] sm:$0xff]  ;;  %v6379_v2 = vld [vmem:[#allocation6 + $0x3a8] sm:$0xff] }
 0x29b   :  { %1626 = vmatpush2.msra.mxu0 %v6361_v5  ;;  %1697 = vmatpush2.msra.mxu1 %v6363_v8  ;;  %9546 = vst [vmem:[#allocation112_spill] sm:$0xff] %v6375_v53  ;;  %9547 = vst [vmem:[#allocation113_spill] sm:$0xff] %v6379_v2  ;;  %v6381_v5 = vld [vmem:[#allocation6 + $0x3b8] sm:$0xff]  ;;  %v6385_v8 = vld [vmem:[#allocation6 + $0x3a0] sm:$0xff] }
 0x29c   :  { %1627 = vmatprep.subr.mxu0 %v6367_v24  ;;  %1698 = vmatprep.subr.mxu1 %v6369_v13  ;;  %9548 = vst [vmem:[#allocation114_spill] sm:$0xff] %v6381_v5  ;;  %9549 = vst [vmem:[#allocation115_spill] sm:$0xff] %v6385_v8  ;;  %v6387_v24 = vld [vmem:[#allocation6 + $0x3b0] sm:$0xff]  ;;  %v6391_v13 = vld [vmem:[#allocation6 + $0x388] sm:$0xff] }
 0x29d   :  { %1628 = vmatpush2.msra.mxu0 %v6373_v58  ;;  %1699 = vmatpush2.msra.mxu1 %v6375_v53  ;;  %9550 = vst [vmem:[#allocation116_spill] sm:$0xff] %v6387_v24  ;;  %9551 = vst [vmem:[#allocation117_spill] sm:$0xff] %v6391_v13  ;;  %v6393_v58 = vld [vmem:[#allocation6 + $0x398] sm:$0xff]  ;;  %v6397_v53 = vld [vmem:[#allocation6 + $0x380] sm:$0xff] }
 0x29e   :  { %1629 = vmatprep.subr.mxu0 %v6379_v2  ;;  %1700 = vmatprep.subr.mxu1 %v6381_v5  ;;  %9552 = vst [vmem:[#allocation118_spill] sm:$0xff] %v6393_v58  ;;  %9553 = vst [vmem:[#allocation119_spill] sm:$0xff] %v6397_v53  ;;  %v6399_v2 = vld [vmem:[#allocation6 + $0x390] sm:$0xff]  ;;  %v6403_v5 = vld [vmem:[#allocation6 + $0x368] sm:$0xff] }
 0x29f   :  { %1630 = vmatpush2.msra.mxu0 %v6385_v8  ;;  %1701 = vmatpush2.msra.mxu1 %v6387_v24  ;;  %9554 = vst [vmem:[#allocation120_spill] sm:$0xff] %v6399_v2  ;;  %9555 = vst [vmem:[#allocation121_spill] sm:$0xff] %v6403_v5  ;;  %v6405_v8 = vld [vmem:[#allocation6 + $0x378] sm:$0xff]  ;;  %v6409_v24 = vld [vmem:[#allocation6 + $0x360] sm:$0xff] }
 0x2a0   :  { %1631 = vmatprep.subr.mxu0 %v6391_v13  ;;  %1702 = vmatprep.subr.mxu1 %v6393_v58  ;;  %9556 = vst [vmem:[#allocation122_spill] sm:$0xff] %v6405_v8  ;;  %9557 = vst [vmem:[#allocation123_spill] sm:$0xff] %v6409_v24  ;;  %v6411_v13 = vld [vmem:[#allocation6 + $0x370] sm:$0xff]  ;;  %v6415_v58 = vld [vmem:[#allocation6 + $0x348] sm:$0xff] }
 0x2a1   :  { %1632 = vmatpush2.msra.mxu0 %v6397_v53  ;;  %1703 = vmatpush2.msra.mxu1 %v6399_v2  ;;  %9558 = vst [vmem:[#allocation124_spill] sm:$0xff] %v6411_v13  ;;  %9559 = vst [vmem:[#allocation125_spill] sm:$0xff] %v6415_v58  ;;  %v6417_v53 = vld [vmem:[#allocation6 + $0x358] sm:$0xff]  ;;  %v6421_v2 = vld [vmem:[#allocation6 + $0x340] sm:$0xff] }
 0x2a2   :  { %1633 = vmatprep.subr.mxu0 %v6403_v5  ;;  %1704 = vmatprep.subr.mxu1 %v6405_v8  ;;  %9560 = vst [vmem:[#allocation126_spill] sm:$0xff] %v6417_v53  ;;  %9561 = vst [vmem:[#allocation127_spill] sm:$0xff] %v6421_v2  ;;  %v6423_v5 = vld [vmem:[#allocation6 + $0x350] sm:$0xff]  ;;  %v6427_v8 = vld [vmem:[#allocation6 + $0x328] sm:$0xff] }
 0x2a3   :  { %1634 = vmatpush2.msra.mxu0 %v6409_v24  ;;  %1705 = vmatpush2.msra.mxu1 %v6411_v13  ;;  %9562 = vst [vmem:[#allocation128_spill] sm:$0xff] %v6423_v5  ;;  %9563 = vst [vmem:[#allocation129_spill] sm:$0xff] %v6427_v8  ;;  %v6429_v24 = vld [vmem:[#allocation6 + $0x338] sm:$0xff]  ;;  %v6433_v13 = vld [vmem:[#allocation6 + $0x320] sm:$0xff] }
 0x2a4   :  { %1635 = vmatprep.subr.mxu0 %v6415_v58  ;;  %1706 = vmatprep.subr.mxu1 %v6417_v53  ;;  %9564 = vst [vmem:[#allocation130_spill] sm:$0xff] %v6429_v24  ;;  %9565 = vst [vmem:[#allocation131_spill] sm:$0xff] %v6433_v13  ;;  %v6435_v58 = vld [vmem:[#allocation6 + $0x330] sm:$0xff]  ;;  %v6437_v53 = vld [vmem:[#allocation6 + $0x308] sm:$0xff] }
 0x2a5   :  { %1636 = vmatpush2.msra.mxu0 %v6421_v2  ;;  %1707 = vmatpush2.msra.mxu1 %v6423_v5  ;;  %9566 = vst [vmem:[#allocation132_spill] sm:$0xff] %v6435_v58  ;;  %9567 = vst [vmem:[#allocation133_spill] sm:$0xff] %v6437_v53  ;;  %v6441_v2 = vld [vmem:[#allocation6 + $0x318] sm:$0xff]  ;;  %v6443_v5 = vld [vmem:[#allocation6 + $0x300] sm:$0xff] }
 0x2a6   :  { %1637 = vmatprep.subr.mxu0 %v6427_v8  ;;  %1708 = vmatprep.subr.mxu1 %v6429_v24  ;;  %9568 = vst [vmem:[#allocation134_spill] sm:$0xff] %v6441_v2  ;;  %9569 = vst [vmem:[#allocation135_spill] sm:$0xff] %v6443_v5  ;;  %v6449_v24 = vld [vmem:[#allocation6 + $0x2e8] sm:$0xff]  ;;  %v6451_v8 = vld [vmem:[#allocation6 + $0x2f8] sm:$0xff] }
 0x2a7   :  { %1638 = vmatpush2.msra.mxu0 %v6433_v13  ;;  %1709 = vmatpush2.msra.mxu1 %v6435_v58  ;;  %9571 = vst [vmem:[#allocation137_spill] sm:$0xff] %v6449_v24  ;;  %9572 = vst [vmem:[#allocation138_spill] sm:$0xff] %v6451_v8  ;;  %v6457_v58 = vld [vmem:[#allocation6 + $0x2f0] sm:$0xff]  ;;  %v6459_v13 = vld [vmem:[#allocation6 + $0x2c8] sm:$0xff] }
 0x2a8   :  { %1639 = vmatprep.subr.mxu0 %v6437_v53  ;;  %1710 = vmatprep.subr.mxu1 %v6441_v2  ;;  %9574 = vst [vmem:[#allocation140_spill] sm:$0xff] %v6457_v58  ;;  %9575 = vst [vmem:[#allocation141_spill] sm:$0xff] %v6459_v13  ;;  %v6465_v2 = vld [vmem:[#allocation6 + $0x2c0] sm:$0xff]  ;;  %v6467_v53 = vld [vmem:[#allocation6 + $0x2d0] sm:$0xff] }
 0x2a9   :  { %1640 = vmatpush2.msra.mxu0 %v6443_v5  ;;  %1711 = vmatpush2.msra.mxu1 %v6445_v51  ;;  %9577 = vst [vmem:[#allocation143_spill] sm:$0xff] %v6465_v2  ;;  %9578 = vst [vmem:[#allocation144_spill] sm:$0xff] %v6467_v53  ;;  %v6471_v5 = vld [vmem:[#allocation6 + $0x2a8] sm:$0xff]  ;;  %v6473_v51 = vld [vmem:[#allocation6 + $0x2b8] sm:$0xff] }
 0x2aa   :  { %1641 = vmatprep.subr.mxu0 %v6449_v24  ;;  %1712 = vmatprep.subr.mxu1 %v6451_v8  ;;  %9579 = vst [vmem:[#allocation145_spill] sm:$0xff] %v6471_v5  ;;  %9580 = vst [vmem:[#allocation146_spill] sm:$0xff] %v6473_v51  ;;  %v6479_v24 = vld [vmem:[#allocation6 + $0x2b0] sm:$0xff]  ;;  %v6483_v8 = vld [vmem:[#allocation6 + $0x288] sm:$0xff] }
 0x2ab   :  { %1642 = vmatpush2.msra.mxu0 %v6453_v12  ;;  %1713 = vmatpush2.msra.mxu1 %v6457_v58  ;;  %9582 = vst [vmem:[#allocation148_spill] sm:$0xff] %v6479_v24  ;;  %9583 = vst [vmem:[#allocation149_spill] sm:$0xff] %v6483_v8  ;;  %v6485_v12 = vld [vmem:[#allocation6 + $0x298] sm:$0xff]  ;;  %v6489_v58 = vld [vmem:[#allocation6 + $0x280] sm:$0xff] }
 0x2ac   :  { %1643 = vmatprep.subr.mxu0 %v6459_v13  ;;  %1714 = vmatprep.subr.mxu1 %v6461_v1  ;;  %9584 = vst [vmem:[#allocation150_spill] sm:$0xff] %v6485_v12  ;;  %9585 = vst [vmem:[#allocation151_spill] sm:$0xff] %v6489_v58  ;;  %v6491_v13 = vld [vmem:[#allocation6 + $0x290] sm:$0xff]  ;;  %v6495_v1 = vld [vmem:[#allocation6 + $0x268] sm:$0xff] }
 0x2ad   :  { %1644 = vmatpush2.msra.mxu0 %v6465_v2  ;;  %1715 = vmatpush2.msra.mxu1 %v6467_v53  ;;  %9586 = vst [vmem:[#allocation152_spill] sm:$0xff] %v6491_v13  ;;  %9587 = vst [vmem:[#allocation153_spill] sm:$0xff] %v6495_v1  ;;  %v6497_v2 = vld [vmem:[#allocation6 + $0x278] sm:$0xff]  ;;  %v6501_v53 = vld [vmem:[#allocation6 + $0x260] sm:$0xff] }
 0x2ae   :  { %1645 = vmatprep.subr.mxu0 %v6471_v5  ;;  %1716 = vmatprep.subr.mxu1 %v6473_v51  ;;  %9588 = vst [vmem:[#allocation154_spill] sm:$0xff] %v6497_v2  ;;  %9589 = vst [vmem:[#allocation155_spill] sm:$0xff] %v6501_v53  ;;  %v6503_v5 = vld [vmem:[#allocation6 + $0x270] sm:$0xff]  ;;  %v6507_v51 = vld [vmem:[#allocation6 + $0x248] sm:$0xff] }
 0x2af   :  { %1646 = vmatpush2.msra.mxu0 %v6477_v10  ;;  %1717 = vmatpush2.msra.mxu1 %v6479_v24  ;;  %9590 = vst [vmem:[#allocation156_spill] sm:$0xff] %v6503_v5  ;;  %9591 = vst [vmem:[#allocation157_spill] sm:$0xff] %v6507_v51  ;;  %v6509_v10 = vld [vmem:[#allocation6 + $0x258] sm:$0xff]  ;;  %v6513_v24 = vld [vmem:[#allocation6 + $0x240] sm:$0xff] }
 0x2b0   :  { %1647 = vmatprep.subr.mxu0 %v6483_v8  ;;  %1718 = vmatprep.subr.mxu1 %v6485_v12  ;;  %9592 = vst [vmem:[#allocation159_spill] sm:$0xff] %v6509_v10  ;;  %9593 = vst [vmem:[#allocation160_spill] sm:$0xff] %v6513_v24  ;;  %v6515_v8 = vld [vmem:[#allocation6 + $0x250] sm:$0xff]  ;;  %v6519_v12 = vld [vmem:[#allocation6 + $0x228] sm:$0xff] }
 0x2b1   :  { %1648 = vmatpush2.msra.mxu0 %v6489_v58  ;;  %1719 = vmatpush2.msra.mxu1 %v6491_v13  ;;  %9594 = vst [vmem:[#allocation163_spill] sm:$0xff] %v6515_v8  ;;  %9595 = vst [vmem:[#allocation164_spill] sm:$0xff] %v6519_v12  ;;  %v6521_v58 = vld [vmem:[#allocation6 + $0x238] sm:$0xff]  ;;  %v6525_v13 = vld [vmem:[#allocation6 + $0x220] sm:$0xff] }
 0x2b2   :  { %1649 = vmatprep.subr.mxu0 %v6495_v1  ;;  %1720 = vmatprep.subr.mxu1 %v6497_v2  ;;  %9596 = vst [vmem:[#allocation165_spill] sm:$0xff] %v6521_v58  ;;  %9597 = vst [vmem:[#allocation166_spill] sm:$0xff] %v6525_v13  ;;  %v6527_v1 = vld [vmem:[#allocation6 + $0x230] sm:$0xff]  ;;  %v6531_v2 = vld [vmem:[#allocation6 + $0x208] sm:$0xff] }
 0x2b3   :  { %1650 = vmatpush2.msra.mxu0 %v6501_v53  ;;  %1721 = vmatpush2.msra.mxu1 %v6503_v5  ;;  %9598 = vst [vmem:[#allocation167_spill] sm:$0xff] %v6527_v1  ;;  %9599 = vst [vmem:[#allocation168_spill] sm:$0xff] %v6531_v2  ;;  %v6533_v53 = vld [vmem:[#allocation6 + $0x218] sm:$0xff]  ;;  %v6537_v5 = vld [vmem:[#allocation6 + $0x200] sm:$0xff] }
 0x2b4   :  { %1651 = vmatprep.subr.mxu0 %v6507_v51  ;;  %1722 = vmatprep.subr.mxu1 %v6509_v10  ;;  %9600 = vst [vmem:[#allocation169_spill] sm:$0xff] %v6533_v53  ;;  %9601 = vst [vmem:[#allocation170_spill] sm:$0xff] %v6537_v5  ;;  %v6539_v51 = vld [vmem:[#allocation6 + $0x210] sm:$0xff] }
 0x2b5   :  { %1652 = vmatpush2.msra.mxu0 %v6513_v24  ;;  %1723 = vmatpush2.msra.mxu1 %v6515_v8  ;;  %9602 = vst [vmem:[#allocation171_spill] sm:$0xff] %v6539_v51 }
 0x2b6   :  { %1653 = vmatprep.subr.mxu0 %v6519_v12  ;;  %1724 = vmatprep.subr.mxu1 %v6521_v58 }
 0x2b7   :  { %1654 = vmatpush2.msra.mxu0 %v6525_v13  ;;  %1725 = vmatpush2.msra.mxu1 %v6527_v1 }
 0x2b8   :  { %1655 = vmatprep.subr.mxu0 %v6531_v2  ;;  %1726 = vmatprep.subr.mxu1 %v6533_v53 }
 0x2b9   :  { %1656 = vmatpush2.msra.mxu0 %v6537_v5  ;;  %1727 = vmatpush2.msra.mxu1 %v6539_v51 }
 0x2ba   :  { %1836 = vmatprep.subr.mxu0 %v5910_v42  ;;  %1907 = vmatprep.subr.mxu1 %v5912_v43 }
 0x318   :  { %v1114_v58 = vpop.f32.mrf.mxu0  ;;  %v1185_v1 = vpop.f32.mrf.mxu1 }
 0x319   :  { %v1115_v12 = vadd.f32 %v1114_v58, %v5920_v46  ;;  %v1186_v42 = vadd.f32 %v1185_v1, %v5944_v6 }
 0x31a   :  { %v1116_v8 = vpop.f32.mrf.mxu0  ;;  %v1187_v53 = vpop.f32.mrf.mxu1 }
 0x31b   :  { %v4636_v24 = vmul.f32 -1.442695, %v1115_v12  ;;  %v1117_v13 = vadd.f32 %v1116_v8, %v5926_v60  ;;  %v1188_v5 = vadd.f32 %v1187_v53, %v5937_v62  ;;  %v1221_v12 = vpop.permute.xlu1 %1220 }
 0x31c   :  { %v1223_v8 = vmul.f32 %v1221_v12, %v9444_v14 }
 0x31d   :  { %4740 = vpow2.f32 %v4636_v24  ;;  %v4637_v2 = vmul.f32 -1.442695, %v1117_v13  ;;  %v4638_v10 = vmul.f32 -1.442695, %v1188_v5 }
 0x31f   :  { %4742 = vpow2.f32 %v4637_v2  ;;  %v1224_v2 = vmul.f32 %v1221_v12, %v9445_v49  ;;  %v1226_v49 = vmul.f32 %v1221_v12, %v9446_v35 }
 0x320   :  { %4744 = vpow2.f32 %v4638_v10 }
 0x32a   :  { %v4741_v51 = vpop.eup %4740 }
 0x32b   :  { %v1193_v9 = vadd.f32 1.0, %v4741_v51 }
 0x32c   :  { %v4743_v43 = vpop.eup %4742 }
 0x32d   :  { %4746 = vrcp.f32 %v1193_v9  ;;  %v1199_v58 = vadd.f32 1.0, %v4743_v43  ;;  %v4745_v24 = vpop.eup %4744 }
 0x32e   :  { %4748 = vtanh.f32 %v1186_v42  ;;  %v1206_v62 = vadd.f32 1.0, %v4745_v24 }
 0x32f   :  { %4750 = vrcp.f32 %v1199_v58 }
 0x330   :  { %4752 = vrcp.f32 %v1206_v62 }
 0x339   :  { %v1357_v13 = vpop.f32.mrf.mxu0  ;;  %v1428_v10 = vpop.f32.mrf.mxu1 }
 0x33a   :  { %v4747_v60 = vpop.eup %4746  ;;  %v1433_v53 = vadd.f32 %v1357_v13, %v1223_v8 }
 0x33b   :  { %v4749_v5 = vpop.eup %4748  ;;  %v1359_v46 = vpop.f32.mrf.mxu0 }
 0x33c   :  { %v4751_v1 = vpop.eup %4750  ;;  %v1437_v51 = vadd.f32 %v1433_v53, %v5682_v61  ;;  %v1434_v9 = vadd.f32 %v1359_v46, %v1224_v2  ;;  %v1210_v43 = vmul.f32 %v4749_v5, %v4747_v60  ;;  %v1430_v24 = vpop.f32.mrf.mxu1  ;;  %v1225_v46 = vmul.f32 %v1221_v12, %v9447_v38 }
 0x33d   :  { %v1209_v42 = vmul.f32 %v4751_v1, %v5951_v32  ;;  %v1436_v13 = vadd.f32 %v1430_v24, %v1226_v49  ;;  %v4753_v53 = vpop.eup %4752 }
 0x33e   :  { %v4640_v58 = vmul.f32 -1.442695, %v1437_v51  ;;  %v1438_v14 = vadd.f32 %v1434_v9, %v5686_v54  ;;  %v1435_v32 = vadd.f32 %v1428_v10, %v1225_v46 }
 0x33f   :  { %v6559_v6 = vadd.f32 %v1210_v43, %v1209_v42  ;;  %v1440_v60 = vadd.f32 %v1436_v13, %v5701_v55 }
 0x340   :  { %4754 = vpow2.f32 %v4640_v58  ;;  %v4641_v8 = vmul.f32 -1.442695, %v1438_v14  ;;  %v1439_v62 = vadd.f32 %v1435_v32, %v5706_v50 }
 0x341   :  { %4756 = vtanh.f32 %v6559_v6  ;;  %v4642_v2 = vmul.f32 -1.442695, %v1440_v60 }
 0x342   :  { %4758 = vpow2.f32 %v4641_v8 }
 0x343   :  { %4760 = vpow2.f32 %v4642_v2 }
 0x34d   :  { %v4755_v5 = vpop.eup %4754 }
 0x34e   :  { %v4757_v1 = vpop.eup %4756  ;;  %v1444_v51 = vadd.f32 1.0, %v4755_v5 }
 0x34f   :  { %v4759_v9 = vpop.eup %4758  ;;  %v1213_v14 = vmul.f32 %v4757_v1, %v4753_v53  ;;  %v9641_v1 = vld [vmem:[#allocation51_spill] sm:$0xff] }
 0x350   :  { %4762 = vrcp.f32 %v1444_v51  ;;  %v1450_v43 = vadd.f32 1.0, %v4759_v9  ;;  %v4761_v42 = vpop.eup %4760  ;;  %v9642_v51 = vld [vmem:[#allocation52_spill] sm:$0xff]  ;;  %v9643_v9 = vld [vmem:[#allocation53_spill] sm:$0xff] }
 0x351   :  { %4764 = vtanh.f32 %v1439_v62  ;;  %1215 = vst [vmem:[#allocation2 + $0x4] sm:$0xf] %v1213_v14  ;;  %1657 = vmatprep.mubr.f32.mxu0 %v1213_v14  ;;  %1728 = vmatprep.mubr.f32.mxu1 %v1213_v14  ;;  %v1457_v13 = vadd.f32 1.0, %v4761_v42  ;;  %v9640_v62 = vld [vmem:[#allocation50_spill] sm:$0xff]  ;;  %v9649_v42 = vld [vmem:[#allocation59_spill] sm:$0xff] }
 0x352   :  { %4766 = vrcp.f32 %v1450_v43  ;;  %v9644_v14 = vld [vmem:[#allocation54_spill] sm:$0xff]  ;;  %v9645_v43 = vld [vmem:[#allocation55_spill] sm:$0xff] }
 0x353   :  { %4768 = vrcp.f32 %v1457_v13  ;;  %v9653_v13 = vld [vmem:[#allocation63_spill] sm:$0xff] }
 0x358   :  { %v4487_v49 = vld [vmem:[#allocation2 + $0x4] sm:$0xf] }
 0x359   :  { %v4502_v12 = vmul.f32 %v5961_v4, %v4487_v49  ;;  %v9603_v4 = vld [vmem:[#allocation14_spill] sm:$0xff]  ;;  %v9646_v49 = vld [vmem:[#allocation56_spill] sm:$0xff] }
 0x35b   :  { %v4513_v10 = vsel %vm4509_vm0, %v4502_v12, 0.0  ;;  %v9647_v12 = vld [vmem:[#allocation57_spill] sm:$0xff] }
 0x35c   :  { %4514 = vadd.xlane.f32.xlu1 %v4513_v10  ;;  %v9648_v10 = vld [vmem:[#allocation58_spill] sm:$0xff] }
 0x35d   :  { %v4763_v58 = vpop.eup %4762 }
 0x35e   :  { %v4765_v8 = vpop.eup %4764 }
 0x35f   :  { %v4767_v24 = vpop.eup %4766  ;;  %v1461_v46 = vmul.f32 %v4765_v8, %v4763_v58  ;;  %v9650_v58 = vld [vmem:[#allocation60_spill] sm:$0xff]  ;;  %v9651_v8 = vld [vmem:[#allocation61_spill] sm:$0xff] }
 0x360   :  { %v1460_v60 = vmul.f32 %v4767_v24, %v5966_v11  ;;  %v4769_v2 = vpop.eup %4768  ;;  %v9604_v11 = vld [vmem:[#allocation15_spill] sm:$0xff]  ;;  %v9652_v24 = vld [vmem:[#allocation62_spill] sm:$0xff] }
 0x362   :  { %v6568_v32 = vadd.f32 %v1461_v46, %v1460_v60  ;;  %v9654_v46 = vld [vmem:[#allocation64_spill] sm:$0xff]  ;;  %v9655_v60 = vld [vmem:[#allocation65_spill] sm:$0xff] }
 0x364   :  { %4770 = vtanh.f32 %v6568_v32 }
 0x371   :  { %v4771_v53 = vpop.eup %4770 }
 0x372   :  { %v6571_v5 = vmul.f32 %v4771_v53, %v4769_v2  ;;  %v9656_v2 = vld [vmem:[#allocation66_spill] sm:$0xff]  ;;  %v9657_v53 = vld [vmem:[#allocation67_spill] sm:$0xff] }
 0x374   :  { %1658 = vmatmul.mubr.f32.vlgmr.msra.gmra.mxu0 %v6571_v5  ;;  %1729 = vmatmul.mubr.f32.vlgmr.msra.gmra.mxu1 %v6571_v5 }
 0x375   :  { %1837 = vmatpush1.msra.mxu0 %v5971_v15  ;;  %1908 = vmatpush1.msra.mxu1 %v5973_v16  ;;  %v9605_v15 = vld [vmem:[#allocation16_spill] sm:$0xff]  ;;  %v9606_v16 = vld [vmem:[#allocation17_spill] sm:$0xff] }
 0x376   :  { %1838 = vmatprep.subr.mxu0 %v5975_v17  ;;  %1909 = vmatprep.subr.mxu1 %v5977_v18  ;;  %v9607_v17 = vld [vmem:[#allocation18_spill] sm:$0xff]  ;;  %v9608_v18 = vld [vmem:[#allocation19_spill] sm:$0xff] }
 0x377   :  { %1839 = vmatpush1.msra.mxu0 %v5981_v0  ;;  %1910 = vmatpush1.msra.mxu1 %v5983_v19  ;;  %v9609_v0 = vld [vmem:[#allocation20_spill] sm:$0xff]  ;;  %v9610_v19 = vld [vmem:[#allocation21_spill] sm:$0xff] }
 0x378   :  { %1840 = vmatprep.subr.mxu0 %v5987_v20  ;;  %1911 = vmatprep.subr.mxu1 %v5989_v21  ;;  %v9611_v20 = vld [vmem:[#allocation22_spill] sm:$0xff]  ;;  %v9612_v21 = vld [vmem:[#allocation23_spill] sm:$0xff] }
 0x379   :  { %1841 = vmatpush1.msra.mxu0 %v5993_v22  ;;  %1912 = vmatpush1.msra.mxu1 %v5995_v23  ;;  %v9613_v22 = vld [vmem:[#allocation24_spill] sm:$0xff]  ;;  %v9614_v23 = vld [vmem:[#allocation25_spill] sm:$0xff] }
 0x37a   :  { %1842 = vmatprep.subr.mxu0 %v5999_v25  ;;  %1913 = vmatprep.subr.mxu1 %v6001_v26  ;;  %v9615_v25 = vld [vmem:[#allocation26_spill] sm:$0xff]  ;;  %v9616_v26 = vld [vmem:[#allocation27_spill] sm:$0xff] }
 0x37b   :  { %1843 = vmatpush1.msra.mxu0 %v6005_v27  ;;  %1914 = vmatpush1.msra.mxu1 %v6007_v28  ;;  %v9617_v27 = vld [vmem:[#allocation28_spill] sm:$0xff]  ;;  %v9618_v28 = vld [vmem:[#allocation29_spill] sm:$0xff] }
 0x37c   :  { %1844 = vmatprep.subr.mxu0 %v6011_v29  ;;  %1915 = vmatprep.subr.mxu1 %v6013_v30  ;;  %v9619_v29 = vld [vmem:[#allocation30_spill] sm:$0xff]  ;;  %v9620_v30 = vld [vmem:[#allocation31_spill] sm:$0xff] }
 0x37d   :  { %1845 = vmatpush1.msra.mxu0 %v6017_v31  ;;  %1916 = vmatpush1.msra.mxu1 %v6019_v33  ;;  %v9621_v31 = vld [vmem:[#allocation32_spill] sm:$0xff]  ;;  %v9622_v33 = vld [vmem:[#allocation33_spill] sm:$0xff] }
 0x37e   :  { %1846 = vmatprep.subr.mxu0 %v6023_v34  ;;  %1917 = vmatprep.subr.mxu1 %v6025_v36  ;;  %v9623_v34 = vld [vmem:[#allocation34_spill] sm:$0xff]  ;;  %v9624_v36 = vld [vmem:[#allocation35_spill] sm:$0xff] }
 0x37f   :  { %1847 = vmatpush1.msra.mxu0 %v6029_v37  ;;  %1918 = vmatpush1.msra.mxu1 %v6031_v39  ;;  %v9625_v37 = vld [vmem:[#allocation36_spill] sm:$0xff]  ;;  %v9626_v39 = vld [vmem:[#allocation37_spill] sm:$0xff] }
 0x380   :  { %1848 = vmatprep.subr.mxu0 %v6035_v40  ;;  %1919 = vmatprep.subr.mxu1 %v6037_v41  ;;  %v9627_v40 = vld [vmem:[#allocation38_spill] sm:$0xff]  ;;  %v9628_v41 = vld [vmem:[#allocation39_spill] sm:$0xff] }
 0x381   :  { %1849 = vmatpush1.msra.mxu0 %v6041_v44  ;;  %1920 = vmatpush1.msra.mxu1 %v6043_v45  ;;  %v9629_v44 = vmov 0.0   ;;  %v9630_v45 = vld [vmem:[#allocation40_spill] sm:$0xff] }
 0x382   :  { %1850 = vmatprep.subr.mxu0 %v6047_v52  ;;  %1921 = vmatprep.subr.mxu1 %v6049_v56  ;;  %v9631_v52 = vld [vmem:[#allocation41_spill] sm:$0xff]  ;;  %v9632_v56 = vld [vmem:[#allocation42_spill] sm:$0xff] }
 0x383   :  { %1851 = vmatpush1.msra.mxu0 %v6053_v48  ;;  %1922 = vmatpush1.msra.mxu1 %v6055_v57  ;;  %v9633_v48 = vld [vmem:[#allocation43_spill] sm:$0xff]  ;;  %v9634_v57 = vld [vmem:[#allocation44_spill] sm:$0xff] }
 0x384   :  { %1852 = vmatprep.subr.mxu0 %v6059_v3  ;;  %1923 = vmatprep.subr.mxu1 %v6061_v59  ;;  %v9635_v3 = vld [vmem:[#allocation45_spill] sm:$0xff]  ;;  %v9636_v59 = vld [vmem:[#allocation46_spill] sm:$0xff] }
 0x385   :  { %1853 = vmatpush1.msra.mxu0 %v6065_v63  ;;  %1924 = vmatpush1.msra.mxu1 %v6067_v47  ;;  %v9637_v63 = vld [vmem:[#allocation47_spill] sm:$0xff]  ;;  %v9638_v47 = vld [vmem:[#allocation48_spill] sm:$0xff] }
 0x386   :  { %1854 = vmatprep.subr.mxu0 %v9603_v4  ;;  %1925 = vmatprep.subr.mxu1 %v9604_v11  ;;  %v9659_v4 = vld [vmem:[#allocation69_spill] sm:$0xff]  ;;  %v9660_v11 = vld [vmem:[#allocation70_spill] sm:$0xff] }
 0x387   :  { %1855 = vmatpush1.msra.mxu0 %v9605_v15  ;;  %1926 = vmatpush1.msra.mxu1 %v9606_v16  ;;  %v9661_v15 = vld [vmem:[#allocation71_spill] sm:$0xff]  ;;  %v9662_v16 = vld [vmem:[#allocation72_spill] sm:$0xff] }
 0x388   :  { %1856 = vmatprep.subr.mxu0 %v9607_v17  ;;  %1927 = vmatprep.subr.mxu1 %v9608_v18  ;;  %v9663_v17 = vld [vmem:[#allocation73_spill] sm:$0xff]  ;;  %v9664_v18 = vld [vmem:[#allocation74_spill] sm:$0xff] }
 0x389   :  { %1857 = vmatpush1.msra.mxu0 %v9609_v0  ;;  %1928 = vmatpush1.msra.mxu1 %v9610_v19  ;;  %v9665_v0 = vld [vmem:[#allocation75_spill] sm:$0xff]  ;;  %v9666_v19 = vld [vmem:[#allocation76_spill] sm:$0xff] }
 0x38a   :  { %1858 = vmatprep.subr.mxu0 %v9611_v20  ;;  %1929 = vmatprep.subr.mxu1 %v9612_v21  ;;  %v9667_v20 = vld [vmem:[#allocation77_spill] sm:$0xff]  ;;  %v9668_v21 = vld [vmem:[#allocation78_spill] sm:$0xff] }
 0x38b   :  { %1859 = vmatpush1.msra.mxu0 %v9613_v22  ;;  %1930 = vmatpush1.msra.mxu1 %v9614_v23  ;;  %v9669_v22 = vld [vmem:[#allocation79_spill] sm:$0xff]  ;;  %v9670_v23 = vld [vmem:[#allocation80_spill] sm:$0xff] }
 0x38c   :  { %1860 = vmatprep.subr.mxu0 %v9615_v25  ;;  %1931 = vmatprep.subr.mxu1 %v9616_v26  ;;  %v9671_v25 = vld [vmem:[#allocation81_spill] sm:$0xff]  ;;  %v9672_v26 = vld [vmem:[#allocation82_spill] sm:$0xff] }
 0x38d   :  { %1861 = vmatpush1.msra.mxu0 %v9617_v27  ;;  %1932 = vmatpush1.msra.mxu1 %v9618_v28  ;;  %v9673_v27 = vld [vmem:[#allocation83_spill] sm:$0xff]  ;;  %v9674_v28 = vld [vmem:[#allocation84_spill] sm:$0xff] }
 0x38e   :  { %1862 = vmatprep.subr.mxu0 %v6119_v7  ;;  %1933 = vmatprep.subr.mxu1 %v9619_v29  ;;  %v9639_v7 = vld [vmem:[#allocation49_spill] sm:$0xff] }
 0x38f   :  { %1863 = vmatpush1.msra.mxu0 %v9620_v30  ;;  %1934 = vmatpush1.msra.mxu1 %v9621_v31  ;;  %v9675_v29 = vld [vmem:[#allocation85_spill] sm:$0xff]  ;;  %v9676_v30 = vld [vmem:[#allocation86_spill] sm:$0xff]  ;;  %v9677_v31 = vld [vmem:[#allocation87_spill] sm:$0xff] }
 0x390   :  { %1864 = vmatprep.subr.mxu0 %v9622_v33  ;;  %1935 = vmatprep.subr.mxu1 %v9623_v34  ;;  %v9678_v33 = vld [vmem:[#allocation88_spill] sm:$0xff]  ;;  %v9679_v34 = vld [vmem:[#allocation89_spill] sm:$0xff] }
 0x391   :  { %1865 = vmatpush1.msra.mxu0 %v9624_v36  ;;  %1936 = vmatpush1.msra.mxu1 %v9625_v37  ;;  %v9680_v36 = vld [vmem:[#allocation90_spill] sm:$0xff]  ;;  %v9681_v37 = vld [vmem:[#allocation91_spill] sm:$0xff] }
 0x392   :  { %1866 = vmatprep.subr.mxu0 %v9626_v39  ;;  %1937 = vmatprep.subr.mxu1 %v9627_v40  ;;  %v9682_v39 = vld [vmem:[#allocation92_spill] sm:$0xff]  ;;  %v9683_v40 = vld [vmem:[#allocation93_spill] sm:$0xff] }
 0x393   :  { %1867 = vmatpush1.msra.mxu0 %v9628_v41  ;;  %1900 = vmatprep.mubr.f32.mxu0 %v9629_v44  ;;  %v9684_v41 = vld [vmem:[#allocation94_spill] sm:$0xff] }
 0x394   :  { %1938 = vmatpush1.msra.mxu1 %v9630_v45  ;;  %1971 = vmatprep.mubr.f32.mxu1 %v9629_v44  ;;  %v9685_v45 = vld [vmem:[#allocation95_spill] sm:$0xff] }
 0x395   :  { %1901 = vmatmul.mubr.f32.vlgmr.msra.gmra.mxu0 %v6571_v5  ;;  %1972 = vmatmul.mubr.f32.vlgmr.msra.gmra.mxu1 %v6571_v5  ;;  %v9658_v5 = vld [vmem:[#allocation68_spill] sm:$0xff] }
 0x396   :  { %2138 = vmatprep.subr.mxu0 %v9631_v52  ;;  %2209 = vmatprep.subr.mxu1 %v9632_v56  ;;  %v9686_v52 = vld [vmem:[#allocation96_spill] sm:$0xff]  ;;  %v9687_v56 = vld [vmem:[#allocation97_spill] sm:$0xff] }
 0x397   :  { %2139 = vmatpush1.msra.mxu0 %v9633_v48  ;;  %2210 = vmatpush1.msra.mxu1 %v9634_v57  ;;  %v9688_v48 = vld [vmem:[#allocation98_spill] sm:$0xff]  ;;  %v9689_v57 = vld [vmem:[#allocation99_spill] sm:$0xff] }
 0x398   :  { %2140 = vmatprep.subr.mxu0 %v9635_v3  ;;  %2211 = vmatprep.subr.mxu1 %v9636_v59  ;;  %v9690_v3 = vld [vmem:[#allocation100_spill] sm:$0xff]  ;;  %v9691_v59 = vld [vmem:[#allocation101_spill] sm:$0xff] }
 0x399   :  { %2141 = vmatpush1.msra.mxu0 %v9637_v63  ;;  %2212 = vmatpush1.msra.mxu1 %v9638_v47  ;;  %v9692_v63 = vld [vmem:[#allocation102_spill] sm:$0xff]  ;;  %v9693_v47 = vld [vmem:[#allocation103_spill] sm:$0xff] }
 0x39a   :  { %2142 = vmatprep.subr.mxu0 %v9639_v7  ;;  %2213 = vmatprep.subr.mxu1 %v9640_v62  ;;  %v9694_v7 = vld [vmem:[#allocation104_spill] sm:$0xff]  ;;  %v9695_v62 = vld [vmem:[#allocation105_spill] sm:$0xff] }
 0x39b   :  { %2143 = vmatpush1.msra.mxu0 %v9641_v1  ;;  %2214 = vmatpush1.msra.mxu1 %v9642_v51  ;;  %v9696_v1 = vld [vmem:[#allocation106_spill] sm:$0xff]  ;;  %v9697_v51 = vld [vmem:[#allocation107_spill] sm:$0xff] }
 0x39c   :  { %2144 = vmatprep.subr.mxu0 %v9643_v9  ;;  %2215 = vmatprep.subr.mxu1 %v9644_v14  ;;  %v9698_v9 = vld [vmem:[#allocation108_spill] sm:$0xff]  ;;  %v9699_v14 = vld [vmem:[#allocation109_spill] sm:$0xff] }
 0x39d   :  { %2145 = vmatpush1.msra.mxu0 %v9645_v43  ;;  %2216 = vmatpush1.msra.mxu1 %v9646_v49  ;;  %v9700_v43 = vld [vmem:[#allocation110_spill] sm:$0xff]  ;;  %v9701_v49 = vld [vmem:[#allocation111_spill] sm:$0xff] }
 0x39e   :  { %2146 = vmatprep.subr.mxu0 %v9647_v12  ;;  %2217 = vmatprep.subr.mxu1 %v9648_v10  ;;  %v9702_v12 = vld [vmem:[#allocation112_spill] sm:$0xff]  ;;  %v9703_v10 = vld [vmem:[#allocation113_spill] sm:$0xff] }
 0x39f   :  { %2147 = vmatpush1.msra.mxu0 %v9649_v42  ;;  %2218 = vmatpush1.msra.mxu1 %v9650_v58  ;;  %v9704_v42 = vld [vmem:[#allocation114_spill] sm:$0xff]  ;;  %v9705_v58 = vld [vmem:[#allocation115_spill] sm:$0xff] }
 0x3a0   :  { %2148 = vmatprep.subr.mxu0 %v9651_v8  ;;  %2219 = vmatprep.subr.mxu1 %v9652_v24  ;;  %v9706_v8 = vld [vmem:[#allocation116_spill] sm:$0xff]  ;;  %v9707_v24 = vld [vmem:[#allocation117_spill] sm:$0xff] }
 0x3a1   :  { %2149 = vmatpush1.msra.mxu0 %v9653_v13  ;;  %2220 = vmatpush1.msra.mxu1 %v9654_v46  ;;  %v9708_v13 = vld [vmem:[#allocation118_spill] sm:$0xff]  ;;  %v9709_v46 = vld [vmem:[#allocation119_spill] sm:$0xff] }
 0x3a2   :  { %2150 = vmatprep.subr.mxu0 %v9655_v60  ;;  %2221 = vmatprep.subr.mxu1 %v9656_v2  ;;  %v9710_v60 = vld [vmem:[#allocation120_spill] sm:$0xff]  ;;  %v9711_v2 = vld [vmem:[#allocation121_spill] sm:$0xff] }
 0x3a3   :  { %2151 = vmatpush1.msra.mxu0 %v9657_v53  ;;  %2222 = vmatpush1.msra.mxu1 %v9658_v5  ;;  %v9712_v53 = vld [vmem:[#allocation122_spill] sm:$0xff]  ;;  %v9713_v5 = vld [vmem:[#allocation123_spill] sm:$0xff] }
 0x3a4   :  { %2152 = vmatprep.subr.mxu0 %v9659_v4  ;;  %2223 = vmatprep.subr.mxu1 %v9660_v11  ;;  %v9714_v4 = vld [vmem:[#allocation124_spill] sm:$0xff]  ;;  %v9715_v11 = vld [vmem:[#allocation125_spill] sm:$0xff] }
 0x3a5   :  { %2153 = vmatpush1.msra.mxu0 %v9661_v15  ;;  %2224 = vmatpush1.msra.mxu1 %v9662_v16  ;;  %v9716_v15 = vld [vmem:[#allocation126_spill] sm:$0xff]  ;;  %v9717_v16 = vld [vmem:[#allocation127_spill] sm:$0xff] }
 0x3a6   :  { %2154 = vmatprep.subr.mxu0 %v9663_v17  ;;  %2225 = vmatprep.subr.mxu1 %v9664_v18  ;;  %v9718_v17 = vld [vmem:[#allocation128_spill] sm:$0xff]  ;;  %v9719_v18 = vld [vmem:[#allocation129_spill] sm:$0xff] }
 0x3a7   :  { %2155 = vmatpush1.msra.mxu0 %v9665_v0  ;;  %2226 = vmatpush1.msra.mxu1 %v9666_v19  ;;  %v9720_v0 = vld [vmem:[#allocation130_spill] sm:$0xff]  ;;  %v9721_v19 = vld [vmem:[#allocation131_spill] sm:$0xff] }
 0x3a8   :  { %2156 = vmatprep.subr.mxu0 %v9667_v20  ;;  %2227 = vmatprep.subr.mxu1 %v9668_v21  ;;  %v9722_v20 = vld [vmem:[#allocation132_spill] sm:$0xff]  ;;  %v9723_v21 = vld [vmem:[#allocation133_spill] sm:$0xff] }
 0x3a9   :  { %2157 = vmatpush1.msra.mxu0 %v9669_v22  ;;  %2228 = vmatpush1.msra.mxu1 %v9670_v23  ;;  %v9724_v22 = vld [vmem:[#allocation134_spill] sm:$0xff]  ;;  %v9725_v23 = vld [vmem:[#allocation135_spill] sm:$0xff] }
 0x3aa   :  { %2158 = vmatprep.subr.mxu0 %v9671_v25  ;;  %2229 = vmatprep.subr.mxu1 %v9672_v26  ;;  %v9726_v25 = vld [vmem:[#allocation136_spill] sm:$0xff]  ;;  %v9727_v26 = vld [vmem:[#allocation137_spill] sm:$0xff] }
 0x3ab   :  { %2159 = vmatpush1.msra.mxu0 %v9673_v27  ;;  %2230 = vmatpush1.msra.mxu1 %v9674_v28  ;;  %v9728_v27 = vld [vmem:[#allocation138_spill] sm:$0xff]  ;;  %v9729_v28 = vld [vmem:[#allocation139_spill] sm:$0xff] }
 0x3ac   :  { %2160 = vmatprep.subr.mxu0 %v9675_v29  ;;  %2231 = vmatprep.subr.mxu1 %v9676_v30  ;;  %v9730_v29 = vld [vmem:[#allocation140_spill] sm:$0xff]  ;;  %v9731_v30 = vld [vmem:[#allocation141_spill] sm:$0xff] }
 0x3ad   :  { %2161 = vmatpush1.msra.mxu0 %v9677_v31  ;;  %2232 = vmatpush1.msra.mxu1 %v9678_v33  ;;  %v9732_v31 = vld [vmem:[#allocation142_spill] sm:$0xff]  ;;  %v9733_v33 = vld [vmem:[#allocation143_spill] sm:$0xff] }
 0x3ae   :  { %2162 = vmatprep.subr.mxu0 %v9679_v34  ;;  %2233 = vmatprep.subr.mxu1 %v9680_v36  ;;  %v9734_v34 = vld [vmem:[#allocation144_spill] sm:$0xff]  ;;  %v9735_v36 = vld [vmem:[#allocation145_spill] sm:$0xff] }
 0x3af   :  { %2163 = vmatpush1.msra.mxu0 %v9681_v37  ;;  %2234 = vmatpush1.msra.mxu1 %v9682_v39  ;;  %v9736_v37 = vld [vmem:[#allocation146_spill] sm:$0xff]  ;;  %v9737_v39 = vld [vmem:[#allocation147_spill] sm:$0xff] }
 0x3b0   :  { %2164 = vmatprep.subr.mxu0 %v9683_v40  ;;  %2235 = vmatprep.subr.mxu1 %v9684_v41  ;;  %v9738_v40 = vld [vmem:[#allocation148_spill] sm:$0xff]  ;;  %v9739_v41 = vld [vmem:[#allocation149_spill] sm:$0xff] }
 0x3b1   :  { %2165 = vmatpush1.msra.mxu0 %v9685_v45  ;;  %2236 = vmatpush1.msra.mxu1 %v9686_v52  ;;  %v9740_v45 = vld [vmem:[#allocation150_spill] sm:$0xff]  ;;  %v9741_v52 = vld [vmem:[#allocation151_spill] sm:$0xff] }
 0x3b2   :  { %2166 = vmatprep.subr.mxu0 %v9687_v56  ;;  %2237 = vmatprep.subr.mxu1 %v9688_v48  ;;  %v9742_v56 = vld [vmem:[#allocation152_spill] sm:$0xff]  ;;  %v9743_v48 = vld [vmem:[#allocation153_spill] sm:$0xff] }
 0x3b3   :  { %2167 = vmatpush1.msra.mxu0 %v9689_v57  ;;  %2238 = vmatpush1.msra.mxu1 %v9690_v3  ;;  %v9744_v57 = vld [vmem:[#allocation154_spill] sm:$0xff]  ;;  %v9745_v3 = vld [vmem:[#allocation155_spill] sm:$0xff] }
 0x3b4   :  { %2168 = vmatprep.subr.mxu0 %v9691_v59  ;;  %2239 = vmatprep.subr.mxu1 %v9692_v63  ;;  %v9746_v59 = vld [vmem:[#allocation156_spill] sm:$0xff]  ;;  %v9747_v63 = vld [vmem:[#allocation157_spill] sm:$0xff] }
 0x3b5   :  { %2169 = vmatpush1.msra.mxu0 %v9693_v47  ;;  %2240 = vmatpush1.msra.mxu1 %v9694_v7  ;;  %v9748_v47 = vld [vmem:[#allocation159_spill] sm:$0xff]  ;;  %v9749_v7 = vld [vmem:[#allocation160_spill] sm:$0xff] }
 0x3b6   :  { %2170 = vmatprep.subr.mxu0 %v9695_v62  ;;  %2241 = vmatprep.subr.mxu1 %v9696_v1  ;;  %v9750_v62 = vld [vmem:[#allocation163_spill] sm:$0xff]  ;;  %v9751_v1 = vld [vmem:[#allocation164_spill] sm:$0xff] }
 0x3b7   :  { %2171 = vmatpush2.msra.mxu0 %v9697_v51  ;;  %2242 = vmatpush2.msra.mxu1 %v9698_v9  ;;  %v9752_v51 = vld [vmem:[#allocation165_spill] sm:$0xff]  ;;  %v9753_v9 = vld [vmem:[#allocation166_spill] sm:$0xff] }
 0x3b8   :  { %2172 = vmatprep.subr.mxu0 %v9699_v14  ;;  %2243 = vmatprep.subr.mxu1 %v9700_v43  ;;  %v9754_v14 = vld [vmem:[#allocation167_spill] sm:$0xff]  ;;  %v9755_v43 = vld [vmem:[#allocation168_spill] sm:$0xff] }
 0x3b9   :  { %2173 = vmatpush2.msra.mxu0 %v9701_v49  ;;  %2244 = vmatpush2.msra.mxu1 %v9702_v12  ;;  %v9756_v49 = vld [vmem:[#allocation169_spill] sm:$0xff]  ;;  %v9757_v12 = vld [vmem:[#allocation170_spill] sm:$0xff] }
 0x3ba   :  { %2174 = vmatprep.subr.mxu0 %v9703_v10  ;;  %2245 = vmatprep.subr.mxu1 %v9704_v42  ;;  %v9758_v10 = vld [vmem:[#allocation171_spill] sm:$0xff] }
 0x3bb   :  { %2175 = vmatpush2.msra.mxu0 %v9705_v58  ;;  %2246 = vmatpush2.msra.mxu1 %v9706_v8  ;;  %v6769_v42 = vld [vmem:[#allocation4 + $0x1e8] sm:$0xff]  ;;  %v6771_v58 = vld [vmem:[#allocation4 + $0x1f8] sm:$0xff] }
 0x3bc   :  { %2176 = vmatprep.subr.mxu0 %v9707_v24  ;;  %2247 = vmatprep.subr.mxu1 %v9708_v13  ;;  %v9759_v24 = vld [vmem:[#allocation10_spill] sm:$0xff] }
 0x3bd   :  { %2177 = vmatpush2.msra.mxu0 %v9709_v46  ;;  %2248 = vmatpush2.msra.mxu1 %v9710_v60 }
 0x3be   :  { %2178 = vmatprep.subr.mxu0 %v9711_v2  ;;  %2249 = vmatprep.subr.mxu1 %v9712_v53  ;;  %v9760_v2 = vld [vmem:[#allocation11_spill] sm:$0xff] }
 0x3bf   :  { %2179 = vmatpush2.msra.mxu0 %v9713_v5  ;;  %2250 = vmatpush2.msra.mxu1 %v9714_v4 }
 0x3c0   :  { %2180 = vmatprep.subr.mxu0 %v9715_v11  ;;  %2251 = vmatprep.subr.mxu1 %v9716_v15  ;;  %v9761_v15 = vld [vmem:[#allocation12_spill] sm:$0xff] }
 0x3c1   :  { %2181 = vmatpush2.msra.mxu0 %v9717_v16  ;;  %2252 = vmatpush2.msra.mxu1 %v9718_v17 }
 0x3c2   :  { %2182 = vmatprep.subr.mxu0 %v9719_v18  ;;  %2253 = vmatprep.subr.mxu1 %v9720_v0  ;;  %v9762_v0 = vld [vmem:[#allocation13_spill] sm:$0xff] }
 0x3c3   :  { %2183 = vmatpush2.msra.mxu0 %v9721_v19  ;;  %2254 = vmatpush2.msra.mxu1 %v9722_v20 }
 0x3c4   :  { %2184 = vmatprep.subr.mxu0 %v9723_v21  ;;  %2255 = vmatprep.subr.mxu1 %v9724_v22 }
 0x3c5   :  { %2185 = vmatpush2.msra.mxu0 %v9725_v23  ;;  %2256 = vmatpush2.msra.mxu1 %v9726_v25  ;;  %v1766_v23 = vpop.permute.xlu1 %1765 }
 0x3c6   :  { %2186 = vmatprep.subr.mxu0 %v9727_v26  ;;  %2257 = vmatprep.subr.mxu1 %v9728_v27  ;;  %v9763_v26 = vld [vmem:[#allocation161_spill] sm:$0xff] }
 0x3c7   :  { %2187 = vmatpush2.msra.mxu0 %v9729_v28  ;;  %2258 = vmatpush2.msra.mxu1 %v9730_v29  ;;  %v1768_v27 = vmul.f32 %v1766_v23, %v9763_v26 }
 0x3c8   :  { %2188 = vmatprep.subr.mxu0 %v9731_v30  ;;  %2259 = vmatprep.subr.mxu1 %v9732_v31  ;;  %v9764_v31 = vld [vmem:[#allocation162_spill] sm:$0xff] }
 0x3c9   :  { %2189 = vmatpush2.msra.mxu0 %v9733_v33  ;;  %2260 = vmatpush2.msra.mxu1 %v9734_v34  ;;  %v1769_v33 = vmul.f32 %v1766_v23, %v9764_v31 }
 0x3ca   :  { %2190 = vmatprep.subr.mxu0 %v9735_v36  ;;  %2261 = vmatprep.subr.mxu1 %v9736_v37 }
 0x3cb   :  { %2191 = vmatpush2.msra.mxu0 %v9737_v39  ;;  %2262 = vmatpush2.msra.mxu1 %v9738_v40 }
 0x3cc   :  { %2192 = vmatprep.subr.mxu0 %v9739_v41  ;;  %2263 = vmatprep.subr.mxu1 %v9740_v45 }
 0x3cd   :  { %2193 = vmatpush2.msra.mxu0 %v9741_v52  ;;  %2264 = vmatpush2.msra.mxu1 %v9742_v56 }
 0x3ce   :  { %2194 = vmatprep.subr.mxu0 %v9743_v48  ;;  %2265 = vmatprep.subr.mxu1 %v9744_v57 }
 0x3cf   :  { %2195 = vmatpush2.msra.mxu0 %v9745_v3  ;;  %2266 = vmatpush2.msra.mxu1 %v9746_v59 }
 0x3d0   :  { %2196 = vmatprep.subr.mxu0 %v9747_v63  ;;  %2267 = vmatprep.subr.mxu1 %v9748_v47  ;;  %v1771_v47 = vmul.f32 %v1766_v23, %v9446_v35 }
 0x3d1   :  { %2197 = vmatpush2.msra.mxu0 %v9749_v7  ;;  %2268 = vmatpush2.msra.mxu1 %v9750_v62  ;;  %v1770_v62 = vmul.f32 %v1766_v23, %v9447_v38 }
 0x3d2   :  { %2198 = vmatprep.subr.mxu0 %v9751_v1  ;;  %2269 = vmatprep.subr.mxu1 %v9752_v51 }
 0x3d3   :  { %2199 = vmatpush2.msra.mxu0 %v9753_v9  ;;  %2270 = vmatpush2.msra.mxu1 %v9754_v14 }
 0x3d4   :  { %2200 = vmatprep.subr.mxu0 %v9755_v43  ;;  %2271 = vmatprep.subr.mxu1 %v9756_v49 }
 0x3d5   :  { %2201 = vmatpush2.msra.mxu0 %v9757_v12  ;;  %2272 = vmatpush2.msra.mxu1 %v9758_v10 }
 0x3d6   :  { %2381 = vmatprep.subr.mxu0 %v6769_v42  ;;  %2452 = vmatprep.subr.mxu1 %v6771_v58 }
 0x434   :  { %v1659_v8 = vpop.f32.mrf.mxu0  ;;  %v1730_v5 = vpop.f32.mrf.mxu1 }
 0x435   :  { %v1660_v13 = vadd.f32 %v1659_v8, %v9759_v24  ;;  %v1731_v19 = vadd.f32 %v1730_v5, %v9762_v0 }
 0x436   :  { %v1661_v46 = vpop.f32.mrf.mxu0  ;;  %v1732_v11 = vpop.f32.mrf.mxu1 }
 0x437   :  { %v4643_v60 = vmul.f32 -1.442695, %v1660_v13  ;;  %v1662_v53 = vadd.f32 %v1661_v46, %v9760_v2  ;;  %v1733_v16 = vadd.f32 %v1732_v11, %v9761_v15 }
 0x439   :  { %4772 = vpow2.f32 %v4643_v60  ;;  %v4644_v4 = vmul.f32 -1.442695, %v1662_v53  ;;  %v4645_v17 = vmul.f32 -1.442695, %v1733_v16  ;;  %v6794_v60 = vld [vmem:[%s8478_s7] ss:$0 sm:$0xff] }
 0x43b   :  { %4774 = vpow2.f32 %v4644_v4 }
 0x43c   :  { %4776 = vpow2.f32 %v4645_v17 }
 0x446   :  { %v4773_v18 = vpop.eup %4772 }
 0x447   :  { %v1738_v20 = vadd.f32 1.0, %v4773_v18 }
 0x448   :  { %v4775_v21 = vpop.eup %4774 }
 0x449   :  { %4778 = vrcp.f32 %v1738_v20  ;;  %v1744_v22 = vadd.f32 1.0, %v4775_v21  ;;  %v4777_v25 = vpop.eup %4776 }
 0x44a   :  { %4780 = vtanh.f32 %v1731_v19  ;;  %v1751_v36 = vadd.f32 1.0, %v4777_v25 }
 0x44b   :  { %4782 = vrcp.f32 %v1744_v22 }
 0x44c   :  { %4784 = vrcp.f32 %v1751_v36  ;;  %v6822_v36 = vld [vmem:[#allocation4 + $0x1b8] sm:$0xff] }
 0x455   :  { %v1902_v28 = vpop.f32.mrf.mxu0  ;;  %v1973_v41 = vpop.f32.mrf.mxu1 }
 0x456   :  { %v4779_v29 = vpop.eup %4778  ;;  %v1978_v30 = vadd.f32 %v1902_v28, %v1768_v27  ;;  %v6804_v27 = vld [vmem:[#allocation4 + $0x1e0] sm:$0xff]  ;;  %v6806_v28 = vld [vmem:[#allocation4 + $0x1f0] sm:$0xff] }
 0x457   :  { %v4781_v34 = vpop.eup %4780  ;;  %v1904_v37 = vpop.f32.mrf.mxu0 }
 0x458   :  { %v4783_v39 = vpop.eup %4782  ;;  %v1982_v40 = vadd.f32 %v1978_v30, %v5682_v61  ;;  %v1979_v45 = vadd.f32 %v1904_v37, %v1769_v33  ;;  %v1755_v52 = vmul.f32 %v4781_v34, %v4779_v29  ;;  %v1975_v63 = vpop.f32.mrf.mxu1  ;;  %v6808_v29 = vld [vmem:[#allocation4 + $0x1c8] sm:$0xff]  ;;  %v6810_v30 = vld [vmem:[#allocation4 + $0x1d8] sm:$0xff]  ;;  %v6816_v33 = vld [vmem:[#allocation4 + $0x1d0] sm:$0xff] }
 0x459   :  { %v1754_v56 = vmul.f32 %v4783_v39, %v6559_v6  ;;  %v1981_v7 = vadd.f32 %v1975_v63, %v1771_v47  ;;  %v1980_v6 = vadd.f32 %v1973_v41, %v1770_v62  ;;  %v4785_v9 = vpop.eup %4784  ;;  %v6820_v34 = vld [vmem:[#allocation4 + $0x1a8] sm:$0xff]  ;;  %v6826_v37 = vld [vmem:[#allocation4 + $0x1a0] sm:$0xff]  ;;  %v6828_v39 = vld [vmem:[#allocation4 + $0x1b0] sm:$0xff] }
 0x45a   :  { %v4647_v48 = vmul.f32 -1.442695, %v1982_v40  ;;  %v1983_v57 = vadd.f32 %v1979_v45, %v5686_v54  ;;  %v6832_v40 = vld [vmem:[#allocation4 + $0x188] sm:$0xff]  ;;  %v6834_v41 = vld [vmem:[#allocation4 + $0x198] sm:$0xff]  ;;  %v6838_v45 = vld [vmem:[#allocation4 + $0x180] sm:$0xff] }
 0x45b   :  { %v6784_v3 = vadd.f32 %v1755_v52, %v1754_v56  ;;  %v1985_v1 = vadd.f32 %v1981_v7, %v5701_v55  ;;  %v1984_v43 = vadd.f32 %v1980_v6, %v5706_v50  ;;  %v6840_v52 = vld [vmem:[#allocation4 + $0x190] sm:$0xff]  ;;  %v6844_v56 = vld [vmem:[#allocation4 + $0x168] sm:$0xff]  ;;  %v6858_v47 = vld [vmem:[#allocation4 + $0x158] sm:$0xff] }
 0x45c   :  { %4786 = vpow2.f32 %v4647_v48  ;;  %v4648_v59 = vmul.f32 -1.442695, %v1983_v57  ;;  %v6846_v48 = vld [vmem:[#allocation4 + $0x178] sm:$0xff]  ;;  %v6850_v57 = vld [vmem:[#allocation4 + $0x160] sm:$0xff]  ;;  %v6856_v63 = vld [vmem:[#allocation4 + $0x148] sm:$0xff] }
 0x45d   :  { %4788 = vtanh.f32 %v6784_v3  ;;  %v4649_v51 = vmul.f32 -1.442695, %v1985_v1  ;;  %v6862_v7 = vld [vmem:[#allocation4 + $0x140] sm:$0xff]  ;;  %v6864_v62 = vld [vmem:[#allocation4 + $0x150] sm:$0xff]  ;;  %v6868_v1 = vld [vmem:[#allocation4 + $0x128] sm:$0xff] }
 0x45e   :  { %4790 = vpow2.f32 %v4648_v59  ;;  %v6852_v59 = vld [vmem:[#allocation4 + $0x170] sm:$0xff]  ;;  %v6870_v6 = vld [vmem:[#allocation4 + $0x138] sm:$0xff] }
 0x45f   :  { %4792 = vpow2.f32 %v4649_v51  ;;  %v6874_v51 = vld [vmem:[#allocation4 + $0x120] sm:$0xff] }
 0x469   :  { %v4787_v14 = vpop.eup %4786 }
 0x46a   :  { %v4789_v49 = vpop.eup %4788  ;;  %v1989_v12 = vadd.f32 1.0, %v4787_v14  ;;  %v6880_v14 = vld [vmem:[#allocation4 + $0x108] sm:$0xff] }
 0x46b   :  { %v4791_v10 = vpop.eup %4790  ;;  %v1758_v8 = vmul.f32 %v4789_v49, %v4785_v9  ;;  %v6876_v9 = vld [vmem:[#allocation4 + $0x130] sm:$0xff]  ;;  %v6886_v49 = vld [vmem:[#allocation4 + $0x100] sm:$0xff] }
 0x46c   :  { %4794 = vrcp.f32 %v1989_v12  ;;  %v1995_v13 = vadd.f32 1.0, %v4791_v10  ;;  %v4793_v4 = vpop.eup %4792  ;;  %v6888_v12 = vld [vmem:[#allocation4 + $0x110] sm:$0xff]  ;;  %v6892_v10 = vld [vmem:[#allocation4 + $0xe8] sm:$0xff] }
 0x46d   :  { %4796 = vtanh.f32 %v1984_v43  ;;  %1760 = vst [vmem:[#allocation2 + $0x8] sm:$0xf] %v1758_v8  ;;  %2202 = vmatprep.mubr.f32.mxu0 %v1758_v8  ;;  %2273 = vmatprep.mubr.f32.mxu1 %v1758_v8  ;;  %v2002_v18 = vadd.f32 1.0, %v4793_v4  ;;  %v6882_v43 = vld [vmem:[#allocation4 + $0x118] sm:$0xff]  ;;  %v6910_v4 = vld [vmem:[#allocation4 + $0xc0] sm:$0xff] }
 0x46e   :  { %4798 = vrcp.f32 %v1995_v13  ;;  %v6894_v8 = vld [vmem:[#allocation4 + $0xf8] sm:$0xff]  ;;  %v6898_v13 = vld [vmem:[#allocation4 + $0xe0] sm:$0xff]  ;;  %9767 = vst [vmem:[#allocation16_spill] sm:$0xff] %v6910_v4 }
 0x46f   :  { %4800 = vrcp.f32 %v2002_v18  ;;  %v6922_v18 = vld [vmem:[#allocation4 + $0xa0] sm:$0xff] }
 0x470   :  { %9771 = vst [vmem:[#allocation20_spill] sm:$0xff] %v6922_v18 }
 0x474   :  { %v4488_v46 = vld [vmem:[#allocation2 + $0x8] sm:$0xf] }
 0x475   :  { %v4503_v53 = vmul.f32 %v6794_v60, %v4488_v46  ;;  %v6900_v46 = vld [vmem:[#allocation4 + $0xf0] sm:$0xff] }
 0x477   :  { %v4516_v5 = vsel %vm4509_vm0, %v4503_v53, 0.0  ;;  %v6904_v53 = vld [vmem:[#allocation4 + $0xc8] sm:$0xff] }
 0x478   :  { %4517 = vadd.xlane.f32.xlu0 %v4516_v5  ;;  %9765 = vst [vmem:[#allocation14_spill] sm:$0xff] %v6904_v53  ;;  %v6906_v5 = vld [vmem:[#allocation4 + $0xd8] sm:$0xff] }
 0x479   :  { %v4795_v11 = vpop.eup %4794  ;;  %9766 = vst [vmem:[#allocation15_spill] sm:$0xff] %v6906_v5 }
 0x47a   :  { %v4797_v16 = vpop.eup %4796 }
 0x47b   :  { %v4799_v17 = vpop.eup %4798  ;;  %v2006_v19 = vmul.f32 %v4797_v16, %v4795_v11  ;;  %v6912_v11 = vld [vmem:[#allocation4 + $0xd0] sm:$0xff]  ;;  %v6916_v16 = vld [vmem:[#allocation4 + $0xa8] sm:$0xff] }
 0x47c   :  { %v2005_v20 = vmul.f32 %v4799_v17, %v6568_v32  ;;  %v4801_v22 = vpop.eup %4800  ;;  %v6814_v32 = vld [vmem:[#allocation4 + $0x1c0] sm:$0xff]  ;;  %9768 = vst [vmem:[#allocation17_spill] sm:$0xff] %v6912_v11  ;;  %9769 = vst [vmem:[#allocation18_spill] sm:$0xff] %v6916_v16  ;;  %v6918_v17 = vld [vmem:[#allocation4 + $0xb8] sm:$0xff] }
 0x47d   :  { %9770 = vst [vmem:[#allocation19_spill] sm:$0xff] %v6918_v17 }
 0x47e   :  { %v6799_v21 = vadd.f32 %v2006_v19, %v2005_v20  ;;  %v6924_v19 = vld [vmem:[#allocation4 + $0xb0] sm:$0xff]  ;;  %v6928_v20 = vld [vmem:[#allocation4 + $0x88] sm:$0xff] }
 0x47f   :  { %9772 = vst [vmem:[#allocation21_spill] sm:$0xff] %v6924_v19  ;;  %9773 = vst [vmem:[#allocation22_spill] sm:$0xff] %v6928_v20 }
 0x480   :  { %4802 = vtanh.f32 %v6799_v21 }
 0x48d   :  { %v4803_v23 = vpop.eup %4802 }
 0x48e   :  { %v6802_v25 = vmul.f32 %v4803_v23, %v4801_v22  ;;  %v6930_v22 = vld [vmem:[#allocation4 + $0x98] sm:$0xff]  ;;  %v6934_v23 = vld [vmem:[#allocation4 + $0x80] sm:$0xff] }
 0x48f   :  { %9774 = vst [vmem:[#allocation23_spill] sm:$0xff] %v6930_v22  ;;  %9775 = vst [vmem:[#allocation24_spill] sm:$0xff] %v6934_v23 }
 0x490   :  { %2203 = vmatmul.mubr.f32.vlgmr.msra.gmra.mxu0 %v6802_v25  ;;  %2274 = vmatmul.mubr.f32.vlgmr.msra.gmra.mxu1 %v6802_v25 }
 0x491   :  { %2382 = vmatpush1.msra.mxu0 %v6804_v27  ;;  %2453 = vmatpush1.msra.mxu1 %v6806_v28 }
 0x492   :  { %2383 = vmatprep.subr.mxu0 %v6808_v29  ;;  %2454 = vmatprep.subr.mxu1 %v6810_v30 }
 0x493   :  { %2384 = vmatpush1.msra.mxu0 %v6814_v32  ;;  %2455 = vmatpush1.msra.mxu1 %v6816_v33 }
 0x494   :  { %2385 = vmatprep.subr.mxu0 %v6820_v34  ;;  %2456 = vmatprep.subr.mxu1 %v6822_v36 }
 0x495   :  { %2386 = vmatpush1.msra.mxu0 %v6826_v37  ;;  %2457 = vmatpush1.msra.mxu1 %v6828_v39 }
 0x496   :  { %2387 = vmatprep.subr.mxu0 %v6832_v40  ;;  %2458 = vmatprep.subr.mxu1 %v6834_v41 }
 0x497   :  { %2388 = vmatpush1.msra.mxu0 %v6838_v45  ;;  %2459 = vmatpush1.msra.mxu1 %v6840_v52 }
 0x498   :  { %2389 = vmatprep.subr.mxu0 %v6844_v56  ;;  %2460 = vmatprep.subr.mxu1 %v6846_v48 }
 0x499   :  { %2390 = vmatpush1.msra.mxu0 %v6850_v57  ;;  %2461 = vmatpush1.msra.mxu1 %v6852_v59 }
 0x49a   :  { %2391 = vmatprep.subr.mxu0 %v6856_v63  ;;  %2462 = vmatprep.subr.mxu1 %v6858_v47 }
 0x49b   :  { %2392 = vmatpush1.msra.mxu0 %v6862_v7  ;;  %2463 = vmatpush1.msra.mxu1 %v6864_v62 }
 0x49c   :  { %2393 = vmatprep.subr.mxu0 %v6868_v1  ;;  %2464 = vmatprep.subr.mxu1 %v6870_v6 }
 0x49d   :  { %2394 = vmatpush1.msra.mxu0 %v6874_v51  ;;  %2465 = vmatpush1.msra.mxu1 %v6876_v9 }
 0x49e   :  { %2395 = vmatprep.subr.mxu0 %v6880_v14  ;;  %2466 = vmatprep.subr.mxu1 %v6882_v43 }
 0x49f   :  { %2396 = vmatpush1.msra.mxu0 %v6886_v49  ;;  %2467 = vmatpush1.msra.mxu1 %v6888_v12 }
 0x4a0   :  { %2397 = vmatprep.subr.mxu0 %v6892_v10  ;;  %2468 = vmatprep.subr.mxu1 %v6894_v8 }
 0x4a1   :  { %2398 = vmatpush1.msra.mxu0 %v6898_v13  ;;  %2469 = vmatpush1.msra.mxu1 %v6900_v46 }
 0x4a2   :  { %2399 = vmatprep.subr.mxu0 %v6904_v53  ;;  %2470 = vmatprep.subr.mxu1 %v6906_v5  ;;  %v6936_v53 = vld [vmem:[#allocation4 + $0x90] sm:$0xff]  ;;  %v6940_v5 = vld [vmem:[#allocation4 + $0x68] sm:$0xff] }
 0x4a3   :  { %2400 = vmatpush1.msra.mxu0 %v6910_v4  ;;  %2471 = vmatpush1.msra.mxu1 %v6912_v11  ;;  %9776 = vst [vmem:[#allocation25_spill] sm:$0xff] %v6936_v53  ;;  %9777 = vst [vmem:[#allocation26_spill] sm:$0xff] %v6940_v5  ;;  %v6942_v4 = vld [vmem:[#allocation4 + $0x78] sm:$0xff]  ;;  %v6946_v11 = vld [vmem:[#allocation4 + $0x60] sm:$0xff] }
 0x4a4   :  { %2401 = vmatprep.subr.mxu0 %v6916_v16  ;;  %2472 = vmatprep.subr.mxu1 %v6918_v17  ;;  %9778 = vst [vmem:[#allocation27_spill] sm:$0xff] %v6942_v4  ;;  %9779 = vst [vmem:[#allocation28_spill] sm:$0xff] %v6946_v11  ;;  %v6948_v16 = vld [vmem:[#allocation4 + $0x70] sm:$0xff]  ;;  %v6952_v17 = vld [vmem:[#allocation4 + $0x48] sm:$0xff] }
 0x4a5   :  { %2402 = vmatpush1.msra.mxu0 %v6922_v18  ;;  %2473 = vmatpush1.msra.mxu1 %v6924_v19  ;;  %9780 = vst [vmem:[#allocation29_spill] sm:$0xff] %v6948_v16  ;;  %v6954_v18 = vld [vmem:[#allocation4 + $0x58] sm:$0xff]  ;;  %v6958_v19 = vld [vmem:[#allocation4 + $0x40] sm:$0xff] }
 0x4a6   :  { %2403 = vmatprep.subr.mxu0 %v6928_v20  ;;  %2474 = vmatprep.subr.mxu1 %v6930_v22  ;;  %9781 = vst [vmem:[#allocation30_spill] sm:$0xff] %v6954_v18  ;;  %9782 = vst [vmem:[#allocation31_spill] sm:$0xff] %v6958_v19  ;;  %v6960_v20 = vld [vmem:[#allocation4 + $0x50] sm:$0xff]  ;;  %v6964_v22 = vld [vmem:[#allocation4 + $0x28] sm:$0xff] }
 0x4a7   :  { %2404 = vmatpush1.msra.mxu0 %v6934_v23  ;;  %2475 = vmatpush1.msra.mxu1 %v6936_v53  ;;  %9783 = vst [vmem:[#allocation32_spill] sm:$0xff] %v6960_v20  ;;  %9784 = vst [vmem:[#allocation33_spill] sm:$0xff] %v6964_v22  ;;  %v6966_v23 = vld [vmem:[#allocation4 + $0x38] sm:$0xff]  ;;  %v6970_v53 = vld [vmem:[#allocation4 + $0x20] sm:$0xff] }
 0x4a8   :  { %2405 = vmatprep.subr.mxu0 %v6940_v5  ;;  %2476 = vmatprep.subr.mxu1 %v6942_v4  ;;  %9785 = vst [vmem:[#allocation34_spill] sm:$0xff] %v6966_v23  ;;  %9786 = vst [vmem:[#allocation35_spill] sm:$0xff] %v6970_v53  ;;  %v6972_v5 = vld [vmem:[#allocation4 + $0x30] sm:$0xff]  ;;  %v6976_v4 = vld [vmem:[#allocation4 + $0x8] sm:$0xff] }
 0x4a9   :  { %2406 = vmatpush1.msra.mxu0 %v6946_v11  ;;  %2477 = vmatpush1.msra.mxu1 %v6948_v16  ;;  %9787 = vst [vmem:[#allocation36_spill] sm:$0xff] %v6972_v5  ;;  %9788 = vst [vmem:[#allocation37_spill] sm:$0xff] %v6976_v4  ;;  %v6978_v11 = vld [vmem:[#allocation4 + $0x18] sm:$0xff]  ;;  %v6982_v16 = vld [vmem:[#allocation4] sm:$0xff] }
 0x4aa   :  { %2407 = vmatprep.subr.mxu0 %v6952_v17  ;;  %2478 = vmatprep.subr.mxu1 %v6954_v18  ;;  %9789 = vst [vmem:[#allocation38_spill] sm:$0xff] %v6978_v11  ;;  %9790 = vst [vmem:[#allocation39_spill] sm:$0xff] %v6982_v16  ;;  %v6986_v18 = vld [vmem:[#allocation4 + $0x10] sm:$0xff] }
 0x4ab   :  { %2408 = vmatpush1.msra.mxu0 %v6958_v19  ;;  %2479 = vmatpush1.msra.mxu1 %v6960_v20  ;;  %9791 = vst [vmem:[#allocation40_spill] sm:$0xff] %v6986_v18  ;;  %v7310_v20 = vld [vmem:[#allocation6 + $0x2a0] sm:$0xff] }
 0x4ac   :  { %2409 = vmatprep.subr.mxu0 %v6964_v22  ;;  %2480 = vmatprep.subr.mxu1 %v6966_v23  ;;  %v7286_v23 = vld [vmem:[#allocation6 + $0x2e0] sm:$0xff]  ;;  %v7294_v22 = vld [vmem:[#allocation6 + $0x2d8] sm:$0xff]  ;;  %9898 = vst [vmem:[#allocation147_spill] sm:$0xff] %v7310_v20 }
 0x4ad   :  { %2410 = vmatpush1.msra.mxu0 %v6970_v53  ;;  %2481 = vmatpush1.msra.mxu1 %v6972_v5  ;;  %v6996_v53 = vld [vmem:[#allocation6 + $0x1e8] sm:$0xff]  ;;  %v6998_v5 = vld [vmem:[#allocation6 + $0x1f8] sm:$0xff]  ;;  %9890 = vst [vmem:[#allocation139_spill] sm:$0xff] %v7286_v23  ;;  %9893 = vst [vmem:[#allocation142_spill] sm:$0xff] %v7294_v22 }
 0x4ae   :  { %2411 = vmatprep.subr.mxu0 %v6976_v4  ;;  %2482 = vmatprep.subr.mxu1 %v6978_v11  ;;  %9792 = vst [vmem:[#allocation41_spill] sm:$0xff] %v6996_v53  ;;  %9793 = vst [vmem:[#allocation42_spill] sm:$0xff] %v6998_v5  ;;  %v7002_v11 = vld [vmem:[#allocation6 + $0x1e0] sm:$0xff]  ;;  %v7278_v4 = vld [vmem:[#allocation6 + $0x310] sm:$0xff] }
 0x4af   :  { %2412 = vmatpush1.msra.mxu0 %v6982_v16  ;;  %2445 = vmatprep.mubr.f32.mxu0 %v9629_v44  ;;  %9794 = vst [vmem:[#allocation43_spill] sm:$0xff] %v7002_v11  ;;  %v7004_v16 = vld [vmem:[#allocation6 + $0x1f0] sm:$0xff]  ;;  %9887 = vst [vmem:[#allocation136_spill] sm:$0xff] %v7278_v4 }
 0x4b0   :  { %2483 = vmatpush1.msra.mxu1 %v6986_v18  ;;  %2516 = vmatprep.mubr.f32.mxu1 %v9629_v44  ;;  %9795 = vst [vmem:[#allocation44_spill] sm:$0xff] %v7004_v16  ;;  %v7008_v18 = vld [vmem:[#allocation6 + $0x1c8] sm:$0xff]  ;;  %v7010_v44 = vld [vmem:[#allocation6 + $0x1d8] sm:$0xff] }
 0x4b1   :  { %2446 = vmatmul.mubr.f32.vlgmr.msra.gmra.mxu0 %v6802_v25  ;;  %2517 = vmatmul.mubr.f32.vlgmr.msra.gmra.mxu1 %v6802_v25  ;;  %9796 = vst [vmem:[#allocation45_spill] sm:$0xff] %v7008_v18  ;;  %9797 = vst [vmem:[#allocation46_spill] sm:$0xff] %v7010_v44  ;;  %v7014_v25 = vld [vmem:[#allocation6 + $0x1c0] sm:$0xff] }
 0x4b2   :  { %2683 = vmatprep.subr.mxu0 %v6996_v53  ;;  %2754 = vmatprep.subr.mxu1 %v6998_v5  ;;  %9798 = vst [vmem:[#allocation47_spill] sm:$0xff] %v7014_v25  ;;  %v7016_v53 = vld [vmem:[#allocation6 + $0x1d0] sm:$0xff]  ;;  %v7020_v5 = vld [vmem:[#allocation6 + $0x1a8] sm:$0xff] }
 0x4b3   :  { %2684 = vmatpush1.msra.mxu0 %v7002_v11  ;;  %2755 = vmatpush1.msra.mxu1 %v7004_v16  ;;  %9799 = vst [vmem:[#allocation48_spill] sm:$0xff] %v7016_v53  ;;  %9800 = vst [vmem:[#allocation49_spill] sm:$0xff] %v7020_v5  ;;  %v7022_v11 = vld [vmem:[#allocation6 + $0x1b8] sm:$0xff]  ;;  %v7026_v16 = vld [vmem:[#allocation6 + $0x1a0] sm:$0xff] }
 0x4b4   :  { %2685 = vmatprep.subr.mxu0 %v7008_v18  ;;  %2756 = vmatprep.subr.mxu1 %v7010_v44  ;;  %9801 = vst [vmem:[#allocation50_spill] sm:$0xff] %v7022_v11  ;;  %9802 = vst [vmem:[#allocation51_spill] sm:$0xff] %v7026_v16  ;;  %v7028_v18 = vld [vmem:[#allocation6 + $0x1b0] sm:$0xff]  ;;  %v7032_v44 = vld [vmem:[#allocation6 + $0x188] sm:$0xff] }
 0x4b5   :  { %2686 = vmatpush1.msra.mxu0 %v7014_v25  ;;  %2757 = vmatpush1.msra.mxu1 %v7016_v53  ;;  %9803 = vst [vmem:[#allocation52_spill] sm:$0xff] %v7028_v18  ;;  %9804 = vst [vmem:[#allocation53_spill] sm:$0xff] %v7032_v44  ;;  %v7034_v25 = vld [vmem:[#allocation6 + $0x198] sm:$0xff]  ;;  %v7038_v53 = vld [vmem:[#allocation6 + $0x180] sm:$0xff] }
 0x4b6   :  { %2687 = vmatprep.subr.mxu0 %v7020_v5  ;;  %2758 = vmatprep.subr.mxu1 %v7022_v11  ;;  %9805 = vst [vmem:[#allocation54_spill] sm:$0xff] %v7034_v25  ;;  %9806 = vst [vmem:[#allocation55_spill] sm:$0xff] %v7038_v53  ;;  %v7040_v5 = vld [vmem:[#allocation6 + $0x190] sm:$0xff]  ;;  %v7044_v11 = vld [vmem:[#allocation6 + $0x168] sm:$0xff] }
 0x4b7   :  { %2688 = vmatpush1.msra.mxu0 %v7026_v16  ;;  %2759 = vmatpush1.msra.mxu1 %v7028_v18  ;;  %9807 = vst [vmem:[#allocation56_spill] sm:$0xff] %v7040_v5  ;;  %9808 = vst [vmem:[#allocation57_spill] sm:$0xff] %v7044_v11  ;;  %v7046_v16 = vld [vmem:[#allocation6 + $0x178] sm:$0xff]  ;;  %v7050_v18 = vld [vmem:[#allocation6 + $0x160] sm:$0xff] }
 0x4b8   :  { %2689 = vmatprep.subr.mxu0 %v7032_v44  ;;  %2760 = vmatprep.subr.mxu1 %v7034_v25  ;;  %9809 = vst [vmem:[#allocation58_spill] sm:$0xff] %v7046_v16  ;;  %9810 = vst [vmem:[#allocation59_spill] sm:$0xff] %v7050_v18  ;;  %v7052_v44 = vld [vmem:[#allocation6 + $0x170] sm:$0xff]  ;;  %v7056_v25 = vld [vmem:[#allocation6 + $0x148] sm:$0xff] }
 0x4b9   :  { %2690 = vmatpush1.msra.mxu0 %v7038_v53  ;;  %2761 = vmatpush1.msra.mxu1 %v7040_v5  ;;  %9811 = vst [vmem:[#allocation60_spill] sm:$0xff] %v7052_v44  ;;  %9812 = vst [vmem:[#allocation61_spill] sm:$0xff] %v7056_v25  ;;  %v7058_v53 = vld [vmem:[#allocation6 + $0x158] sm:$0xff]  ;;  %v7062_v5 = vld [vmem:[#allocation6 + $0x140] sm:$0xff] }
 0x4ba   :  { %2691 = vmatprep.subr.mxu0 %v7044_v11  ;;  %2762 = vmatprep.subr.mxu1 %v7046_v16  ;;  %9813 = vst [vmem:[#allocation62_spill] sm:$0xff] %v7058_v53  ;;  %9814 = vst [vmem:[#allocation63_spill] sm:$0xff] %v7062_v5  ;;  %v7064_v11 = vld [vmem:[#allocation6 + $0x150] sm:$0xff]  ;;  %v7068_v16 = vld [vmem:[#allocation6 + $0x128] sm:$0xff] }
 0x4bb   :  { %2692 = vmatpush1.msra.mxu0 %v7050_v18  ;;  %2763 = vmatpush1.msra.mxu1 %v7052_v44  ;;  %9815 = vst [vmem:[#allocation64_spill] sm:$0xff] %v7064_v11  ;;  %9816 = vst [vmem:[#allocation65_spill] sm:$0xff] %v7068_v16  ;;  %v7070_v18 = vld [vmem:[#allocation6 + $0x138] sm:$0xff]  ;;  %v7074_v44 = vld [vmem:[#allocation6 + $0x120] sm:$0xff] }
 0x4bc   :  { %2693 = vmatprep.subr.mxu0 %v7056_v25  ;;  %2764 = vmatprep.subr.mxu1 %v7058_v53  ;;  %9817 = vst [vmem:[#allocation66_spill] sm:$0xff] %v7070_v18  ;;  %9818 = vst [vmem:[#allocation67_spill] sm:$0xff] %v7074_v44  ;;  %v7076_v25 = vld [vmem:[#allocation6 + $0x130] sm:$0xff]  ;;  %v7080_v53 = vld [vmem:[#allocation6 + $0x108] sm:$0xff] }
 0x4bd   :  { %2694 = vmatpush1.msra.mxu0 %v7062_v5  ;;  %2765 = vmatpush1.msra.mxu1 %v7064_v11  ;;  %9819 = vst [vmem:[#allocation68_spill] sm:$0xff] %v7076_v25  ;;  %9820 = vst [vmem:[#allocation69_spill] sm:$0xff] %v7080_v53  ;;  %v7082_v5 = vld [vmem:[#allocation6 + $0x118] sm:$0xff]  ;;  %v7086_v11 = vld [vmem:[#allocation6 + $0x100] sm:$0xff] }
 0x4be   :  { %2695 = vmatprep.subr.mxu0 %v7068_v16  ;;  %2766 = vmatprep.subr.mxu1 %v7070_v18  ;;  %9821 = vst [vmem:[#allocation70_spill] sm:$0xff] %v7082_v5  ;;  %9822 = vst [vmem:[#allocation71_spill] sm:$0xff] %v7086_v11  ;;  %v7088_v16 = vld [vmem:[#allocation6 + $0x110] sm:$0xff]  ;;  %v7092_v18 = vld [vmem:[#allocation6 + $0xe8] sm:$0xff] }
 0x4bf   :  { %2696 = vmatpush1.msra.mxu0 %v7074_v44  ;;  %2767 = vmatpush1.msra.mxu1 %v7076_v25  ;;  %9823 = vst [vmem:[#allocation72_spill] sm:$0xff] %v7088_v16  ;;  %9824 = vst [vmem:[#allocation73_spill] sm:$0xff] %v7092_v18  ;;  %v7094_v44 = vld [vmem:[#allocation6 + $0xf8] sm:$0xff]  ;;  %v7098_v25 = vld [vmem:[#allocation6 + $0xe0] sm:$0xff] }
 0x4c0   :  { %2697 = vmatprep.subr.mxu0 %v7080_v53  ;;  %2768 = vmatprep.subr.mxu1 %v7082_v5  ;;  %9825 = vst [vmem:[#allocation74_spill] sm:$0xff] %v7094_v44  ;;  %9826 = vst [vmem:[#allocation75_spill] sm:$0xff] %v7098_v25  ;;  %v7100_v53 = vld [vmem:[#allocation6 + $0xf0] sm:$0xff]  ;;  %v7104_v5 = vld [vmem:[#allocation6 + $0xc8] sm:$0xff] }
 0x4c1   :  { %2698 = vmatpush1.msra.mxu0 %v7086_v11  ;;  %2769 = vmatpush1.msra.mxu1 %v7088_v16  ;;  %9827 = vst [vmem:[#allocation76_spill] sm:$0xff] %v7100_v53  ;;  %9828 = vst [vmem:[#allocation77_spill] sm:$0xff] %v7104_v5  ;;  %v7106_v11 = vld [vmem:[#allocation6 + $0xd8] sm:$0xff]  ;;  %v7110_v16 = vld [vmem:[#allocation6 + $0xc0] sm:$0xff] }
 0x4c2   :  { %2699 = vmatprep.subr.mxu0 %v7092_v18  ;;  %2770 = vmatprep.subr.mxu1 %v7094_v44  ;;  %9829 = vst [vmem:[#allocation78_spill] sm:$0xff] %v7106_v11  ;;  %9830 = vst [vmem:[#allocation79_spill] sm:$0xff] %v7110_v16  ;;  %v7112_v18 = vld [vmem:[#allocation6 + $0xd0] sm:$0xff]  ;;  %v7116_v44 = vld [vmem:[#allocation6 + $0xa8] sm:$0xff] }
 0x4c3   :  { %2700 = vmatpush1.msra.mxu0 %v7098_v25  ;;  %2771 = vmatpush1.msra.mxu1 %v7100_v53  ;;  %9831 = vst [vmem:[#allocation80_spill] sm:$0xff] %v7112_v18  ;;  %9832 = vst [vmem:[#allocation81_spill] sm:$0xff] %v7116_v44  ;;  %v7118_v25 = vld [vmem:[#allocation6 + $0xb8] sm:$0xff]  ;;  %v7122_v53 = vld [vmem:[#allocation6 + $0xa0] sm:$0xff] }
 0x4c4   :  { %2701 = vmatprep.subr.mxu0 %v7104_v5  ;;  %2772 = vmatprep.subr.mxu1 %v7106_v11  ;;  %9833 = vst [vmem:[#allocation82_spill] sm:$0xff] %v7118_v25  ;;  %9834 = vst [vmem:[#allocation83_spill] sm:$0xff] %v7122_v53  ;;  %v7124_v5 = vld [vmem:[#allocation6 + $0xb0] sm:$0xff]  ;;  %v7128_v11 = vld [vmem:[#allocation6 + $0x88] sm:$0xff] }
 0x4c5   :  { %2702 = vmatpush1.msra.mxu0 %v7110_v16  ;;  %2773 = vmatpush1.msra.mxu1 %v7112_v18  ;;  %9835 = vst [vmem:[#allocation84_spill] sm:$0xff] %v7124_v5  ;;  %9836 = vst [vmem:[#allocation85_spill] sm:$0xff] %v7128_v11  ;;  %v7130_v16 = vld [vmem:[#allocation6 + $0x98] sm:$0xff]  ;;  %v7134_v18 = vld [vmem:[#allocation6 + $0x80] sm:$0xff] }
 0x4c6   :  { %2703 = vmatprep.subr.mxu0 %v7116_v44  ;;  %2774 = vmatprep.subr.mxu1 %v7118_v25  ;;  %9837 = vst [vmem:[#allocation86_spill] sm:$0xff] %v7130_v16  ;;  %9838 = vst [vmem:[#allocation87_spill] sm:$0xff] %v7134_v18  ;;  %v7136_v44 = vld [vmem:[#allocation6 + $0x90] sm:$0xff]  ;;  %v7140_v25 = vld [vmem:[#allocation6 + $0x68] sm:$0xff] }
 0x4c7   :  { %2704 = vmatpush1.msra.mxu0 %v7122_v53  ;;  %2775 = vmatpush1.msra.mxu1 %v7124_v5  ;;  %9839 = vst [vmem:[#allocation88_spill] sm:$0xff] %v7136_v44  ;;  %9840 = vst [vmem:[#allocation89_spill] sm:$0xff] %v7140_v25  ;;  %v7142_v53 = vld [vmem:[#allocation6 + $0x78] sm:$0xff]  ;;  %v7146_v5 = vld [vmem:[#allocation6 + $0x60] sm:$0xff] }
 0x4c8   :  { %2705 = vmatprep.subr.mxu0 %v7128_v11  ;;  %2776 = vmatprep.subr.mxu1 %v7130_v16  ;;  %9841 = vst [vmem:[#allocation90_spill] sm:$0xff] %v7142_v53  ;;  %9842 = vst [vmem:[#allocation91_spill] sm:$0xff] %v7146_v5  ;;  %v7148_v11 = vld [vmem:[#allocation6 + $0x70] sm:$0xff]  ;;  %v7152_v16 = vld [vmem:[#allocation6 + $0x48] sm:$0xff] }
 0x4c9   :  { %2706 = vmatpush1.msra.mxu0 %v7134_v18  ;;  %2777 = vmatpush1.msra.mxu1 %v7136_v44  ;;  %9843 = vst [vmem:[#allocation92_spill] sm:$0xff] %v7148_v11  ;;  %9844 = vst [vmem:[#allocation93_spill] sm:$0xff] %v7152_v16  ;;  %v7154_v18 = vld [vmem:[#allocation6 + $0x58] sm:$0xff]  ;;  %v7158_v44 = vld [vmem:[#allocation6 + $0x40] sm:$0xff] }
 0x4ca   :  { %2707 = vmatprep.subr.mxu0 %v7140_v25  ;;  %2778 = vmatprep.subr.mxu1 %v7142_v53  ;;  %9845 = vst [vmem:[#allocation94_spill] sm:$0xff] %v7154_v18  ;;  %9846 = vst [vmem:[#allocation95_spill] sm:$0xff] %v7158_v44  ;;  %v7160_v25 = vld [vmem:[#allocation6 + $0x50] sm:$0xff]  ;;  %v7164_v53 = vld [vmem:[#allocation6 + $0x28] sm:$0xff] }
 0x4cb   :  { %2708 = vmatpush1.msra.mxu0 %v7146_v5  ;;  %2779 = vmatpush1.msra.mxu1 %v7148_v11  ;;  %9847 = vst [vmem:[#allocation96_spill] sm:$0xff] %v7160_v25  ;;  %9848 = vst [vmem:[#allocation97_spill] sm:$0xff] %v7164_v53  ;;  %v7166_v5 = vld [vmem:[#allocation6 + $0x38] sm:$0xff]  ;;  %v7170_v11 = vld [vmem:[#allocation6 + $0x20] sm:$0xff] }
 0x4cc   :  { %2709 = vmatprep.subr.mxu0 %v7152_v16  ;;  %2780 = vmatprep.subr.mxu1 %v7154_v18  ;;  %9849 = vst [vmem:[#allocation98_spill] sm:$0xff] %v7166_v5  ;;  %9850 = vst [vmem:[#allocation99_spill] sm:$0xff] %v7170_v11  ;;  %v7172_v16 = vld [vmem:[#allocation6 + $0x30] sm:$0xff]  ;;  %v7176_v18 = vld [vmem:[#allocation6 + $0x8] sm:$0xff] }
 0x4cd   :  { %2710 = vmatpush1.msra.mxu0 %v7158_v44  ;;  %2781 = vmatpush1.msra.mxu1 %v7160_v25  ;;  %9851 = vst [vmem:[#allocation100_spill] sm:$0xff] %v7172_v16  ;;  %9852 = vst [vmem:[#allocation101_spill] sm:$0xff] %v7176_v18  ;;  %v7178_v44 = vld [vmem:[#allocation6 + $0x18] sm:$0xff]  ;;  %v7182_v25 = vld [vmem:[#allocation6] sm:$0xff] }
 0x4ce   :  { %2711 = vmatprep.subr.mxu0 %v7164_v53  ;;  %2782 = vmatprep.subr.mxu1 %v7166_v5  ;;  %9853 = vst [vmem:[#allocation102_spill] sm:$0xff] %v7178_v44  ;;  %9854 = vst [vmem:[#allocation103_spill] sm:$0xff] %v7182_v25  ;;  %v7184_v53 = vld [vmem:[#allocation6 + $0x10] sm:$0xff]  ;;  %v7188_v5 = vld [vmem:[#allocation6 + $0x3e8] sm:$0xff] }
 0x4cf   :  { %2712 = vmatpush1.msra.mxu0 %v7170_v11  ;;  %2783 = vmatpush1.msra.mxu1 %v7172_v16  ;;  %9855 = vst [vmem:[#allocation104_spill] sm:$0xff] %v7184_v53  ;;  %9856 = vst [vmem:[#allocation105_spill] sm:$0xff] %v7188_v5  ;;  %v7190_v11 = vld [vmem:[#allocation6 + $0x3f8] sm:$0xff]  ;;  %v7194_v16 = vld [vmem:[#allocation6 + $0x3e0] sm:$0xff] }
 0x4d0   :  { %2713 = vmatprep.subr.mxu0 %v7176_v18  ;;  %2784 = vmatprep.subr.mxu1 %v7178_v44  ;;  %9857 = vst [vmem:[#allocation106_spill] sm:$0xff] %v7190_v11  ;;  %9858 = vst [vmem:[#allocation107_spill] sm:$0xff] %v7194_v16  ;;  %v7196_v18 = vld [vmem:[#allocation6 + $0x3f0] sm:$0xff]  ;;  %v7200_v44 = vld [vmem:[#allocation6 + $0x3c8] sm:$0xff] }
 0x4d1   :  { %2714 = vmatpush1.msra.mxu0 %v7182_v25  ;;  %2785 = vmatpush1.msra.mxu1 %v7184_v53  ;;  %9859 = vst [vmem:[#allocation108_spill] sm:$0xff] %v7196_v18  ;;  %9860 = vst [vmem:[#allocation109_spill] sm:$0xff] %v7200_v44  ;;  %v7202_v25 = vld [vmem:[#allocation6 + $0x3d8] sm:$0xff]  ;;  %v7206_v53 = vld [vmem:[#allocation6 + $0x3c0] sm:$0xff] }
 0x4d2   :  { %2715 = vmatprep.subr.mxu0 %v7188_v5  ;;  %2786 = vmatprep.subr.mxu1 %v7190_v11  ;;  %9861 = vst [vmem:[#allocation110_spill] sm:$0xff] %v7202_v25  ;;  %9862 = vst [vmem:[#allocation111_spill] sm:$0xff] %v7206_v53  ;;  %v7208_v5 = vld [vmem:[#allocation6 + $0x3d0] sm:$0xff]  ;;  %v7212_v11 = vld [vmem:[#allocation6 + $0x3a8] sm:$0xff] }
 0x4d3   :  { %2716 = vmatpush2.msra.mxu0 %v7194_v16  ;;  %2787 = vmatpush2.msra.mxu1 %v7196_v18  ;;  %9863 = vst [vmem:[#allocation112_spill] sm:$0xff] %v7208_v5  ;;  %9864 = vst [vmem:[#allocation113_spill] sm:$0xff] %v7212_v11  ;;  %v7214_v16 = vld [vmem:[#allocation6 + $0x3b8] sm:$0xff]  ;;  %v7218_v18 = vld [vmem:[#allocation6 + $0x3a0] sm:$0xff] }
 0x4d4   :  { %2717 = vmatprep.subr.mxu0 %v7200_v44  ;;  %2788 = vmatprep.subr.mxu1 %v7202_v25  ;;  %9865 = vst [vmem:[#allocation114_spill] sm:$0xff] %v7214_v16  ;;  %9866 = vst [vmem:[#allocation115_spill] sm:$0xff] %v7218_v18  ;;  %v7220_v44 = vld [vmem:[#allocation6 + $0x3b0] sm:$0xff]  ;;  %v7224_v25 = vld [vmem:[#allocation6 + $0x388] sm:$0xff] }
 0x4d5   :  { %2718 = vmatpush2.msra.mxu0 %v7206_v53  ;;  %2789 = vmatpush2.msra.mxu1 %v7208_v5  ;;  %9867 = vst [vmem:[#allocation116_spill] sm:$0xff] %v7220_v44  ;;  %9868 = vst [vmem:[#allocation117_spill] sm:$0xff] %v7224_v25  ;;  %v7226_v53 = vld [vmem:[#allocation6 + $0x398] sm:$0xff]  ;;  %v7230_v5 = vld [vmem:[#allocation6 + $0x380] sm:$0xff] }
 0x4d6   :  { %2719 = vmatprep.subr.mxu0 %v7212_v11  ;;  %2790 = vmatprep.subr.mxu1 %v7214_v16  ;;  %9869 = vst [vmem:[#allocation118_spill] sm:$0xff] %v7226_v53  ;;  %9870 = vst [vmem:[#allocation119_spill] sm:$0xff] %v7230_v5  ;;  %v7232_v11 = vld [vmem:[#allocation6 + $0x390] sm:$0xff]  ;;  %v7236_v16 = vld [vmem:[#allocation6 + $0x368] sm:$0xff] }
 0x4d7   :  { %2720 = vmatpush2.msra.mxu0 %v7218_v18  ;;  %2791 = vmatpush2.msra.mxu1 %v7220_v44  ;;  %9871 = vst [vmem:[#allocation120_spill] sm:$0xff] %v7232_v11  ;;  %9872 = vst [vmem:[#allocation121_spill] sm:$0xff] %v7236_v16  ;;  %v7238_v18 = vld [vmem:[#allocation6 + $0x378] sm:$0xff]  ;;  %v7242_v44 = vld [vmem:[#allocation6 + $0x360] sm:$0xff] }
 0x4d8   :  { %2721 = vmatprep.subr.mxu0 %v7224_v25  ;;  %2792 = vmatprep.subr.mxu1 %v7226_v53  ;;  %9873 = vst [vmem:[#allocation122_spill] sm:$0xff] %v7238_v18  ;;  %9874 = vst [vmem:[#allocation123_spill] sm:$0xff] %v7242_v44  ;;  %v7244_v25 = vld [vmem:[#allocation6 + $0x370] sm:$0xff]  ;;  %v7248_v53 = vld [vmem:[#allocation6 + $0x348] sm:$0xff] }
 0x4d9   :  { %2722 = vmatpush2.msra.mxu0 %v7230_v5  ;;  %2793 = vmatpush2.msra.mxu1 %v7232_v11  ;;  %9875 = vst [vmem:[#allocation124_spill] sm:$0xff] %v7244_v25  ;;  %9876 = vst [vmem:[#allocation125_spill] sm:$0xff] %v7248_v53  ;;  %v7250_v5 = vld [vmem:[#allocation6 + $0x358] sm:$0xff]  ;;  %v7254_v11 = vld [vmem:[#allocation6 + $0x340] sm:$0xff] }
 0x4da   :  { %2723 = vmatprep.subr.mxu0 %v7236_v16  ;;  %2794 = vmatprep.subr.mxu1 %v7238_v18  ;;  %9877 = vst [vmem:[#allocation126_spill] sm:$0xff] %v7250_v5  ;;  %9878 = vst [vmem:[#allocation127_spill] sm:$0xff] %v7254_v11  ;;  %v7256_v16 = vld [vmem:[#allocation6 + $0x350] sm:$0xff]  ;;  %v7260_v18 = vld [vmem:[#allocation6 + $0x328] sm:$0xff] }
 0x4db   :  { %2724 = vmatpush2.msra.mxu0 %v7242_v44  ;;  %2795 = vmatpush2.msra.mxu1 %v7244_v25  ;;  %9879 = vst [vmem:[#allocation128_spill] sm:$0xff] %v7256_v16  ;;  %9880 = vst [vmem:[#allocation129_spill] sm:$0xff] %v7260_v18  ;;  %v7262_v44 = vld [vmem:[#allocation6 + $0x338] sm:$0xff]  ;;  %v7266_v25 = vld [vmem:[#allocation6 + $0x320] sm:$0xff] }
 0x4dc   :  { %2725 = vmatprep.subr.mxu0 %v7248_v53  ;;  %2796 = vmatprep.subr.mxu1 %v7250_v5  ;;  %9881 = vst [vmem:[#allocation130_spill] sm:$0xff] %v7262_v44  ;;  %9882 = vst [vmem:[#allocation131_spill] sm:$0xff] %v7266_v25  ;;  %v7268_v53 = vld [vmem:[#allocation6 + $0x330] sm:$0xff]  ;;  %v7270_v5 = vld [vmem:[#allocation6 + $0x308] sm:$0xff] }
 0x4dd   :  { %2726 = vmatpush2.msra.mxu0 %v7254_v11  ;;  %2797 = vmatpush2.msra.mxu1 %v7256_v16  ;;  %9883 = vst [vmem:[#allocation132_spill] sm:$0xff] %v7268_v53  ;;  %9884 = vst [vmem:[#allocation133_spill] sm:$0xff] %v7270_v5  ;;  %v7274_v11 = vld [vmem:[#allocation6 + $0x318] sm:$0xff]  ;;  %v7276_v16 = vld [vmem:[#allocation6 + $0x300] sm:$0xff] }
 0x4de   :  { %2727 = vmatprep.subr.mxu0 %v7260_v18  ;;  %2798 = vmatprep.subr.mxu1 %v7262_v44  ;;  %9885 = vst [vmem:[#allocation134_spill] sm:$0xff] %v7274_v11  ;;  %9886 = vst [vmem:[#allocation135_spill] sm:$0xff] %v7276_v16  ;;  %v7282_v44 = vld [vmem:[#allocation6 + $0x2e8] sm:$0xff]  ;;  %v7284_v18 = vld [vmem:[#allocation6 + $0x2f8] sm:$0xff] }
 0x4df   :  { %2728 = vmatpush2.msra.mxu0 %v7266_v25  ;;  %2799 = vmatpush2.msra.mxu1 %v7268_v53  ;;  %9888 = vst [vmem:[#allocation137_spill] sm:$0xff] %v7282_v44  ;;  %9889 = vst [vmem:[#allocation138_spill] sm:$0xff] %v7284_v18  ;;  %v7290_v53 = vld [vmem:[#allocation6 + $0x2f0] sm:$0xff]  ;;  %v7292_v25 = vld [vmem:[#allocation6 + $0x2c8] sm:$0xff] }
 0x4e0   :  { %2729 = vmatprep.subr.mxu0 %v7270_v5  ;;  %2800 = vmatprep.subr.mxu1 %v7274_v11  ;;  %9891 = vst [vmem:[#allocation140_spill] sm:$0xff] %v7290_v53  ;;  %9892 = vst [vmem:[#allocation141_spill] sm:$0xff] %v7292_v25  ;;  %v7298_v11 = vld [vmem:[#allocation6 + $0x2c0] sm:$0xff]  ;;  %v7300_v5 = vld [vmem:[#allocation6 + $0x2d0] sm:$0xff] }
 0x4e1   :  { %2730 = vmatpush2.msra.mxu0 %v7276_v16  ;;  %2801 = vmatpush2.msra.mxu1 %v7278_v4  ;;  %9894 = vst [vmem:[#allocation143_spill] sm:$0xff] %v7298_v11  ;;  %9895 = vst [vmem:[#allocation144_spill] sm:$0xff] %v7300_v5  ;;  %v7304_v16 = vld [vmem:[#allocation6 + $0x2a8] sm:$0xff]  ;;  %v7306_v4 = vld [vmem:[#allocation6 + $0x2b8] sm:$0xff] }
 0x4e2   :  { %2731 = vmatprep.subr.mxu0 %v7282_v44  ;;  %2802 = vmatprep.subr.mxu1 %v7284_v18  ;;  %9896 = vst [vmem:[#allocation145_spill] sm:$0xff] %v7304_v16  ;;  %9897 = vst [vmem:[#allocation146_spill] sm:$0xff] %v7306_v4  ;;  %v7312_v44 = vld [vmem:[#allocation6 + $0x2b0] sm:$0xff]  ;;  %v7316_v18 = vld [vmem:[#allocation6 + $0x288] sm:$0xff] }
 0x4e3   :  { %2732 = vmatpush2.msra.mxu0 %v7286_v23  ;;  %2803 = vmatpush2.msra.mxu1 %v7290_v53  ;;  %9899 = vst [vmem:[#allocation148_spill] sm:$0xff] %v7312_v44  ;;  %9900 = vst [vmem:[#allocation149_spill] sm:$0xff] %v7316_v18  ;;  %v7318_v23 = vld [vmem:[#allocation6 + $0x298] sm:$0xff]  ;;  %v7322_v53 = vld [vmem:[#allocation6 + $0x280] sm:$0xff] }
 0x4e4   :  { %2733 = vmatprep.subr.mxu0 %v7292_v25  ;;  %2804 = vmatprep.subr.mxu1 %v7294_v22  ;;  %9901 = vst [vmem:[#allocation150_spill] sm:$0xff] %v7318_v23  ;;  %9902 = vst [vmem:[#allocation151_spill] sm:$0xff] %v7322_v53  ;;  %v7324_v25 = vld [vmem:[#allocation6 + $0x290] sm:$0xff]  ;;  %v7328_v22 = vld [vmem:[#allocation6 + $0x268] sm:$0xff] }
 0x4e5   :  { %2734 = vmatpush2.msra.mxu0 %v7298_v11  ;;  %2805 = vmatpush2.msra.mxu1 %v7300_v5  ;;  %9903 = vst [vmem:[#allocation152_spill] sm:$0xff] %v7324_v25  ;;  %9904 = vst [vmem:[#allocation153_spill] sm:$0xff] %v7328_v22  ;;  %v7330_v11 = vld [vmem:[#allocation6 + $0x278] sm:$0xff]  ;;  %v7334_v5 = vld [vmem:[#allocation6 + $0x260] sm:$0xff] }
 0x4e6   :  { %2735 = vmatprep.subr.mxu0 %v7304_v16  ;;  %2806 = vmatprep.subr.mxu1 %v7306_v4  ;;  %9905 = vst [vmem:[#allocation154_spill] sm:$0xff] %v7330_v11  ;;  %9906 = vst [vmem:[#allocation155_spill] sm:$0xff] %v7334_v5  ;;  %v7336_v16 = vld [vmem:[#allocation6 + $0x270] sm:$0xff]  ;;  %v7340_v4 = vld [vmem:[#allocation6 + $0x248] sm:$0xff] }
 0x4e7   :  { %2736 = vmatpush2.msra.mxu0 %v7310_v20  ;;  %2807 = vmatpush2.msra.mxu1 %v7312_v44  ;;  %9907 = vst [vmem:[#allocation156_spill] sm:$0xff] %v7336_v16  ;;  %9908 = vst [vmem:[#allocation157_spill] sm:$0xff] %v7340_v4  ;;  %v7342_v20 = vld [vmem:[#allocation6 + $0x258] sm:$0xff]  ;;  %v7346_v44 = vld [vmem:[#allocation6 + $0x240] sm:$0xff] }
 0x4e8   :  { %2737 = vmatprep.subr.mxu0 %v7316_v18  ;;  %2808 = vmatprep.subr.mxu1 %v7318_v23  ;;  %9909 = vst [vmem:[#allocation159_spill] sm:$0xff] %v7342_v20  ;;  %9910 = vst [vmem:[#allocation160_spill] sm:$0xff] %v7346_v44  ;;  %v7348_v18 = vld [vmem:[#allocation6 + $0x250] sm:$0xff]  ;;  %v7352_v23 = vld [vmem:[#allocation6 + $0x228] sm:$0xff] }
 0x4e9   :  { %2738 = vmatpush2.msra.mxu0 %v7322_v53  ;;  %2809 = vmatpush2.msra.mxu1 %v7324_v25  ;;  %9911 = vst [vmem:[#allocation163_spill] sm:$0xff] %v7348_v18  ;;  %9912 = vst [vmem:[#allocation164_spill] sm:$0xff] %v7352_v23  ;;  %v7354_v53 = vld [vmem:[#allocation6 + $0x238] sm:$0xff]  ;;  %v7358_v25 = vld [vmem:[#allocation6 + $0x220] sm:$0xff] }
 0x4ea   :  { %2739 = vmatprep.subr.mxu0 %v7328_v22  ;;  %2810 = vmatprep.subr.mxu1 %v7330_v11  ;;  %9913 = vst [vmem:[#allocation165_spill] sm:$0xff] %v7354_v53  ;;  %9914 = vst [vmem:[#allocation166_spill] sm:$0xff] %v7358_v25  ;;  %v7360_v22 = vld [vmem:[#allocation6 + $0x230] sm:$0xff]  ;;  %v7364_v11 = vld [vmem:[#allocation6 + $0x208] sm:$0xff] }
 0x4eb   :  { %2740 = vmatpush2.msra.mxu0 %v7334_v5  ;;  %2811 = vmatpush2.msra.mxu1 %v7336_v16  ;;  %9915 = vst [vmem:[#allocation167_spill] sm:$0xff] %v7360_v22  ;;  %9916 = vst [vmem:[#allocation168_spill] sm:$0xff] %v7364_v11  ;;  %v7366_v5 = vld [vmem:[#allocation6 + $0x218] sm:$0xff]  ;;  %v7370_v16 = vld [vmem:[#allocation6 + $0x200] sm:$0xff] }
 0x4ec   :  { %2741 = vmatprep.subr.mxu0 %v7340_v4  ;;  %2812 = vmatprep.subr.mxu1 %v7342_v20  ;;  %9917 = vst [vmem:[#allocation169_spill] sm:$0xff] %v7366_v5  ;;  %9918 = vst [vmem:[#allocation170_spill] sm:$0xff] %v7370_v16  ;;  %v7372_v4 = vld [vmem:[#allocation6 + $0x210] sm:$0xff] }
 0x4ed   :  { %2742 = vmatpush2.msra.mxu0 %v7346_v44  ;;  %2813 = vmatpush2.msra.mxu1 %v7348_v18  ;;  %9919 = vst [vmem:[#allocation171_spill] sm:$0xff] %v7372_v4 }
 0x4ee   :  { %2743 = vmatprep.subr.mxu0 %v7352_v23  ;;  %2814 = vmatprep.subr.mxu1 %v7354_v53 }
 0x4ef   :  { %2744 = vmatpush2.msra.mxu0 %v7358_v25  ;;  %2815 = vmatpush2.msra.mxu1 %v7360_v22 }
 0x4f0   :  { %2745 = vmatprep.subr.mxu0 %v7364_v11  ;;  %2816 = vmatprep.subr.mxu1 %v7366_v5 }
 0x4f1   :  { %2746 = vmatpush2.msra.mxu0 %v7370_v16  ;;  %2817 = vmatpush2.msra.mxu1 %v7372_v4 }
 0x4f2   :  { %2926 = vmatprep.subr.mxu0 %v6769_v42  ;;  %2997 = vmatprep.subr.mxu1 %v6771_v58 }
 0x550   :  { %v2204_v53 = vpop.f32.mrf.mxu0  ;;  %v2275_v22 = vpop.f32.mrf.mxu1 }
 0x551   :  { %v2205_v23 = vadd.f32 %v2204_v53, %v9759_v24  ;;  %v2276_v42 = vadd.f32 %v2275_v22, %v9762_v0 }
 0x552   :  { %v2206_v18 = vpop.f32.mrf.mxu0  ;;  %v2277_v5 = vpop.f32.mrf.mxu1 }
 0x553   :  { %v4650_v44 = vmul.f32 -1.442695, %v2205_v23  ;;  %v2207_v25 = vadd.f32 %v2206_v18, %v9760_v2  ;;  %v2278_v16 = vadd.f32 %v2277_v5, %v9761_v15  ;;  %v2311_v23 = vpop.permute.xlu0 %2310 }
 0x554   :  { %v2314_v5 = vmul.f32 %v2311_v23, %v9764_v31 }
 0x555   :  { %4804 = vpow2.f32 %v4650_v44  ;;  %v4651_v11 = vmul.f32 -1.442695, %v2207_v25  ;;  %v4652_v20 = vmul.f32 -1.442695, %v2278_v16  ;;  %v2313_v44 = vmul.f32 %v2311_v23, %v9763_v26 }
 0x557   :  { %4806 = vpow2.f32 %v4651_v11 }
 0x558   :  { %4808 = vpow2.f32 %v4652_v20 }
 0x562   :  { %v4805_v4 = vpop.eup %4804 }
 0x563   :  { %v2283_v19 = vadd.f32 1.0, %v4805_v4 }
 0x564   :  { %v4807_v58 = vpop.eup %4806 }
 0x565   :  { %4810 = vrcp.f32 %v2283_v19  ;;  %v2289_v53 = vadd.f32 1.0, %v4807_v58  ;;  %v4809_v18 = vpop.eup %4808 }
 0x566   :  { %4812 = vtanh.f32 %v2276_v42  ;;  %v2296_v15 = vadd.f32 1.0, %v4809_v18  ;;  %v2316_v18 = vmul.f32 %v2311_v23, %v9446_v35 }
 0x567   :  { %4814 = vrcp.f32 %v2289_v53 }
 0x568   :  { %4816 = vrcp.f32 %v2296_v15 }
 0x571   :  { %v2447_v25 = vpop.f32.mrf.mxu0  ;;  %v2518_v20 = vpop.f32.mrf.mxu1 }
 0x572   :  { %v4811_v11 = vpop.eup %4810  ;;  %v2523_v2 = vadd.f32 %v2447_v25, %v2313_v44 }
 0x573   :  { %v4813_v16 = vpop.eup %4812  ;;  %v2449_v24 = vpop.f32.mrf.mxu0 }
 0x574   :  { %v4815_v22 = vpop.eup %4814  ;;  %v2527_v4 = vadd.f32 %v2523_v2, %v5682_v61  ;;  %v2524_v19 = vadd.f32 %v2449_v24, %v2314_v5  ;;  %v2300_v58 = vmul.f32 %v4813_v16, %v4811_v11  ;;  %v2520_v25 = vpop.f32.mrf.mxu1  ;;  %v2315_v24 = vmul.f32 %v2311_v23, %v9447_v38 }
 0x575   :  { %v2299_v42 = vmul.f32 %v4815_v22, %v6784_v3  ;;  %v2526_v2 = vadd.f32 %v2520_v25, %v2316_v18  ;;  %v4817_v16 = vpop.eup %4816 }
 0x576   :  { %v4654_v53 = vmul.f32 -1.442695, %v2527_v4  ;;  %v2528_v0 = vadd.f32 %v2524_v19, %v5686_v54  ;;  %v2525_v3 = vadd.f32 %v2518_v20, %v2315_v24 }
 0x577   :  { %v7391_v26 = vadd.f32 %v2300_v58, %v2299_v42  ;;  %v2530_v11 = vadd.f32 %v2526_v2, %v5701_v55 }
 0x578   :  { %4818 = vpow2.f32 %v4654_v53  ;;  %v4655_v44 = vmul.f32 -1.442695, %v2528_v0  ;;  %v2529_v15 = vadd.f32 %v2525_v3, %v5706_v50 }
 0x579   :  { %4820 = vtanh.f32 %v7391_v26  ;;  %v4656_v5 = vmul.f32 -1.442695, %v2530_v11 }
 0x57a   :  { %4822 = vpow2.f32 %v4655_v44 }
 0x57b   :  { %4824 = vpow2.f32 %v4656_v5 }
 0x585   :  { %v4819_v22 = vpop.eup %4818 }
 0x586   :  { %v4821_v4 = vpop.eup %4820  ;;  %v2534_v19 = vadd.f32 1.0, %v4819_v22 }
 0x587   :  { %v4823_v0 = vpop.eup %4822  ;;  %v2303_v58 = vmul.f32 %v4821_v4, %v4817_v16  ;;  %v9957_v4 = vld [vmem:[#allocation50_spill] sm:$0xff] }
 0x588   :  { %4826 = vrcp.f32 %v2534_v19  ;;  %v2540_v42 = vadd.f32 1.0, %v4823_v0  ;;  %v4825_v44 = vpop.eup %4824  ;;  %v9958_v19 = vld [vmem:[#allocation51_spill] sm:$0xff]  ;;  %v9959_v0 = vld [vmem:[#allocation52_spill] sm:$0xff] }
 0x589   :  { %4828 = vtanh.f32 %v2529_v15  ;;  %2305 = vst [vmem:[#allocation2 + $0xc] sm:$0xf] %v2303_v58  ;;  %2747 = vmatprep.mubr.f32.mxu0 %v2303_v58  ;;  %2818 = vmatprep.mubr.f32.mxu1 %v2303_v58  ;;  %v2547_v24 = vadd.f32 1.0, %v4825_v44  ;;  %v9960_v58 = vld [vmem:[#allocation53_spill] sm:$0xff]  ;;  %v9965_v44 = vld [vmem:[#allocation58_spill] sm:$0xff] }
 0x58a   :  { %4830 = vrcp.f32 %v2540_v42  ;;  %v9961_v42 = vld [vmem:[#allocation54_spill] sm:$0xff] }
 0x58b   :  { %4832 = vrcp.f32 %v2547_v24  ;;  %v9969_v24 = vld [vmem:[#allocation62_spill] sm:$0xff] }
 0x590   :  { %v4489_v23 = vld [vmem:[#allocation2 + $0xc] sm:$0xf] }
 0x591   :  { %v4504_v20 = vmul.f32 %v6794_v60, %v4489_v23  ;;  %v9920_v60 = vld [vmem:[#allocation14_spill] sm:$0xff]  ;;  %v9962_v23 = vld [vmem:[#allocation55_spill] sm:$0xff] }
 0x593   :  { %v4519_v53 = vsel %vm4509_vm0, %v4504_v20, 0.0  ;;  %v9963_v20 = vld [vmem:[#allocation56_spill] sm:$0xff] }
 0x594   :  { %4520 = vadd.xlane.f32.xlu0 %v4519_v53  ;;  %v9964_v53 = vld [vmem:[#allocation57_spill] sm:$0xff] }
 0x595   :  { %v4827_v25 = vpop.eup %4826 }
 0x596   :  { %v4829_v18 = vpop.eup %4828 }
 0x597   :  { %v4831_v2 = vpop.eup %4830  ;;  %v2551_v11 = vmul.f32 %v4829_v18, %v4827_v25  ;;  %v9966_v25 = vld [vmem:[#allocation59_spill] sm:$0xff]  ;;  %v9967_v18 = vld [vmem:[#allocation60_spill] sm:$0xff] }
 0x598   :  { %v2550_v3 = vmul.f32 %v4831_v2, %v6799_v21  ;;  %v4833_v16 = vpop.eup %4832  ;;  %v9921_v21 = vld [vmem:[#allocation15_spill] sm:$0xff]  ;;  %v9968_v2 = vld [vmem:[#allocation61_spill] sm:$0xff] }
 0x59a   :  { %v7401_v5 = vadd.f32 %v2551_v11, %v2550_v3  ;;  %v9970_v11 = vld [vmem:[#allocation63_spill] sm:$0xff]  ;;  %v9971_v3 = vld [vmem:[#allocation64_spill] sm:$0xff] }
 0x59c   :  { %4834 = vtanh.f32 %v7401_v5 }
 0x5a9   :  { %v4835_v22 = vpop.eup %4834 }
 0x5aa   :  { %v7404_v15 = vmul.f32 %v4835_v22, %v4833_v16  ;;  %v9972_v16 = vld [vmem:[#allocation65_spill] sm:$0xff]  ;;  %v9973_v22 = vld [vmem:[#allocation66_spill] sm:$0xff] }
 0x5ac   :  { %2748 = vmatmul.mubr.f32.vlgmr.msra.gmra.mxu0 %v7404_v15  ;;  %2819 = vmatmul.mubr.f32.vlgmr.msra.gmra.mxu1 %v7404_v15 }
 0x5ad   :  { %2927 = vmatpush1.msra.mxu0 %v6804_v27  ;;  %2998 = vmatpush1.msra.mxu1 %v6806_v28  ;;  %v9922_v27 = vld [vmem:[#allocation16_spill] sm:$0xff]  ;;  %v9923_v28 = vld [vmem:[#allocation17_spill] sm:$0xff] }
 0x5ae   :  { %2928 = vmatprep.subr.mxu0 %v6808_v29  ;;  %2999 = vmatprep.subr.mxu1 %v6810_v30  ;;  %v9924_v29 = vld [vmem:[#allocation18_spill] sm:$0xff]  ;;  %v9925_v30 = vld [vmem:[#allocation19_spill] sm:$0xff] }
 0x5af   :  { %2929 = vmatpush1.msra.mxu0 %v6814_v32  ;;  %3000 = vmatpush1.msra.mxu1 %v6816_v33  ;;  %v9926_v32 = vld [vmem:[#allocation20_spill] sm:$0xff]  ;;  %v9927_v33 = vld [vmem:[#allocation21_spill] sm:$0xff] }
 0x5b0   :  { %2930 = vmatprep.subr.mxu0 %v6820_v34  ;;  %3001 = vmatprep.subr.mxu1 %v6822_v36  ;;  %v9928_v34 = vld [vmem:[#allocation22_spill] sm:$0xff]  ;;  %v9929_v36 = vld [vmem:[#allocation23_spill] sm:$0xff] }
 0x5b1   :  { %2931 = vmatpush1.msra.mxu0 %v6826_v37  ;;  %3002 = vmatpush1.msra.mxu1 %v6828_v39  ;;  %v9930_v37 = vld [vmem:[#allocation24_spill] sm:$0xff]  ;;  %v9931_v39 = vld [vmem:[#allocation25_spill] sm:$0xff] }
 0x5b2   :  { %2932 = vmatprep.subr.mxu0 %v6832_v40  ;;  %3003 = vmatprep.subr.mxu1 %v6834_v41  ;;  %v9932_v40 = vld [vmem:[#allocation26_spill] sm:$0xff]  ;;  %v9933_v41 = vld [vmem:[#allocation27_spill] sm:$0xff] }
 0x5b3   :  { %2933 = vmatpush1.msra.mxu0 %v6838_v45  ;;  %3004 = vmatpush1.msra.mxu1 %v6840_v52  ;;  %v9934_v45 = vld [vmem:[#allocation28_spill] sm:$0xff]  ;;  %v9935_v52 = vld [vmem:[#allocation29_spill] sm:$0xff] }
 0x5b4   :  { %2934 = vmatprep.subr.mxu0 %v6844_v56  ;;  %3005 = vmatprep.subr.mxu1 %v6846_v48  ;;  %v9936_v56 = vld [vmem:[#allocation30_spill] sm:$0xff]  ;;  %v9937_v48 = vld [vmem:[#allocation31_spill] sm:$0xff] }
 0x5b5   :  { %2935 = vmatpush1.msra.mxu0 %v6850_v57  ;;  %3006 = vmatpush1.msra.mxu1 %v6852_v59  ;;  %v9938_v57 = vld [vmem:[#allocation32_spill] sm:$0xff]  ;;  %v9939_v59 = vld [vmem:[#allocation33_spill] sm:$0xff] }
 0x5b6   :  { %2936 = vmatprep.subr.mxu0 %v6856_v63  ;;  %3007 = vmatprep.subr.mxu1 %v6858_v47  ;;  %v9940_v63 = vld [vmem:[#allocation34_spill] sm:$0xff]  ;;  %v9941_v47 = vld [vmem:[#allocation35_spill] sm:$0xff] }
 0x5b7   :  { %2937 = vmatpush1.msra.mxu0 %v6862_v7  ;;  %3008 = vmatpush1.msra.mxu1 %v6864_v62  ;;  %v9942_v7 = vld [vmem:[#allocation36_spill] sm:$0xff]  ;;  %v9943_v62 = vld [vmem:[#allocation37_spill] sm:$0xff] }
 0x5b8   :  { %2938 = vmatprep.subr.mxu0 %v6868_v1  ;;  %3009 = vmatprep.subr.mxu1 %v6870_v6  ;;  %v9944_v1 = vld [vmem:[#allocation38_spill] sm:$0xff]  ;;  %v9945_v6 = vld [vmem:[#allocation39_spill] sm:$0xff] }
 0x5b9   :  { %2939 = vmatpush1.msra.mxu0 %v6874_v51  ;;  %3010 = vmatpush1.msra.mxu1 %v6876_v9  ;;  %v9946_v51 = vmov 0.0   ;;  %v9947_v9 = vld [vmem:[#allocation40_spill] sm:$0xff] }
 0x5ba   :  { %2940 = vmatprep.subr.mxu0 %v6880_v14  ;;  %3011 = vmatprep.subr.mxu1 %v6882_v43  ;;  %v9948_v14 = vld [vmem:[#allocation41_spill] sm:$0xff]  ;;  %v9949_v43 = vld [vmem:[#allocation42_spill] sm:$0xff] }
 0x5bb   :  { %2941 = vmatpush1.msra.mxu0 %v6886_v49  ;;  %3012 = vmatpush1.msra.mxu1 %v6888_v12  ;;  %v9950_v49 = vld [vmem:[#allocation43_spill] sm:$0xff]  ;;  %v9951_v12 = vld [vmem:[#allocation44_spill] sm:$0xff] }
 0x5bc   :  { %2942 = vmatprep.subr.mxu0 %v6892_v10  ;;  %3013 = vmatprep.subr.mxu1 %v6894_v8  ;;  %v9952_v10 = vld [vmem:[#allocation45_spill] sm:$0xff]  ;;  %v9953_v8 = vld [vmem:[#allocation46_spill] sm:$0xff] }
 0x5bd   :  { %2943 = vmatpush1.msra.mxu0 %v6898_v13  ;;  %3014 = vmatpush1.msra.mxu1 %v6900_v46  ;;  %v9954_v13 = vld [vmem:[#allocation47_spill] sm:$0xff]  ;;  %v9955_v46 = vld [vmem:[#allocation48_spill] sm:$0xff] }
 0x5be   :  { %2944 = vmatprep.subr.mxu0 %v9920_v60  ;;  %3015 = vmatprep.subr.mxu1 %v9921_v21  ;;  %v9975_v60 = vld [vmem:[#allocation68_spill] sm:$0xff]  ;;  %v9976_v21 = vld [vmem:[#allocation69_spill] sm:$0xff] }
 0x5bf   :  { %2945 = vmatpush1.msra.mxu0 %v9922_v27  ;;  %3016 = vmatpush1.msra.mxu1 %v9923_v28  ;;  %v9977_v27 = vld [vmem:[#allocation70_spill] sm:$0xff]  ;;  %v9978_v28 = vld [vmem:[#allocation71_spill] sm:$0xff] }
 0x5c0   :  { %2946 = vmatprep.subr.mxu0 %v9924_v29  ;;  %3017 = vmatprep.subr.mxu1 %v9925_v30  ;;  %v9979_v29 = vld [vmem:[#allocation72_spill] sm:$0xff]  ;;  %v9980_v30 = vld [vmem:[#allocation73_spill] sm:$0xff] }
 0x5c1   :  { %2947 = vmatpush1.msra.mxu0 %v9926_v32  ;;  %3018 = vmatpush1.msra.mxu1 %v9927_v33  ;;  %v9981_v32 = vld [vmem:[#allocation74_spill] sm:$0xff]  ;;  %v9982_v33 = vld [vmem:[#allocation75_spill] sm:$0xff] }
 0x5c2   :  { %2948 = vmatprep.subr.mxu0 %v9928_v34  ;;  %3019 = vmatprep.subr.mxu1 %v9929_v36  ;;  %v9983_v34 = vld [vmem:[#allocation76_spill] sm:$0xff]  ;;  %v9984_v36 = vld [vmem:[#allocation77_spill] sm:$0xff] }
 0x5c3   :  { %2949 = vmatpush1.msra.mxu0 %v9930_v37  ;;  %3020 = vmatpush1.msra.mxu1 %v9931_v39  ;;  %v9985_v37 = vld [vmem:[#allocation78_spill] sm:$0xff]  ;;  %v9986_v39 = vld [vmem:[#allocation79_spill] sm:$0xff] }
 0x5c4   :  { %2950 = vmatprep.subr.mxu0 %v9932_v40  ;;  %3021 = vmatprep.subr.mxu1 %v9933_v41  ;;  %v9987_v40 = vld [vmem:[#allocation80_spill] sm:$0xff]  ;;  %v9988_v41 = vld [vmem:[#allocation81_spill] sm:$0xff] }
 0x5c5   :  { %2951 = vmatpush1.msra.mxu0 %v9934_v45  ;;  %3022 = vmatpush1.msra.mxu1 %v9935_v52  ;;  %v9989_v45 = vld [vmem:[#allocation82_spill] sm:$0xff]  ;;  %v9990_v52 = vld [vmem:[#allocation83_spill] sm:$0xff] }
 0x5c6   :  { %2952 = vmatprep.subr.mxu0 %v6952_v17  ;;  %3023 = vmatprep.subr.mxu1 %v9936_v56  ;;  %v9956_v17 = vld [vmem:[#allocation49_spill] sm:$0xff]  ;;  %v9991_v56 = vld [vmem:[#allocation84_spill] sm:$0xff] }
 0x5c7   :  { %2953 = vmatpush1.msra.mxu0 %v9937_v48  ;;  %3024 = vmatpush1.msra.mxu1 %v9938_v57  ;;  %v9992_v48 = vld [vmem:[#allocation85_spill] sm:$0xff]  ;;  %v9993_v57 = vld [vmem:[#allocation86_spill] sm:$0xff] }
 0x5c8   :  { %2954 = vmatprep.subr.mxu0 %v9939_v59  ;;  %3025 = vmatprep.subr.mxu1 %v9940_v63  ;;  %v9994_v59 = vld [vmem:[#allocation87_spill] sm:$0xff]  ;;  %v9995_v63 = vld [vmem:[#allocation88_spill] sm:$0xff] }
 0x5c9   :  { %2955 = vmatpush1.msra.mxu0 %v9941_v47  ;;  %3026 = vmatpush1.msra.mxu1 %v9942_v7  ;;  %v9996_v47 = vld [vmem:[#allocation89_spill] sm:$0xff]  ;;  %v9997_v7 = vld [vmem:[#allocation90_spill] sm:$0xff] }
 0x5ca   :  { %2956 = vmatprep.subr.mxu0 %v9943_v62  ;;  %3027 = vmatprep.subr.mxu1 %v9944_v1  ;;  %v9998_v62 = vld [vmem:[#allocation91_spill] sm:$0xff]  ;;  %v9999_v1 = vld [vmem:[#allocation92_spill] sm:$0xff] }
 0x5cb   :  { %2957 = vmatpush1.msra.mxu0 %v9945_v6  ;;  %2990 = vmatprep.mubr.f32.mxu0 %v9946_v51  ;;  %v10000_v6 = vld [vmem:[#allocation93_spill] sm:$0xff] }
 0x5cc   :  { %3028 = vmatpush1.msra.mxu1 %v9947_v9  ;;  %3061 = vmatprep.mubr.f32.mxu1 %v9946_v51  ;;  %v10001_v9 = vld [vmem:[#allocation94_spill] sm:$0xff] }
 0x5cd   :  { %2991 = vmatmul.mubr.f32.vlgmr.msra.gmra.mxu0 %v7404_v15  ;;  %3062 = vmatmul.mubr.f32.vlgmr.msra.gmra.mxu1 %v7404_v15  ;;  %v9974_v15 = vld [vmem:[#allocation67_spill] sm:$0xff] }
 0x5ce   :  { %3228 = vmatprep.subr.mxu0 %v9948_v14  ;;  %3299 = vmatprep.subr.mxu1 %v9949_v43  ;;  %v10002_v14 = vld [vmem:[#allocation95_spill] sm:$0xff]  ;;  %v10003_v43 = vld [vmem:[#allocation96_spill] sm:$0xff] }
 0x5cf   :  { %3229 = vmatpush1.msra.mxu0 %v9950_v49  ;;  %3300 = vmatpush1.msra.mxu1 %v9951_v12  ;;  %v10004_v49 = vld [vmem:[#allocation97_spill] sm:$0xff]  ;;  %v10005_v12 = vld [vmem:[#allocation98_spill] sm:$0xff] }
 0x5d0   :  { %3230 = vmatprep.subr.mxu0 %v9952_v10  ;;  %3301 = vmatprep.subr.mxu1 %v9953_v8  ;;  %v10006_v10 = vld [vmem:[#allocation99_spill] sm:$0xff]  ;;  %v10007_v8 = vld [vmem:[#allocation100_spill] sm:$0xff] }
 0x5d1   :  { %3231 = vmatpush1.msra.mxu0 %v9954_v13  ;;  %3302 = vmatpush1.msra.mxu1 %v9955_v46  ;;  %v10008_v13 = vld [vmem:[#allocation101_spill] sm:$0xff]  ;;  %v10009_v46 = vld [vmem:[#allocation102_spill] sm:$0xff] }
 0x5d2   :  { %3232 = vmatprep.subr.mxu0 %v9956_v17  ;;  %3303 = vmatprep.subr.mxu1 %v9957_v4  ;;  %v10010_v17 = vld [vmem:[#allocation103_spill] sm:$0xff]  ;;  %v10011_v4 = vld [vmem:[#allocation104_spill] sm:$0xff] }
 0x5d3   :  { %3233 = vmatpush1.msra.mxu0 %v9958_v19  ;;  %3304 = vmatpush1.msra.mxu1 %v9959_v0  ;;  %v10012_v19 = vld [vmem:[#allocation105_spill] sm:$0xff]  ;;  %v10013_v0 = vld [vmem:[#allocation106_spill] sm:$0xff] }
 0x5d4   :  { %3234 = vmatprep.subr.mxu0 %v9960_v58  ;;  %3305 = vmatprep.subr.mxu1 %v9961_v42  ;;  %v10014_v58 = vld [vmem:[#allocation107_spill] sm:$0xff]  ;;  %v10015_v42 = vld [vmem:[#allocation108_spill] sm:$0xff] }
 0x5d5   :  { %3235 = vmatpush1.msra.mxu0 %v9962_v23  ;;  %3306 = vmatpush1.msra.mxu1 %v9963_v20  ;;  %v10016_v23 = vld [vmem:[#allocation109_spill] sm:$0xff]  ;;  %v10017_v20 = vld [vmem:[#allocation110_spill] sm:$0xff] }
 0x5d6   :  { %3236 = vmatprep.subr.mxu0 %v9964_v53  ;;  %3307 = vmatprep.subr.mxu1 %v9965_v44  ;;  %v10018_v53 = vld [vmem:[#allocation111_spill] sm:$0xff]  ;;  %v10019_v44 = vld [vmem:[#allocation112_spill] sm:$0xff] }
 0x5d7   :  { %3237 = vmatpush1.msra.mxu0 %v9966_v25  ;;  %3308 = vmatpush1.msra.mxu1 %v9967_v18  ;;  %v10020_v25 = vld [vmem:[#allocation113_spill] sm:$0xff]  ;;  %v10021_v18 = vld [vmem:[#allocation114_spill] sm:$0xff] }
 0x5d8   :  { %3238 = vmatprep.subr.mxu0 %v9968_v2  ;;  %3309 = vmatprep.subr.mxu1 %v9969_v24  ;;  %v10022_v2 = vld [vmem:[#allocation115_spill] sm:$0xff]  ;;  %v10023_v24 = vld [vmem:[#allocation116_spill] sm:$0xff] }
 0x5d9   :  { %3239 = vmatpush1.msra.mxu0 %v9970_v11  ;;  %3310 = vmatpush1.msra.mxu1 %v9971_v3  ;;  %v10024_v11 = vld [vmem:[#allocation117_spill] sm:$0xff]  ;;  %v10025_v3 = vld [vmem:[#allocation118_spill] sm:$0xff] }
 0x5da   :  { %3240 = vmatprep.subr.mxu0 %v9972_v16  ;;  %3311 = vmatprep.subr.mxu1 %v9973_v22  ;;  %v10026_v16 = vld [vmem:[#allocation119_spill] sm:$0xff]  ;;  %v10027_v22 = vld [vmem:[#allocation120_spill] sm:$0xff] }
 0x5db   :  { %3241 = vmatpush1.msra.mxu0 %v9974_v15  ;;  %3312 = vmatpush1.msra.mxu1 %v9975_v60  ;;  %v10028_v15 = vld [vmem:[#allocation121_spill] sm:$0xff]  ;;  %v10029_v60 = vld [vmem:[#allocation122_spill] sm:$0xff] }
 0x5dc   :  { %3242 = vmatprep.subr.mxu0 %v9976_v21  ;;  %3313 = vmatprep.subr.mxu1 %v9977_v27  ;;  %v10030_v21 = vld [vmem:[#allocation123_spill] sm:$0xff]  ;;  %v10031_v27 = vld [vmem:[#allocation124_spill] sm:$0xff] }
 0x5dd   :  { %3243 = vmatpush1.msra.mxu0 %v9978_v28  ;;  %3314 = vmatpush1.msra.mxu1 %v9979_v29  ;;  %v10032_v28 = vld [vmem:[#allocation125_spill] sm:$0xff]  ;;  %v10033_v29 = vld [vmem:[#allocation126_spill] sm:$0xff] }
 0x5de   :  { %3244 = vmatprep.subr.mxu0 %v9980_v30  ;;  %3315 = vmatprep.subr.mxu1 %v9981_v32  ;;  %v10034_v30 = vld [vmem:[#allocation127_spill] sm:$0xff]  ;;  %v10035_v32 = vld [vmem:[#allocation128_spill] sm:$0xff] }
 0x5df   :  { %3245 = vmatpush1.msra.mxu0 %v9982_v33  ;;  %3316 = vmatpush1.msra.mxu1 %v9983_v34  ;;  %v10036_v33 = vld [vmem:[#allocation129_spill] sm:$0xff]  ;;  %v10037_v34 = vld [vmem:[#allocation130_spill] sm:$0xff] }
 0x5e0   :  { %3246 = vmatprep.subr.mxu0 %v9984_v36  ;;  %3317 = vmatprep.subr.mxu1 %v9985_v37  ;;  %v10038_v36 = vld [vmem:[#allocation131_spill] sm:$0xff]  ;;  %v10039_v37 = vld [vmem:[#allocation132_spill] sm:$0xff] }
 0x5e1   :  { %3247 = vmatpush1.msra.mxu0 %v9986_v39  ;;  %3318 = vmatpush1.msra.mxu1 %v9987_v40  ;;  %v10040_v39 = vld [vmem:[#allocation133_spill] sm:$0xff]  ;;  %v10041_v40 = vld [vmem:[#allocation134_spill] sm:$0xff] }
 0x5e2   :  { %3248 = vmatprep.subr.mxu0 %v9988_v41  ;;  %3319 = vmatprep.subr.mxu1 %v9989_v45  ;;  %v10042_v41 = vld [vmem:[#allocation135_spill] sm:$0xff]  ;;  %v10043_v45 = vld [vmem:[#allocation136_spill] sm:$0xff] }
 0x5e3   :  { %3249 = vmatpush1.msra.mxu0 %v9990_v52  ;;  %3320 = vmatpush1.msra.mxu1 %v9991_v56  ;;  %v10044_v52 = vld [vmem:[#allocation137_spill] sm:$0xff]  ;;  %v10045_v56 = vld [vmem:[#allocation138_spill] sm:$0xff] }
 0x5e4   :  { %3250 = vmatprep.subr.mxu0 %v9992_v48  ;;  %3321 = vmatprep.subr.mxu1 %v9993_v57  ;;  %v10046_v48 = vld [vmem:[#allocation139_spill] sm:$0xff]  ;;  %v10047_v57 = vld [vmem:[#allocation140_spill] sm:$0xff] }
 0x5e5   :  { %3251 = vmatpush1.msra.mxu0 %v9994_v59  ;;  %3322 = vmatpush1.msra.mxu1 %v9995_v63  ;;  %v10048_v59 = vld [vmem:[#allocation141_spill] sm:$0xff]  ;;  %v10049_v63 = vld [vmem:[#allocation142_spill] sm:$0xff] }
 0x5e6   :  { %3252 = vmatprep.subr.mxu0 %v9996_v47  ;;  %3323 = vmatprep.subr.mxu1 %v9997_v7  ;;  %v10050_v47 = vld [vmem:[#allocation143_spill] sm:$0xff]  ;;  %v10051_v7 = vld [vmem:[#allocation144_spill] sm:$0xff] }
 0x5e7   :  { %3253 = vmatpush1.msra.mxu0 %v9998_v62  ;;  %3324 = vmatpush1.msra.mxu1 %v9999_v1  ;;  %v10052_v62 = vld [vmem:[#allocation145_spill] sm:$0xff]  ;;  %v10053_v1 = vld [vmem:[#allocation146_spill] sm:$0xff] }
 0x5e8   :  { %3254 = vmatprep.subr.mxu0 %v10000_v6  ;;  %3325 = vmatprep.subr.mxu1 %v10001_v9  ;;  %v10054_v6 = vld [vmem:[#allocation147_spill] sm:$0xff]  ;;  %v10055_v9 = vld [vmem:[#allocation148_spill] sm:$0xff] }
 0x5e9   :  { %3255 = vmatpush1.msra.mxu0 %v10002_v14  ;;  %3326 = vmatpush1.msra.mxu1 %v10003_v43  ;;  %v10056_v14 = vld [vmem:[#allocation149_spill] sm:$0xff]  ;;  %v10057_v43 = vld [vmem:[#allocation150_spill] sm:$0xff] }
 0x5ea   :  { %3256 = vmatprep.subr.mxu0 %v10004_v49  ;;  %3327 = vmatprep.subr.mxu1 %v10005_v12  ;;  %v10058_v49 = vld [vmem:[#allocation151_spill] sm:$0xff]  ;;  %v10059_v12 = vld [vmem:[#allocation152_spill] sm:$0xff] }
 0x5eb   :  { %3257 = vmatpush1.msra.mxu0 %v10006_v10  ;;  %3328 = vmatpush1.msra.mxu1 %v10007_v8  ;;  %v10060_v10 = vld [vmem:[#allocation153_spill] sm:$0xff]  ;;  %v10061_v8 = vld [vmem:[#allocation154_spill] sm:$0xff] }
 0x5ec   :  { %3258 = vmatprep.subr.mxu0 %v10008_v13  ;;  %3329 = vmatprep.subr.mxu1 %v10009_v46  ;;  %v10062_v13 = vld [vmem:[#allocation155_spill] sm:$0xff]  ;;  %v10063_v46 = vld [vmem:[#allocation156_spill] sm:$0xff] }
 0x5ed   :  { %3259 = vmatpush1.msra.mxu0 %v10010_v17  ;;  %3330 = vmatpush1.msra.mxu1 %v10011_v4  ;;  %v10064_v17 = vld [vmem:[#allocation157_spill] sm:$0xff]  ;;  %v10065_v4 = vld [vmem:[#allocation159_spill] sm:$0xff] }
 0x5ee   :  { %3260 = vmatprep.subr.mxu0 %v10012_v19  ;;  %3331 = vmatprep.subr.mxu1 %v10013_v0  ;;  %v10066_v19 = vld [vmem:[#allocation160_spill] sm:$0xff]  ;;  %v10067_v0 = vld [vmem:[#allocation163_spill] sm:$0xff] }
 0x5ef   :  { %3261 = vmatpush2.msra.mxu0 %v10014_v58  ;;  %3332 = vmatpush2.msra.mxu1 %v10015_v42  ;;  %v10068_v58 = vld [vmem:[#allocation164_spill] sm:$0xff]  ;;  %v10069_v42 = vld [vmem:[#allocation165_spill] sm:$0xff] }
 0x5f0   :  { %3262 = vmatprep.subr.mxu0 %v10016_v23  ;;  %3333 = vmatprep.subr.mxu1 %v10017_v20  ;;  %v10070_v23 = vld [vmem:[#allocation166_spill] sm:$0xff]  ;;  %v10071_v20 = vld [vmem:[#allocation167_spill] sm:$0xff] }
 0x5f1   :  { %3263 = vmatpush2.msra.mxu0 %v10018_v53  ;;  %3334 = vmatpush2.msra.mxu1 %v10019_v44  ;;  %v10072_v53 = vld [vmem:[#allocation168_spill] sm:$0xff]  ;;  %v10073_v44 = vld [vmem:[#allocation169_spill] sm:$0xff] }
 0x5f2   :  { %3264 = vmatprep.subr.mxu0 %v10020_v25  ;;  %3335 = vmatprep.subr.mxu1 %v10021_v18  ;;  %v10074_v25 = vld [vmem:[#allocation170_spill] sm:$0xff]  ;;  %v10075_v18 = vld [vmem:[#allocation171_spill] sm:$0xff] }
 0x5f3   :  { %3265 = vmatpush2.msra.mxu0 %v10022_v2  ;;  %3336 = vmatpush2.msra.mxu1 %v10023_v24  ;;  %v7602_v2 = vld [vmem:[#allocation4 + $0x1e8] sm:$0xff]  ;;  %v7604_v24 = vld [vmem:[#allocation4 + $0x1f8] sm:$0xff] }
 0x5f4   :  { %3266 = vmatprep.subr.mxu0 %v10024_v11  ;;  %3337 = vmatprep.subr.mxu1 %v10025_v3  ;;  %v10076_v3 = vld [vmem:[#allocation10_spill] sm:$0xff] }
 0x5f5   :  { %3267 = vmatpush2.msra.mxu0 %v10026_v16  ;;  %3338 = vmatpush2.msra.mxu1 %v10027_v22 }
 0x5f6   :  { %3268 = vmatprep.subr.mxu0 %v10028_v15  ;;  %3339 = vmatprep.subr.mxu1 %v10029_v60  ;;  %v10077_v60 = vld [vmem:[#allocation11_spill] sm:$0xff] }
 0x5f7   :  { %3269 = vmatpush2.msra.mxu0 %v10030_v21  ;;  %3340 = vmatpush2.msra.mxu1 %v10031_v27 }
 0x5f8   :  { %3270 = vmatprep.subr.mxu0 %v10032_v28  ;;  %3341 = vmatprep.subr.mxu1 %v10033_v29 }
 0x5f9   :  { %3271 = vmatpush2.msra.mxu0 %v10034_v30  ;;  %3342 = vmatpush2.msra.mxu1 %v10035_v32  ;;  %v10078_v30 = vld [vmem:[#allocation12_spill] sm:$0xff] }
 0x5fa   :  { %3272 = vmatprep.subr.mxu0 %v10036_v33  ;;  %3343 = vmatprep.subr.mxu1 %v10037_v34 }
 0x5fb   :  { %3273 = vmatpush2.msra.mxu0 %v10038_v36  ;;  %3344 = vmatpush2.msra.mxu1 %v10039_v37  ;;  %v10079_v36 = vld [vmem:[#allocation13_spill] sm:$0xff] }
 0x5fc   :  { %3274 = vmatprep.subr.mxu0 %v10040_v39  ;;  %3345 = vmatprep.subr.mxu1 %v10041_v40 }
 0x5fd   :  { %3275 = vmatpush2.msra.mxu0 %v10042_v41  ;;  %3346 = vmatpush2.msra.mxu1 %v10043_v45  ;;  %v2856_v45 = vpop.permute.xlu1 %2855 }
 0x5fe   :  { %3276 = vmatprep.subr.mxu0 %v10044_v52  ;;  %3347 = vmatprep.subr.mxu1 %v10045_v56  ;;  %v10080_v56 = vld [vmem:[#allocation161_spill] sm:$0xff] }
 0x5ff   :  { %3277 = vmatpush2.msra.mxu0 %v10046_v48  ;;  %3348 = vmatpush2.msra.mxu1 %v10047_v57  ;;  %v2858_v48 = vmul.f32 %v2856_v45, %v10080_v56 }
 0x600   :  { %3278 = vmatprep.subr.mxu0 %v10048_v59  ;;  %3349 = vmatprep.subr.mxu1 %v10049_v63 }
 0x601   :  { %3279 = vmatpush2.msra.mxu0 %v10050_v47  ;;  %3350 = vmatpush2.msra.mxu1 %v10051_v7  ;;  %v2859_v47 = vmul.f32 %v2856_v45, %v9764_v31 }
 0x602   :  { %3280 = vmatprep.subr.mxu0 %v10052_v62  ;;  %3351 = vmatprep.subr.mxu1 %v10053_v1 }
 0x603   :  { %3281 = vmatpush2.msra.mxu0 %v10054_v6  ;;  %3352 = vmatpush2.msra.mxu1 %v10055_v9 }
 0x604   :  { %3282 = vmatprep.subr.mxu0 %v10056_v14  ;;  %3353 = vmatprep.subr.mxu1 %v10057_v43 }
 0x605   :  { %3283 = vmatpush2.msra.mxu0 %v10058_v49  ;;  %3354 = vmatpush2.msra.mxu1 %v10059_v12 }
 0x606   :  { %3284 = vmatprep.subr.mxu0 %v10060_v10  ;;  %3355 = vmatprep.subr.mxu1 %v10061_v8 }
 0x607   :  { %3285 = vmatpush2.msra.mxu0 %v10062_v13  ;;  %3356 = vmatpush2.msra.mxu1 %v10063_v46 }
 0x608   :  { %3286 = vmatprep.subr.mxu0 %v10064_v17  ;;  %3357 = vmatprep.subr.mxu1 %v10065_v4  ;;  %v2861_v4 = vmul.f32 %v2856_v45, %v9446_v35 }
 0x609   :  { %3287 = vmatpush2.msra.mxu0 %v10066_v19  ;;  %3358 = vmatpush2.msra.mxu1 %v10067_v0  ;;  %v2860_v0 = vmul.f32 %v2856_v45, %v9447_v38 }
 0x60a   :  { %3288 = vmatprep.subr.mxu0 %v10068_v58  ;;  %3359 = vmatprep.subr.mxu1 %v10069_v42 }
 0x60b   :  { %3289 = vmatpush2.msra.mxu0 %v10070_v23  ;;  %3360 = vmatpush2.msra.mxu1 %v10071_v20 }
 0x60c   :  { %3290 = vmatprep.subr.mxu0 %v10072_v53  ;;  %3361 = vmatprep.subr.mxu1 %v10073_v44 }
 0x60d   :  { %3291 = vmatpush2.msra.mxu0 %v10074_v25  ;;  %3362 = vmatpush2.msra.mxu1 %v10075_v18 }
 0x60e   :  { %3471 = vmatprep.subr.mxu0 %v7602_v2  ;;  %3542 = vmatprep.subr.mxu1 %v7604_v24 }
 0x66c   :  { %v2749_v11 = vpop.f32.mrf.mxu0  ;;  %v2820_v27 = vpop.f32.mrf.mxu1 }
 0x66d   :  { %v2750_v16 = vadd.f32 %v2749_v11, %v10076_v3  ;;  %v2821_v37 = vadd.f32 %v2820_v27, %v10079_v36 }
 0x66e   :  { %v2751_v22 = vpop.f32.mrf.mxu0  ;;  %v2822_v29 = vpop.f32.mrf.mxu1 }
 0x66f   :  { %v4657_v15 = vmul.f32 -1.442695, %v2750_v16  ;;  %v2752_v21 = vadd.f32 %v2751_v22, %v10077_v60  ;;  %v2823_v32 = vadd.f32 %v2822_v29, %v10078_v30 }
 0x671   :  { %4836 = vpow2.f32 %v4657_v15  ;;  %v4658_v28 = vmul.f32 -1.442695, %v2752_v21  ;;  %v4659_v33 = vmul.f32 -1.442695, %v2823_v32  ;;  %v7627_v15 = vld [vmem:[%s8478_s7] ss:$0 sm:$0xff] }
 0x673   :  { %4838 = vpow2.f32 %v4658_v28 }
 0x674   :  { %4840 = vpow2.f32 %v4659_v33 }
 0x67e   :  { %v4837_v34 = vpop.eup %4836 }
 0x67f   :  { %v2828_v39 = vadd.f32 1.0, %v4837_v34 }
 0x680   :  { %v4839_v40 = vpop.eup %4838 }
 0x681   :  { %4842 = vrcp.f32 %v2828_v39  ;;  %v2834_v41 = vadd.f32 1.0, %v4839_v40  ;;  %v4841_v52 = vpop.eup %4840 }
 0x682   :  { %4844 = vtanh.f32 %v2821_v37  ;;  %v2841_v62 = vadd.f32 1.0, %v4841_v52 }
 0x683   :  { %4846 = vrcp.f32 %v2834_v41 }
 0x684   :  { %4848 = vrcp.f32 %v2841_v62  ;;  %v7655_v62 = vld [vmem:[#allocation4 + $0x1b8] sm:$0xff] }
 0x68d   :  { %v2992_v57 = vpop.f32.mrf.mxu0  ;;  %v3063_v14 = vpop.f32.mrf.mxu1 }
 0x68e   :  { %v4843_v59 = vpop.eup %4842  ;;  %v3068_v63 = vadd.f32 %v2992_v57, %v2858_v48  ;;  %v7637_v48 = vld [vmem:[#allocation4 + $0x1e0] sm:$0xff]  ;;  %v7639_v57 = vld [vmem:[#allocation4 + $0x1f0] sm:$0xff] }
 0x68f   :  { %v4845_v7 = vpop.eup %4844  ;;  %v2994_v1 = vpop.f32.mrf.mxu0 }
 0x690   :  { %v4847_v6 = vpop.eup %4846  ;;  %v3072_v9 = vadd.f32 %v3068_v63, %v5682_v61  ;;  %v3069_v43 = vadd.f32 %v2994_v1, %v2859_v47  ;;  %v2845_v49 = vmul.f32 %v4845_v7, %v4843_v59  ;;  %v3065_v17 = vpop.f32.mrf.mxu1  ;;  %v7641_v59 = vld [vmem:[#allocation4 + $0x1c8] sm:$0xff]  ;;  %v7643_v63 = vld [vmem:[#allocation4 + $0x1d8] sm:$0xff]  ;;  %v7649_v47 = vld [vmem:[#allocation4 + $0x1d0] sm:$0xff] }
 0x691   :  { %v2844_v12 = vmul.f32 %v4847_v6, %v7391_v26  ;;  %v3071_v19 = vadd.f32 %v3065_v17, %v2861_v4  ;;  %v3070_v26 = vadd.f32 %v3063_v14, %v2860_v0  ;;  %v4849_v23 = vpop.eup %4848  ;;  %v7653_v7 = vld [vmem:[#allocation4 + $0x1a8] sm:$0xff]  ;;  %v7659_v1 = vld [vmem:[#allocation4 + $0x1a0] sm:$0xff]  ;;  %v7661_v6 = vld [vmem:[#allocation4 + $0x1b0] sm:$0xff] }
 0x692   :  { %v4661_v10 = vmul.f32 -1.442695, %v3072_v9  ;;  %v3073_v8 = vadd.f32 %v3069_v43, %v5686_v54  ;;  %v7665_v9 = vld [vmem:[#allocation4 + $0x188] sm:$0xff]  ;;  %v7667_v14 = vld [vmem:[#allocation4 + $0x198] sm:$0xff]  ;;  %v7671_v43 = vld [vmem:[#allocation4 + $0x180] sm:$0xff] }
 0x693   :  { %v7617_v13 = vadd.f32 %v2845_v49, %v2844_v12  ;;  %v3075_v58 = vadd.f32 %v3071_v19, %v5701_v55  ;;  %v3074_v53 = vadd.f32 %v3070_v26, %v5706_v50  ;;  %v7673_v49 = vld [vmem:[#allocation4 + $0x190] sm:$0xff]  ;;  %v7677_v12 = vld [vmem:[#allocation4 + $0x168] sm:$0xff]  ;;  %v7691_v4 = vld [vmem:[#allocation4 + $0x158] sm:$0xff] }
 0x694   :  { %4850 = vpow2.f32 %v4661_v10  ;;  %v4662_v46 = vmul.f32 -1.442695, %v3073_v8  ;;  %v7679_v10 = vld [vmem:[#allocation4 + $0x178] sm:$0xff]  ;;  %v7683_v8 = vld [vmem:[#allocation4 + $0x160] sm:$0xff]  ;;  %v7689_v17 = vld [vmem:[#allocation4 + $0x148] sm:$0xff] }
 0x695   :  { %4852 = vtanh.f32 %v7617_v13  ;;  %v4663_v42 = vmul.f32 -1.442695, %v3075_v58  ;;  %v7695_v19 = vld [vmem:[#allocation4 + $0x140] sm:$0xff]  ;;  %v7697_v0 = vld [vmem:[#allocation4 + $0x150] sm:$0xff]  ;;  %v7701_v58 = vld [vmem:[#allocation4 + $0x128] sm:$0xff] }
 0x696   :  { %4854 = vpow2.f32 %v4662_v46  ;;  %v7685_v46 = vld [vmem:[#allocation4 + $0x170] sm:$0xff]  ;;  %v7703_v26 = vld [vmem:[#allocation4 + $0x138] sm:$0xff] }
 0x697   :  { %4856 = vpow2.f32 %v4663_v42  ;;  %v7707_v42 = vld [vmem:[#allocation4 + $0x120] sm:$0xff] }
 0x6a1   :  { %v4851_v20 = vpop.eup %4850 }
 0x6a2   :  { %v4853_v44 = vpop.eup %4852  ;;  %v3079_v25 = vadd.f32 1.0, %v4851_v20  ;;  %v7713_v20 = vld [vmem:[#allocation4 + $0x108] sm:$0xff] }
 0x6a3   :  { %v4855_v18 = vpop.eup %4854  ;;  %v2848_v11 = vmul.f32 %v4853_v44, %v4849_v23  ;;  %v7709_v23 = vld [vmem:[#allocation4 + $0x130] sm:$0xff]  ;;  %v7719_v44 = vld [vmem:[#allocation4 + $0x100] sm:$0xff] }
 0x6a4   :  { %4858 = vrcp.f32 %v3079_v25  ;;  %v3085_v16 = vadd.f32 1.0, %v4855_v18  ;;  %v4857_v28 = vpop.eup %4856  ;;  %v7721_v25 = vld [vmem:[#allocation4 + $0x110] sm:$0xff]  ;;  %v7725_v18 = vld [vmem:[#allocation4 + $0xe8] sm:$0xff] }
 0x6a5   :  { %4860 = vtanh.f32 %v3074_v53  ;;  %2850 = vst [vmem:[#allocation2 + $0x10] sm:$0xf] %v2848_v11  ;;  %3292 = vmatprep.mubr.f32.mxu0 %v2848_v11  ;;  %3363 = vmatprep.mubr.f32.mxu1 %v2848_v11  ;;  %v3092_v34 = vadd.f32 1.0, %v4857_v28  ;;  %v7715_v53 = vld [vmem:[#allocation4 + $0x118] sm:$0xff]  ;;  %v7743_v28 = vld [vmem:[#allocation4 + $0xc0] sm:$0xff] }
 0x6a6   :  { %4862 = vrcp.f32 %v3085_v16  ;;  %v7727_v11 = vld [vmem:[#allocation4 + $0xf8] sm:$0xff]  ;;  %v7731_v16 = vld [vmem:[#allocation4 + $0xe0] sm:$0xff]  ;;  %10083 = vst [vmem:[#allocation15_spill] sm:$0xff] %v7743_v28 }
 0x6a7   :  { %4864 = vrcp.f32 %v3092_v34  ;;  %v7755_v34 = vld [vmem:[#allocation4 + $0xa0] sm:$0xff] }
 0x6a8   :  { %10087 = vst [vmem:[#allocation19_spill] sm:$0xff] %v7755_v34 }
 0x6ac   :  { %v4490_v22 = vld [vmem:[#allocation2 + $0x10] sm:$0xf] }
 0x6ad   :  { %v4505_v21 = vmul.f32 %v7627_v15, %v4490_v22  ;;  %v7733_v22 = vld [vmem:[#allocation4 + $0xf0] sm:$0xff] }
 0x6af   :  { %v4522_v27 = vsel %vm4509_vm0, %v4505_v21, 0.0  ;;  %v7737_v21 = vld [vmem:[#allocation4 + $0xc8] sm:$0xff] }
 0x6b0   :  { %4523 = vadd.xlane.f32.xlu1 %v4522_v27  ;;  %10081 = vst [vmem:[#allocation162_spill] sm:$0xff] %v7737_v21  ;;  %v7739_v27 = vld [vmem:[#allocation4 + $0xd8] sm:$0xff] }
 0x6b1   :  { %v4859_v29 = vpop.eup %4858  ;;  %10082 = vst [vmem:[#allocation14_spill] sm:$0xff] %v7739_v27 }
 0x6b2   :  { %v4861_v32 = vpop.eup %4860 }
 0x6b3   :  { %v4863_v33 = vpop.eup %4862  ;;  %v3096_v37 = vmul.f32 %v4861_v32, %v4859_v29  ;;  %v7745_v29 = vld [vmem:[#allocation4 + $0xd0] sm:$0xff]  ;;  %v7749_v32 = vld [vmem:[#allocation4 + $0xa8] sm:$0xff] }
 0x6b4   :  { %v3095_v39 = vmul.f32 %v4863_v33, %v7401_v5  ;;  %v4865_v41 = vpop.eup %4864  ;;  %v7647_v5 = vld [vmem:[#allocation4 + $0x1c0] sm:$0xff]  ;;  %10084 = vst [vmem:[#allocation16_spill] sm:$0xff] %v7745_v29  ;;  %10085 = vst [vmem:[#allocation17_spill] sm:$0xff] %v7749_v32  ;;  %v7751_v33 = vld [vmem:[#allocation4 + $0xb8] sm:$0xff] }
 0x6b5   :  { %10086 = vst [vmem:[#allocation18_spill] sm:$0xff] %v7751_v33 }
 0x6b6   :  { %v7632_v40 = vadd.f32 %v3096_v37, %v3095_v39  ;;  %v7757_v37 = vld [vmem:[#allocation4 + $0xb0] sm:$0xff]  ;;  %v7761_v39 = vld [vmem:[#allocation4 + $0x88] sm:$0xff] }
 0x6b7   :  { %10088 = vst [vmem:[#allocation20_spill] sm:$0xff] %v7757_v37  ;;  %10089 = vst [vmem:[#allocation21_spill] sm:$0xff] %v7761_v39 }
 0x6b8   :  { %4866 = vtanh.f32 %v7632_v40 }
 0x6c5   :  { %v4867_v45 = vpop.eup %4866 }
 0x6c6   :  { %v7635_v52 = vmul.f32 %v4867_v45, %v4865_v41  ;;  %v7763_v41 = vld [vmem:[#allocation4 + $0x98] sm:$0xff]  ;;  %v7767_v45 = vld [vmem:[#allocation4 + $0x80] sm:$0xff] }
 0x6c7   :  { %10090 = vst [vmem:[#allocation22_spill] sm:$0xff] %v7763_v41  ;;  %10091 = vst [vmem:[#allocation23_spill] sm:$0xff] %v7767_v45 }
 0x6c8   :  { %3293 = vmatmul.mubr.f32.vlgmr.msra.gmra.mxu0 %v7635_v52  ;;  %3364 = vmatmul.mubr.f32.vlgmr.msra.gmra.mxu1 %v7635_v52 }
 0x6c9   :  { %3472 = vmatpush1.msra.mxu0 %v7637_v48  ;;  %3543 = vmatpush1.msra.mxu1 %v7639_v57 }
 0x6ca   :  { %3473 = vmatprep.subr.mxu0 %v7641_v59  ;;  %3544 = vmatprep.subr.mxu1 %v7643_v63 }
 0x6cb   :  { %3474 = vmatpush1.msra.mxu0 %v7647_v5  ;;  %3545 = vmatpush1.msra.mxu1 %v7649_v47 }
 0x6cc   :  { %3475 = vmatprep.subr.mxu0 %v7653_v7  ;;  %3546 = vmatprep.subr.mxu1 %v7655_v62 }
 0x6cd   :  { %3476 = vmatpush1.msra.mxu0 %v7659_v1  ;;  %3547 = vmatpush1.msra.mxu1 %v7661_v6 }
 0x6ce   :  { %3477 = vmatprep.subr.mxu0 %v7665_v9  ;;  %3548 = vmatprep.subr.mxu1 %v7667_v14 }
 0x6cf   :  { %3478 = vmatpush1.msra.mxu0 %v7671_v43  ;;  %3549 = vmatpush1.msra.mxu1 %v7673_v49 }
 0x6d0   :  { %3479 = vmatprep.subr.mxu0 %v7677_v12  ;;  %3550 = vmatprep.subr.mxu1 %v7679_v10 }
 0x6d1   :  { %3480 = vmatpush1.msra.mxu0 %v7683_v8  ;;  %3551 = vmatpush1.msra.mxu1 %v7685_v46 }
 0x6d2   :  { %3481 = vmatprep.subr.mxu0 %v7689_v17  ;;  %3552 = vmatprep.subr.mxu1 %v7691_v4 }
 0x6d3   :  { %3482 = vmatpush1.msra.mxu0 %v7695_v19  ;;  %3553 = vmatpush1.msra.mxu1 %v7697_v0 }
 0x6d4   :  { %3483 = vmatprep.subr.mxu0 %v7701_v58  ;;  %3554 = vmatprep.subr.mxu1 %v7703_v26 }
 0x6d5   :  { %3484 = vmatpush1.msra.mxu0 %v7707_v42  ;;  %3555 = vmatpush1.msra.mxu1 %v7709_v23 }
 0x6d6   :  { %3485 = vmatprep.subr.mxu0 %v7713_v20  ;;  %3556 = vmatprep.subr.mxu1 %v7715_v53 }
 0x6d7   :  { %3486 = vmatpush1.msra.mxu0 %v7719_v44  ;;  %3557 = vmatpush1.msra.mxu1 %v7721_v25 }
 0x6d8   :  { %3487 = vmatprep.subr.mxu0 %v7725_v18  ;;  %3558 = vmatprep.subr.mxu1 %v7727_v11 }
 0x6d9   :  { %3488 = vmatpush1.msra.mxu0 %v7731_v16  ;;  %3559 = vmatpush1.msra.mxu1 %v7733_v22 }
 0x6da   :  { %3489 = vmatprep.subr.mxu0 %v7737_v21  ;;  %3560 = vmatprep.subr.mxu1 %v7739_v27  ;;  %v7769_v21 = vld [vmem:[#allocation4 + $0x90] sm:$0xff]  ;;  %v7773_v27 = vld [vmem:[#allocation4 + $0x68] sm:$0xff] }
 0x6db   :  { %3490 = vmatpush1.msra.mxu0 %v7743_v28  ;;  %3561 = vmatpush1.msra.mxu1 %v7745_v29  ;;  %10092 = vst [vmem:[#allocation24_spill] sm:$0xff] %v7769_v21  ;;  %10093 = vst [vmem:[#allocation25_spill] sm:$0xff] %v7773_v27  ;;  %v7775_v28 = vld [vmem:[#allocation4 + $0x78] sm:$0xff]  ;;  %v7779_v29 = vld [vmem:[#allocation4 + $0x60] sm:$0xff] }
 0x6dc   :  { %3491 = vmatprep.subr.mxu0 %v7749_v32  ;;  %3562 = vmatprep.subr.mxu1 %v7751_v33  ;;  %10094 = vst [vmem:[#allocation26_spill] sm:$0xff] %v7775_v28  ;;  %10095 = vst [vmem:[#allocation27_spill] sm:$0xff] %v7779_v29  ;;  %v7781_v32 = vld [vmem:[#allocation4 + $0x70] sm:$0xff]  ;;  %v7785_v33 = vld [vmem:[#allocation4 + $0x48] sm:$0xff] }
 0x6dd   :  { %3492 = vmatpush1.msra.mxu0 %v7755_v34  ;;  %3563 = vmatpush1.msra.mxu1 %v7757_v37  ;;  %10096 = vst [vmem:[#allocation28_spill] sm:$0xff] %v7781_v32  ;;  %v7787_v34 = vld [vmem:[#allocation4 + $0x58] sm:$0xff]  ;;  %v7791_v37 = vld [vmem:[#allocation4 + $0x40] sm:$0xff] }
 0x6de   :  { %3493 = vmatprep.subr.mxu0 %v7761_v39  ;;  %3564 = vmatprep.subr.mxu1 %v7763_v41  ;;  %10097 = vst [vmem:[#allocation29_spill] sm:$0xff] %v7787_v34  ;;  %10098 = vst [vmem:[#allocation30_spill] sm:$0xff] %v7791_v37  ;;  %v7793_v39 = vld [vmem:[#allocation4 + $0x50] sm:$0xff]  ;;  %v7797_v41 = vld [vmem:[#allocation4 + $0x28] sm:$0xff] }
 0x6df   :  { %3494 = vmatpush1.msra.mxu0 %v7767_v45  ;;  %3565 = vmatpush1.msra.mxu1 %v7769_v21  ;;  %10099 = vst [vmem:[#allocation31_spill] sm:$0xff] %v7793_v39  ;;  %10100 = vst [vmem:[#allocation32_spill] sm:$0xff] %v7797_v41  ;;  %v7799_v45 = vld [vmem:[#allocation4 + $0x38] sm:$0xff]  ;;  %v7803_v21 = vld [vmem:[#allocation4 + $0x20] sm:$0xff] }
 0x6e0   :  { %3495 = vmatprep.subr.mxu0 %v7773_v27  ;;  %3566 = vmatprep.subr.mxu1 %v7775_v28  ;;  %10101 = vst [vmem:[#allocation33_spill] sm:$0xff] %v7799_v45  ;;  %10102 = vst [vmem:[#allocation34_spill] sm:$0xff] %v7803_v21  ;;  %v7805_v27 = vld [vmem:[#allocation4 + $0x30] sm:$0xff]  ;;  %v7809_v28 = vld [vmem:[#allocation4 + $0x8] sm:$0xff] }
 0x6e1   :  { %3496 = vmatpush1.msra.mxu0 %v7779_v29  ;;  %3567 = vmatpush1.msra.mxu1 %v7781_v32  ;;  %10103 = vst [vmem:[#allocation35_spill] sm:$0xff] %v7805_v27  ;;  %10104 = vst [vmem:[#allocation36_spill] sm:$0xff] %v7809_v28  ;;  %v7811_v29 = vld [vmem:[#allocation4 + $0x18] sm:$0xff]  ;;  %v7815_v32 = vld [vmem:[#allocation4] sm:$0xff] }
 0x6e2   :  { %3497 = vmatprep.subr.mxu0 %v7785_v33  ;;  %3568 = vmatprep.subr.mxu1 %v7787_v34  ;;  %10105 = vst [vmem:[#allocation37_spill] sm:$0xff] %v7811_v29  ;;  %10106 = vst [vmem:[#allocation38_spill] sm:$0xff] %v7815_v32  ;;  %v7819_v34 = vld [vmem:[#allocation4 + $0x10] sm:$0xff] }
 0x6e3   :  { %3498 = vmatpush1.msra.mxu0 %v7791_v37  ;;  %3569 = vmatpush1.msra.mxu1 %v7793_v39  ;;  %10107 = vst [vmem:[#allocation39_spill] sm:$0xff] %v7819_v34  ;;  %v8143_v39 = vld [vmem:[#allocation6 + $0x2a0] sm:$0xff] }
 0x6e4   :  { %3499 = vmatprep.subr.mxu0 %v7797_v41  ;;  %3570 = vmatprep.subr.mxu1 %v7799_v45  ;;  %v8119_v45 = vld [vmem:[#allocation6 + $0x2e0] sm:$0xff]  ;;  %v8127_v41 = vld [vmem:[#allocation6 + $0x2d8] sm:$0xff]  ;;  %10214 = vst [vmem:[#allocation146_spill] sm:$0xff] %v8143_v39 }
 0x6e5   :  { %3500 = vmatpush1.msra.mxu0 %v7803_v21  ;;  %3571 = vmatpush1.msra.mxu1 %v7805_v27  ;;  %v7829_v21 = vld [vmem:[#allocation6 + $0x1e8] sm:$0xff]  ;;  %v7831_v27 = vld [vmem:[#allocation6 + $0x1f8] sm:$0xff]  ;;  %10206 = vst [vmem:[#allocation138_spill] sm:$0xff] %v8119_v45  ;;  %10209 = vst [vmem:[#allocation141_spill] sm:$0xff] %v8127_v41 }
 0x6e6   :  { %3501 = vmatprep.subr.mxu0 %v7809_v28  ;;  %3572 = vmatprep.subr.mxu1 %v7811_v29  ;;  %10108 = vst [vmem:[#allocation40_spill] sm:$0xff] %v7829_v21  ;;  %10109 = vst [vmem:[#allocation41_spill] sm:$0xff] %v7831_v27  ;;  %v7835_v29 = vld [vmem:[#allocation6 + $0x1e0] sm:$0xff]  ;;  %v8111_v28 = vld [vmem:[#allocation6 + $0x310] sm:$0xff] }
 0x6e7   :  { %3502 = vmatpush1.msra.mxu0 %v7815_v32  ;;  %3535 = vmatprep.mubr.f32.mxu0 %v9946_v51  ;;  %10110 = vst [vmem:[#allocation42_spill] sm:$0xff] %v7835_v29  ;;  %v7837_v32 = vld [vmem:[#allocation6 + $0x1f0] sm:$0xff]  ;;  %10203 = vst [vmem:[#allocation135_spill] sm:$0xff] %v8111_v28 }
 0x6e8   :  { %3573 = vmatpush1.msra.mxu1 %v7819_v34  ;;  %3606 = vmatprep.mubr.f32.mxu1 %v9946_v51  ;;  %10111 = vst [vmem:[#allocation43_spill] sm:$0xff] %v7837_v32  ;;  %v7841_v34 = vld [vmem:[#allocation6 + $0x1c8] sm:$0xff]  ;;  %v7843_v51 = vld [vmem:[#allocation6 + $0x1d8] sm:$0xff] }
 0x6e9   :  { %3536 = vmatmul.mubr.f32.vlgmr.msra.gmra.mxu0 %v7635_v52  ;;  %3607 = vmatmul.mubr.f32.vlgmr.msra.gmra.mxu1 %v7635_v52  ;;  %10112 = vst [vmem:[#allocation44_spill] sm:$0xff] %v7841_v34  ;;  %10113 = vst [vmem:[#allocation45_spill] sm:$0xff] %v7843_v51  ;;  %v7847_v52 = vld [vmem:[#allocation6 + $0x1c0] sm:$0xff] }
 0x6ea   :  { %3773 = vmatprep.subr.mxu0 %v7829_v21  ;;  %3844 = vmatprep.subr.mxu1 %v7831_v27  ;;  %10114 = vst [vmem:[#allocation46_spill] sm:$0xff] %v7847_v52  ;;  %v7849_v21 = vld [vmem:[#allocation6 + $0x1d0] sm:$0xff]  ;;  %v7853_v27 = vld [vmem:[#allocation6 + $0x1a8] sm:$0xff] }
 0x6eb   :  { %3774 = vmatpush1.msra.mxu0 %v7835_v29  ;;  %3845 = vmatpush1.msra.mxu1 %v7837_v32  ;;  %10115 = vst [vmem:[#allocation47_spill] sm:$0xff] %v7849_v21  ;;  %10116 = vst [vmem:[#allocation48_spill] sm:$0xff] %v7853_v27  ;;  %v7855_v29 = vld [vmem:[#allocation6 + $0x1b8] sm:$0xff]  ;;  %v7859_v32 = vld [vmem:[#allocation6 + $0x1a0] sm:$0xff] }
 0x6ec   :  { %3775 = vmatprep.subr.mxu0 %v7841_v34  ;;  %3846 = vmatprep.subr.mxu1 %v7843_v51  ;;  %10117 = vst [vmem:[#allocation49_spill] sm:$0xff] %v7855_v29  ;;  %10118 = vst [vmem:[#allocation50_spill] sm:$0xff] %v7859_v32  ;;  %v7861_v34 = vld [vmem:[#allocation6 + $0x1b0] sm:$0xff]  ;;  %v7865_v51 = vld [vmem:[#allocation6 + $0x188] sm:$0xff] }
 0x6ed   :  { %3776 = vmatpush1.msra.mxu0 %v7847_v52  ;;  %3847 = vmatpush1.msra.mxu1 %v7849_v21  ;;  %10119 = vst [vmem:[#allocation51_spill] sm:$0xff] %v7861_v34  ;;  %10120 = vst [vmem:[#allocation52_spill] sm:$0xff] %v7865_v51  ;;  %v7867_v52 = vld [vmem:[#allocation6 + $0x198] sm:$0xff]  ;;  %v7871_v21 = vld [vmem:[#allocation6 + $0x180] sm:$0xff] }
 0x6ee   :  { %3777 = vmatprep.subr.mxu0 %v7853_v27  ;;  %3848 = vmatprep.subr.mxu1 %v7855_v29  ;;  %10121 = vst [vmem:[#allocation53_spill] sm:$0xff] %v7867_v52  ;;  %10122 = vst [vmem:[#allocation54_spill] sm:$0xff] %v7871_v21  ;;  %v7873_v27 = vld [vmem:[#allocation6 + $0x190] sm:$0xff]  ;;  %v7877_v29 = vld [vmem:[#allocation6 + $0x168] sm:$0xff] }
 0x6ef   :  { %3778 = vmatpush1.msra.mxu0 %v7859_v32  ;;  %3849 = vmatpush1.msra.mxu1 %v7861_v34  ;;  %10123 = vst [vmem:[#allocation55_spill] sm:$0xff] %v7873_v27  ;;  %10124 = vst [vmem:[#allocation56_spill] sm:$0xff] %v7877_v29  ;;  %v7879_v32 = vld [vmem:[#allocation6 + $0x178] sm:$0xff]  ;;  %v7883_v34 = vld [vmem:[#allocation6 + $0x160] sm:$0xff] }
 0x6f0   :  { %3779 = vmatprep.subr.mxu0 %v7865_v51  ;;  %3850 = vmatprep.subr.mxu1 %v7867_v52  ;;  %10125 = vst [vmem:[#allocation57_spill] sm:$0xff] %v7879_v32  ;;  %10126 = vst [vmem:[#allocation58_spill] sm:$0xff] %v7883_v34  ;;  %v7885_v51 = vld [vmem:[#allocation6 + $0x170] sm:$0xff]  ;;  %v7889_v52 = vld [vmem:[#allocation6 + $0x148] sm:$0xff] }
 0x6f1   :  { %3780 = vmatpush1.msra.mxu0 %v7871_v21  ;;  %3851 = vmatpush1.msra.mxu1 %v7873_v27  ;;  %10127 = vst [vmem:[#allocation59_spill] sm:$0xff] %v7885_v51  ;;  %10128 = vst [vmem:[#allocation60_spill] sm:$0xff] %v7889_v52  ;;  %v7891_v21 = vld [vmem:[#allocation6 + $0x158] sm:$0xff]  ;;  %v7895_v27 = vld [vmem:[#allocation6 + $0x140] sm:$0xff] }
 0x6f2   :  { %3781 = vmatprep.subr.mxu0 %v7877_v29  ;;  %3852 = vmatprep.subr.mxu1 %v7879_v32  ;;  %10129 = vst [vmem:[#allocation61_spill] sm:$0xff] %v7891_v21  ;;  %10130 = vst [vmem:[#allocation62_spill] sm:$0xff] %v7895_v27  ;;  %v7897_v29 = vld [vmem:[#allocation6 + $0x150] sm:$0xff]  ;;  %v7901_v32 = vld [vmem:[#allocation6 + $0x128] sm:$0xff] }
 0x6f3   :  { %3782 = vmatpush1.msra.mxu0 %v7883_v34  ;;  %3853 = vmatpush1.msra.mxu1 %v7885_v51  ;;  %10131 = vst [vmem:[#allocation63_spill] sm:$0xff] %v7897_v29  ;;  %10132 = vst [vmem:[#allocation64_spill] sm:$0xff] %v7901_v32  ;;  %v7903_v34 = vld [vmem:[#allocation6 + $0x138] sm:$0xff]  ;;  %v7907_v51 = vld [vmem:[#allocation6 + $0x120] sm:$0xff] }
 0x6f4   :  { %3783 = vmatprep.subr.mxu0 %v7889_v52  ;;  %3854 = vmatprep.subr.mxu1 %v7891_v21  ;;  %10133 = vst [vmem:[#allocation65_spill] sm:$0xff] %v7903_v34  ;;  %10134 = vst [vmem:[#allocation66_spill] sm:$0xff] %v7907_v51  ;;  %v7909_v52 = vld [vmem:[#allocation6 + $0x130] sm:$0xff]  ;;  %v7913_v21 = vld [vmem:[#allocation6 + $0x108] sm:$0xff] }
 0x6f5   :  { %3784 = vmatpush1.msra.mxu0 %v7895_v27  ;;  %3855 = vmatpush1.msra.mxu1 %v7897_v29  ;;  %10135 = vst [vmem:[#allocation67_spill] sm:$0xff] %v7909_v52  ;;  %10136 = vst [vmem:[#allocation68_spill] sm:$0xff] %v7913_v21  ;;  %v7915_v27 = vld [vmem:[#allocation6 + $0x118] sm:$0xff]  ;;  %v7919_v29 = vld [vmem:[#allocation6 + $0x100] sm:$0xff] }
 0x6f6   :  { %3785 = vmatprep.subr.mxu0 %v7901_v32  ;;  %3856 = vmatprep.subr.mxu1 %v7903_v34  ;;  %10137 = vst [vmem:[#allocation69_spill] sm:$0xff] %v7915_v27  ;;  %10138 = vst [vmem:[#allocation70_spill] sm:$0xff] %v7919_v29  ;;  %v7921_v32 = vld [vmem:[#allocation6 + $0x110] sm:$0xff]  ;;  %v7925_v34 = vld [vmem:[#allocation6 + $0xe8] sm:$0xff] }
 0x6f7   :  { %3786 = vmatpush1.msra.mxu0 %v7907_v51  ;;  %3857 = vmatpush1.msra.mxu1 %v7909_v52  ;;  %10139 = vst [vmem:[#allocation71_spill] sm:$0xff] %v7921_v32  ;;  %10140 = vst [vmem:[#allocation72_spill] sm:$0xff] %v7925_v34  ;;  %v7927_v51 = vld [vmem:[#allocation6 + $0xf8] sm:$0xff]  ;;  %v7931_v52 = vld [vmem:[#allocation6 + $0xe0] sm:$0xff] }
 0x6f8   :  { %3787 = vmatprep.subr.mxu0 %v7913_v21  ;;  %3858 = vmatprep.subr.mxu1 %v7915_v27  ;;  %10141 = vst [vmem:[#allocation73_spill] sm:$0xff] %v7927_v51  ;;  %10142 = vst [vmem:[#allocation74_spill] sm:$0xff] %v7931_v52  ;;  %v7933_v21 = vld [vmem:[#allocation6 + $0xf0] sm:$0xff]  ;;  %v7937_v27 = vld [vmem:[#allocation6 + $0xc8] sm:$0xff] }
 0x6f9   :  { %3788 = vmatpush1.msra.mxu0 %v7919_v29  ;;  %3859 = vmatpush1.msra.mxu1 %v7921_v32  ;;  %10143 = vst [vmem:[#allocation75_spill] sm:$0xff] %v7933_v21  ;;  %10144 = vst [vmem:[#allocation76_spill] sm:$0xff] %v7937_v27  ;;  %v7939_v29 = vld [vmem:[#allocation6 + $0xd8] sm:$0xff]  ;;  %v7943_v32 = vld [vmem:[#allocation6 + $0xc0] sm:$0xff] }
 0x6fa   :  { %3789 = vmatprep.subr.mxu0 %v7925_v34  ;;  %3860 = vmatprep.subr.mxu1 %v7927_v51  ;;  %10145 = vst [vmem:[#allocation77_spill] sm:$0xff] %v7939_v29  ;;  %10146 = vst [vmem:[#allocation78_spill] sm:$0xff] %v7943_v32  ;;  %v7945_v34 = vld [vmem:[#allocation6 + $0xd0] sm:$0xff]  ;;  %v7949_v51 = vld [vmem:[#allocation6 + $0xa8] sm:$0xff] }
 0x6fb   :  { %3790 = vmatpush1.msra.mxu0 %v7931_v52  ;;  %3861 = vmatpush1.msra.mxu1 %v7933_v21  ;;  %10147 = vst [vmem:[#allocation79_spill] sm:$0xff] %v7945_v34  ;;  %10148 = vst [vmem:[#allocation80_spill] sm:$0xff] %v7949_v51  ;;  %v7951_v52 = vld [vmem:[#allocation6 + $0xb8] sm:$0xff]  ;;  %v7955_v21 = vld [vmem:[#allocation6 + $0xa0] sm:$0xff] }
 0x6fc   :  { %3791 = vmatprep.subr.mxu0 %v7937_v27  ;;  %3862 = vmatprep.subr.mxu1 %v7939_v29  ;;  %10149 = vst [vmem:[#allocation81_spill] sm:$0xff] %v7951_v52  ;;  %10150 = vst [vmem:[#allocation82_spill] sm:$0xff] %v7955_v21  ;;  %v7957_v27 = vld [vmem:[#allocation6 + $0xb0] sm:$0xff]  ;;  %v7961_v29 = vld [vmem:[#allocation6 + $0x88] sm:$0xff] }
 0x6fd   :  { %3792 = vmatpush1.msra.mxu0 %v7943_v32  ;;  %3863 = vmatpush1.msra.mxu1 %v7945_v34  ;;  %10151 = vst [vmem:[#allocation83_spill] sm:$0xff] %v7957_v27  ;;  %10152 = vst [vmem:[#allocation84_spill] sm:$0xff] %v7961_v29  ;;  %v7963_v32 = vld [vmem:[#allocation6 + $0x98] sm:$0xff]  ;;  %v7967_v34 = vld [vmem:[#allocation6 + $0x80] sm:$0xff] }
 0x6fe   :  { %3793 = vmatprep.subr.mxu0 %v7949_v51  ;;  %3864 = vmatprep.subr.mxu1 %v7951_v52  ;;  %10153 = vst [vmem:[#allocation85_spill] sm:$0xff] %v7963_v32  ;;  %10154 = vst [vmem:[#allocation86_spill] sm:$0xff] %v7967_v34  ;;  %v7969_v51 = vld [vmem:[#allocation6 + $0x90] sm:$0xff]  ;;  %v7973_v52 = vld [vmem:[#allocation6 + $0x68] sm:$0xff] }
 0x6ff   :  { %3794 = vmatpush1.msra.mxu0 %v7955_v21  ;;  %3865 = vmatpush1.msra.mxu1 %v7957_v27  ;;  %10155 = vst [vmem:[#allocation87_spill] sm:$0xff] %v7969_v51  ;;  %10156 = vst [vmem:[#allocation88_spill] sm:$0xff] %v7973_v52  ;;  %v7975_v21 = vld [vmem:[#allocation6 + $0x78] sm:$0xff]  ;;  %v7979_v27 = vld [vmem:[#allocation6 + $0x60] sm:$0xff] }
 0x700   :  { %3795 = vmatprep.subr.mxu0 %v7961_v29  ;;  %3866 = vmatprep.subr.mxu1 %v7963_v32  ;;  %10157 = vst [vmem:[#allocation89_spill] sm:$0xff] %v7975_v21  ;;  %10158 = vst [vmem:[#allocation90_spill] sm:$0xff] %v7979_v27  ;;  %v7981_v29 = vld [vmem:[#allocation6 + $0x70] sm:$0xff]  ;;  %v7985_v32 = vld [vmem:[#allocation6 + $0x48] sm:$0xff] }
 0x701   :  { %3796 = vmatpush1.msra.mxu0 %v7967_v34  ;;  %3867 = vmatpush1.msra.mxu1 %v7969_v51  ;;  %10159 = vst [vmem:[#allocation91_spill] sm:$0xff] %v7981_v29  ;;  %10160 = vst [vmem:[#allocation92_spill] sm:$0xff] %v7985_v32  ;;  %v7987_v34 = vld [vmem:[#allocation6 + $0x58] sm:$0xff]  ;;  %v7991_v51 = vld [vmem:[#allocation6 + $0x40] sm:$0xff] }
 0x702   :  { %3797 = vmatprep.subr.mxu0 %v7973_v52  ;;  %3868 = vmatprep.subr.mxu1 %v7975_v21  ;;  %10161 = vst [vmem:[#allocation93_spill] sm:$0xff] %v7987_v34  ;;  %10162 = vst [vmem:[#allocation94_spill] sm:$0xff] %v7991_v51  ;;  %v7993_v52 = vld [vmem:[#allocation6 + $0x50] sm:$0xff]  ;;  %v7997_v21 = vld [vmem:[#allocation6 + $0x28] sm:$0xff] }
 0x703   :  { %3798 = vmatpush1.msra.mxu0 %v7979_v27  ;;  %3869 = vmatpush1.msra.mxu1 %v7981_v29  ;;  %10163 = vst [vmem:[#allocation95_spill] sm:$0xff] %v7993_v52  ;;  %10164 = vst [vmem:[#allocation96_spill] sm:$0xff] %v7997_v21  ;;  %v7999_v27 = vld [vmem:[#allocation6 + $0x38] sm:$0xff]  ;;  %v8003_v29 = vld [vmem:[#allocation6 + $0x20] sm:$0xff] }
 0x704   :  { %3799 = vmatprep.subr.mxu0 %v7985_v32  ;;  %3870 = vmatprep.subr.mxu1 %v7987_v34  ;;  %10165 = vst [vmem:[#allocation97_spill] sm:$0xff] %v7999_v27  ;;  %10166 = vst [vmem:[#allocation98_spill] sm:$0xff] %v8003_v29  ;;  %v8005_v32 = vld [vmem:[#allocation6 + $0x30] sm:$0xff]  ;;  %v8009_v34 = vld [vmem:[#allocation6 + $0x8] sm:$0xff] }
 0x705   :  { %3800 = vmatpush1.msra.mxu0 %v7991_v51  ;;  %3871 = vmatpush1.msra.mxu1 %v7993_v52  ;;  %10167 = vst [vmem:[#allocation99_spill] sm:$0xff] %v8005_v32  ;;  %10168 = vst [vmem:[#allocation100_spill] sm:$0xff] %v8009_v34  ;;  %v8011_v51 = vld [vmem:[#allocation6 + $0x18] sm:$0xff]  ;;  %v8015_v52 = vld [vmem:[#allocation6] sm:$0xff] }
 0x706   :  { %3801 = vmatprep.subr.mxu0 %v7997_v21  ;;  %3872 = vmatprep.subr.mxu1 %v7999_v27  ;;  %10169 = vst [vmem:[#allocation101_spill] sm:$0xff] %v8011_v51  ;;  %10170 = vst [vmem:[#allocation102_spill] sm:$0xff] %v8015_v52  ;;  %v8017_v21 = vld [vmem:[#allocation6 + $0x10] sm:$0xff]  ;;  %v8021_v27 = vld [vmem:[#allocation6 + $0x3e8] sm:$0xff] }
 0x707   :  { %3802 = vmatpush1.msra.mxu0 %v8003_v29  ;;  %3873 = vmatpush1.msra.mxu1 %v8005_v32  ;;  %10171 = vst [vmem:[#allocation103_spill] sm:$0xff] %v8017_v21  ;;  %10172 = vst [vmem:[#allocation104_spill] sm:$0xff] %v8021_v27  ;;  %v8023_v29 = vld [vmem:[#allocation6 + $0x3f8] sm:$0xff]  ;;  %v8027_v32 = vld [vmem:[#allocation6 + $0x3e0] sm:$0xff] }
 0x708   :  { %3803 = vmatprep.subr.mxu0 %v8009_v34  ;;  %3874 = vmatprep.subr.mxu1 %v8011_v51  ;;  %10173 = vst [vmem:[#allocation105_spill] sm:$0xff] %v8023_v29  ;;  %10174 = vst [vmem:[#allocation106_spill] sm:$0xff] %v8027_v32  ;;  %v8029_v34 = vld [vmem:[#allocation6 + $0x3f0] sm:$0xff]  ;;  %v8033_v51 = vld [vmem:[#allocation6 + $0x3c8] sm:$0xff] }
 0x709   :  { %3804 = vmatpush1.msra.mxu0 %v8015_v52  ;;  %3875 = vmatpush1.msra.mxu1 %v8017_v21  ;;  %10175 = vst [vmem:[#allocation107_spill] sm:$0xff] %v8029_v34  ;;  %10176 = vst [vmem:[#allocation108_spill] sm:$0xff] %v8033_v51  ;;  %v8035_v52 = vld [vmem:[#allocation6 + $0x3d8] sm:$0xff]  ;;  %v8039_v21 = vld [vmem:[#allocation6 + $0x3c0] sm:$0xff] }
 0x70a   :  { %3805 = vmatprep.subr.mxu0 %v8021_v27  ;;  %3876 = vmatprep.subr.mxu1 %v8023_v29  ;;  %10177 = vst [vmem:[#allocation109_spill] sm:$0xff] %v8035_v52  ;;  %10178 = vst [vmem:[#allocation110_spill] sm:$0xff] %v8039_v21  ;;  %v8041_v27 = vld [vmem:[#allocation6 + $0x3d0] sm:$0xff]  ;;  %v8045_v29 = vld [vmem:[#allocation6 + $0x3a8] sm:$0xff] }
 0x70b   :  { %3806 = vmatpush2.msra.mxu0 %v8027_v32  ;;  %3877 = vmatpush2.msra.mxu1 %v8029_v34  ;;  %10179 = vst [vmem:[#allocation111_spill] sm:$0xff] %v8041_v27  ;;  %10180 = vst [vmem:[#allocation112_spill] sm:$0xff] %v8045_v29  ;;  %v8047_v32 = vld [vmem:[#allocation6 + $0x3b8] sm:$0xff]  ;;  %v8051_v34 = vld [vmem:[#allocation6 + $0x3a0] sm:$0xff] }
 0x70c   :  { %3807 = vmatprep.subr.mxu0 %v8033_v51  ;;  %3878 = vmatprep.subr.mxu1 %v8035_v52  ;;  %10181 = vst [vmem:[#allocation113_spill] sm:$0xff] %v8047_v32  ;;  %10182 = vst [vmem:[#allocation114_spill] sm:$0xff] %v8051_v34  ;;  %v8053_v51 = vld [vmem:[#allocation6 + $0x3b0] sm:$0xff]  ;;  %v8057_v52 = vld [vmem:[#allocation6 + $0x388] sm:$0xff] }
 0x70d   :  { %3808 = vmatpush2.msra.mxu0 %v8039_v21  ;;  %3879 = vmatpush2.msra.mxu1 %v8041_v27  ;;  %10183 = vst [vmem:[#allocation115_spill] sm:$0xff] %v8053_v51  ;;  %10184 = vst [vmem:[#allocation116_spill] sm:$0xff] %v8057_v52  ;;  %v8059_v21 = vld [vmem:[#allocation6 + $0x398] sm:$0xff]  ;;  %v8063_v27 = vld [vmem:[#allocation6 + $0x380] sm:$0xff] }
 0x70e   :  { %3809 = vmatprep.subr.mxu0 %v8045_v29  ;;  %3880 = vmatprep.subr.mxu1 %v8047_v32  ;;  %10185 = vst [vmem:[#allocation117_spill] sm:$0xff] %v8059_v21  ;;  %10186 = vst [vmem:[#allocation118_spill] sm:$0xff] %v8063_v27  ;;  %v8065_v29 = vld [vmem:[#allocation6 + $0x390] sm:$0xff]  ;;  %v8069_v32 = vld [vmem:[#allocation6 + $0x368] sm:$0xff] }
 0x70f   :  { %3810 = vmatpush2.msra.mxu0 %v8051_v34  ;;  %3881 = vmatpush2.msra.mxu1 %v8053_v51  ;;  %10187 = vst [vmem:[#allocation119_spill] sm:$0xff] %v8065_v29  ;;  %10188 = vst [vmem:[#allocation120_spill] sm:$0xff] %v8069_v32  ;;  %v8071_v34 = vld [vmem:[#allocation6 + $0x378] sm:$0xff]  ;;  %v8075_v51 = vld [vmem:[#allocation6 + $0x360] sm:$0xff] }
 0x710   :  { %3811 = vmatprep.subr.mxu0 %v8057_v52  ;;  %3882 = vmatprep.subr.mxu1 %v8059_v21  ;;  %10189 = vst [vmem:[#allocation121_spill] sm:$0xff] %v8071_v34  ;;  %10190 = vst [vmem:[#allocation122_spill] sm:$0xff] %v8075_v51  ;;  %v8077_v52 = vld [vmem:[#allocation6 + $0x370] sm:$0xff]  ;;  %v8081_v21 = vld [vmem:[#allocation6 + $0x348] sm:$0xff] }
 0x711   :  { %3812 = vmatpush2.msra.mxu0 %v8063_v27  ;;  %3883 = vmatpush2.msra.mxu1 %v8065_v29  ;;  %10191 = vst [vmem:[#allocation123_spill] sm:$0xff] %v8077_v52  ;;  %10192 = vst [vmem:[#allocation124_spill] sm:$0xff] %v8081_v21  ;;  %v8083_v27 = vld [vmem:[#allocation6 + $0x358] sm:$0xff]  ;;  %v8087_v29 = vld [vmem:[#allocation6 + $0x340] sm:$0xff] }
 0x712   :  { %3813 = vmatprep.subr.mxu0 %v8069_v32  ;;  %3884 = vmatprep.subr.mxu1 %v8071_v34  ;;  %10193 = vst [vmem:[#allocation125_spill] sm:$0xff] %v8083_v27  ;;  %10194 = vst [vmem:[#allocation126_spill] sm:$0xff] %v8087_v29  ;;  %v8089_v32 = vld [vmem:[#allocation6 + $0x350] sm:$0xff]  ;;  %v8093_v34 = vld [vmem:[#allocation6 + $0x328] sm:$0xff] }
 0x713   :  { %3814 = vmatpush2.msra.mxu0 %v8075_v51  ;;  %3885 = vmatpush2.msra.mxu1 %v8077_v52  ;;  %10195 = vst [vmem:[#allocation127_spill] sm:$0xff] %v8089_v32  ;;  %10196 = vst [vmem:[#allocation128_spill] sm:$0xff] %v8093_v34  ;;  %v8095_v51 = vld [vmem:[#allocation6 + $0x338] sm:$0xff]  ;;  %v8099_v52 = vld [vmem:[#allocation6 + $0x320] sm:$0xff] }
 0x714   :  { %3815 = vmatprep.subr.mxu0 %v8081_v21  ;;  %3886 = vmatprep.subr.mxu1 %v8083_v27  ;;  %10197 = vst [vmem:[#allocation129_spill] sm:$0xff] %v8095_v51  ;;  %10198 = vst [vmem:[#allocation130_spill] sm:$0xff] %v8099_v52  ;;  %v8101_v21 = vld [vmem:[#allocation6 + $0x330] sm:$0xff]  ;;  %v8103_v27 = vld [vmem:[#allocation6 + $0x308] sm:$0xff] }
 0x715   :  { %3816 = vmatpush2.msra.mxu0 %v8087_v29  ;;  %3887 = vmatpush2.msra.mxu1 %v8089_v32  ;;  %10199 = vst [vmem:[#allocation131_spill] sm:$0xff] %v8101_v21  ;;  %10200 = vst [vmem:[#allocation132_spill] sm:$0xff] %v8103_v27  ;;  %v8107_v29 = vld [vmem:[#allocation6 + $0x318] sm:$0xff]  ;;  %v8109_v32 = vld [vmem:[#allocation6 + $0x300] sm:$0xff] }
 0x716   :  { %3817 = vmatprep.subr.mxu0 %v8093_v34  ;;  %3888 = vmatprep.subr.mxu1 %v8095_v51  ;;  %10201 = vst [vmem:[#allocation133_spill] sm:$0xff] %v8107_v29  ;;  %10202 = vst [vmem:[#allocation134_spill] sm:$0xff] %v8109_v32  ;;  %v8115_v51 = vld [vmem:[#allocation6 + $0x2e8] sm:$0xff]  ;;  %v8117_v34 = vld [vmem:[#allocation6 + $0x2f8] sm:$0xff] }
 0x717   :  { %3818 = vmatpush2.msra.mxu0 %v8099_v52  ;;  %3889 = vmatpush2.msra.mxu1 %v8101_v21  ;;  %10204 = vst [vmem:[#allocation136_spill] sm:$0xff] %v8115_v51  ;;  %10205 = vst [vmem:[#allocation137_spill] sm:$0xff] %v8117_v34  ;;  %v8123_v21 = vld [vmem:[#allocation6 + $0x2f0] sm:$0xff]  ;;  %v8125_v52 = vld [vmem:[#allocation6 + $0x2c8] sm:$0xff] }
 0x718   :  { %3819 = vmatprep.subr.mxu0 %v8103_v27  ;;  %3890 = vmatprep.subr.mxu1 %v8107_v29  ;;  %10207 = vst [vmem:[#allocation139_spill] sm:$0xff] %v8123_v21  ;;  %10208 = vst [vmem:[#allocation140_spill] sm:$0xff] %v8125_v52  ;;  %v8131_v29 = vld [vmem:[#allocation6 + $0x2c0] sm:$0xff]  ;;  %v8133_v27 = vld [vmem:[#allocation6 + $0x2d0] sm:$0xff] }
 0x719   :  { %3820 = vmatpush2.msra.mxu0 %v8109_v32  ;;  %3891 = vmatpush2.msra.mxu1 %v8111_v28  ;;  %10210 = vst [vmem:[#allocation142_spill] sm:$0xff] %v8131_v29  ;;  %10211 = vst [vmem:[#allocation143_spill] sm:$0xff] %v8133_v27  ;;  %v8137_v32 = vld [vmem:[#allocation6 + $0x2a8] sm:$0xff]  ;;  %v8139_v28 = vld [vmem:[#allocation6 + $0x2b8] sm:$0xff] }
 0x71a   :  { %3821 = vmatprep.subr.mxu0 %v8115_v51  ;;  %3892 = vmatprep.subr.mxu1 %v8117_v34  ;;  %10212 = vst [vmem:[#allocation144_spill] sm:$0xff] %v8137_v32  ;;  %10213 = vst [vmem:[#allocation145_spill] sm:$0xff] %v8139_v28  ;;  %v8145_v51 = vld [vmem:[#allocation6 + $0x2b0] sm:$0xff]  ;;  %v8149_v34 = vld [vmem:[#allocation6 + $0x288] sm:$0xff] }
 0x71b   :  { %3822 = vmatpush2.msra.mxu0 %v8119_v45  ;;  %3893 = vmatpush2.msra.mxu1 %v8123_v21  ;;  %10215 = vst [vmem:[#allocation147_spill] sm:$0xff] %v8145_v51  ;;  %10216 = vst [vmem:[#allocation148_spill] sm:$0xff] %v8149_v34  ;;  %v8151_v45 = vld [vmem:[#allocation6 + $0x298] sm:$0xff]  ;;  %v8155_v21 = vld [vmem:[#allocation6 + $0x280] sm:$0xff] }
 0x71c   :  { %3823 = vmatprep.subr.mxu0 %v8125_v52  ;;  %3894 = vmatprep.subr.mxu1 %v8127_v41  ;;  %10217 = vst [vmem:[#allocation149_spill] sm:$0xff] %v8151_v45  ;;  %10218 = vst [vmem:[#allocation150_spill] sm:$0xff] %v8155_v21  ;;  %v8157_v52 = vld [vmem:[#allocation6 + $0x290] sm:$0xff]  ;;  %v8161_v41 = vld [vmem:[#allocation6 + $0x268] sm:$0xff] }
 0x71d   :  { %3824 = vmatpush2.msra.mxu0 %v8131_v29  ;;  %3895 = vmatpush2.msra.mxu1 %v8133_v27  ;;  %10219 = vst [vmem:[#allocation151_spill] sm:$0xff] %v8157_v52  ;;  %10220 = vst [vmem:[#allocation152_spill] sm:$0xff] %v8161_v41  ;;  %v8163_v29 = vld [vmem:[#allocation6 + $0x278] sm:$0xff]  ;;  %v8167_v27 = vld [vmem:[#allocation6 + $0x260] sm:$0xff] }
 0x71e   :  { %3825 = vmatprep.subr.mxu0 %v8137_v32  ;;  %3896 = vmatprep.subr.mxu1 %v8139_v28  ;;  %10221 = vst [vmem:[#allocation153_spill] sm:$0xff] %v8163_v29  ;;  %10222 = vst [vmem:[#allocation154_spill] sm:$0xff] %v8167_v27  ;;  %v8169_v32 = vld [vmem:[#allocation6 + $0x270] sm:$0xff]  ;;  %v8173_v28 = vld [vmem:[#allocation6 + $0x248] sm:$0xff] }
 0x71f   :  { %3826 = vmatpush2.msra.mxu0 %v8143_v39  ;;  %3897 = vmatpush2.msra.mxu1 %v8145_v51  ;;  %10223 = vst [vmem:[#allocation155_spill] sm:$0xff] %v8169_v32  ;;  %10224 = vst [vmem:[#allocation156_spill] sm:$0xff] %v8173_v28  ;;  %v8175_v39 = vld [vmem:[#allocation6 + $0x258] sm:$0xff]  ;;  %v8179_v51 = vld [vmem:[#allocation6 + $0x240] sm:$0xff] }
 0x720   :  { %3827 = vmatprep.subr.mxu0 %v8149_v34  ;;  %3898 = vmatprep.subr.mxu1 %v8151_v45  ;;  %10225 = vst [vmem:[#allocation157_spill] sm:$0xff] %v8175_v39  ;;  %10226 = vst [vmem:[#allocation159_spill] sm:$0xff] %v8179_v51  ;;  %v8181_v34 = vld [vmem:[#allocation6 + $0x250] sm:$0xff]  ;;  %v8185_v45 = vld [vmem:[#allocation6 + $0x228] sm:$0xff] }
 0x721   :  { %3828 = vmatpush2.msra.mxu0 %v8155_v21  ;;  %3899 = vmatpush2.msra.mxu1 %v8157_v52  ;;  %10227 = vst [vmem:[#allocation160_spill] sm:$0xff] %v8181_v34  ;;  %10228 = vst [vmem:[#allocation163_spill] sm:$0xff] %v8185_v45  ;;  %v8187_v21 = vld [vmem:[#allocation6 + $0x238] sm:$0xff]  ;;  %v8191_v52 = vld [vmem:[#allocation6 + $0x220] sm:$0xff] }
 0x722   :  { %3829 = vmatprep.subr.mxu0 %v8161_v41  ;;  %3900 = vmatprep.subr.mxu1 %v8163_v29  ;;  %10229 = vst [vmem:[#allocation164_spill] sm:$0xff] %v8187_v21  ;;  %10230 = vst [vmem:[#allocation165_spill] sm:$0xff] %v8191_v52  ;;  %v8193_v41 = vld [vmem:[#allocation6 + $0x230] sm:$0xff]  ;;  %v8197_v29 = vld [vmem:[#allocation6 + $0x208] sm:$0xff] }
 0x723   :  { %3830 = vmatpush2.msra.mxu0 %v8167_v27  ;;  %3901 = vmatpush2.msra.mxu1 %v8169_v32  ;;  %10231 = vst [vmem:[#allocation166_spill] sm:$0xff] %v8193_v41  ;;  %10232 = vst [vmem:[#allocation167_spill] sm:$0xff] %v8197_v29  ;;  %v8199_v27 = vld [vmem:[#allocation6 + $0x218] sm:$0xff]  ;;  %v8203_v32 = vld [vmem:[#allocation6 + $0x200] sm:$0xff] }
 0x724   :  { %3831 = vmatprep.subr.mxu0 %v8173_v28  ;;  %3902 = vmatprep.subr.mxu1 %v8175_v39  ;;  %10233 = vst [vmem:[#allocation168_spill] sm:$0xff] %v8199_v27  ;;  %10234 = vst [vmem:[#allocation169_spill] sm:$0xff] %v8203_v32  ;;  %v8205_v28 = vld [vmem:[#allocation6 + $0x210] sm:$0xff] }
 0x725   :  { %3832 = vmatpush2.msra.mxu0 %v8179_v51  ;;  %3903 = vmatpush2.msra.mxu1 %v8181_v34  ;;  %10235 = vst [vmem:[#allocation170_spill] sm:$0xff] %v8205_v28 }
 0x726   :  { %3833 = vmatprep.subr.mxu0 %v8185_v45  ;;  %3904 = vmatprep.subr.mxu1 %v8187_v21 }
 0x727   :  { %3834 = vmatpush2.msra.mxu0 %v8191_v52  ;;  %3905 = vmatpush2.msra.mxu1 %v8193_v41 }
 0x728   :  { %3835 = vmatprep.subr.mxu0 %v8197_v29  ;;  %3906 = vmatprep.subr.mxu1 %v8199_v27 }
 0x729   :  { %3836 = vmatpush2.msra.mxu0 %v8203_v32  ;;  %3907 = vmatpush2.msra.mxu1 %v8205_v28 }
 0x72a   :  { %4016 = vmatprep.subr.mxu0 %v7602_v2  ;;  %4087 = vmatprep.subr.mxu1 %v7604_v24 }
 0x788   :  { %v3294_v21 = vpop.f32.mrf.mxu0  ;;  %v3365_v41 = vpop.f32.mrf.mxu1 }
 0x789   :  { %v3295_v45 = vadd.f32 %v3294_v21, %v10076_v3  ;;  %v3366_v2 = vadd.f32 %v3365_v41, %v10079_v36 }
 0x78a   :  { %v3296_v34 = vpop.f32.mrf.mxu0  ;;  %v3367_v27 = vpop.f32.mrf.mxu1 }
 0x78b   :  { %v4664_v51 = vmul.f32 -1.442695, %v3295_v45  ;;  %v3297_v52 = vadd.f32 %v3296_v34, %v10077_v60  ;;  %v3368_v32 = vadd.f32 %v3367_v27, %v10078_v30  ;;  %v3401_v45 = vpop.permute.xlu0 %3400 }
 0x78c   :  { %v3404_v27 = vmul.f32 %v3401_v45, %v9764_v31 }
 0x78d   :  { %4868 = vpow2.f32 %v4664_v51  ;;  %v4665_v29 = vmul.f32 -1.442695, %v3297_v52  ;;  %v4666_v39 = vmul.f32 -1.442695, %v3368_v32  ;;  %v3403_v51 = vmul.f32 %v3401_v45, %v10080_v56 }
 0x78f   :  { %4870 = vpow2.f32 %v4665_v29 }
 0x790   :  { %4872 = vpow2.f32 %v4666_v39 }
 0x79a   :  { %v4869_v28 = vpop.eup %4868 }
 0x79b   :  { %v3373_v37 = vadd.f32 1.0, %v4869_v28 }
 0x79c   :  { %v4871_v24 = vpop.eup %4870 }
 0x79d   :  { %4874 = vrcp.f32 %v3373_v37  ;;  %v3379_v21 = vadd.f32 1.0, %v4871_v24  ;;  %v4873_v34 = vpop.eup %4872 }
 0x79e   :  { %4876 = vtanh.f32 %v3366_v2  ;;  %v3386_v30 = vadd.f32 1.0, %v4873_v34  ;;  %v3406_v34 = vmul.f32 %v3401_v45, %v9446_v35 }
 0x79f   :  { %4878 = vrcp.f32 %v3379_v21 }
 0x7a0   :  { %4880 = vrcp.f32 %v3386_v30 }
 0x7a9   :  { %v3537_v52 = vpop.f32.mrf.mxu0  ;;  %v3608_v39 = vpop.f32.mrf.mxu1 }
 0x7aa   :  { %v4875_v29 = vpop.eup %4874  ;;  %v3613_v60 = vadd.f32 %v3537_v52, %v3403_v51 }
 0x7ab   :  { %v4877_v32 = vpop.eup %4876  ;;  %v3539_v3 = vpop.f32.mrf.mxu0 }
 0x7ac   :  { %v4879_v41 = vpop.eup %4878  ;;  %v3617_v28 = vadd.f32 %v3613_v60, %v5682_v61  ;;  %v3614_v37 = vadd.f32 %v3539_v3, %v3404_v27  ;;  %v3390_v24 = vmul.f32 %v4877_v32, %v4875_v29  ;;  %v3610_v52 = vpop.f32.mrf.mxu1  ;;  %v3405_v3 = vmul.f32 %v3401_v45, %v9447_v38 }
 0x7ad   :  { %v3389_v2 = vmul.f32 %v4879_v41, %v7617_v13  ;;  %v3616_v60 = vadd.f32 %v3610_v52, %v3406_v34  ;;  %v4881_v32 = vpop.eup %4880 }
 0x7ae   :  { %v4668_v21 = vmul.f32 -1.442695, %v3617_v28  ;;  %v3618_v36 = vadd.f32 %v3614_v37, %v5686_v54  ;;  %v3615_v13 = vadd.f32 %v3608_v39, %v3405_v3 }
 0x7af   :  { %v8224_v56 = vadd.f32 %v3390_v24, %v3389_v2  ;;  %v3620_v29 = vadd.f32 %v3616_v60, %v5701_v55 }
 0x7b0   :  { %4882 = vpow2.f32 %v4668_v21  ;;  %v4669_v51 = vmul.f32 -1.442695, %v3618_v36  ;;  %v3619_v30 = vadd.f32 %v3615_v13, %v5706_v50 }
 0x7b1   :  { %4884 = vtanh.f32 %v8224_v56  ;;  %v4670_v27 = vmul.f32 -1.442695, %v3620_v29 }
 0x7b2   :  { %4886 = vpow2.f32 %v4669_v51 }
 0x7b3   :  { %4888 = vpow2.f32 %v4670_v27 }
 0x7bd   :  { %v4883_v41 = vpop.eup %4882 }
 0x7be   :  { %v4885_v28 = vpop.eup %4884  ;;  %v3624_v37 = vadd.f32 1.0, %v4883_v41 }
 0x7bf   :  { %v4887_v36 = vpop.eup %4886  ;;  %v3393_v24 = vmul.f32 %v4885_v28, %v4881_v32  ;;  %v10273_v28 = vld [vmem:[#allocation49_spill] sm:$0xff] }
 0x7c0   :  { %4890 = vrcp.f32 %v3624_v37  ;;  %v3630_v2 = vadd.f32 1.0, %v4887_v36  ;;  %v4889_v51 = vpop.eup %4888  ;;  %v10274_v37 = vld [vmem:[#allocation50_spill] sm:$0xff]  ;;  %v10275_v36 = vld [vmem:[#allocation51_spill] sm:$0xff] }
 0x7c1   :  { %4892 = vtanh.f32 %v3619_v30  ;;  %3395 = vst [vmem:[#allocation2 + $0x14] sm:$0xf] %v3393_v24  ;;  %3837 = vmatprep.mubr.f32.mxu0 %v3393_v24  ;;  %3908 = vmatprep.mubr.f32.mxu1 %v3393_v24  ;;  %v3637_v3 = vadd.f32 1.0, %v4889_v51  ;;  %v10276_v24 = vld [vmem:[#allocation52_spill] sm:$0xff]  ;;  %v10281_v51 = vld [vmem:[#allocation57_spill] sm:$0xff] }
 0x7c2   :  { %4894 = vrcp.f32 %v3630_v2  ;;  %v10277_v2 = vld [vmem:[#allocation53_spill] sm:$0xff] }
 0x7c3   :  { %4896 = vrcp.f32 %v3637_v3  ;;  %v10285_v3 = vld [vmem:[#allocation61_spill] sm:$0xff] }
 0x7c8   :  { %v4491_v45 = vld [vmem:[#allocation2 + $0x14] sm:$0xf] }
 0x7c9   :  { %v4506_v39 = vmul.f32 %v7627_v15, %v4491_v45  ;;  %v10236_v15 = vld [vmem:[#allocation162_spill] sm:$0xff] }
 0x7ca   :  { %v10278_v45 = vld [vmem:[#allocation54_spill] sm:$0xff] }
 0x7cb   :  { %v4525_v21 = vsel %vm4509_vm0, %v4506_v39, 0.0  ;;  %v10279_v39 = vld [vmem:[#allocation55_spill] sm:$0xff] }
 0x7cc   :  { %4526 = vadd.xlane.f32.xlu0 %v4525_v21  ;;  %v10280_v21 = vld [vmem:[#allocation56_spill] sm:$0xff] }
 0x7cd   :  { %v4891_v52 = vpop.eup %4890 }
 0x7ce   :  { %v4893_v34 = vpop.eup %4892 }
 0x7cf   :  { %v4895_v60 = vpop.eup %4894  ;;  %v3641_v29 = vmul.f32 %v4893_v34, %v4891_v52  ;;  %v10282_v52 = vld [vmem:[#allocation58_spill] sm:$0xff]  ;;  %v10283_v34 = vld [vmem:[#allocation59_spill] sm:$0xff] }
 0x7d0   :  { %v3640_v13 = vmul.f32 %v4895_v60, %v7632_v40  ;;  %v4897_v32 = vpop.eup %4896  ;;  %v10237_v40 = vld [vmem:[#allocation14_spill] sm:$0xff]  ;;  %v10284_v60 = vld [vmem:[#allocation60_spill] sm:$0xff] }
 0x7d2   :  { %v8234_v27 = vadd.f32 %v3641_v29, %v3640_v13  ;;  %v10286_v29 = vld [vmem:[#allocation62_spill] sm:$0xff]  ;;  %v10287_v13 = vld [vmem:[#allocation63_spill] sm:$0xff] }
 0x7d4   :  { %4898 = vtanh.f32 %v8234_v27 }
 0x7e1   :  { %v4899_v41 = vpop.eup %4898 }
 0x7e2   :  { %v8237_v30 = vmul.f32 %v4899_v41, %v4897_v32  ;;  %v10288_v32 = vld [vmem:[#allocation64_spill] sm:$0xff]  ;;  %v10289_v41 = vld [vmem:[#allocation65_spill] sm:$0xff] }
 0x7e4   :  { %3838 = vmatmul.mubr.f32.vlgmr.msra.gmra.mxu0 %v8237_v30  ;;  %3909 = vmatmul.mubr.f32.vlgmr.msra.gmra.mxu1 %v8237_v30 }
 0x7e5   :  { %4017 = vmatpush1.msra.mxu0 %v7637_v48  ;;  %4088 = vmatpush1.msra.mxu1 %v7639_v57  ;;  %v10238_v48 = vld [vmem:[#allocation15_spill] sm:$0xff]  ;;  %v10239_v57 = vld [vmem:[#allocation16_spill] sm:$0xff] }
 0x7e6   :  { %4018 = vmatprep.subr.mxu0 %v7641_v59  ;;  %4089 = vmatprep.subr.mxu1 %v7643_v63  ;;  %v10240_v59 = vld [vmem:[#allocation17_spill] sm:$0xff]  ;;  %v10241_v63 = vld [vmem:[#allocation18_spill] sm:$0xff] }
 0x7e7   :  { %4019 = vmatpush1.msra.mxu0 %v7647_v5  ;;  %4090 = vmatpush1.msra.mxu1 %v7649_v47  ;;  %v10242_v5 = vld [vmem:[#allocation19_spill] sm:$0xff]  ;;  %v10243_v47 = vld [vmem:[#allocation20_spill] sm:$0xff] }
 0x7e8   :  { %4020 = vmatprep.subr.mxu0 %v7653_v7  ;;  %4091 = vmatprep.subr.mxu1 %v7655_v62  ;;  %v10244_v7 = vld [vmem:[#allocation21_spill] sm:$0xff]  ;;  %v10245_v62 = vld [vmem:[#allocation22_spill] sm:$0xff] }
 0x7e9   :  { %4021 = vmatpush1.msra.mxu0 %v7659_v1  ;;  %4092 = vmatpush1.msra.mxu1 %v7661_v6  ;;  %v10246_v1 = vld [vmem:[#allocation23_spill] sm:$0xff]  ;;  %v10247_v6 = vld [vmem:[#allocation24_spill] sm:$0xff] }
 0x7ea   :  { %4022 = vmatprep.subr.mxu0 %v7665_v9  ;;  %4093 = vmatprep.subr.mxu1 %v7667_v14  ;;  %v10248_v9 = vld [vmem:[#allocation25_spill] sm:$0xff]  ;;  %v10249_v14 = vld [vmem:[#allocation26_spill] sm:$0xff] }
 0x7eb   :  { %4023 = vmatpush1.msra.mxu0 %v7671_v43  ;;  %4094 = vmatpush1.msra.mxu1 %v7673_v49  ;;  %v10250_v43 = vld [vmem:[#allocation27_spill] sm:$0xff]  ;;  %v10251_v49 = vld [vmem:[#allocation28_spill] sm:$0xff] }
 0x7ec   :  { %4024 = vmatprep.subr.mxu0 %v7677_v12  ;;  %4095 = vmatprep.subr.mxu1 %v7679_v10  ;;  %v10252_v12 = vld [vmem:[#allocation29_spill] sm:$0xff]  ;;  %v10253_v10 = vld [vmem:[#allocation30_spill] sm:$0xff] }
 0x7ed   :  { %4025 = vmatpush1.msra.mxu0 %v7683_v8  ;;  %4096 = vmatpush1.msra.mxu1 %v7685_v46  ;;  %v10254_v8 = vld [vmem:[#allocation31_spill] sm:$0xff]  ;;  %v10255_v46 = vld [vmem:[#allocation32_spill] sm:$0xff] }
 0x7ee   :  { %4026 = vmatprep.subr.mxu0 %v7689_v17  ;;  %4097 = vmatprep.subr.mxu1 %v7691_v4  ;;  %v10256_v17 = vld [vmem:[#allocation33_spill] sm:$0xff]  ;;  %v10257_v4 = vld [vmem:[#allocation34_spill] sm:$0xff] }
 0x7ef   :  { %4027 = vmatpush1.msra.mxu0 %v7695_v19  ;;  %4098 = vmatpush1.msra.mxu1 %v7697_v0  ;;  %v10258_v19 = vld [vmem:[#allocation35_spill] sm:$0xff]  ;;  %v10259_v0 = vld [vmem:[#allocation36_spill] sm:$0xff] }
 0x7f0   :  { %4028 = vmatprep.subr.mxu0 %v7701_v58  ;;  %4099 = vmatprep.subr.mxu1 %v7703_v26  ;;  %v10260_v58 = vld [vmem:[#allocation37_spill] sm:$0xff]  ;;  %v10261_v26 = vld [vmem:[#allocation38_spill] sm:$0xff] }
 0x7f1   :  { %4029 = vmatpush1.msra.mxu0 %v7707_v42  ;;  %4100 = vmatpush1.msra.mxu1 %v7709_v23  ;;  %v10262_v42 = vmov 0.0   ;;  %v10263_v23 = vld [vmem:[#allocation39_spill] sm:$0xff] }
 0x7f2   :  { %4030 = vmatprep.subr.mxu0 %v7713_v20  ;;  %4101 = vmatprep.subr.mxu1 %v7715_v53  ;;  %v10264_v20 = vld [vmem:[#allocation40_spill] sm:$0xff]  ;;  %v10265_v53 = vld [vmem:[#allocation41_spill] sm:$0xff] }
 0x7f3   :  { %4031 = vmatpush1.msra.mxu0 %v7719_v44  ;;  %4102 = vmatpush1.msra.mxu1 %v7721_v25  ;;  %v10266_v44 = vld [vmem:[#allocation42_spill] sm:$0xff]  ;;  %v10267_v25 = vld [vmem:[#allocation43_spill] sm:$0xff] }
 0x7f4   :  { %4032 = vmatprep.subr.mxu0 %v7725_v18  ;;  %4103 = vmatprep.subr.mxu1 %v7727_v11  ;;  %v10268_v18 = vld [vmem:[#allocation44_spill] sm:$0xff]  ;;  %v10269_v11 = vld [vmem:[#allocation45_spill] sm:$0xff] }
 0x7f5   :  { %4033 = vmatpush1.msra.mxu0 %v7731_v16  ;;  %4104 = vmatpush1.msra.mxu1 %v7733_v22  ;;  %v10270_v16 = vld [vmem:[#allocation46_spill] sm:$0xff]  ;;  %v10271_v22 = vld [vmem:[#allocation47_spill] sm:$0xff] }
 0x7f6   :  { %4034 = vmatprep.subr.mxu0 %v10236_v15  ;;  %4105 = vmatprep.subr.mxu1 %v10237_v40  ;;  %v10291_v15 = vld [vmem:[#allocation67_spill] sm:$0xff]  ;;  %v10292_v40 = vld [vmem:[#allocation68_spill] sm:$0xff] }
 0x7f7   :  { %4035 = vmatpush1.msra.mxu0 %v10238_v48  ;;  %4106 = vmatpush1.msra.mxu1 %v10239_v57  ;;  %v10293_v48 = vld [vmem:[#allocation69_spill] sm:$0xff]  ;;  %v10294_v57 = vld [vmem:[#allocation70_spill] sm:$0xff] }
 0x7f8   :  { %4036 = vmatprep.subr.mxu0 %v10240_v59  ;;  %4107 = vmatprep.subr.mxu1 %v10241_v63  ;;  %v10295_v59 = vld [vmem:[#allocation71_spill] sm:$0xff]  ;;  %v10296_v63 = vld [vmem:[#allocation72_spill] sm:$0xff] }
 0x7f9   :  { %4037 = vmatpush1.msra.mxu0 %v10242_v5  ;;  %4108 = vmatpush1.msra.mxu1 %v10243_v47  ;;  %v10297_v5 = vld [vmem:[#allocation73_spill] sm:$0xff]  ;;  %v10298_v47 = vld [vmem:[#allocation74_spill] sm:$0xff] }
 0x7fa   :  { %4038 = vmatprep.subr.mxu0 %v10244_v7  ;;  %4109 = vmatprep.subr.mxu1 %v10245_v62  ;;  %v10299_v7 = vld [vmem:[#allocation75_spill] sm:$0xff]  ;;  %v10300_v62 = vld [vmem:[#allocation76_spill] sm:$0xff] }
 0x7fb   :  { %4039 = vmatpush1.msra.mxu0 %v10246_v1  ;;  %4110 = vmatpush1.msra.mxu1 %v10247_v6  ;;  %v10301_v1 = vld [vmem:[#allocation77_spill] sm:$0xff]  ;;  %v10302_v6 = vld [vmem:[#allocation78_spill] sm:$0xff] }
 0x7fc   :  { %4040 = vmatprep.subr.mxu0 %v10248_v9  ;;  %4111 = vmatprep.subr.mxu1 %v10249_v14  ;;  %v10303_v9 = vld [vmem:[#allocation79_spill] sm:$0xff]  ;;  %v10304_v14 = vld [vmem:[#allocation80_spill] sm:$0xff] }
 0x7fd   :  { %4041 = vmatpush1.msra.mxu0 %v10250_v43  ;;  %4112 = vmatpush1.msra.mxu1 %v10251_v49  ;;  %v10305_v43 = vld [vmem:[#allocation81_spill] sm:$0xff]  ;;  %v10306_v49 = vld [vmem:[#allocation82_spill] sm:$0xff] }
 0x7fe   :  { %4042 = vmatprep.subr.mxu0 %v7785_v33  ;;  %4113 = vmatprep.subr.mxu1 %v10252_v12  ;;  %v10272_v33 = vld [vmem:[#allocation48_spill] sm:$0xff]  ;;  %v10307_v12 = vld [vmem:[#allocation83_spill] sm:$0xff] }
 0x7ff   :  { %4043 = vmatpush1.msra.mxu0 %v10253_v10  ;;  %4114 = vmatpush1.msra.mxu1 %v10254_v8  ;;  %v10308_v10 = vld [vmem:[#allocation84_spill] sm:$0xff]  ;;  %v10309_v8 = vld [vmem:[#allocation85_spill] sm:$0xff] }
 0x800   :  { %4044 = vmatprep.subr.mxu0 %v10255_v46  ;;  %4115 = vmatprep.subr.mxu1 %v10256_v17  ;;  %v10310_v46 = vld [vmem:[#allocation86_spill] sm:$0xff]  ;;  %v10311_v17 = vld [vmem:[#allocation87_spill] sm:$0xff] }
 0x801   :  { %4045 = vmatpush1.msra.mxu0 %v10257_v4  ;;  %4116 = vmatpush1.msra.mxu1 %v10258_v19  ;;  %v10312_v4 = vld [vmem:[#allocation88_spill] sm:$0xff]  ;;  %v10313_v19 = vld [vmem:[#allocation89_spill] sm:$0xff] }
 0x802   :  { %4046 = vmatprep.subr.mxu0 %v10259_v0  ;;  %4117 = vmatprep.subr.mxu1 %v10260_v58  ;;  %v10314_v0 = vld [vmem:[#allocation90_spill] sm:$0xff]  ;;  %v10315_v58 = vld [vmem:[#allocation91_spill] sm:$0xff] }
 0x803   :  { %4047 = vmatpush1.msra.mxu0 %v10261_v26  ;;  %4080 = vmatprep.mubr.f32.mxu0 %v10262_v42  ;;  %v10316_v26 = vld [vmem:[#allocation92_spill] sm:$0xff] }
 0x804   :  { %4118 = vmatpush1.msra.mxu1 %v10263_v23  ;;  %4151 = vmatprep.mubr.f32.mxu1 %v10262_v42  ;;  %v10317_v42 = vld [vmem:[#allocation93_spill] sm:$0xff]  ;;  %v10318_v23 = vld [vmem:[#allocation94_spill] sm:$0xff] }
 0x805   :  { %4081 = vmatmul.mubr.f32.vlgmr.msra.gmra.mxu0 %v8237_v30  ;;  %4152 = vmatmul.mubr.f32.vlgmr.msra.gmra.mxu1 %v8237_v30  ;;  %v10290_v30 = vld [vmem:[#allocation66_spill] sm:$0xff] }
 0x806   :  { %4318 = vmatprep.subr.mxu0 %v10264_v20  ;;  %4389 = vmatprep.subr.mxu1 %v10265_v53  ;;  %v10319_v20 = vld [vmem:[#allocation95_spill] sm:$0xff]  ;;  %v10320_v53 = vld [vmem:[#allocation96_spill] sm:$0xff] }
 0x807   :  { %4319 = vmatpush1.msra.mxu0 %v10266_v44  ;;  %4390 = vmatpush1.msra.mxu1 %v10267_v25  ;;  %v10321_v44 = vld [vmem:[#allocation97_spill] sm:$0xff]  ;;  %v10322_v25 = vld [vmem:[#allocation98_spill] sm:$0xff] }
 0x808   :  { %4320 = vmatprep.subr.mxu0 %v10268_v18  ;;  %4391 = vmatprep.subr.mxu1 %v10269_v11  ;;  %v10323_v18 = vld [vmem:[#allocation99_spill] sm:$0xff]  ;;  %v10324_v11 = vld [vmem:[#allocation100_spill] sm:$0xff] }
 0x809   :  { %4321 = vmatpush1.msra.mxu0 %v10270_v16  ;;  %4392 = vmatpush1.msra.mxu1 %v10271_v22  ;;  %v10325_v16 = vld [vmem:[#allocation101_spill] sm:$0xff]  ;;  %v10326_v22 = vld [vmem:[#allocation102_spill] sm:$0xff] }
 0x80a   :  { %4322 = vmatprep.subr.mxu0 %v10272_v33  ;;  %4393 = vmatprep.subr.mxu1 %v10273_v28  ;;  %v10327_v33 = vld [vmem:[#allocation103_spill] sm:$0xff]  ;;  %v10328_v28 = vld [vmem:[#allocation104_spill] sm:$0xff] }
 0x80b   :  { %4323 = vmatpush1.msra.mxu0 %v10274_v37  ;;  %4394 = vmatpush1.msra.mxu1 %v10275_v36  ;;  %v10329_v37 = vld [vmem:[#allocation105_spill] sm:$0xff]  ;;  %v10330_v36 = vld [vmem:[#allocation106_spill] sm:$0xff] }
 0x80c   :  { %4324 = vmatprep.subr.mxu0 %v10276_v24  ;;  %4395 = vmatprep.subr.mxu1 %v10277_v2  ;;  %v10331_v24 = vld [vmem:[#allocation107_spill] sm:$0xff]  ;;  %v10332_v2 = vld [vmem:[#allocation108_spill] sm:$0xff] }
 0x80d   :  { %4325 = vmatpush1.msra.mxu0 %v10278_v45  ;;  %4396 = vmatpush1.msra.mxu1 %v10279_v39  ;;  %v10333_v45 = vld [vmem:[#allocation109_spill] sm:$0xff]  ;;  %v10334_v39 = vld [vmem:[#allocation110_spill] sm:$0xff] }
 0x80e   :  { %4326 = vmatprep.subr.mxu0 %v10280_v21  ;;  %4397 = vmatprep.subr.mxu1 %v10281_v51  ;;  %v10335_v21 = vld [vmem:[#allocation111_spill] sm:$0xff]  ;;  %v10336_v51 = vld [vmem:[#allocation112_spill] sm:$0xff] }
 0x80f   :  { %4327 = vmatpush1.msra.mxu0 %v10282_v52  ;;  %4398 = vmatpush1.msra.mxu1 %v10283_v34  ;;  %v10337_v52 = vld [vmem:[#allocation113_spill] sm:$0xff]  ;;  %v10338_v34 = vld [vmem:[#allocation114_spill] sm:$0xff] }
 0x810   :  { %4328 = vmatprep.subr.mxu0 %v10284_v60  ;;  %4399 = vmatprep.subr.mxu1 %v10285_v3  ;;  %v10339_v60 = vld [vmem:[#allocation115_spill] sm:$0xff]  ;;  %v10340_v3 = vld [vmem:[#allocation116_spill] sm:$0xff] }
 0x811   :  { %4329 = vmatpush1.msra.mxu0 %v10286_v29  ;;  %4400 = vmatpush1.msra.mxu1 %v10287_v13  ;;  %v10341_v29 = vld [vmem:[#allocation117_spill] sm:$0xff]  ;;  %v10342_v13 = vld [vmem:[#allocation118_spill] sm:$0xff] }
 0x812   :  { %4330 = vmatprep.subr.mxu0 %v10288_v32  ;;  %4401 = vmatprep.subr.mxu1 %v10289_v41  ;;  %v10343_v32 = vld [vmem:[#allocation119_spill] sm:$0xff]  ;;  %v10344_v41 = vld [vmem:[#allocation120_spill] sm:$0xff] }
 0x813   :  { %4331 = vmatpush1.msra.mxu0 %v10290_v30  ;;  %4402 = vmatpush1.msra.mxu1 %v10291_v15  ;;  %v10345_v30 = vld [vmem:[#allocation121_spill] sm:$0xff]  ;;  %v10346_v15 = vld [vmem:[#allocation122_spill] sm:$0xff] }
 0x814   :  { %4332 = vmatprep.subr.mxu0 %v10292_v40  ;;  %4403 = vmatprep.subr.mxu1 %v10293_v48  ;;  %v10347_v40 = vld [vmem:[#allocation123_spill] sm:$0xff]  ;;  %v10348_v48 = vld [vmem:[#allocation124_spill] sm:$0xff] }
 0x815   :  { %4333 = vmatpush1.msra.mxu0 %v10294_v57  ;;  %4404 = vmatpush1.msra.mxu1 %v10295_v59  ;;  %v10349_v57 = vld [vmem:[#allocation125_spill] sm:$0xff]  ;;  %v10350_v59 = vld [vmem:[#allocation126_spill] sm:$0xff] }
 0x816   :  { %4334 = vmatprep.subr.mxu0 %v10296_v63  ;;  %4405 = vmatprep.subr.mxu1 %v10297_v5  ;;  %v10351_v63 = vld [vmem:[#allocation127_spill] sm:$0xff]  ;;  %v10352_v5 = vld [vmem:[#allocation128_spill] sm:$0xff] }
 0x817   :  { %4335 = vmatpush1.msra.mxu0 %v10298_v47  ;;  %4406 = vmatpush1.msra.mxu1 %v10299_v7  ;;  %v10353_v47 = vld [vmem:[#allocation129_spill] sm:$0xff]  ;;  %v10354_v7 = vld [vmem:[#allocation130_spill] sm:$0xff] }
 0x818   :  { %4336 = vmatprep.subr.mxu0 %v10300_v62  ;;  %4407 = vmatprep.subr.mxu1 %v10301_v1  ;;  %v10355_v62 = vld [vmem:[#allocation131_spill] sm:$0xff]  ;;  %v10356_v1 = vld [vmem:[#allocation132_spill] sm:$0xff] }
 0x819   :  { %4337 = vmatpush1.msra.mxu0 %v10302_v6  ;;  %4408 = vmatpush1.msra.mxu1 %v10303_v9  ;;  %v10357_v6 = vld [vmem:[#allocation133_spill] sm:$0xff]  ;;  %v10358_v9 = vld [vmem:[#allocation134_spill] sm:$0xff] }
 0x81a   :  { %4338 = vmatprep.subr.mxu0 %v10304_v14  ;;  %4409 = vmatprep.subr.mxu1 %v10305_v43  ;;  %v10359_v14 = vld [vmem:[#allocation135_spill] sm:$0xff]  ;;  %v10360_v43 = vld [vmem:[#allocation136_spill] sm:$0xff] }
 0x81b   :  { %4339 = vmatpush1.msra.mxu0 %v10306_v49  ;;  %4410 = vmatpush1.msra.mxu1 %v10307_v12  ;;  %v10361_v49 = vld [vmem:[#allocation137_spill] sm:$0xff]  ;;  %v10362_v12 = vld [vmem:[#allocation138_spill] sm:$0xff] }
 0x81c   :  { %4340 = vmatprep.subr.mxu0 %v10308_v10  ;;  %4411 = vmatprep.subr.mxu1 %v10309_v8  ;;  %v10363_v10 = vld [vmem:[#allocation139_spill] sm:$0xff]  ;;  %v10364_v8 = vld [vmem:[#allocation140_spill] sm:$0xff] }
 0x81d   :  { %4341 = vmatpush1.msra.mxu0 %v10310_v46  ;;  %4412 = vmatpush1.msra.mxu1 %v10311_v17  ;;  %v10365_v46 = vld [vmem:[#allocation141_spill] sm:$0xff]  ;;  %v10366_v17 = vld [vmem:[#allocation142_spill] sm:$0xff] }
 0x81e   :  { %4342 = vmatprep.subr.mxu0 %v10312_v4  ;;  %4413 = vmatprep.subr.mxu1 %v10313_v19  ;;  %v10367_v4 = vld [vmem:[#allocation143_spill] sm:$0xff]  ;;  %v10368_v19 = vld [vmem:[#allocation144_spill] sm:$0xff] }
 0x81f   :  { %4343 = vmatpush1.msra.mxu0 %v10314_v0  ;;  %4414 = vmatpush1.msra.mxu1 %v10315_v58  ;;  %v10369_v0 = vld [vmem:[#allocation145_spill] sm:$0xff]  ;;  %v10370_v58 = vld [vmem:[#allocation146_spill] sm:$0xff] }
 0x820   :  { %4344 = vmatprep.subr.mxu0 %v10316_v26  ;;  %4415 = vmatprep.subr.mxu1 %v10317_v42  ;;  %v10371_v26 = vld [vmem:[#allocation147_spill] sm:$0xff]  ;;  %v10372_v42 = vld [vmem:[#allocation148_spill] sm:$0xff] }
 0x821   :  { %4345 = vmatpush1.msra.mxu0 %v10318_v23  ;;  %4416 = vmatpush1.msra.mxu1 %v10319_v20  ;;  %v10373_v23 = vld [vmem:[#allocation149_spill] sm:$0xff]  ;;  %v10374_v20 = vld [vmem:[#allocation150_spill] sm:$0xff] }
 0x822   :  { %4346 = vmatprep.subr.mxu0 %v10320_v53  ;;  %4417 = vmatprep.subr.mxu1 %v10321_v44  ;;  %v10375_v53 = vld [vmem:[#allocation151_spill] sm:$0xff]  ;;  %v10376_v44 = vld [vmem:[#allocation152_spill] sm:$0xff] }
 0x823   :  { %4347 = vmatpush1.msra.mxu0 %v10322_v25  ;;  %4418 = vmatpush1.msra.mxu1 %v10323_v18  ;;  %v10377_v25 = vld [vmem:[#allocation153_spill] sm:$0xff]  ;;  %v10378_v18 = vld [vmem:[#allocation154_spill] sm:$0xff] }
 0x824   :  { %4348 = vmatprep.subr.mxu0 %v10324_v11  ;;  %4419 = vmatprep.subr.mxu1 %v10325_v16  ;;  %v10379_v11 = vld [vmem:[#allocation155_spill] sm:$0xff]  ;;  %v10380_v16 = vld [vmem:[#allocation156_spill] sm:$0xff] }
 0x825   :  { %4349 = vmatpush1.msra.mxu0 %v10326_v22  ;;  %4420 = vmatpush1.msra.mxu1 %v10327_v33  ;;  %v10381_v22 = vld [vmem:[#allocation157_spill] sm:$0xff]  ;;  %v10382_v33 = vld [vmem:[#allocation159_spill] sm:$0xff] }
 0x826   :  { %4350 = vmatprep.subr.mxu0 %v10328_v28  ;;  %4421 = vmatprep.subr.mxu1 %v10329_v37  ;;  %v10383_v28 = vld [vmem:[#allocation160_spill] sm:$0xff]  ;;  %v10384_v37 = vld [vmem:[#allocation163_spill] sm:$0xff] }
 0x827   :  { %4351 = vmatpush2.msra.mxu0 %v10330_v36  ;;  %4422 = vmatpush2.msra.mxu1 %v10331_v24  ;;  %v10385_v36 = vld [vmem:[#allocation164_spill] sm:$0xff]  ;;  %v10386_v24 = vld [vmem:[#allocation165_spill] sm:$0xff] }
 0x828   :  { %4352 = vmatprep.subr.mxu0 %v10332_v2  ;;  %4423 = vmatprep.subr.mxu1 %v10333_v45  ;;  %v10387_v2 = vld [vmem:[#allocation166_spill] sm:$0xff]  ;;  %v10388_v45 = vld [vmem:[#allocation167_spill] sm:$0xff] }
 0x829   :  { %4353 = vmatpush2.msra.mxu0 %v10334_v39  ;;  %4424 = vmatpush2.msra.mxu1 %v10335_v21  ;;  %v10389_v39 = vld [vmem:[#allocation168_spill] sm:$0xff]  ;;  %v10390_v21 = vld [vmem:[#allocation169_spill] sm:$0xff] }
 0x82a   :  { %4354 = vmatprep.subr.mxu0 %v10336_v51  ;;  %4425 = vmatprep.subr.mxu1 %v10337_v52  ;;  %v10391_v51 = vld [vmem:[#allocation170_spill] sm:$0xff] }
 0x82b   :  { %4355 = vmatpush2.msra.mxu0 %v10338_v34  ;;  %4426 = vmatpush2.msra.mxu1 %v10339_v60  ;;  %v10392_v34 = vld [vmem:[#allocation10_spill] sm:$0xff] }
 0x82c   :  { %4356 = vmatprep.subr.mxu0 %v10340_v3  ;;  %4427 = vmatprep.subr.mxu1 %v10341_v29 }
 0x82d   :  { %4357 = vmatpush2.msra.mxu0 %v10342_v13  ;;  %4428 = vmatpush2.msra.mxu1 %v10343_v32  ;;  %v10393_v13 = vld [vmem:[#allocation11_spill] sm:$0xff] }
 0x82e   :  { %4358 = vmatprep.subr.mxu0 %v10344_v41  ;;  %4429 = vmatprep.subr.mxu1 %v10345_v30 }
 0x82f   :  { %4359 = vmatpush2.msra.mxu0 %v10346_v15  ;;  %4430 = vmatpush2.msra.mxu1 %v10347_v40  ;;  %v10394_v40 = vld [vmem:[#allocation12_spill] sm:$0xff] }
 0x830   :  { %4360 = vmatprep.subr.mxu0 %v10348_v48  ;;  %4431 = vmatprep.subr.mxu1 %v10349_v57 }
 0x831   :  { %4361 = vmatpush2.msra.mxu0 %v10350_v59  ;;  %4432 = vmatpush2.msra.mxu1 %v10351_v63  ;;  %v10395_v63 = vld [vmem:[#allocation13_spill] sm:$0xff] }
 0x832   :  { %4362 = vmatprep.subr.mxu0 %v10352_v5  ;;  %4433 = vmatprep.subr.mxu1 %v10353_v47 }
 0x833   :  { %4363 = vmatpush2.msra.mxu0 %v10354_v7  ;;  %4434 = vmatpush2.msra.mxu1 %v10355_v62 }
 0x834   :  { %4364 = vmatprep.subr.mxu0 %v10356_v1  ;;  %4435 = vmatprep.subr.mxu1 %v10357_v6  ;;  %v3946_v1 = vpop.permute.xlu1 %3945 }
 0x835   :  { %4365 = vmatpush2.msra.mxu0 %v10358_v9  ;;  %4436 = vmatpush2.msra.mxu1 %v10359_v14  ;;  %v10396_v9 = vld [vmem:[#allocation161_spill] sm:$0xff] }
 0x836   :  { %4366 = vmatprep.subr.mxu0 %v10360_v43  ;;  %4437 = vmatprep.subr.mxu1 %v10361_v49  ;;  %v3948_v14 = vmul.f32 %v3946_v1, %v10396_v9 }
 0x837   :  { %4367 = vmatpush2.msra.mxu0 %v10362_v12  ;;  %4438 = vmatpush2.msra.mxu1 %v10363_v10  ;;  %v3949_v10 = vmul.f32 %v3946_v1, %v9764_v31 }
 0x838   :  { %4368 = vmatprep.subr.mxu0 %v10364_v8  ;;  %4439 = vmatprep.subr.mxu1 %v10365_v46 }
 0x839   :  { %4369 = vmatpush2.msra.mxu0 %v10366_v17  ;;  %4440 = vmatpush2.msra.mxu1 %v10367_v4 }
 0x83a   :  { %4370 = vmatprep.subr.mxu0 %v10368_v19  ;;  %4441 = vmatprep.subr.mxu1 %v10369_v0 }
 0x83b   :  { %4371 = vmatpush2.msra.mxu0 %v10370_v58  ;;  %4442 = vmatpush2.msra.mxu1 %v10371_v26 }
 0x83c   :  { %4372 = vmatprep.subr.mxu0 %v10372_v42  ;;  %4443 = vmatprep.subr.mxu1 %v10373_v23 }
 0x83d   :  { %4373 = vmatpush2.msra.mxu0 %v10374_v20  ;;  %4444 = vmatpush2.msra.mxu1 %v10375_v53 }
 0x83e   :  { %4374 = vmatprep.subr.mxu0 %v10376_v44  ;;  %4445 = vmatprep.subr.mxu1 %v10377_v25  ;;  %v3951_v25 = vmul.f32 %v3946_v1, %v9446_v35 }
 0x83f   :  { %4375 = vmatpush2.msra.mxu0 %v10378_v18  ;;  %4446 = vmatpush2.msra.mxu1 %v10379_v11  ;;  %v3950_v18 = vmul.f32 %v3946_v1, %v9447_v38 }
 0x840   :  { %4376 = vmatprep.subr.mxu0 %v10380_v16  ;;  %4447 = vmatprep.subr.mxu1 %v10381_v22 }
 0x841   :  { %4377 = vmatpush2.msra.mxu0 %v10382_v33  ;;  %4448 = vmatpush2.msra.mxu1 %v10383_v28 }
 0x842   :  { %4378 = vmatprep.subr.mxu0 %v10384_v37  ;;  %4449 = vmatprep.subr.mxu1 %v10385_v36 }
 0x843   :  { %4379 = vmatpush2.msra.mxu0 %v10386_v24  ;;  %4450 = vmatpush2.msra.mxu1 %v10387_v2 }
 0x844   :  { %4380 = vmatprep.subr.mxu0 %v10388_v45  ;;  %4451 = vmatprep.subr.mxu1 %v10389_v39 }
 0x845   :  { %4381 = vmatpush2.msra.mxu0 %v10390_v21  ;;  %4452 = vmatpush2.msra.mxu1 %v10391_v51 }
 0x8a4   :  { %v3839_v52 = vpop.f32.mrf.mxu0  ;;  %v3910_v41 = vpop.f32.mrf.mxu1 }
 0x8a5   :  { %v3840_v60 = vadd.f32 %v3839_v52, %v10392_v34  ;;  %v3911_v5 = vadd.f32 %v3910_v41, %v10395_v63 }
 0x8a6   :  { %v3841_v3 = vpop.f32.mrf.mxu0  ;;  %v3912_v15 = vpop.f32.mrf.mxu1 }
 0x8a7   :  { %v4671_v29 = vmul.f32 -1.442695, %v3840_v60  ;;  %v3842_v32 = vadd.f32 %v3841_v3, %v10393_v13  ;;  %v3913_v48 = vadd.f32 %v3912_v15, %v10394_v40 }
 0x8a9   :  { %4900 = vpow2.f32 %v4671_v29  ;;  %v4672_v30 = vmul.f32 -1.442695, %v3842_v32  ;;  %v4673_v57 = vmul.f32 -1.442695, %v3913_v48  ;;  %v4682_v32 = vld [vmem:[#allocation3] ss:$0 sm:$0xff] }
 0x8ab   :  { %4902 = vpow2.f32 %v4672_v30 }
 0x8ac   :  { %4904 = vpow2.f32 %v4673_v57 }
 0x8b6   :  { %v4901_v59 = vpop.eup %4900 }
 0x8b7   :  { %v3918_v47 = vadd.f32 1.0, %v4901_v59 }
 0x8b8   :  { %v4903_v7 = vpop.eup %4902 }
 0x8b9   :  { %4906 = vrcp.f32 %v3918_v47  ;;  %v3924_v62 = vadd.f32 1.0, %v4903_v7  ;;  %v4905_v6 = vpop.eup %4904 }
 0x8ba   :  { %4908 = vtanh.f32 %v3911_v5  ;;  %v3931_v46 = vadd.f32 1.0, %v4905_v6 }
 0x8bb   :  { %4910 = vrcp.f32 %v3924_v62 }
 0x8bc   :  { %4912 = vrcp.f32 %v3931_v46 }
 0x8c5   :  { %v4082_v43 = vpop.f32.mrf.mxu0  ;;  %v4153_v0 = vpop.f32.mrf.mxu1 }
 0x8c6   :  { %v4907_v49 = vpop.eup %4906  ;;  %v4158_v12 = vadd.f32 %v4082_v43, %v3948_v14 }
 0x8c7   :  { %v4909_v8 = vpop.eup %4908  ;;  %v4084_v17 = vpop.f32.mrf.mxu0 }
 0x8c8   :  { %v4911_v4 = vpop.eup %4910  ;;  %v4162_v19 = vadd.f32 %v4158_v12, %v5682_v61  ;;  %v4159_v58 = vadd.f32 %v4084_v17, %v3949_v10  ;;  %v3935_v26 = vmul.f32 %v4909_v8, %v4907_v49  ;;  %v4155_v31 = vpop.f32.mrf.mxu1 }
 0x8c9   :  { %v3934_v42 = vmul.f32 %v4911_v4, %v8224_v56  ;;  %v4161_v61 = vadd.f32 %v4155_v31, %v3951_v25  ;;  %v4160_v56 = vadd.f32 %v4153_v0, %v3950_v18  ;;  %v4913_v22 = vpop.eup %4912  ;;  %v10397_v31 = vlaneseq  ;;  %v4512_v18 = vpop.xlane.xlu0 %4511 }
 0x8ca   :  { %v4675_v23 = vmul.f32 -1.442695, %v4162_v19  ;;  %v4163_v20 = vadd.f32 %v4159_v58, %v5686_v54 }
 0x8cb   :  { %v8444_v53 = vadd.f32 %v3935_v26, %v3934_v42  ;;  %v4165_v11 = vadd.f32 %v4161_v61, %v5701_v55  ;;  %v4164_v33 = vadd.f32 %v4160_v56, %v5706_v50  ;;  %v4950_v55 = vld [vmem:[%s8478_s7] ss:$0 sm:$0xff]  ;;  %v4569_v25 = vand.u32 127, %v10397_v31 }
 0x8cc   :  { %4914 = vpow2.f32 %v4675_v23  ;;  %v4676_v44 = vmul.f32 -1.442695, %v4163_v20  ;;  %v4515_v23 = vpop.xlane.xlu1 %4514 }
 0x8cd   :  { %4916 = vtanh.f32 %v8444_v53  ;;  %v4677_v16 = vmul.f32 -1.442695, %v4165_v11 }
 0x8ce   :  { %4918 = vpow2.f32 %v4676_v44 }
 0x8cf   :  { %4920 = vpow2.f32 %v4677_v16 }
 0x8d0   :  { %v4524_v20 = vpop.xlane.xlu1 %4523 }
 0x8d9   :  { %v4915_v54 = vpop.eup %4914 }
 0x8da   :  { %v4917_v28 = vpop.eup %4916  ;;  %v4169_v37 = vadd.f32 1.0, %v4915_v54 }
 0x8db   :  { %v4919_v36 = vpop.eup %4918  ;;  %v3938_v24 = vmul.f32 %v4917_v28, %v4913_v22  ;;  %v4518_v22 = vpop.xlane.xlu0 %4517 }
 0x8dc   :  { %4922 = vrcp.f32 %v4169_v37  ;;  %v4175_v35 = vadd.f32 1.0, %v4919_v36  ;;  %v4921_v45 = vpop.eup %4920 }
 0x8dd   :  { %4924 = vtanh.f32 %v4164_v33  ;;  %3940 = vst [vmem:[#allocation2 + $0x18] sm:$0xf] %v3938_v24  ;;  %4382 = vmatprep.mubr.f32.mxu0 %v3938_v24  ;;  %4453 = vmatprep.mubr.f32.mxu1 %v3938_v24  ;;  %v4182_v52 = vadd.f32 1.0, %v4921_v45 }
 0x8de   :  { %4926 = vrcp.f32 %v4175_v35 }
 0x8df   :  { %4928 = vrcp.f32 %v4182_v52  ;;  %v4521_v37 = vpop.xlane.xlu0 %4520 }
 0x8e4   :  { %v4492_v38 = vld [vmem:[#allocation2 + $0x18] sm:$0xf] }
 0x8e5   :  { %v4507_v2 = vmul.f32 %v4950_v55, %v4492_v38 }
 0x8e7   :  { %v4528_v50 = vsel %vm4509_vm0, %v4507_v2, 0.0 }
 0x8e8   :  { %4529 = vadd.xlane.f32.xlu1 %v4528_v50  ;;  %v4527_v50 = vpop.xlane.xlu0 %4526 }
 0x8e9   :  { %v4923_v39 = vpop.eup %4922 }
 0x8ea   :  { %v4925_v21 = vpop.eup %4924 }
 0x8eb   :  { %v4927_v51 = vpop.eup %4926  ;;  %v4186_v60 = vmul.f32 %v4925_v21, %v4923_v39 }
 0x8ec   :  { %v4185_v3 = vmul.f32 %v4927_v51, %v8234_v27  ;;  %v4929_v41 = vpop.eup %4928 }
 0x8ee   :  { %v4187_v29 = vadd.f32 %v4186_v60, %v4185_v3  ;;  %v4683_v3 = vld [vmem:[%s8472_s1] ss:$0 sm:$0xff] }
 0x8f0   :  { %4930 = vtanh.f32 %v4187_v29 }
 0x8f9   :  { %4541 = vperm.xlu1 %4691, %v4682_v32  }
 0x8fd   :  { %v4931_v30 = vpop.eup %4930 }
 0x8fe   :  { %v4189_v15 = vmul.f32 %v4931_v30, %v4929_v41 }
 0x900   :  { %4383 = vmatmul.mubr.f32.vlgmr.msra.gmra.mxu0 %v4189_v15  ;;  %4454 = vmatmul.mubr.f32.vlgmr.msra.gmra.mxu1 %v4189_v15 }
 0x971   :  { %v4530_v44 = vpop.xlane.xlu1 %4529 }
 0x975   :  { %v4542_v61 = vpop.permute.xlu1 %4541 }
 0x976   :  { %v4544_v56 = vadd.f32 %v4542_v61, %v4512_v18  ;;  %v4545_v16 = vadd.f32 %v4542_v61, %v4515_v23  ;;  %v4546_v54 = vadd.f32 %v4542_v61, %v4518_v22  ;;  %v4547_v24 = vadd.f32 %v4542_v61, %v4521_v37 }
 0x977   :  { %v4548_v38 = vadd.f32 %v4542_v61, %v4524_v20  ;;  %v4549_v45 = vadd.f32 %v4542_v61, %v4527_v50  ;;  %v4550_v51 = vadd.f32 %v4542_v61, %v4530_v44 }
 0x9c0   :  { %v4384_v48 = vpop.f32.mrf.mxu0  ;;  %v4455_v7 = vpop.f32.mrf.mxu1 }
 0x9c1   :  { %v4385_v57 = vadd.f32 %v4384_v48, %v10392_v34  ;;  %v4456_v14 = vadd.f32 %v4455_v7, %v10395_v63 }
 0x9c2   :  { %v4386_v59 = vpop.f32.mrf.mxu0  ;;  %v4457_v62 = vpop.f32.mrf.mxu1 }
 0x9c3   :  { %v4678_v5 = vmul.f32 -1.442695, %v4385_v57  ;;  %v4387_v47 = vadd.f32 %v4386_v59, %v10393_v13  ;;  %v4458_v1 = vadd.f32 %v4457_v62, %v10394_v40 }
 0x9c5   :  { %4932 = vpow2.f32 %v4678_v5  ;;  %v4679_v27 = vmul.f32 -1.442695, %v4387_v47  ;;  %v4680_v6 = vmul.f32 -1.442695, %v4458_v1 }
 0x9c7   :  { %4934 = vpow2.f32 %v4679_v27 }
 0x9c8   :  { %4936 = vpow2.f32 %v4680_v6 }
 0x9d2   :  { %v4933_v9 = vpop.eup %4932 }
 0x9d3   :  { %v4463_v43 = vadd.f32 1.0, %v4933_v9 }
 0x9d4   :  { %v4935_v49 = vpop.eup %4934 }
 0x9d5   :  { %4938 = vrcp.f32 %v4463_v43  ;;  %v4469_v34 = vadd.f32 1.0, %v4935_v49  ;;  %v4937_v12 = vpop.eup %4936 }
 0x9d6   :  { %4940 = vtanh.f32 %v4456_v14  ;;  %v4476_v46 = vadd.f32 1.0, %v4937_v12 }
 0x9d7   :  { %4942 = vrcp.f32 %v4469_v34 }
 0x9d8   :  { %4944 = vrcp.f32 %v4476_v46 }
 0x9e2   :  { %v4939_v13 = vpop.eup %4938 }
 0x9e3   :  { %v4941_v10 = vpop.eup %4940 }
 0x9e4   :  { %v4943_v8 = vpop.eup %4942  ;;  %v4480_v17 = vmul.f32 %v4941_v10, %v4939_v13 }
 0x9e5   :  { %v4479_v4 = vmul.f32 %v4943_v8, %v8444_v53  ;;  %v4945_v19 = vpop.eup %4944  ;;  %v10398_v53 = vld [vmem:[#allocation158_spill] sm:$0xff] }
 0x9e6   :  { %v4572_v11 = vsub.s32 %v4569_v25, %v10398_v53  ;;  %vm4559_vm8 = vcmp.lt.s32.totalorder %v10398_v53, %v4683_v3 }
 0x9e7   :  { %v4481_v40 = vadd.f32 %v4480_v17, %v4479_v4 }
 0x9e8   :  { %v4573_v33 = vrot.slane %v4544_v56, %v4572_v11  ;;  %v4577_v28 = vrot.slane %v4545_v16, %v4572_v11  ;;  %v4581_v36 = vrot.slane %v4546_v54, %v4572_v11  ;;  %v4585_v2 = vrot.slane %v4547_v24, %v4572_v11 }
 0x9e9   :  { %4946 = vtanh.f32 %v4481_v40  ;;  %v4589_v21 = vrot.slane %v4548_v38, %v4572_v11  ;;  %v4593_v60 = vrot.slane %v4549_v45, %v4572_v11  ;;  %v4597_v30 = vrot.slane %v4550_v51, %v4572_v11 }
 0x9ea   :  { %v4603_v35 = vsel %vm4602_vm1, %v4577_v28, %v4573_v33 }
 0x9f6   :  { %v4947_v63 = vpop.eup %4946 }
 0x9f7   :  { %v4483_v0 = vmul.f32 %v4947_v63, %v4945_v19 }
 0x9f9   :  { %4485 = vst [vmem:[#allocation2 + $0x1c] sm:$0xf] %v4483_v0 }
 0xa00   :  { %v4493_v58 = vld [vmem:[#allocation2 + $0x1c] sm:$0xf] }
 0xa01   :  { %v4508_v26 = vmul.f32 %v4950_v55, %v4493_v58  ;;  %v4605_v55 = vsel %vm4604_vm2, %v4581_v36, %v4603_v35 }
 0xa02   :  { %v4607_v39 = vsel %vm4606_vm3, %v4585_v2, %v4605_v55 }
 0xa03   :  { %v4531_v42 = vsel %vm4509_vm0, %v4508_v26, 0.0  ;;  %v4609_v52 = vsel %vm4608_vm4, %v4589_v21, %v4607_v39 }
 0xa04   :  { %4532 = vadd.xlane.f32.xlu0 %v4531_v42  ;;  %v4611_v32 = vsel %vm4610_vm5, %v4593_v60, %v4609_v52 }
 0xa05   :  { %v4613_v48 = vsel %vm4612_vm6, %v4597_v30, %v4611_v32 }
 0xa8d   :  { %v4533_v29 = vpop.xlane.xlu0 %4532 }
 0xa8e   :  { %v4551_v41 = vadd.f32 %v4542_v61, %v4533_v29 }
 0xa90   :  { %v4601_v15 = vrot.slane %v4551_v41, %v4572_v11 }
 0xa92   :  { %v4615_v57 = vsel %vm4614_vm7, %v4601_v15, %v4613_v48 }
 0xa93   :  { %v4617_v59 = vsel %vm4559_vm8, %v4615_v57, 0.0 }
 0xa94   :  { %4619 = vst.msk [vmem:[%s8480_s9] sm:$0xff] %vm4618_vm9, %v4617_v59 }
 0xa95   :  { %4624 = vsyncpa [#allocation5], 1 }
 0xa96   :  { %4625 = vsyncpa [#allocation7], 1 }

</bundles_post_ra>
